<compile_context>
chip_gen: v7x
topology: tpu7x:2x2x1
jax: 0.10.0
libtpu: 0.0.40
codegen_flags: <defaults>
</compile_context>

<pallas_src>
import functools

import jax
import jax.numpy as jnp
from jax.experimental import pallas as pl
from jax.experimental.pallas import tpu as pltpu


def encoder_block_kernel(x_ref, wqkv_ref, bqkv_ref, wo_ref, ob_ref,
                         w1_ref, b1_ref, w2_ref, b2_ref, out_ref,
                         *, n_heads, n_layers, d_head, ln_eps):
    Bt, S, D = x_ref.shape
    R = Bt * S
    HK = n_heads * d_head
    bf16 = jnp.bfloat16

    # Flatten the Bt sequences of this grid step into one lane-dense row block.
    x = x_ref[...].reshape(R, D)                       # (R, D) float32

    def layer_norm(t):
        # Matches LayerNorm.forward(): center, divide by RMS of the centered
        # residual (the module's w/b parameters are never applied).
        # One-pass stats: var = E[x^2] - mu^2; rsqrt goes to the EUP.
        mu = jnp.mean(t, axis=-1, keepdims=True)
        ms = jnp.mean(t * t, axis=-1, keepdims=True)
        return (t - mu) * jax.lax.rsqrt(ms - mu * mu + ln_eps)

    # --- LN1 + fused multi-head attention ------------------------------------
    xn = layer_norm(x)

    # One lane-dense QKV projection for ALL heads (bf16 operands, f32 accum),
    # followed by a single broadcast bias add.
    qkv = jnp.dot(xn.astype(bf16), wqkv_ref[...],
                  preferred_element_type=jnp.float32) + bqkv_ref[...]   # (R, 3*HK)

    inv_sqrt_dh = 1.0 / (float(d_head) ** 0.5)
    z_heads = []
    for h in range(n_heads):                           # tiny static unroll
        q0 = h * d_head                                # 128-lane-aligned slice offsets
        qh = qkv[:, q0:q0 + d_head].reshape(Bt, S, d_head)
        kh = qkv[:, HK + q0:HK + q0 + d_head].reshape(Bt, S, d_head)
        vh = qkv[:, 2 * HK + q0:2 * HK + q0 + d_head].reshape(Bt, S, d_head)

        # scores[b, q, p] = sum_k q[b,q,k] * k[b,p,k]  (batched over sequences)
        s = jnp.einsum('bqk,bpk->bqp', qh.astype(bf16), kh.astype(bf16),
                       preferred_element_type=jnp.float32) * inv_sqrt_dh
        m = jnp.max(s, axis=-1, keepdims=True)
        e = jnp.exp(s - m)
        den = jnp.sum(e, axis=-1, keepdims=True)
        p = e * pl.reciprocal(den, approx=True)        # EUP vrcp + VALU mul
        z_heads.append(jnp.einsum('bqp,bpk->bqk', p.astype(bf16), vh.astype(bf16),
                                  preferred_element_type=jnp.float32))

    # Concatenate heads (128-lane-aligned pieces) -> single output projection.
    z = jnp.concatenate(z_heads, axis=-1).reshape(R, HK)
    attn = jnp.dot(z.astype(bf16), wo_ref[...],
                   preferred_element_type=jnp.float32) + ob_ref[...]
    resid_mid = attn + x                               # (R, D) float32

    # --- LN2 + MLP stack ------------------------------------------------------
    hcur = layer_norm(resid_mid)
    for l in range(n_layers):                          # tiny static unroll
        hcur = jnp.maximum(
            jnp.dot(hcur.astype(bf16), w1_ref[l],
                    preferred_element_type=jnp.float32) + b1_ref[l][None, :], 0.0)
        hcur = jnp.dot(hcur.astype(bf16), w2_ref[l],
                       preferred_element_type=jnp.float32) + b2_ref[l][None, :]

    out_ref[...] = (hcur + resid_mid).reshape(Bt, S, D).astype(out_ref.dtype)


def _pick_batch_tile(B, S, target_rows):
    """Largest divisor Bt of B with Bt*S <= target_rows, keeping grid >= 2."""
    best = 1
    for bt in range(1, B + 1):
        if B % bt:
            continue
        if bt * S > target_rows:
            break
        if B // bt >= 2 or B == 1:
            best = bt
    return best


def encoder_block_forward(resid_pre, params, *, ln_eps=1e-5,
                          batch_tile=None, target_rows=256):
    # target_rows=256 matches the v6e/v7x 256x256 MXU; 128 is enough on v5e
    # (larger tiles are still correct there, just slightly more vreg pressure).
    B, S, D = resid_pre.shape
    H, _, K = params["Qs"].shape
    L, _, M = params["W1"].shape
    HK = H * K

    Bt = batch_tile if batch_tile is not None else _pick_batch_tile(B, S, target_rows)
    assert B % Bt == 0

    f32, bf16 = jnp.float32, jnp.bfloat16

    # Wrapper-side weight plumbing: head-fused, lane-dense layouts, bf16 MXU
    # operands.  Biases stay f32 (elementwise adds are kept in f32).
    wq = jnp.transpose(params["Qs"], (1, 0, 2)).reshape(D, HK)
    wk = jnp.transpose(params["Ks"], (1, 0, 2)).reshape(D, HK)
    wv = jnp.transpose(params["Vs"], (1, 0, 2)).reshape(D, HK)
    wqkv = jnp.concatenate([wq, wk, wv], axis=1).astype(bf16)        # (D, 3*HK)
    bqkv = jnp.concatenate([params["Qbs"].reshape(HK),
                            params["Kbs"].reshape(HK),
                            params["Vbs"].reshape(HK)]).reshape(1, 3 * HK).astype(f32)
    wo = params["O"].reshape(HK, D).astype(bf16)                     # (HK, D)
    ob = params["Ob"].reshape(1, D).astype(f32)
    w1 = params["W1"].astype(bf16)                                   # (L, D, M)
    b1 = params["B1"].astype(f32)
    w2 = params["W2"].astype(bf16)                                   # (L, M, D)
    b2 = params["B2"].astype(f32)

    kernel = functools.partial(encoder_block_kernel,
                               n_heads=H, n_layers=L, d_head=K, ln_eps=ln_eps)

    def resident(arr):
        # Full-array block, constant index_map -> loaded once, stays in VMEM.
        # NOTE: before scaling d_model/d_mlp/n_layers, tile W1/W2 over the layer
        # axis and/or single-buffer these constant specs (pl.Buffered(1)) so the
        # resident weights stop being double-buffered (v7x has only 64 MiB VMEM).
        nd = arr.ndim
        return pl.BlockSpec(arr.shape, lambda b, _nd=nd: (0,) * _nd)

    in_specs = [
        pl.BlockSpec((Bt, S, D), lambda b: (b, 0, 0)),   # Bt sequences per step
        resident(wqkv), resident(bqkv), resident(wo), resident(ob),
        resident(w1), resident(b1), resident(w2), resident(b2),
    ]

    return pl.pallas_call(
        kernel,
        out_shape=jax.ShapeDtypeStruct((B, S, D), jnp.float32),
        grid=(B // Bt,),
        in_specs=in_specs,
        out_specs=pl.BlockSpec((Bt, S, D), lambda b: (b, 0, 0)),
        compiler_params=pltpu.CompilerParams(
            dimension_semantics=("parallel",),
            vmem_limit_bytes=32 * 1024 * 1024),
    )(resid_pre, wqkv, bqkv, wo, ob, w1, b1, w2, b2)


def encoder_block_reference(resid_pre, params, *, ln_eps=1e-5):
    """Pure-JAX (float32) mirror of the PyTorch EncoderBlock.forward()."""
    d_head = params["Qs"].shape[-1]
    n_layers = params["W1"].shape[0]

    def ln(t):
        c = t - jnp.mean(t, axis=-1, keepdims=True)
        scale = jnp.sqrt(jnp.mean(c * c, axis=-1, keepdims=True) + ln_eps)
        return c / scale

    xn = ln(resid_pre)
    q = jnp.einsum('bpd,hdk->bphk', xn, params["Qs"]) + params["Qbs"]
    k = jnp.einsum('bpd,hdk->bphk', xn, params["Ks"]) + params["Kbs"]
    v = jnp.einsum('bpd,hdk->bphk', xn, params["Vs"]) + params["Vbs"]
    scores = jnp.einsum('bqhk,bphk->bhqp', q, k) / jnp.sqrt(jnp.float32(d_head))
    pattern = jax.nn.softmax(scores, axis=-1)
    z = jnp.einsum('bphk,bhqp->bqhk', v, pattern)
    attn_out = jnp.einsum('bqhk,hkd->bqd', z, params["O"]) + params["Ob"]
    resid_mid = attn_out + resid_pre

    h = ln(resid_mid)
    for l in range(n_layers):
        h = jax.nn.relu(h @ params["W1"][l] + params["B1"][l])
        h = h @ params["W2"][l] + params["B2"][l]
    return h + resid_mid


if __name__ == "__main__":
    # Small, standard, lane-dense ViT-style config: every matmul dimension is a
    # multiple of 128, n_heads * d_head == d_model, and B is large enough that
    # each grid step sees 256 rows while the grid still has >= 2 parallel steps.
    B, S, D = 32, 16, 256         # batch, seq (num patches), d_model
    H, K = 2, 128                 # n_heads, d_head
    M, L = 512, 2                 # d_mlp, n_layers
    INIT_RANGE = 0.02
    LN_EPS = 1e-5

    key = jax.random.PRNGKey(0)
    kq, kk, kv, ko, kw1, kw2, kx = jax.random.split(key, 7)

    params = {
        "Qs": INIT_RANGE * jax.random.normal(kq, (H, D, K), jnp.float32),
        "Ks": INIT_RANGE * jax.random.normal(kk, (H, D, K), jnp.float32),
        "Vs": INIT_RANGE * jax.random.normal(kv, (H, D, K), jnp.float32),
        "O":  INIT_RANGE * jax.random.normal(ko, (H, K, D), jnp.float32),
        "Qbs": jnp.zeros((H, K), jnp.float32),
        "Kbs": jnp.zeros((H, K), jnp.float32),
        "Vbs": jnp.zeros((H, K), jnp.float32),
        "Ob":  jnp.zeros((D,), jnp.float32),
        # nn.Linear weights, pre-transposed so the kernel does x @ W (+ b).
        "W1": INIT_RANGE * jax.random.normal(kw1, (L, D, M), jnp.float32),
        "B1": jnp.zeros((L, M), jnp.float32),
        "W2": INIT_RANGE * jax.random.normal(kw2, (L, M, D), jnp.float32),
        "B2": jnp.zeros((L, D), jnp.float32),
    }
    resid_pre = jax.random.normal(kx, (B, S, D), jnp.float32)

    out = encoder_block_forward(resid_pre, params, ln_eps=LN_EPS)
    out = jax.block_until_ready(out)

    ref = encoder_block_reference(resid_pre, params, ln_eps=LN_EPS)
    assert out.shape == (B, S, D)
    # Tolerance accounts for bf16 matmul operands (f32 accumulation) and the
    # approximate EUP reciprocal in the softmax; f32 reference.
    assert jnp.allclose(out, ref, atol=2e-2, rtol=2e-2), "mismatch vs pure-JAX reference"

    print("KERNEL_OK")
</pallas_src>

<mosaic_0001>
module attributes {stable_mosaic.version = 11 : i64} {
  func.func @encoder_block_kernel(%arg0: i32, %arg1: memref<16x16x256xf32, #tpu.memory_space<vmem>>, %arg2: memref<256x768xbf16, #tpu.memory_space<vmem>>, %arg3: memref<1x768xf32, #tpu.memory_space<vmem>>, %arg4: memref<256x256xbf16, #tpu.memory_space<vmem>>, %arg5: memref<1x256xf32, #tpu.memory_space<vmem>>, %arg6: memref<2x256x512xbf16, #tpu.memory_space<vmem>>, %arg7: memref<2x512xf32, #tpu.memory_space<vmem>>, %arg8: memref<2x512x256xbf16, #tpu.memory_space<vmem>>, %arg9: memref<2x256xf32, #tpu.memory_space<vmem>>, %arg10: memref<16x16x256xf32, #tpu.memory_space<vmem>>) attributes {dimension_semantics = [#tpu.dimension_semantics<parallel>], iteration_bounds = array<i64: 2>, scalar_prefetch = 0 : i64, scratch_operands = 0 : i64, tpu.core_type = #tpu.core_type<tc>, window_params = [{transform_indices = @transform_0, window_bounds = array<i64: 16, 16, 256>}, {pipeline_mode = #tpu.pipeline_mode<synchronous>, transform_indices = @transform_1, window_bounds = array<i64: 256, 768>}, {pipeline_mode = #tpu.pipeline_mode<synchronous>, transform_indices = @transform_2, window_bounds = array<i64: 1, 768>}, {pipeline_mode = #tpu.pipeline_mode<synchronous>, transform_indices = @transform_3, window_bounds = array<i64: 256, 256>}, {pipeline_mode = #tpu.pipeline_mode<synchronous>, transform_indices = @transform_4, window_bounds = array<i64: 1, 256>}, {pipeline_mode = #tpu.pipeline_mode<synchronous>, transform_indices = @transform_5, window_bounds = array<i64: 2, 256, 512>}, {pipeline_mode = #tpu.pipeline_mode<synchronous>, transform_indices = @transform_6, window_bounds = array<i64: 2, 512>}, {pipeline_mode = #tpu.pipeline_mode<synchronous>, transform_indices = @transform_7, window_bounds = array<i64: 2, 512, 256>}, {pipeline_mode = #tpu.pipeline_mode<synchronous>, transform_indices = @transform_8, window_bounds = array<i64: 2, 256>}, {transform_indices = @transform_9, window_bounds = array<i64: 16, 16, 256>}]} {
    %c0 = arith.constant 0 : index
    %c0_0 = arith.constant 0 : index
    %c0_1 = arith.constant 0 : index
    %0 = vector.load %arg1[%c0, %c0_0, %c0_1] : memref<16x16x256xf32, #tpu.memory_space<vmem>>, vector<16x16x256xf32>
    %1 = vector.shape_cast %0 : vector<16x16x256xf32> to vector<256x256xf32>
    %cst = arith.constant dense<0.000000e+00> : vector<256xf32>
    %2 = vector.multi_reduction <add>, %1, %cst [1] : vector<256x256xf32> to vector<256xf32>
    %3 = vector.shape_cast %2 : vector<256xf32> to vector<256x1xf32>
    %cst_2 = arith.constant 2.560000e+02 : f32
    %4 = vector.broadcast %cst_2 : f32 to vector<256x1xf32>
    %5 = arith.divf %3, %4 : vector<256x1xf32>
    %6 = arith.mulf %1, %1 : vector<256x256xf32>
    %cst_3 = arith.constant dense<0.000000e+00> : vector<256xf32>
    %7 = vector.multi_reduction <add>, %6, %cst_3 [1] : vector<256x256xf32> to vector<256xf32>
    %8 = vector.shape_cast %7 : vector<256xf32> to vector<256x1xf32>
    %cst_4 = arith.constant 2.560000e+02 : f32
    %9 = vector.broadcast %cst_4 : f32 to vector<256x1xf32>
    %10 = arith.divf %8, %9 : vector<256x1xf32>
    %11 = vector.broadcast %5 : vector<256x1xf32> to vector<256x256xf32>
    %12 = arith.subf %1, %11 : vector<256x256xf32>
    %13 = arith.mulf %5, %5 : vector<256x1xf32>
    %14 = arith.subf %10, %13 : vector<256x1xf32>
    %cst_5 = arith.constant 9.99999974E-6 : f32
    %15 = vector.broadcast %cst_5 : f32 to vector<256x1xf32>
    %16 = arith.addf %14, %15 : vector<256x1xf32>
    %17 = math.rsqrt %16 : vector<256x1xf32>
    %18 = vector.broadcast %17 : vector<256x1xf32> to vector<256x256xf32>
    %19 = arith.mulf %12, %18 : vector<256x256xf32>
    %20 = arith.truncf %19 : vector<256x256xf32> to vector<256x256xbf16>
    %c0_6 = arith.constant 0 : index
    %c0_7 = arith.constant 0 : index
    %21 = vector.load %arg2[%c0_6, %c0_7] : memref<256x768xbf16, #tpu.memory_space<vmem>>, vector<256x768xbf16>
    %cst_8 = arith.constant dense<0.000000e+00> : vector<256x768xf32>
    %22 = tpu.matmul %20, %21, %cst_8 {dimension_numbers = #tpu.dot_dimension_numbers<[1], [0], [0], [1], [0, 0, 1, 1], [], []>} : vector<256x256xbf16>, vector<256x768xbf16>, vector<256x768xf32> -> vector<256x768xf32>
    %c0_9 = arith.constant 0 : index
    %c0_10 = arith.constant 0 : index
    %23 = vector.load %arg3[%c0_9, %c0_10] : memref<1x768xf32, #tpu.memory_space<vmem>>, vector<1x768xf32>
    %24 = vector.broadcast %23 : vector<1x768xf32> to vector<256x768xf32>
    %25 = arith.addf %22, %24 : vector<256x768xf32>
    %26 = vector.extract_strided_slice %25 {offsets = [0, 0], sizes = [256, 128], strides = [1, 1]} : vector<256x768xf32> to vector<256x128xf32>
    %27 = vector.shape_cast %26 : vector<256x128xf32> to vector<16x16x128xf32>
    %28 = vector.extract_strided_slice %25 {offsets = [0, 256], sizes = [256, 128], strides = [1, 1]} : vector<256x768xf32> to vector<256x128xf32>
    %29 = vector.shape_cast %28 : vector<256x128xf32> to vector<16x16x128xf32>
    %30 = vector.extract_strided_slice %25 {offsets = [0, 512], sizes = [256, 128], strides = [1, 1]} : vector<256x768xf32> to vector<256x128xf32>
    %31 = vector.shape_cast %30 : vector<256x128xf32> to vector<16x16x128xf32>
    %32 = arith.truncf %27 : vector<16x16x128xf32> to vector<16x16x128xbf16>
    %33 = arith.truncf %29 : vector<16x16x128xf32> to vector<16x16x128xbf16>
    "tpu.trace_start"() <{level = 10 : i32, message = "bqk,bpk->bqp"}> : () -> ()
    %cst_11 = arith.constant dense<0.000000e+00> : vector<16x16x16xf32>
    %34 = tpu.matmul %32, %33, %cst_11 {dimension_numbers = #tpu.dot_dimension_numbers<[2], [2], [1], [1], [0, 0, 0, 1, 1, 1], [0], [0]>} : vector<16x16x128xbf16>, vector<16x16x128xbf16>, vector<16x16x16xf32> -> vector<16x16x16xf32>
    "tpu.trace_stop"() : () -> ()
    %cst_12 = arith.constant 0.0883883461 : f32
    %35 = vector.broadcast %cst_12 : f32 to vector<16x16x16xf32>
    %36 = arith.mulf %34, %35 : vector<16x16x16xf32>
    %cst_13 = arith.constant dense<0xFF800000> : vector<16x16xf32>
    %37 = vector.multi_reduction <maximumf>, %36, %cst_13 [2] : vector<16x16x16xf32> to vector<16x16xf32>
    %38 = vector.shape_cast %37 : vector<16x16xf32> to vector<16x16x1xf32>
    %39 = vector.broadcast %38 : vector<16x16x1xf32> to vector<16x16x16xf32>
    %40 = arith.subf %36, %39 : vector<16x16x16xf32>
    %41 = math.exp %40 : vector<16x16x16xf32>
    %cst_14 = arith.constant dense<0.000000e+00> : vector<16x16xf32>
    %42 = vector.multi_reduction <add>, %41, %cst_14 [2] : vector<16x16x16xf32> to vector<16x16xf32>
    %43 = vector.shape_cast %42 : vector<16x16xf32> to vector<16x16x1xf32>
    %44 = tpu.reciprocal %43 {approx = true} : vector<16x16x1xf32> -> vector<16x16x1xf32>
    %45 = vector.broadcast %44 : vector<16x16x1xf32> to vector<16x16x16xf32>
    %46 = arith.mulf %41, %45 : vector<16x16x16xf32>
    %47 = arith.truncf %46 : vector<16x16x16xf32> to vector<16x16x16xbf16>
    %48 = arith.truncf %31 : vector<16x16x128xf32> to vector<16x16x128xbf16>
    "tpu.trace_start"() <{level = 10 : i32, message = "bqp,bpk->bqk"}> : () -> ()
    %cst_15 = arith.constant dense<0.000000e+00> : vector<16x16x128xf32>
    %49 = tpu.matmul %47, %48, %cst_15 {dimension_numbers = #tpu.dot_dimension_numbers<[2], [1], [1], [2], [0, 0, 0, 1, 1, 2], [0], [0]>} : vector<16x16x16xbf16>, vector<16x16x128xbf16>, vector<16x16x128xf32> -> vector<16x16x128xf32>
    "tpu.trace_stop"() : () -> ()
    %50 = vector.extract_strided_slice %25 {offsets = [0, 128], sizes = [256, 128], strides = [1, 1]} : vector<256x768xf32> to vector<256x128xf32>
    %51 = vector.shape_cast %50 : vector<256x128xf32> to vector<16x16x128xf32>
    %52 = vector.extract_strided_slice %25 {offsets = [0, 384], sizes = [256, 128], strides = [1, 1]} : vector<256x768xf32> to vector<256x128xf32>
    %53 = vector.shape_cast %52 : vector<256x128xf32> to vector<16x16x128xf32>
    %54 = vector.extract_strided_slice %25 {offsets = [0, 640], sizes = [256, 128], strides = [1, 1]} : vector<256x768xf32> to vector<256x128xf32>
    %55 = vector.shape_cast %54 : vector<256x128xf32> to vector<16x16x128xf32>
    %56 = arith.truncf %51 : vector<16x16x128xf32> to vector<16x16x128xbf16>
    %57 = arith.truncf %53 : vector<16x16x128xf32> to vector<16x16x128xbf16>
    "tpu.trace_start"() <{level = 10 : i32, message = "bqk,bpk->bqp"}> : () -> ()
    %cst_16 = arith.constant dense<0.000000e+00> : vector<16x16x16xf32>
    %58 = tpu.matmul %56, %57, %cst_16 {dimension_numbers = #tpu.dot_dimension_numbers<[2], [2], [1], [1], [0, 0, 0, 1, 1, 1], [0], [0]>} : vector<16x16x128xbf16>, vector<16x16x128xbf16>, vector<16x16x16xf32> -> vector<16x16x16xf32>
    "tpu.trace_stop"() : () -> ()
    %cst_17 = arith.constant 0.0883883461 : f32
    %59 = vector.broadcast %cst_17 : f32 to vector<16x16x16xf32>
    %60 = arith.mulf %58, %59 : vector<16x16x16xf32>
    %cst_18 = arith.constant dense<0xFF800000> : vector<16x16xf32>
    %61 = vector.multi_reduction <maximumf>, %60, %cst_18 [2] : vector<16x16x16xf32> to vector<16x16xf32>
    %62 = vector.shape_cast %61 : vector<16x16xf32> to vector<16x16x1xf32>
    %63 = vector.broadcast %62 : vector<16x16x1xf32> to vector<16x16x16xf32>
    %64 = arith.subf %60, %63 : vector<16x16x16xf32>
    %65 = math.exp %64 : vector<16x16x16xf32>
    %cst_19 = arith.constant dense<0.000000e+00> : vector<16x16xf32>
    %66 = vector.multi_reduction <add>, %65, %cst_19 [2] : vector<16x16x16xf32> to vector<16x16xf32>
    %67 = vector.shape_cast %66 : vector<16x16xf32> to vector<16x16x1xf32>
    %68 = tpu.reciprocal %67 {approx = true} : vector<16x16x1xf32> -> vector<16x16x1xf32>
    %69 = vector.broadcast %68 : vector<16x16x1xf32> to vector<16x16x16xf32>
    %70 = arith.mulf %65, %69 : vector<16x16x16xf32>
    %71 = arith.truncf %70 : vector<16x16x16xf32> to vector<16x16x16xbf16>
    %72 = arith.truncf %55 : vector<16x16x128xf32> to vector<16x16x128xbf16>
    "tpu.trace_start"() <{level = 10 : i32, message = "bqp,bpk->bqk"}> : () -> ()
    %cst_20 = arith.constant dense<0.000000e+00> : vector<16x16x128xf32>
    %73 = tpu.matmul %71, %72, %cst_20 {dimension_numbers = #tpu.dot_dimension_numbers<[2], [1], [1], [2], [0, 0, 0, 1, 1, 2], [0], [0]>} : vector<16x16x16xbf16>, vector<16x16x128xbf16>, vector<16x16x128xf32> -> vector<16x16x128xf32>
    "tpu.trace_stop"() : () -> ()
    %74 = tpu.concatenate %49, %73 in 2 : vector<16x16x128xf32>, vector<16x16x128xf32> -> vector<16x16x256xf32>
    %75 = vector.shape_cast %74 : vector<16x16x256xf32> to vector<256x256xf32>
    %76 = arith.truncf %75 : vector<256x256xf32> to vector<256x256xbf16>
    %c0_21 = arith.constant 0 : index
    %c0_22 = arith.constant 0 : index
    %77 = vector.load %arg4[%c0_21, %c0_22] : memref<256x256xbf16, #tpu.memory_space<vmem>>, vector<256x256xbf16>
    %cst_23 = arith.constant dense<0.000000e+00> : vector<256x256xf32>
    %78 = tpu.matmul %76, %77, %cst_23 {dimension_numbers = #tpu.dot_dimension_numbers<[1], [0], [0], [1], [0, 0, 1, 1], [], []>} : vector<256x256xbf16>, vector<256x256xbf16>, vector<256x256xf32> -> vector<256x256xf32>
    %c0_24 = arith.constant 0 : index
    %c0_25 = arith.constant 0 : index
    %79 = vector.load %arg5[%c0_24, %c0_25] : memref<1x256xf32, #tpu.memory_space<vmem>>, vector<1x256xf32>
    %80 = vector.broadcast %79 : vector<1x256xf32> to vector<256x256xf32>
    %81 = arith.addf %78, %80 : vector<256x256xf32>
    %82 = arith.addf %81, %1 : vector<256x256xf32>
    %cst_26 = arith.constant dense<0.000000e+00> : vector<256xf32>
    %83 = vector.multi_reduction <add>, %82, %cst_26 [1] : vector<256x256xf32> to vector<256xf32>
    %84 = vector.shape_cast %83 : vector<256xf32> to vector<256x1xf32>
    %cst_27 = arith.constant 2.560000e+02 : f32
    %85 = vector.broadcast %cst_27 : f32 to vector<256x1xf32>
    %86 = arith.divf %84, %85 : vector<256x1xf32>
    %87 = arith.mulf %82, %82 : vector<256x256xf32>
    %cst_28 = arith.constant dense<0.000000e+00> : vector<256xf32>
    %88 = vector.multi_reduction <add>, %87, %cst_28 [1] : vector<256x256xf32> to vector<256xf32>
    %89 = vector.shape_cast %88 : vector<256xf32> to vector<256x1xf32>
    %cst_29 = arith.constant 2.560000e+02 : f32
    %90 = vector.broadcast %cst_29 : f32 to vector<256x1xf32>
    %91 = arith.divf %89, %90 : vector<256x1xf32>
    %92 = vector.broadcast %86 : vector<256x1xf32> to vector<256x256xf32>
    %93 = arith.subf %82, %92 : vector<256x256xf32>
    %94 = arith.mulf %86, %86 : vector<256x1xf32>
    %95 = arith.subf %91, %94 : vector<256x1xf32>
    %cst_30 = arith.constant 9.99999974E-6 : f32
    %96 = vector.broadcast %cst_30 : f32 to vector<256x1xf32>
    %97 = arith.addf %95, %96 : vector<256x1xf32>
    %98 = math.rsqrt %97 : vector<256x1xf32>
    %99 = vector.broadcast %98 : vector<256x1xf32> to vector<256x256xf32>
    %100 = arith.mulf %93, %99 : vector<256x256xf32>
    %101 = arith.truncf %100 : vector<256x256xf32> to vector<256x256xbf16>
    %c0_31 = arith.constant 0 : index
    %c0_32 = arith.constant 0 : index
    %c0_33 = arith.constant 0 : index
    %102 = vector.load %arg6[%c0_31, %c0_32, %c0_33] : memref<2x256x512xbf16, #tpu.memory_space<vmem>>, vector<1x256x512xbf16>
    %103 = vector.shape_cast %102 : vector<1x256x512xbf16> to vector<256x512xbf16>
    %cst_34 = arith.constant dense<0.000000e+00> : vector<256x512xf32>
    %104 = tpu.matmul %101, %103, %cst_34 {dimension_numbers = #tpu.dot_dimension_numbers<[1], [0], [0], [1], [0, 0, 1, 1], [], []>} : vector<256x256xbf16>, vector<256x512xbf16>, vector<256x512xf32> -> vector<256x512xf32>
    %c0_35 = arith.constant 0 : index
    %c0_36 = arith.constant 0 : index
    %105 = vector.load %arg7[%c0_35, %c0_36] : memref<2x512xf32, #tpu.memory_space<vmem>>, vector<1x512xf32>
    %106 = vector.shape_cast %105 : vector<1x512xf32> to vector<512xf32>
    %107 = vector.shape_cast %106 : vector<512xf32> to vector<1x512xf32>
    %108 = vector.broadcast %107 : vector<1x512xf32> to vector<256x512xf32>
    %109 = arith.addf %104, %108 : vector<256x512xf32>
    %cst_37 = arith.constant 0.000000e+00 : f32
    %110 = vector.broadcast %cst_37 : f32 to vector<256x512xf32>
    %111 = arith.maximumf %109, %110 : vector<256x512xf32>
    %112 = arith.truncf %111 : vector<256x512xf32> to vector<256x512xbf16>
    %c0_38 = arith.constant 0 : index
    %c0_39 = arith.constant 0 : index
    %c0_40 = arith.constant 0 : index
    %113 = vector.load %arg8[%c0_38, %c0_39, %c0_40] : memref<2x512x256xbf16, #tpu.memory_space<vmem>>, vector<1x512x256xbf16>
    %114 = vector.shape_cast %113 : vector<1x512x256xbf16> to vector<512x256xbf16>
    %cst_41 = arith.constant dense<0.000000e+00> : vector<256x256xf32>
    %115 = tpu.matmul %112, %114, %cst_41 {dimension_numbers = #tpu.dot_dimension_numbers<[1], [0], [0], [1], [0, 0, 1, 1], [], []>} : vector<256x512xbf16>, vector<512x256xbf16>, vector<256x256xf32> -> vector<256x256xf32>
    %c0_42 = arith.constant 0 : index
    %c0_43 = arith.constant 0 : index
    %116 = vector.load %arg9[%c0_42, %c0_43] : memref<2x256xf32, #tpu.memory_space<vmem>>, vector<1x256xf32>
    %117 = vector.shape_cast %116 : vector<1x256xf32> to vector<256xf32>
    %118 = vector.shape_cast %117 : vector<256xf32> to vector<1x256xf32>
    %119 = vector.broadcast %118 : vector<1x256xf32> to vector<256x256xf32>
    %120 = arith.addf %115, %119 : vector<256x256xf32>
    %121 = arith.truncf %120 : vector<256x256xf32> to vector<256x256xbf16>
    %c1 = arith.constant 1 : index
    %c0_44 = arith.constant 0 : index
    %c0_45 = arith.constant 0 : index
    %122 = vector.load %arg6[%c1, %c0_44, %c0_45] : memref<2x256x512xbf16, #tpu.memory_space<vmem>>, vector<1x256x512xbf16>
    %123 = vector.shape_cast %122 : vector<1x256x512xbf16> to vector<256x512xbf16>
    %cst_46 = arith.constant dense<0.000000e+00> : vector<256x512xf32>
    %124 = tpu.matmul %121, %123, %cst_46 {dimension_numbers = #tpu.dot_dimension_numbers<[1], [0], [0], [1], [0, 0, 1, 1], [], []>} : vector<256x256xbf16>, vector<256x512xbf16>, vector<256x512xf32> -> vector<256x512xf32>
    %c1_47 = arith.constant 1 : index
    %c0_48 = arith.constant 0 : index
    %125 = vector.load %arg7[%c1_47, %c0_48] : memref<2x512xf32, #tpu.memory_space<vmem>>, vector<1x512xf32>
    %126 = vector.shape_cast %125 : vector<1x512xf32> to vector<512xf32>
    %127 = vector.shape_cast %126 : vector<512xf32> to vector<1x512xf32>
    %128 = vector.broadcast %127 : vector<1x512xf32> to vector<256x512xf32>
    %129 = arith.addf %124, %128 : vector<256x512xf32>
    %cst_49 = arith.constant 0.000000e+00 : f32
    %130 = vector.broadcast %cst_49 : f32 to vector<256x512xf32>
    %131 = arith.maximumf %129, %130 : vector<256x512xf32>
    %132 = arith.truncf %131 : vector<256x512xf32> to vector<256x512xbf16>
    %c1_50 = arith.constant 1 : index
    %c0_51 = arith.constant 0 : index
    %c0_52 = arith.constant 0 : index
    %133 = vector.load %arg8[%c1_50, %c0_51, %c0_52] : memref<2x512x256xbf16, #tpu.memory_space<vmem>>, vector<1x512x256xbf16>
    %134 = vector.shape_cast %133 : vector<1x512x256xbf16> to vector<512x256xbf16>
    %cst_53 = arith.constant dense<0.000000e+00> : vector<256x256xf32>
    %135 = tpu.matmul %132, %134, %cst_53 {dimension_numbers = #tpu.dot_dimension_numbers<[1], [0], [0], [1], [0, 0, 1, 1], [], []>} : vector<256x512xbf16>, vector<512x256xbf16>, vector<256x256xf32> -> vector<256x256xf32>
    %c1_54 = arith.constant 1 : index
    %c0_55 = arith.constant 0 : index
    %136 = vector.load %arg9[%c1_54, %c0_55] : memref<2x256xf32, #tpu.memory_space<vmem>>, vector<1x256xf32>
    %137 = vector.shape_cast %136 : vector<1x256xf32> to vector<256xf32>
    %138 = vector.shape_cast %137 : vector<256xf32> to vector<1x256xf32>
    %139 = vector.broadcast %138 : vector<1x256xf32> to vector<256x256xf32>
    %140 = arith.addf %135, %139 : vector<256x256xf32>
    %141 = arith.addf %140, %82 : vector<256x256xf32>
    %142 = vector.shape_cast %141 : vector<256x256xf32> to vector<16x16x256xf32>
    %c0_56 = arith.constant 0 : index
    %c0_57 = arith.constant 0 : index
    %c0_58 = arith.constant 0 : index
    %143 = vector.load %arg10[%c0_56, %c0_57, %c0_58] : memref<16x16x256xf32, #tpu.memory_space<vmem>>, vector<16x16x256xf32>
    tpu.vector_store %arg10[%c0_56, %c0_57, %c0_58], %142 {strides = array<i32>} : memref<16x16x256xf32, #tpu.memory_space<vmem>>, vector<16x16x256xf32>,
    return
  }
  func.func @transform_0(%arg0: i32) -> (i32, i32, i32) {
    %c0_i32 = arith.constant 0 : i32
    %c0_i32_0 = arith.constant 0 : i32
    %c0_i32_1 = arith.constant 0 : i32
    return %arg0, %c0_i32, %c0_i32_0 : i32, i32, i32
  }
  func.func @transform_1(%arg0: i32) -> (i32, i32) {
    %c0_i32 = arith.constant 0 : i32
    %c0_i32_0 = arith.constant 0 : i32
    %c0_i32_1 = arith.constant 0 : i32
    return %c0_i32, %c0_i32_0 : i32, i32
  }
  func.func @transform_2(%arg0: i32) -> (i32, i32) {
    %c0_i32 = arith.constant 0 : i32
    %c0_i32_0 = arith.constant 0 : i32
    %c0_i32_1 = arith.constant 0 : i32
    return %c0_i32, %c0_i32_0 : i32, i32
  }
  func.func @transform_3(%arg0: i32) -> (i32, i32) {
    %c0_i32 = arith.constant 0 : i32
    %c0_i32_0 = arith.constant 0 : i32
    %c0_i32_1 = arith.constant 0 : i32
    return %c0_i32, %c0_i32_0 : i32, i32
  }
  func.func @transform_4(%arg0: i32) -> (i32, i32) {
    %c0_i32 = arith.constant 0 : i32
    %c0_i32_0 = arith.constant 0 : i32
    %c0_i32_1 = arith.constant 0 : i32
    return %c0_i32, %c0_i32_0 : i32, i32
  }
  func.func @transform_5(%arg0: i32) -> (i32, i32, i32) {
    %c0_i32 = arith.constant 0 : i32
    %c0_i32_0 = arith.constant 0 : i32
    %c0_i32_1 = arith.constant 0 : i32
    %c0_i32_2 = arith.constant 0 : i32
    return %c0_i32, %c0_i32_0, %c0_i32_1 : i32, i32, i32
  }
  func.func @transform_6(%arg0: i32) -> (i32, i32) {
    %c0_i32 = arith.constant 0 : i32
    %c0_i32_0 = arith.constant 0 : i32
    %c0_i32_1 = arith.constant 0 : i32
    return %c0_i32, %c0_i32_0 : i32, i32
  }
  func.func @transform_7(%arg0: i32) -> (i32, i32, i32) {
    %c0_i32 = arith.constant 0 : i32
    %c0_i32_0 = arith.constant 0 : i32
    %c0_i32_1 = arith.constant 0 : i32
    %c0_i32_2 = arith.constant 0 : i32
    return %c0_i32, %c0_i32_0, %c0_i32_1 : i32, i32, i32
  }
  func.func @transform_8(%arg0: i32) -> (i32, i32) {
    %c0_i32 = arith.constant 0 : i32
    %c0_i32_0 = arith.constant 0 : i32
    %c0_i32_1 = arith.constant 0 : i32
    return %c0_i32, %c0_i32_0 : i32, i32
  }
  func.func @transform_9(%arg0: i32) -> (i32, i32, i32) {
    %c0_i32 = arith.constant 0 : i32
    %c0_i32_0 = arith.constant 0 : i32
    %c0_i32_1 = arith.constant 0 : i32
    return %arg0, %c0_i32, %c0_i32_0 : i32, i32, i32
  }
}

</mosaic_0001>

<bundles_post_ra>
// kernel: tpu_custom_call.1
= control target key start
LH: loop header
LB: loop body
LE: loop exit
PB: predicated region body
PF: predicated region fallthrough
CT: control target
= control target key end

     0   :  { %s17941_s0 = inlined_call_operand.hbm [shape: f32[32,16,256], index: 0, kind: input, shape index: {}]   ;;  %s17942_s1 = inlined_call_operand.hbm [shape: bf16[256,768], index: 1, kind: input, shape index: {}]   ;;  %s17943_s2 = inlined_call_operand.vmem [shape: f32[1,768], index: 2, kind: input, shape index: {}]   ;;  %s17944_s3 = inlined_call_operand.hbm [shape: bf16[256,256], index: 3, kind: input, shape index: {}]   ;;  %s17945_s4 = inlined_call_operand.hbm [shape: f32[1,256], index: 4, kind: input, shape index: {}]   ;;  %s17946_s5 = inlined_call_operand.hbm [shape: bf16[2,256,512], index: 5, kind: input, shape index: {}]   ;;  %s17947_s6 = inlined_call_operand.vmem [shape: f32[2,512], index: 6, kind: input, shape index: {}]   ;;  %s17948_s7 = inlined_call_operand.hbm [shape: bf16[2,512,256], index: 7, kind: input, shape index: {}]   ;;  %s17949_s8 = inlined_call_operand.vmem [shape: f32[2,256], index: 8, kind: input, shape index: {}]   ;;  %s17950_s9 = inlined_call_operand.hbm [shape: f32[32,16,256], index: 9, kind: output, shape index: {}]  }
   0x1   :  { %18183 = sst [smem:[#allocation129_spill]] %s17950_s9 }
   0x2   :  { %14 = vsyncpa [#allocation3], 0 }
   0x3   :  { %16 = vsyncpa [#allocation3 + $0x1], 0 }
   0x4   :  { %17 = vsyncpa [#allocation6], 0 }
   0x5   :  { %18 = vsyncpa [#allocation9], 0 }
   0x6   :  { %19 = vsyncpa [#allocation12], 0 }
   0x7   :  { %20 = vsyncpa [#allocation4], 0 }
   0x8   :  { %22 = vsyncpa [#allocation4 + $0x1], 0  ;;  %s13627_s30 = smov 0   ;;  %s13629_s10 = smov 0  }
   0x9   :  { %s13631_s11 = smov 0   ;;  %s13633_s12 = smov 0  }
   0xa LB: > { %s13560_s13 = smov [#allocation5]   ;;  %s13648_s15 = sadd.s32 4294967295, %s13558_s12   ;;  %s13558_s12 = sphi %s13633_s12, %s18723_s12   ;;  %s13554_s11 = sphi %s13631_s11, %s18722_s11   ;;  %s13550_s10 = sphi %s13629_s10, %s18721_s10   ;;  %s13546_s30 = sphi %s13627_s30, %s18720_s30  }
   0xb   : > { %s265_s14 = sshll.u32 %s13560_s13, 4  ;;  %p10837_p0 = scmp.ge.s32.totalorder %s13558_s12, 1  ;;  %s13653_s14 = int_to_ptr.vmem [resolvable:$true] %s265_s14 }
   0xc   : > { %p17952_p1 = scmp.eq.s32.totalorder %s13648_s15, 0  ;;  %p253_p2 = scmp.lt.s32.totalorder %s13558_s12, 3 }
   0xd   : > { %s13561_s17 = smov [#allocation8]   ;;  %s13562_s20 = smov [#allocation7]  }
   0xe   : > { %p13655_p3 = pnand %p10837_p0, %p253_p2  ;;  %s295_s18 = sshll.u32 %s13561_s17, 4  ;;  %s13668_s18 = int_to_ptr.vmem [resolvable:$true] %s295_s18 }
   0xf   : > { %s281_s21 = sshll.u32 %s13562_s20, 4  ;;  %s13310_s24 = scalar_lea.hbm %s17942_s1, 12288  ;;  %s13670_s21 = int_to_ptr.vmem [resolvable:$true] %s281_s21 }
  0x10   : > { %s18184_s16 = scalar_select %p13655_p3, 1, 0 }
  0x11   : > { %p12108_p5 = pneg %p13655_p3  ;;  %p13311_p7 = scmp.ne.s32.totalorder %s17942_s1, %s13310_s24 }
  0x12   : > { %p13317_p11 = scmp.lt.u32.totalorder %s13310_s24, %s17942_s1 }
  0x13   : > { %p13664_p6 = pnand %p12108_p5, %p17952_p1 }
  0x15   : > { %p13680_p8 = pneg %p13664_p6 }
  0x17   : > { %p13313_p9 = pnand %p13680_p8, %p13311_p7 }
  0x19   : > { %p13314_p10 = pneg %p13313_p9 }
  0x1b   : > { %p13319_p12 = pnand %p13317_p11, %p13314_p10 }
  0x1d   : > { %13322 = shalt.err (!%p13319_p12)
}
  0x1e   : > { %s13323_s13 = scalar_lea.vmem %s13653_s14, 12288  ;;  %p13331_p5 = scmp.lt.s32.totalorder %s13653_s14, %s13653_s14 }
  0x1f   : > { %p13324_p13 = scmp.ne.s32.totalorder %s13653_s14, %s13323_s13  ;;  %p13332_p4 = scmp.lt.s32.totalorder %s13323_s13, %s13323_s13 }
  0x21   : > { %p13326_p0 = pnand %p13324_p13, %p13680_p8  ;;  %p13333_p7 = por %p13332_p4, %p13331_p5 }
  0x23   : > { %p13327_p2 = pneg %p13326_p0 }
  0x25   : > { %p13334_p9 = pnand %p13333_p7, %p13327_p2 }
  0x27   : > { %13337 = shalt.err (!%p13334_p9)
}
  0x28   : > { %s13563_s17 = smov 384   ;;  %s13564_s20 = smov 24  }
  0x29   : > { %12111 = dma.hbm_to_vmem [thread:$0]  (!%p13664_p6), %s17942_s1, 12288, %s13653_s14, [#allocation6], %s13563_s17, %s13563_s17, %s13564_s20  }
  0x2a   : > { %s13338_s26 = scalar_lea.hbm %s17945_s4, 32 }
  0x2b   : > { %p13339_p4 = scmp.ne.s32.totalorder %s17945_s4, %s13338_s26  ;;  %p13345_p12 = scmp.lt.u32.totalorder %s13338_s26, %s17945_s4 }
  0x2d   : > { %p13341_p10 = pnand %p13339_p4, %p13680_p8 }
  0x2f   : > { %p13342_p11 = pneg %p13341_p10 }
  0x31   : > { %p13347_p13 = pnand %p13345_p12, %p13342_p11 }
  0x33   : > { %13350 = shalt.err (!%p13347_p13)
}
  0x34   : > { %s13351_s14 = scalar_lea.vmem %s13668_s18, 32  ;;  %p13359_p7 = scmp.lt.s32.totalorder %s13668_s18, %s13668_s18 }
  0x35   : > { %p13352_p0 = scmp.ne.s32.totalorder %s13668_s18, %s13351_s14  ;;  %p13360_p9 = scmp.lt.s32.totalorder %s13351_s14, %s13351_s14 }
  0x37   : > { %p13354_p2 = pnand %p13352_p0, %p13680_p8  ;;  %p13361_p4 = por %p13360_p9, %p13359_p7 }
  0x39   : > { %p13355_p5 = pneg %p13354_p2 }
  0x3b   : > { %p13362_p10 = pnand %p13361_p4, %p13355_p5 }
  0x3d   : > { %13365 = shalt.err (!%p13362_p10)
}
  0x3e   : > { %12117 = dma.hbm_to_vmem [thread:$0]  (!%p13664_p6), %s17945_s4, 32, %s13668_s18, [#allocation9]  }
  0x3f   : > { %s13366_s23 = scalar_lea.hbm %s17944_s3, 4096 }
  0x40   : > { %p13367_p11 = scmp.ne.s32.totalorder %s17944_s3, %s13366_s23  ;;  %p13373_p0 = scmp.lt.u32.totalorder %s13366_s23, %s17944_s3 }
  0x42   : > { %p13369_p12 = pnand %p13367_p11, %p13680_p8 }
  0x44   : > { %p13370_p13 = pneg %p13369_p12 }
  0x46   : > { %p13375_p2 = pnand %p13373_p0, %p13370_p13 }
  0x48   : > { %13378 = shalt.err (!%p13375_p2)
}
  0x49   : > { %s13379_s18 = scalar_lea.vmem %s13670_s21, 4096  ;;  %p13387_p4 = scmp.lt.s32.totalorder %s13670_s21, %s13670_s21 }
  0x4a   : > { %p13380_p5 = scmp.ne.s32.totalorder %s13670_s21, %s13379_s18  ;;  %p13388_p10 = scmp.lt.s32.totalorder %s13379_s18, %s13379_s18 }
  0x4c   : > { %p13382_p7 = pnand %p13380_p5, %p13680_p8  ;;  %p13389_p11 = por %p13388_p10, %p13387_p4 }
  0x4e   : > { %p13383_p9 = pneg %p13382_p7 }
  0x50   : > { %p13390_p12 = pnand %p13389_p11, %p13383_p9 }
  0x52   : > { %13393 = shalt.err (!%p13390_p12)
}
  0x53   : > { %s17954_s29 = smov 128   ;;  %s17955_s13 = smov 8  }
  0x54   : > { %12114 = dma.hbm_to_vmem [thread:$0]  (!%p13664_p6), %s17944_s3, 4096, %s13670_s21, [#allocation6], %s17954_s29, %s17954_s29, %s17955_s13  }
  0x55   : > { %s13567_s17 = smov [#allocation10]   ;;  %s13394_s24 = scalar_lea.hbm %s17946_s5, 16384 }
  0x56   : > { %s305_s20 = sshll.u32 %s13567_s17, 4  ;;  %p13395_p13 = scmp.ne.s32.totalorder %s17946_s5, %s13394_s24  ;;  %s306_s20 = int_to_ptr.vmem [resolvable:$true] %s305_s20 }
  0x57   : > { %p13401_p5 = scmp.lt.u32.totalorder %s13394_s24, %s17946_s5 }
  0x58   : > { %p13397_p0 = pnand %p13395_p13, %p13680_p8 }
  0x5a   : > { %p13398_p2 = pneg %p13397_p0 }
  0x5c   : > { %p13403_p7 = pnand %p13401_p5, %p13398_p2 }
  0x5e   : > { %13406 = shalt.err (!%p13403_p7)
}
  0x5f   : > { %s13407_s21 = scalar_lea.vmem %s306_s20, 16384  ;;  %p13415_p11 = scmp.lt.s32.totalorder %s306_s20, %s306_s20 }
  0x60   : > { %p13408_p9 = scmp.ne.s32.totalorder %s306_s20, %s13407_s21  ;;  %p13416_p12 = scmp.lt.s32.totalorder %s13407_s21, %s13407_s21 }
  0x62   : > { %p13410_p4 = pnand %p13408_p9, %p13680_p8  ;;  %p13417_p1 = por %p13416_p12, %p13415_p11 }
  0x64   : > { %p13411_p10 = pneg %p13410_p4 }
  0x66   : > { %p13418_p3 = pnand %p13417_p1, %p13411_p10 }
  0x68   : > { %13421 = shalt.err (!%p13418_p3)
}
  0x69   : > { %s17956_s14 = smov 256   ;;  %s17957_s9 = smov 16  }
  0x6a   : > { %12120 = dma.hbm_to_vmem [thread:$0]  (!%p13664_p6), %s17946_s5, 16384, %s306_s20, [#allocation9], %s17956_s14, %s17956_s14, %s17957_s9  }
  0x6b   : > { %s13570_s23 = smov [#allocation11]   ;;  %s13422_s28 = scalar_lea.hbm %s17948_s7, 16384 }
  0x6c   : > { %s321_s24 = sshll.u32 %s13570_s23, 4  ;;  %p13423_p1 = scmp.ne.s32.totalorder %s17948_s7, %s13422_s28  ;;  %s322_s24 = int_to_ptr.vmem [resolvable:$true] %s321_s24 }
  0x6d   : > { %p13429_p0 = scmp.lt.u32.totalorder %s13422_s28, %s17948_s7 }
  0x6e   : > { %p13425_p3 = pnand %p13423_p1, %p13680_p8 }
  0x70   : > { %p13426_p13 = pneg %p13425_p3 }
  0x72   : > { %p13431_p2 = pnand %p13429_p0, %p13426_p13 }
  0x74   : > { %13434 = shalt.err (!%p13431_p2)
}
  0x75   : > { %s13435_s20 = scalar_lea.vmem %s322_s24, 16384  ;;  %p13443_p4 = scmp.lt.s32.totalorder %s322_s24, %s322_s24 }
  0x76   : > { %p13436_p5 = scmp.ne.s32.totalorder %s322_s24, %s13435_s20  ;;  %p13444_p10 = scmp.lt.s32.totalorder %s13435_s20, %s13435_s20 }
  0x78   : > { %p13438_p7 = pnand %p13436_p5, %p13680_p8  ;;  %p13445_p11 = por %p13444_p10, %p13443_p4 }
  0x7a   : > { %p13439_p9 = pneg %p13438_p7 }
  0x7c   : > { %p13446_p12 = pnand %p13445_p11, %p13439_p9 }
  0x7e   : > { %13449 = shalt.err (!%p13446_p12)
}
  0x7f   : > { %s18187_s17 = smov 8   ;;  %s18188_s22 = smov 128  }
  0x80   : > { %12123 = dma.hbm_to_vmem [thread:$0]  (!%p13664_p6), %s17948_s7, 16384, %s322_s24, [#allocation12], %s18188_s22, %s18188_s22, %s18187_s17  }
  0x81   : > { %s10836_s19 = sadd.s32 4294967294, %s13558_s12   ;;  %s13794_s27 = sadd.s32 1, %s13558_s12  }
  0x82   : > { %s35_s23 = sadd.s32 1, %s13554_s11  ;;  %s32_s25 = ssub.s32 %s13558_s12, %s13794_s27 }
  0x83   : > { %p42_p8 = scmp.ne.s32.totalorder %s13554_s11, %s13550_s10  ;;  %p33_p1 = scmp.eq.s32.totalorder %s32_s25, 0 }
  0x84   : > { %p43_p3 = scmp.eq.s32.totalorder %s13558_s12, 0  ;;  %p48_p13 = scmp.ne.s32.totalorder %s13550_s10, %s13546_s30 }
  0x85   : > { %p240_p0 = scmp.eq.s32.totalorder %s13648_s15, 1  ;;  %p18189_p5 = scmp.eq.s32.totalorder %s13648_s15, 0 }
  0x86   : > { %s13806_s26 = scalar_select %p33_p1, %s13554_s11, %s35_s23  }
  0x87   : > { %p44_p2 = por %p43_p3, %p42_p8  ;;  %p13810_p7 = por %p18189_p5, %p48_p13 }
  0x88   : > { %p13814_p6 = por %p240_p0, %p42_p8  ;;  %p246_p9 = scmp.eq.s32.totalorder %s10836_s19, 1 }
  0x89   : > { %p12137_p4 = scmp.lt.s32.totalorder %s13558_s12, 2  ;;  %s338_s18 = sand.u32 1, %s13554_s11  }
  0x8a   : > { %s18191_s24 = scalar_select %p13814_p6, 1, 0 }
  0x8b   : > { %p13820_p10 = por %p246_p9, %p48_p13  ;;  %s10844_s20 = sshll.u32 %s338_s18, 9 }
  0x8c   : > { %s11281_s17 = sshll.u32 %s13558_s12, 13  ;;  %s342_s23 = scalar_lea.vmem [#allocation2], %s10844_s20 }
  0x8d   : > { %s18192_s21 = scalar_select %p13820_p10, 1, 0 }
  0x8e   : > { %s13828_s13 = scalar_lea.hbm %s17941_s0, %s11281_s17  ;;  %s350_s25 = sshll.u32 %s342_s23, 4  ;;  %s13834_s25 = int_to_ptr.vmem [resolvable:$true] %s350_s25 }
  0x8f   : > { %p13830_p11 = pnand %p12137_p4, %p44_p2  ;;  %s13836_s14 = scalar_lea.sflag [#allocation3], %s338_s18 }
  0x90   : > { %s13450_s9 = scalar_lea.hbm %s13828_s13, 8192  ;;  %s13455_s22 = scalar_lea.hbm %s17941_s0, 16384 }
  0x91   : > { %p13451_p12 = scmp.ne.s32.totalorder %s13828_s13, %s13450_s9  ;;  %p13452_p8 = pneg %p13830_p11 }
  0x92   : > { %p13456_p13 = scmp.lt.u32.totalorder %s13828_s13, %s17941_s0  ;;  %p13457_p0 = scmp.lt.u32.totalorder %s13455_s22, %s13450_s9 }
  0x93   : > { %p13453_p1 = pnand %p13452_p8, %p13451_p12  ;;  %p13459_p5 = scmp.lt.u32.totalorder %s13450_s9, %s13828_s13 }
  0x94   : > { %p13458_p2 = por %p13457_p0, %p13456_p13 }
  0x95   : > { %p13454_p3 = pneg %p13453_p1 }
  0x96   : > { %p13460_p9 = por %p13459_p5, %p13458_p2 }
  0x98   : > { %p13461_p4 = pnand %p13460_p9, %p13454_p3 }
  0x9a   : > { %13464 = shalt.err (!%p13461_p4)
}
  0x9b   : > { %s13465_s18 = scalar_lea.vmem %s13834_s25, 8192  ;;  %s13571_s20 = smov [#allocation2]  }
  0x9c   : > { %p13466_p12 = scmp.ne.s32.totalorder %s13834_s25, %s13465_s18  ;;  %s13470_s17 = sshll.u32 %s13571_s20, 4  ;;  %s13471_s17 = int_to_ptr.vmem [resolvable:$false] %s13470_s17 }
  0x9d   : > { %s13472_s29 = scalar_lea.vmem %s13471_s17, 16384  ;;  %p13473_p6 = scmp.lt.s32.totalorder %s13834_s25, %s13471_s17 }
  0x9e   : > { %p13468_p1 = pnand %p13466_p12, %p13452_p8  ;;  %p13474_p13 = scmp.lt.s32.totalorder %s13472_s29, %s13465_s18 }
  0xa0   : > { %p13469_p10 = pneg %p13468_p1  ;;  %p13475_p0 = por %p13474_p13, %p13473_p6 }
  0xa2   : > { %p13476_p2 = pnand %p13475_p0, %p13469_p10 }
  0xa4   : > { %13479 = shalt.err (!%p13476_p2)
}
  0xa5   : > { %s18194_s9 = smov 16   ;;  %s18195_s22 = smov 256  }
  0xa6   : > { %12127 = dma.hbm_to_vmem [thread:$0]  (!%p13830_p11), %s13828_s13, 8192, %s13834_s25, %s13836_s14, %s18195_s22, %s18195_s22, %s18194_s9  }
  0xa7   : > { %p18196_p8 = scmp.ne.s32.totalorder %s18184_s16, 0 }
  0xa9   : > { %362 = sbr.rel (%p18196_p8) target bundleno = 3847 (0xf07), region = 56 }
  0xb0   : > { %s13870_s23 = sand.u32 1, %s13550_s10  }
  0xb1   : > { %s10849_s18 = sshll.u32 %s13870_s23, 9  ;;  %s365_s20 = scalar_lea.sflag [#allocation3], %s13870_s23 }
  0xb2   : > { %s13876_s19 = scalar_lea.vmem [#allocation2], %s10849_s18 }
  0xb3   : > { %13525 = dma.done.wait (%p13810_p7), %s365_s20, 8192  }
  0xb4   : > { %13527 = vsyncadd (%p13810_p7), %s365_s20, 4294959104  ;;  %p18197_p6 = scmp.eq.s32.totalorder %s13648_s15, 0 }
  0xb6   : > { %13529 = dma.done.wait (%p18197_p6), [#allocation6], 16384   ;;  %p18198_p10 = pmov %p18197_p6 }
  0xb7   : > { %p18199_p11 = pmov %p18197_p6 }
  0xb8   : > { %13531 = vsyncadd (%p18198_p10), [#allocation6], 4294950912 }
  0xb9   : > { %13533 = dma.done.wait (%p18199_p11), [#allocation9], 16416   ;;  %p18200_p3 = pmov %p18197_p6 }
  0xbb   : > { %13535 = vsyncadd (%p18200_p3), [#allocation9], 4294950880  ;;  %p18201_p5 = pmov %p18200_p3 }
  0xbc   : > { %p18202_p9 = pmov %p18200_p3 }
  0xbd   : > { %13537 = dma.done.wait (%p18201_p5), [#allocation12], 16384  }
  0xbe   : > { %13539 = vsyncadd (%p18202_p9), [#allocation12], 4294950912  ;;  %v426_v0 = vld [vmem:[%s13876_s19] sm:$0xff]  ;;  %v427_v1 = vld [vmem:[%s13876_s19 + $0x8] sm:$0xff]  ;;  %vm13573_vm0 = vmmov 0   ;;  %vm3006_vm1 = vcmask 130048  }
  0xbf   : > { %v428_v2 = vld [vmem:[%s13876_s19 + $0x10] sm:$0xff]  ;;  %v490_v3 = vadd.f32 %v427_v1, %v426_v0  ;;  %v619_v4 = vmul.f32 %v426_v0, %v426_v0  ;;  %v620_v5 = vmul.f32 %v427_v1, %v427_v1  ;;  %v429_v6 = vld [vmem:[%s13876_s19 + $0x18] sm:$0xff]  ;;  %v430_v11 = vld [vmem:[%s13876_s19 + $0x20] sm:$0xff]  ;;  %s18715_s13 = sld [smem:[#allocation129_spill]]  ;;  %p18717_p4 = scmp.ne.s32.totalorder %s18191_s24, 0 }
  0xc0   : > { %v621_v7 = vmul.f32 %v428_v2, %v428_v2  ;;  %v622_v8 = vmul.f32 %v429_v6, %v429_v6  ;;  %v493_v10 = vadd.f32 %v429_v6, %v428_v2  ;;  %v431_v12 = vld [vmem:[%s13876_s19 + $0x28] sm:$0xff]  ;;  %v432_v14 = vld [vmem:[%s13876_s19 + $0x30] sm:$0xff]  ;;  %v433_v15 = vld [vmem:[%s13876_s19 + $0x38] sm:$0xff]  ;;  %v623_v17 = vmul.f32 %v430_v11, %v430_v11  ;;  %s13574_s29 = smov [#allocation13]  }
  0xc1   : > { %491 = vadd.xlane.f32.xlu0 %v490_v3  ;;  %v683_v9 = vadd.f32 %v620_v5, %v619_v4  ;;  %v496_v16 = vadd.f32 %v431_v12, %v430_v11  ;;  %v624_v18 = vmul.f32 %v431_v12, %v431_v12  ;;  %v499_v19 = vadd.f32 %v433_v15, %v432_v14  ;;  %v434_v23 = vld [vmem:[%s13876_s19 + $0x40] sm:$0xff]  ;;  %v435_v24 = vld [vmem:[%s13876_s19 + $0x48] sm:$0xff]  ;;  %v436_v26 = vld [vmem:[%s13876_s19 + $0x50] sm:$0xff]  ;;  %s13484_s9 = sshll.u32 %s13574_s29, 4  ;;  %s13485_s9 = int_to_ptr.vmem [resolvable:$false] %s13484_s9 }
  0xc2   : > { %v686_v13 = vadd.f32 %v622_v8, %v621_v7  ;;  %v625_v20 = vmul.f32 %v432_v14, %v432_v14  ;;  %v626_v21 = vmul.f32 %v433_v15, %v433_v15  ;;  %v437_v27 = vld [vmem:[%s13876_s19 + $0x58] sm:$0xff]  ;;  %v502_v28 = vadd.f32 %v435_v24, %v434_v23  ;;  %v438_v36 = vld [vmem:[%s13876_s19 + $0x60] sm:$0xff]  ;;  %v439_v37 = vld [vmem:[%s13876_s19 + $0x68] sm:$0xff]  ;;  %s13486_s22 = scalar_lea.vmem %s13485_s9, 16384 }
  0xc3   : > { %684 = vadd.xlane.f32.xlu1 %v683_v9  ;;  %v689_v22 = vadd.f32 %v624_v18, %v623_v17  ;;  %v627_v29 = vmul.f32 %v434_v23, %v434_v23  ;;  %v628_v30 = vmul.f32 %v435_v24, %v435_v24  ;;  %v505_v31 = vadd.f32 %v437_v27, %v436_v26  ;;  %v12191_v34 = vld [vmem:[#allocation5 + $0x4] ss:$24 sps:$4 sm:$0xff]   ;;  %v12193_v38 = vld [vmem:[#allocation5] ss:$24 sps:$4 sm:$0xff]   ;;  %v12194_v39 = vld [vmem:[#allocation5 + $0x34] ss:$24 sps:$4 sm:$0xff]  }
  0xc4   : > { %v692_v25 = vadd.f32 %v626_v21, %v625_v20  ;;  %v629_v32 = vmul.f32 %v436_v26, %v436_v26  ;;  %v630_v33 = vmul.f32 %v437_v27, %v437_v27  ;;  %1707 = vmatprep.subr.bf16.mxu0 %v12191_v34  ;;  %v440_v41 = vld [vmem:[%s13876_s19 + $0x70] sm:$0xff]  ;;  %v441_v42 = vld [vmem:[%s13876_s19 + $0x78] sm:$0xff]  ;;  %v508_v44 = vadd.f32 %v439_v37, %v438_v36  ;;  %v442_v53 = vld [vmem:[%s13876_s19 + $0x80] sm:$0xff] }
  0xc5   : > { %494 = vadd.xlane.f32.xlu0 %v493_v10  ;;  %v695_v35 = vadd.f32 %v628_v30, %v627_v29  ;;  %1708 = vmatpush1.bf16.msra.mxu0 %v12193_v38  ;;  %v12196_v43 = vld [vmem:[#allocation5 + $0x30] ss:$24 sps:$4 sm:$0xff]   ;;  %v631_v45 = vmul.f32 %v438_v36, %v438_v36  ;;  %v632_v46 = vmul.f32 %v439_v37, %v439_v37  ;;  %v12197_v47 = vld [vmem:[#allocation5 + $0x64] ss:$24 sps:$4 sm:$0xff]   ;;  %v12199_v51 = vld [vmem:[#allocation5 + $0x60] ss:$24 sps:$4 sm:$0xff]  }
  0xc6   : > { %v698_v40 = vadd.f32 %v630_v33, %v629_v32  ;;  %1709 = vmatprep.subr.bf16.mxu0 %v12194_v39  ;;  %v511_v48 = vadd.f32 %v441_v42, %v440_v41  ;;  %v633_v49 = vmul.f32 %v440_v41, %v440_v41  ;;  %v634_v50 = vmul.f32 %v441_v42, %v441_v42  ;;  %v12200_v54 = vld [vmem:[#allocation5 + $0x94] ss:$24 sps:$4 sm:$0xff]   ;;  %v445_v58 = vld [vmem:[%s13876_s19 + $0x98] sm:$0xff]  ;;  %v12202_v59 = vld [vmem:[#allocation5 + $0x90] ss:$24 sps:$4 sm:$0xff]  }
  0xc7   : > { %687 = vadd.xlane.f32.xlu1 %v686_v13  ;;  %v701_v52 = vadd.f32 %v632_v46, %v631_v45  ;;  %v443_v55 = vld [vmem:[%s13876_s19 + $0x88] sm:$0xff]  ;;  %v444_v57 = vld [vmem:[%s13876_s19 + $0x90] sm:$0xff]  ;;  %v635_v61 = vmul.f32 %v442_v53, %v442_v53  ;;  %v12203_v63 = vld [vmem:[#allocation5 + $0xc4] ss:$24 sps:$4 sm:$0xff]   ;;  %v638_v2 = vmul.f32 %v445_v58, %v445_v58 }
  0xc8   : > { %v704_v56 = vadd.f32 %v634_v50, %v633_v49  ;;  %v514_v60 = vadd.f32 %v443_v55, %v442_v53  ;;  %v636_v62 = vmul.f32 %v443_v55, %v443_v55  ;;  %v517_v0 = vadd.f32 %v445_v58, %v444_v57  ;;  %v12205_v3 = vld [vmem:[#allocation5 + $0xc0] ss:$24 sps:$4 sm:$0xff]   ;;  %v12206_v6 = vld [vmem:[#allocation5 + $0xf4] ss:$24 sps:$4 sm:$0xff]   ;;  %v12208_v11 = vld [vmem:[#allocation5 + $0xf0] ss:$24 sps:$4 sm:$0xff]  }
  0xc9   : > { %497 = vadd.xlane.f32.xlu0 %v496_v16  ;;  %1710 = vmatpush1.bf16.msra.mxu0 %v12196_v43  ;;  %v637_v1 = vmul.f32 %v444_v57, %v444_v57  ;;  %v446_v5 = vld [vmem:[%s13876_s19 + $0xa0] sm:$0xff]  ;;  %v447_v7 = vld [vmem:[%s13876_s19 + $0xa8] sm:$0xff]  ;;  %v448_v9 = vld [vmem:[%s13876_s19 + $0xb0] sm:$0xff] }
  0xca   : > { %1711 = vmatprep.subr.bf16.mxu0 %v12197_v47  ;;  %v707_v4 = vadd.f32 %v636_v62, %v635_v61  ;;  %v449_v10 = vld [vmem:[%s13876_s19 + $0xb8] sm:$0xff]  ;;  %v520_v12 = vadd.f32 %v447_v7, %v446_v5  ;;  %v639_v13 = vmul.f32 %v446_v5, %v446_v5  ;;  %v640_v14 = vmul.f32 %v447_v7, %v447_v7  ;;  %v451_v20 = vld [vmem:[%s13876_s19 + $0xc8] sm:$0xff]  ;;  %v452_v24 = vld [vmem:[%s13876_s19 + $0xd0] sm:$0xff] }
  0xcb   : > { %500 = vadd.xlane.f32.xlu1 %v499_v19  ;;  %v710_v8 = vadd.f32 %v638_v2, %v637_v1  ;;  %v12209_v15 = vld [vmem:[#allocation5 + $0x124] ss:$24 sps:$4 sm:$0xff]   ;;  %v523_v16 = vadd.f32 %v449_v10, %v448_v9  ;;  %v641_v17 = vmul.f32 %v448_v9, %v448_v9  ;;  %v642_v18 = vmul.f32 %v449_v10, %v449_v10  ;;  %v12211_v21 = vld [vmem:[#allocation5 + $0x120] ss:$24 sps:$4 sm:$0xff]   ;;  %v12214_v26 = vld [vmem:[#allocation5 + $0x150] ss:$24 sps:$4 sm:$0xff]  }
  0xcc   : > { %v450_v19 = vld [vmem:[%s13876_s19 + $0xc0] sm:$0xff]  ;;  %v713_v23 = vadd.f32 %v640_v14, %v639_v13  ;;  %v644_v33 = vmul.f32 %v451_v20, %v451_v20  ;;  %v645_v36 = vmul.f32 %v452_v24, %v452_v24  ;;  %v12218_v38 = vld [vmem:[#allocation5 + $0x1b4] ss:$24 sps:$4 sm:$0xff]   ;;  %v12244_v42 = vld [vmem:[#allocation5 + $0x38] ss:$24 sps:$4 sm:$0xff]  }
  0xcd   : > { %690 = vadd.xlane.f32.xlu0 %v689_v22  ;;  %1712 = vmatpush1.bf16.msra.mxu0 %v12199_v51  ;;  %v12212_v22 = vld [vmem:[#allocation5 + $0x154] ss:$24 sps:$4 sm:$0xff]   ;;  %v716_v27 = vadd.f32 %v642_v18, %v641_v17  ;;  %v12241_v30 = vld [vmem:[#allocation5 + $0x8] ss:$24 sps:$4 sm:$0xff]   ;;  %v643_v32 = vmul.f32 %v450_v19, %v450_v19  ;;  %v457_v45 = vld [vmem:[%s13876_s19 + $0xf8] sm:$0xff] }
  0xce   : > { %1713 = vmatprep.subr.bf16.mxu0 %v12200_v54  ;;  %v13922_v29 = vld [vmem:[#allocation5 + $0xc] ss:$24 sps:$4 sm:$0xff]   ;;  %v12217_v34 = vld [vmem:[#allocation5 + $0x180] ss:$24 sps:$4 sm:$0xff]   ;;  %v12242_v39 = vld [vmem:[#allocation5 + $0x3c] ss:$24 sps:$4 sm:$0xff]   ;;  %v650_v57 = vmul.f32 %v457_v45, %v457_v45 }
  0xcf   : > { %693 = vadd.xlane.f32.xlu1 %v692_v25  ;;  %v453_v25 = vld [vmem:[%s13876_s19 + $0xd8] sm:$0xff]  ;;  %11796 = vmatprep.subr.bf16.mxu1 %v13922_v29  ;;  %v455_v41 = vld [vmem:[%s13876_s19 + $0xe8] sm:$0xff]  ;;  %v719_v43 = vadd.f32 %v644_v33, %v643_v32 }
  0xd0   : > { %v646_v37 = vmul.f32 %v453_v25, %v453_v25  ;;  %11812 = vmatpush1.bf16.msra.mxu1 %v12241_v30  ;;  %v12220_v46 = vld [vmem:[#allocation5 + $0x1b0] ss:$24 sps:$4 sm:$0xff]   ;;  %v12245_v49 = vld [vmem:[#allocation5 + $0x6c] ss:$24 sps:$4 sm:$0xff]   ;;  %v648_v53 = vmul.f32 %v455_v41, %v455_v41  ;;  %v12223_v54 = vld [vmem:[#allocation5 + $0x1e0] ss:$24 sps:$4 sm:$0xff]  }
  0xd1   : > { %503 = vadd.xlane.f32.xlu0 %v502_v28  ;;  %1714 = vmatpush1.bf16.msra.mxu0 %v12202_v59  ;;  %v12215_v28 = vld [vmem:[#allocation5 + $0x184] ss:$24 sps:$4 sm:$0xff]   ;;  %v12247_v50 = vld [vmem:[#allocation5 + $0x68] ss:$24 sps:$4 sm:$0xff]   ;;  %v12224_v58 = vld [vmem:[#allocation5 + $0x214] ss:$24 sps:$4 sm:$0xff]  }
  0xd2   : > { %1715 = vmatprep.subr.bf16.mxu0 %v12203_v63  ;;  %11797 = vmatprep.subr.bf16.mxu1 %v12242_v39  ;;  %v722_v47 = vadd.f32 %v646_v37, %v645_v36  ;;  %v12248_v59 = vld [vmem:[#allocation5 + $0x9c] ss:$24 sps:$4 sm:$0xff]   ;;  %v459_v61 = vld [vmem:[%s13876_s19 + $0x108] sm:$0xff]  ;;  %v12250_v62 = vld [vmem:[#allocation5 + $0x98] ss:$24 sps:$4 sm:$0xff]  }
  0xd3   : > { %506 = vadd.xlane.f32.xlu1 %v505_v31  ;;  %v526_v31 = vadd.f32 %v451_v20, %v450_v19  ;;  %v461_v1 = vld [vmem:[%s13876_s19 + $0x118] sm:$0xff]  ;;  %v12226_v2 = vld [vmem:[#allocation5 + $0x210] ss:$24 sps:$4 sm:$0xff]   ;;  %v12251_v5 = vld [vmem:[#allocation5 + $0xcc] ss:$24 sps:$4 sm:$0xff]   ;;  %v652_v9 = vmul.f32 %v459_v61, %v459_v61 }
  0xd4   : > { %11813 = vmatpush1.bf16.msra.mxu1 %v12244_v42  ;;  %v12229_v10 = vld [vmem:[#allocation5 + $0x240] ss:$24 sps:$4 sm:$0xff]   ;;  %v654_v13 = vmul.f32 %v461_v1, %v461_v1  ;;  %v12230_v14 = vld [vmem:[#allocation5 + $0x274] ss:$24 sps:$4 sm:$0xff]  }
  0xd5   : > { %696 = vadd.xlane.f32.xlu0 %v695_v35  ;;  %1716 = vmatpush1.bf16.msra.mxu0 %v12205_v3  ;;  %v529_v35 = vadd.f32 %v453_v25, %v452_v24  ;;  %v463_v17 = vld [vmem:[%s13876_s19 + $0x128] sm:$0xff]  ;;  %v12256_v18 = vld [vmem:[#allocation5 + $0xf8] ss:$24 sps:$4 sm:$0xff]   ;;  %v12233_v24 = vld [vmem:[#allocation5 + $0x2a4] ss:$24 sps:$4 sm:$0xff]  }
  0xd6   : > { %1717 = vmatprep.subr.bf16.mxu0 %v12206_v6  ;;  %11798 = vmatprep.subr.bf16.mxu1 %v12245_v49  ;;  %v12253_v6 = vld [vmem:[#allocation5 + $0xc8] ss:$24 sps:$4 sm:$0xff]   ;;  %v464_v20 = vld [vmem:[%s13876_s19 + $0x130] sm:$0xff]  ;;  %v12257_v25 = vld [vmem:[#allocation5 + $0x12c] ss:$24 sps:$4 sm:$0xff]   ;;  %v656_v30 = vmul.f32 %v463_v17, %v463_v17 }
  0xd7   : > { %699 = vadd.xlane.f32.xlu1 %v698_v40  ;;  %v454_v40 = vld [vmem:[%s13876_s19 + $0xe0] sm:$0xff]  ;;  %v657_v33 = vmul.f32 %v464_v20, %v464_v20  ;;  %v12260_v36 = vld [vmem:[#allocation5 + $0x15c] ss:$24 sps:$4 sm:$0xff]   ;;  %v12262_v39 = vld [vmem:[#allocation5 + $0x158] ss:$24 sps:$4 sm:$0xff]  }
  0xd8   : > { %v532_v51 = vadd.f32 %v455_v41, %v454_v40  ;;  %11814 = vmatpush1.bf16.msra.mxu1 %v12247_v50  ;;  %v466_v37 = vld [vmem:[%s13876_s19 + $0x140] sm:$0xff]  ;;  %v468_v41 = vld [vmem:[%s13876_s19 + $0x150] sm:$0xff]  ;;  %v469_v42 = vld [vmem:[%s13876_s19 + $0x158] sm:$0xff] }
  0xd9   : > { %509 = vadd.xlane.f32.xlu0 %v508_v44  ;;  %1718 = vmatpush1.bf16.msra.mxu0 %v12208_v11  ;;  %v456_v44 = vld [vmem:[%s13876_s19 + $0xf0] sm:$0xff]  ;;  %v553_v50 = vadd.f32 %v469_v42, %v468_v41 }
  0xda   : > { %1719 = vmatprep.subr.bf16.mxu0 %v12209_v15  ;;  %v535_v55 = vadd.f32 %v457_v45, %v456_v44  ;;  %11799 = vmatprep.subr.bf16.mxu1 %v12248_v59  ;;  %v12254_v15 = vld [vmem:[#allocation5 + $0xfc] ss:$24 sps:$4 sm:$0xff]   ;;  %v12263_v45 = vld [vmem:[#allocation5 + $0x18c] ss:$24 sps:$4 sm:$0xff]  }
  0xdb   : > { %512 = vadd.xlane.f32.xlu1 %v511_v48  ;;  %v12221_v48 = vld [vmem:[#allocation5 + $0x1e4] ss:$24 sps:$4 sm:$0xff]  }
  0xdc   : > { %11815 = vmatpush1.bf16.msra.mxu1 %v12250_v62  ;;  %v473_v59 = vld [vmem:[%s13876_s19 + $0x178] sm:$0xff]  ;;  %v12271_v62 = vld [vmem:[#allocation5 + $0x1e8] ss:$24 sps:$4 sm:$0xff]  }
  0xdd   : > { %702 = vadd.xlane.f32.xlu0 %v701_v52  ;;  %1720 = vmatpush1.bf16.msra.mxu0 %v12211_v21  ;;  %v647_v52 = vmul.f32 %v454_v40, %v454_v40  ;;  %v465_v21 = vld [vmem:[%s13876_s19 + $0x138] sm:$0xff] }
  0xde   : > { %1721 = vmatprep.subr.bf16.mxu0 %v12212_v22  ;;  %11800 = vmatprep.subr.bf16.mxu1 %v12251_v5  ;;  %v12232_v22 = vld [vmem:[#allocation5 + $0x270] ss:$24 sps:$4 sm:$0xff]   ;;  %v547_v32 = vadd.f32 %v465_v21, %v464_v20  ;;  %v474_v5 = vld [vmem:[%s13876_s19 + $0x180] sm:$0xff]  ;;  %v12278_v20 = vld [vmem:[#allocation5 + $0x27c] ss:$24 sps:$4 sm:$0xff]  }
  0xdf   : > { %705 = vadd.xlane.f32.xlu1 %v704_v56  ;;  %v649_v56 = vmul.f32 %v456_v44, %v456_v44  ;;  %v725_v63 = vadd.f32 %v648_v53, %v647_v52  ;;  %v662_v52 = vmul.f32 %v469_v42, %v469_v42  ;;  %v12266_v53 = vld [vmem:[#allocation5 + $0x1bc] ss:$24 sps:$4 sm:$0xff]  }
  0xe0   : > { %11816 = vmatpush1.bf16.msra.mxu1 %v12253_v6  ;;  %v475_v6 = vld [vmem:[%s13876_s19 + $0x188] sm:$0xff]  ;;  %v484_v42 = vld [vmem:[%s13876_s19 + $0x1d0] sm:$0xff] }
  0xe1   : > { %515 = vadd.xlane.f32.xlu0 %v514_v60  ;;  %1722 = vmatpush1.bf16.msra.mxu0 %v12214_v26  ;;  %v458_v60 = vld [vmem:[%s13876_s19 + $0x100] sm:$0xff]  ;;  %v728_v3 = vadd.f32 %v650_v57, %v649_v56  ;;  %v12268_v56 = vld [vmem:[#allocation5 + $0x1b8] ss:$24 sps:$4 sm:$0xff]  }
  0xe2   : > { %1723 = vmatprep.subr.bf16.mxu0 %v12215_v28  ;;  %v538_v7 = vadd.f32 %v459_v61, %v458_v60  ;;  %11801 = vmatprep.subr.bf16.mxu1 %v12254_v15  ;;  %v12259_v26 = vld [vmem:[#allocation5 + $0x128] ss:$24 sps:$4 sm:$0xff]   ;;  %v12269_v61 = vld [vmem:[#allocation5 + $0x1ec] ss:$24 sps:$4 sm:$0xff]   ;;  %v667_v15 = vmul.f32 %v474_v5, %v474_v5 }
  0xe3   : > { %518 = vadd.xlane.f32.xlu1 %v517_v0  ;;  %v460_v0 = vld [vmem:[%s13876_s19 + $0x110] sm:$0xff] }
  0xe4   : > { %v541_v11 = vadd.f32 %v461_v1, %v460_v0  ;;  %11817 = vmatpush1.bf16.msra.mxu1 %v12256_v18 }
  0xe5   : > { %708 = vadd.xlane.f32.xlu0 %v707_v4  ;;  %1724 = vmatpush1.bf16.msra.mxu0 %v12217_v34  ;;  %v12227_v4 = vld [vmem:[#allocation5 + $0x244] ss:$24 sps:$4 sm:$0xff]   ;;  %v658_v34 = vmul.f32 %v465_v21, %v465_v21 }
  0xe6   : > { %1725 = vmatprep.subr.bf16.mxu0 %v12218_v38  ;;  %11802 = vmatprep.subr.bf16.mxu1 %v12257_v25  ;;  %v467_v38 = vld [vmem:[%s13876_s19 + $0x148] sm:$0xff]  ;;  %v478_v21 = vld [vmem:[%s13876_s19 + $0x1a0] sm:$0xff]  ;;  %v480_v25 = vld [vmem:[%s13876_s19 + $0x1b0] sm:$0xff] }
  0xe7   : > { %711 = vadd.xlane.f32.xlu1 %v710_v8  ;;  %v651_v8 = vmul.f32 %v458_v60, %v458_v60  ;;  %v740_v44 = vadd.f32 %v658_v34, %v657_v33  ;;  %v660_v49 = vmul.f32 %v467_v38, %v467_v38 }
  0xe8   : > { %11818 = vmatpush1.bf16.msra.mxu1 %v12259_v26  ;;  %v481_v26 = vld [vmem:[%s13876_s19 + $0x1b8] sm:$0xff] }
  0xe9   : > { %521 = vadd.xlane.f32.xlu0 %v520_v12  ;;  %1726 = vmatpush1.bf16.msra.mxu0 %v12220_v46  ;;  %v653_v12 = vmul.f32 %v460_v0, %v460_v0  ;;  %v731_v19 = vadd.f32 %v652_v9, %v651_v8  ;;  %v12265_v46 = vld [vmem:[#allocation5 + $0x188] ss:$24 sps:$4 sm:$0xff]   ;;  %v476_v9 = vld [vmem:[%s13876_s19 + $0x190] sm:$0xff]  ;;  %v571_v34 = vadd.f32 %v481_v26, %v480_v25 }
  0xea   : > { %1727 = vmatprep.subr.bf16.mxu0 %v12221_v48  ;;  %11803 = vmatprep.subr.bf16.mxu1 %v12260_v36  ;;  %v659_v48 = vmul.f32 %v466_v37, %v466_v37  ;;  %v669_v18 = vmul.f32 %v476_v9, %v476_v9  ;;  %v674_v36 = vmul.f32 %v481_v26, %v481_v26 }
  0xeb   : > { %524 = vadd.xlane.f32.xlu1 %v523_v16  ;;  %v462_v16 = vld [vmem:[%s13876_s19 + $0x120] sm:$0xff] }
  0xec   : > { %v655_v28 = vmul.f32 %v462_v16, %v462_v16  ;;  %11819 = vmatpush1.bf16.msra.mxu1 %v12262_v39  ;;  %v743_v57 = vadd.f32 %v660_v49, %v659_v48  ;;  %v483_v39 = vld [vmem:[%s13876_s19 + $0x1c8] sm:$0xff]  ;;  %v677_v49 = vmul.f32 %v484_v42, %v484_v42 }
  0xed   : > { %714 = vadd.xlane.f32.xlu0 %v713_v23  ;;  %1728 = vmatpush1.bf16.msra.mxu0 %v12223_v54  ;;  %v734_v23 = vadd.f32 %v654_v13, %v653_v12  ;;  %v470_v54 = vld [vmem:[%s13876_s19 + $0x160] sm:$0xff] }
  0xee   : > { %1729 = vmatprep.subr.bf16.mxu0 %v12224_v58  ;;  %v737_v40 = vadd.f32 %v656_v30, %v655_v28  ;;  %11804 = vmatprep.subr.bf16.mxu1 %v12263_v45  ;;  %v472_v58 = vld [vmem:[%s13876_s19 + $0x170] sm:$0xff]  ;;  %v663_v0 = vmul.f32 %v470_v54, %v470_v54  ;;  %v12275_v12 = vld [vmem:[#allocation5 + $0x24c] ss:$24 sps:$4 sm:$0xff]   ;;  %v12277_v13 = vld [vmem:[#allocation5 + $0x248] ss:$24 sps:$4 sm:$0xff]  }
  0xef   : > { %717 = vadd.xlane.f32.xlu1 %v716_v27  ;;  %v544_v27 = vadd.f32 %v463_v17, %v462_v16  ;;  %v668_v16 = vmul.f32 %v475_v6, %v475_v6  ;;  %v12281_v28 = vld [vmem:[#allocation5 + $0x2ac] ss:$24 sps:$4 sm:$0xff]   ;;  %v12283_v30 = vld [vmem:[#allocation5 + $0x2a8] ss:$24 sps:$4 sm:$0xff]  }
  0xf0   : > { %11820 = vmatpush1.bf16.msra.mxu1 %v12265_v46 }
  0xf1   : > { %527 = vadd.xlane.f32.xlu0 %v526_v31  ;;  %1730 = vmatpush1.bf16.msra.mxu0 %v12226_v2  ;;  %v12235_v31 = vld [vmem:[#allocation5 + $0x2a0] ss:$24 sps:$4 sm:$0xff]   ;;  %v559_v2 = vadd.f32 %v473_v59, %v472_v58 }
  0xf2   : > { %1731 = vmatprep.subr.bf16.mxu0 %v12227_v4  ;;  %11805 = vmatprep.subr.bf16.mxu1 %v12266_v53  ;;  %v666_v4 = vmul.f32 %v473_v59, %v473_v59 }
  0xf3   : > { %530 = vadd.xlane.f32.xlu1 %v529_v35  ;;  %v12236_v35 = vld [vmem:[#allocation5 + $0x2d4] ss:$24 sps:$4 sm:$0xff]  }
  0xf4   : > { %11821 = vmatpush1.bf16.msra.mxu1 %v12268_v56 }
  0xf5   : > { %720 = vadd.xlane.f32.xlu0 %v719_v43  ;;  %1732 = vmatpush1.bf16.msra.mxu0 %v12229_v10  ;;  %v12238_v43 = vld [vmem:[#allocation5 + $0x2d0] ss:$24 sps:$4 sm:$0xff]   ;;  %v477_v10 = vld [vmem:[%s13876_s19 + $0x198] sm:$0xff] }
  0xf6   : > { %1733 = vmatprep.subr.bf16.mxu0 %v12230_v14  ;;  %11806 = vmatprep.subr.bf16.mxu1 %v12269_v61  ;;  %v562_v14 = vadd.f32 %v475_v6, %v474_v5  ;;  %v565_v17 = vadd.f32 %v477_v10, %v476_v9 }
  0xf7   : > { %723 = vadd.xlane.f32.xlu1 %v722_v47  ;;  %v550_v47 = vadd.f32 %v467_v38, %v466_v37  ;;  %v12284_v37 = vld [vmem:[#allocation5 + $0x2dc] ss:$24 sps:$4 sm:$0xff]   ;;  %v482_v38 = vld [vmem:[%s13876_s19 + $0x1c0] sm:$0xff] }
  0xf8   : > { %11822 = vmatpush1.bf16.msra.mxu1 %v12271_v62  ;;  %v574_v45 = vadd.f32 %v483_v39, %v482_v38  ;;  %v675_v46 = vmul.f32 %v482_v38, %v482_v38  ;;  %v13151_v38 = vld [vmem:[%s13876_s19 + $0x18] sm:$0xff] }
  0xf9   : > { %533 = vadd.xlane.f32.xlu0 %v532_v51  ;;  %1734 = vmatpush1.bf16.msra.mxu0 %v12232_v22  ;;  %v661_v51 = vmul.f32 %v468_v41, %v468_v41  ;;  %v479_v22 = vld [vmem:[%s13876_s19 + $0x1a8] sm:$0xff] }
  0xfa   : > { %1735 = vmatprep.subr.bf16.mxu0 %v12233_v24  ;;  %v755_v24 = vadd.f32 %v668_v16, %v667_v15  ;;  %v672_v33 = vmul.f32 %v479_v22, %v479_v22 }
  0xfb   : > { %536 = vadd.xlane.f32.xlu1 %v535_v55  ;;  %v471_v55 = vld [vmem:[%s13876_s19 + $0x168] sm:$0xff]  ;;  %v746_v60 = vadd.f32 %v662_v52, %v661_v51  ;;  %v486_v51 = vld [vmem:[%s13876_s19 + $0x1e0] sm:$0xff] }
  0xfc   : > { %v664_v1 = vmul.f32 %v471_v55, %v471_v55  ;;  %v487_v52 = vld [vmem:[%s13876_s19 + $0x1e8] sm:$0xff] }
  0xfd   : > { %726 = vadd.xlane.f32.xlu0 %v725_v63  ;;  %1736 = vmatpush1.bf16.msra.mxu0 %v12235_v31  ;;  %v556_v63 = vadd.f32 %v471_v55, %v470_v54  ;;  %v568_v31 = vadd.f32 %v479_v22, %v478_v21  ;;  %v488_v54 = vld [vmem:[%s13876_s19 + $0x1f0] sm:$0xff]  ;;  %v489_v55 = vld [vmem:[%s13876_s19 + $0x1f8] sm:$0xff]  ;;  %v680_v59 = vmul.f32 %v487_v52, %v487_v52 }
  0xfe   : > { %1737 = vmatprep.subr.bf16.mxu0 %v12236_v35  ;;  %v749_v8 = vadd.f32 %v664_v1, %v663_v0  ;;  %v673_v35 = vmul.f32 %v480_v25, %v480_v25  ;;  %v681_v61 = vmul.f32 %v488_v54, %v488_v54  ;;  %v682_v62 = vmul.f32 %v489_v55, %v489_v55 }
  0xff   : > { %729 = vadd.xlane.f32.xlu1 %v728_v3  ;;  %v665_v3 = vmul.f32 %v472_v58, %v472_v58  ;;  %v679_v58 = vmul.f32 %v486_v51, %v486_v51 }
 0x100   : > { %v776_v0 = vadd.f32 %v682_v62, %v681_v61 }
 0x101   : > { %539 = vadd.xlane.f32.xlu0 %v538_v7  ;;  %1738 = vmatpush1.bf16.msra.mxu0 %v12238_v43  ;;  %v12274_v7 = vld [vmem:[#allocation5 + $0x218] ss:$24 sps:$4 sm:$0xff]  }
 0x102   : > { %1900 = vmatprep.subr.bf16.mxu0 %v13922_v29  ;;  %v12272_v29 = vld [vmem:[#allocation5 + $0x21c] ss:$24 sps:$4 sm:$0xff]  }
 0x103   : > { %542 = vadd.xlane.f32.xlu1 %v541_v11  ;;  %11807 = vmatprep.subr.bf16.mxu1 %v12272_v29  ;;  %v752_v11 = vadd.f32 %v666_v4, %v665_v3  ;;  %v485_v43 = vld [vmem:[%s13876_s19 + $0x1d8] sm:$0xff] }
 0x104   : > { %11823 = vmatpush1.bf16.msra.mxu1 %v12274_v7  ;;  %v577_v48 = vadd.f32 %v485_v43, %v484_v42 }
 0x105   : > { %732 = vadd.xlane.f32.xlu0 %v731_v19  ;;  %11808 = vmatprep.subr.bf16.mxu1 %v12275_v12  ;;  %v670_v19 = vmul.f32 %v477_v10, %v477_v10 }
 0x107   : > { %735 = vadd.xlane.f32.xlu1 %v734_v23  ;;  %v12280_v23 = vld [vmem:[#allocation5 + $0x278] ss:$24 sps:$4 sm:$0xff]  }
 0x108   : > { %11824 = vmatpush1.bf16.msra.mxu1 %v12277_v13 }
 0x109   : > { %545 = vadd.xlane.f32.xlu0 %v544_v27  ;;  %11809 = vmatprep.subr.bf16.mxu1 %v12278_v20  ;;  %v758_v27 = vadd.f32 %v670_v19, %v669_v18 }
 0x10b   : > { %548 = vadd.xlane.f32.xlu1 %v547_v32  ;;  %v671_v32 = vmul.f32 %v478_v21, %v478_v21 }
 0x10c   : > { %11825 = vmatpush1.bf16.msra.mxu1 %v12280_v23 }
 0x10d   : > { %738 = vadd.xlane.f32.xlu0 %v737_v40  ;;  %11810 = vmatprep.subr.bf16.mxu1 %v12281_v28  ;;  %v12286_v40 = vld [vmem:[#allocation5 + $0x2d8] ss:$24 sps:$4 sm:$0xff]   ;;  %v761_v41 = vadd.f32 %v672_v33, %v671_v32 }
 0x10f   : > { %741 = vadd.xlane.f32.xlu1 %v740_v44  ;;  %v764_v44 = vadd.f32 %v674_v36, %v673_v35 }
 0x110   : > { %11826 = vmatpush1.bf16.msra.mxu1 %v12283_v30 }
 0x111   : > { %551 = vadd.xlane.f32.xlu0 %v550_v47  ;;  %11811 = vmatprep.subr.bf16.mxu1 %v12284_v37  ;;  %v676_v47 = vmul.f32 %v483_v39, %v483_v39 }
 0x113   : > { %554 = vadd.xlane.f32.xlu1 %v553_v50  ;;  %v678_v50 = vmul.f32 %v485_v43, %v485_v43  ;;  %v767_v53 = vadd.f32 %v676_v47, %v675_v46  ;;  %v13153_v46 = vld [vmem:[%s13876_s19 + $0x8] sm:$0xff] }
 0x114   : > { %11827 = vmatpush1.bf16.msra.mxu1 %v12286_v40 }
 0x115   : > { %744 = vadd.xlane.f32.xlu0 %v743_v57  ;;  %v770_v56 = vadd.f32 %v678_v50, %v677_v49  ;;  %v580_v57 = vadd.f32 %v487_v52, %v486_v51 }
 0x117   : > { %747 = vadd.xlane.f32.xlu1 %v746_v60  ;;  %v583_v60 = vadd.f32 %v489_v55, %v488_v54 }
 0x119   : > { %557 = vadd.xlane.f32.xlu0 %v556_v63  ;;  %v773_v63 = vadd.f32 %v680_v59, %v679_v58 }
 0x11b   : > { %560 = vadd.xlane.f32.xlu1 %v559_v2 }
 0x11d   : > { %750 = vadd.xlane.f32.xlu0 %v749_v8 }
 0x11f   : > { %753 = vadd.xlane.f32.xlu1 %v752_v11 }
 0x121   : > { %563 = vadd.xlane.f32.xlu0 %v562_v14 }
 0x123   : > { %566 = vadd.xlane.f32.xlu1 %v565_v17 }
 0x125   : > { %756 = vadd.xlane.f32.xlu0 %v755_v24 }
 0x127   : > { %759 = vadd.xlane.f32.xlu1 %v758_v27 }
 0x129   : > { %569 = vadd.xlane.f32.xlu0 %v568_v31 }
 0x12b   : > { %572 = vadd.xlane.f32.xlu1 %v571_v34 }
 0x12d   : > { %762 = vadd.xlane.f32.xlu0 %v761_v41 }
 0x12f   : > { %765 = vadd.xlane.f32.xlu1 %v764_v44  ;;  %v13152_v44 = vld [vmem:[%s13876_s19] sm:$0xff] }
 0x131   : > { %575 = vadd.xlane.f32.xlu0 %v574_v45 }
 0x133   : > { %578 = vadd.xlane.f32.xlu1 %v577_v48  ;;  %v13154_v48 = vld [vmem:[%s13876_s19 + $0x10] sm:$0xff] }
 0x135   : > { %768 = vadd.xlane.f32.xlu0 %v767_v53 }
 0x137   : > { %771 = vadd.xlane.f32.xlu1 %v770_v56 }
 0x139   : > { %581 = vadd.xlane.f32.xlu0 %v580_v57 }
 0x13b   : > { %584 = vadd.xlane.f32.xlu1 %v583_v60 }
 0x13d   : > { %774 = vadd.xlane.f32.xlu0 %v773_v63 }
 0x13f   : > { %777 = vadd.xlane.f32.xlu1 %v776_v0 }
 0x14e   : > { %v492_v1 = vpop.xlane.xlu0 %491 }
 0x14f   : > { %v587_v2 = vmul.f32 0.00390625, %v492_v1 }
 0x150   : > { %v685_v3 = vpop.xlane.xlu1 %684 }
 0x151   : > { %v779_v4 = vmul.f32 0.00390625, %v685_v3  ;;  %v875_v29 = vmul.f32 %v587_v2, %v587_v2  ;;  %v811_v45 = vsub.f32 %v13152_v44, %v587_v2  ;;  %v812_v47 = vsub.f32 %v13153_v46, %v587_v2  ;;  %v13155_v3 = vld [vmem:[%s13876_s19 + $0x28] sm:$0xff] }
 0x152   : > { %v495_v5 = vpop.xlane.xlu0 %494 }
 0x153   : > { %v907_v6 = vsub.f32 %v779_v4, %v875_v29  ;;  %v588_v7 = vmul.f32 0.00390625, %v495_v5  ;;  %v13156_v29 = vld [vmem:[%s13876_s19 + $0x30] sm:$0xff] }
 0x154   : > { %v688_v8 = vpop.xlane.xlu1 %687 }
 0x155   : > { %v780_v9 = vmul.f32 0.00390625, %v688_v8  ;;  %v876_v10 = vmul.f32 %v588_v7, %v588_v7  ;;  %v939_v12 = vadd.f32 1e-05, %v907_v6  ;;  %v814_v39 = vsub.f32 %v13151_v38, %v588_v7  ;;  %v13157_v6 = vld [vmem:[%s13876_s19 + $0x38] sm:$0xff]  ;;  %v13162_v38 = vld [vmem:[#allocation5 + $0x6c] ss:$24 sps:$4 sm:$0xff]  }
 0x156   : > { %v498_v11 = vpop.xlane.xlu0 %497  ;;  %v813_v49 = vsub.f32 %v13154_v48, %v588_v7 }
 0x157   : > { %v13962_v13 = vmul.f32 0.00390625, %v498_v11  ;;  %v908_v14 = vsub.f32 %v780_v9, %v876_v10  ;;  %12767 = vrsqrt.f32 %v939_v12  ;;  %v13158_v10 = vld [vmem:[%s13876_s19 + $0x20] sm:$0xff] }
 0x158   : > { %v501_v15 = vpop.xlane.xlu1 %500 }
 0x159   : > { %v13964_v16 = vmul.f32 0.00390625, %v501_v15  ;;  %v877_v17 = vmul.f32 %v13962_v13, %v13962_v13  ;;  %v940_v18 = vadd.f32 1e-05, %v908_v14  ;;  %v816_v4 = vsub.f32 %v13155_v3, %v13962_v13 }
 0x15a   : > { %v691_v19 = vpop.xlane.xlu0 %690  ;;  %v815_v11 = vsub.f32 %v13158_v10, %v13962_v13  ;;  %v13171_v10 = vld [vmem:[%s13876_s19 + $0x68] sm:$0xff] }
 0x15b   : > { %v781_v20 = vmul.f32 0.00390625, %v691_v19  ;;  %12769 = vrsqrt.f32 %v940_v18  ;;  %v878_v23 = vmul.f32 %v13964_v16, %v13964_v16  ;;  %v817_v5 = vsub.f32 %v13156_v29, %v13964_v16 }
 0x15c   : > { %v694_v21 = vpop.xlane.xlu1 %693  ;;  %v818_v7 = vsub.f32 %v13157_v6, %v13964_v16  ;;  %v13169_v6 = vld [vmem:[#allocation5 + $0x98] ss:$24 sps:$4 sm:$0xff]  }
 0x15d   : > { %v909_v22 = vsub.f32 %v781_v20, %v877_v17  ;;  %v782_v24 = vmul.f32 0.00390625, %v694_v21  ;;  %v13159_v21 = vld [vmem:[#allocation5 + $0x8] ss:$24 sps:$4 sm:$0xff]  }
 0x15e   : > { %v504_v25 = vpop.xlane.xlu0 %503 }
 0x15f   : > { %v941_v26 = vadd.f32 1e-05, %v909_v22  ;;  %v910_v27 = vsub.f32 %v782_v24, %v878_v23  ;;  %v13970_v28 = vmul.f32 0.00390625, %v504_v25  ;;  %v13160_v25 = vld [vmem:[#allocation5 + $0x3c] ss:$24 sps:$4 sm:$0xff]  }
 0x160   : > { %v507_v30 = vpop.xlane.xlu1 %506 }
 0x161   : > { %12771 = vrsqrt.f32 %v941_v26  ;;  %v942_v31 = vadd.f32 1e-05, %v910_v27  ;;  %v13972_v32 = vmul.f32 0.00390625, %v507_v30  ;;  %v879_v33 = vmul.f32 %v13970_v28, %v13970_v28  ;;  %v12768_v37 = vpop.eup %12767 }
 0x162   : > { %v697_v34 = vpop.xlane.xlu0 %696  ;;  %v1004_v56 = vmul.f32 %v12768_v37, %v812_v47  ;;  %v1003_v57 = vmul.f32 %v12768_v37, %v811_v45  ;;  %v13166_v47 = vld [vmem:[%s13876_s19 + $0x40] sm:$0xff] }
 0x163   : > { %12773 = vrsqrt.f32 %v942_v31  ;;  %v783_v35 = vmul.f32 0.00390625, %v697_v34  ;;  %v880_v41 = vmul.f32 %v13972_v32, %v13972_v32  ;;  %v819_v48 = vsub.f32 %v13166_v47, %v13970_v28 }
 0x164   : > { %v700_v36 = vpop.xlane.xlu1 %699 }
 0x165   : > { %v911_v40 = vsub.f32 %v783_v35, %v879_v33  ;;  %v784_v42 = vmul.f32 0.00390625, %v700_v36  ;;  %v12770_v43 = vpop.eup %12769  ;;  %v13161_v35 = vld [vmem:[#allocation5 + $0x38] ss:$24 sps:$4 sm:$0xff]  }
 0x166   : > { %v510_v50 = vpop.xlane.xlu0 %509  ;;  %v1006_v54 = vmul.f32 %v12770_v43, %v814_v39  ;;  %v1005_v58 = vmul.f32 %v12770_v43, %v813_v49  ;;  %v13163_v39 = vld [vmem:[%s13876_s19 + $0x48] sm:$0xff]  ;;  %v13165_v43 = vld [vmem:[%s13876_s19 + $0x58] sm:$0xff] }
 0x167   : > { %v943_v51 = vadd.f32 1e-05, %v911_v40  ;;  %v912_v52 = vsub.f32 %v784_v42, %v880_v41  ;;  %v13982_v53 = vmul.f32 0.00390625, %v510_v50  ;;  %v820_v40 = vsub.f32 %v13163_v39, %v13970_v28  ;;  %v13164_v41 = vld [vmem:[%s13876_s19 + $0x50] sm:$0xff] }
 0x168   : > { %v513_v55 = vpop.xlane.xlu1 %512  ;;  %v13986_v61 = vpack.c.bf16 %v1006_v54, %v1004_v56  ;;  %v13990_v0 = vpack.c.bf16 %v1005_v58, %v1003_v57  ;;  %v821_v42 = vsub.f32 %v13164_v41, %v13972_v32  ;;  %v822_v44 = vsub.f32 %v13165_v43, %v13972_v32  ;;  %v13167_v57 = vld [vmem:[#allocation5 + $0x68] ss:$24 sps:$4 sm:$0xff]  }
 0x169   : > { %12775 = vrsqrt.f32 %v943_v51  ;;  %v944_v59 = vadd.f32 1e-05, %v912_v52  ;;  %v13984_v60 = vmul.f32 0.00390625, %v513_v55  ;;  %v881_v62 = vmul.f32 %v13982_v53, %v13982_v53 }
 0x16a   : > { %v703_v63 = vpop.xlane.xlu0 %702  ;;  %1739 = vmatprep.mubr.bf16.mxu0 %v13986_v61 }
 0x16b   : > { %v12772_v1 = vpop.eup %12771  ;;  %12777 = vrsqrt.f32 %v944_v59  ;;  %v785_v2 = vmul.f32 0.00390625, %v703_v63  ;;  %1740 = vmatmul.mubr.bf16.vlgmr.msra.gmra.mrb[0].mxu0 %v13990_v0  ;;  %v882_v14 = vmul.f32 %v13984_v60, %v13984_v60  ;;  %v13168_v63 = vld [vmem:[#allocation5 + $0x9c] ss:$24 sps:$4 sm:$0xff]  }
 0x16c   : > { %v706_v8 = vpop.xlane.xlu1 %705  ;;  %v1008_v18 = vmul.f32 %v12772_v1, %v816_v4  ;;  %1901 = vmatpush1.bf16.msra.mxu0 %v13159_v21  ;;  %v1007_v24 = vmul.f32 %v12772_v1, %v815_v11  ;;  %v824_v11 = vsub.f32 %v13171_v10, %v13982_v53 }
 0x16d   : > { %v12774_v9 = vpop.eup %12773  ;;  %v913_v12 = vsub.f32 %v785_v2, %v881_v62  ;;  %v786_v15 = vmul.f32 0.00390625, %v706_v8  ;;  %1902 = vmatprep.subr.bf16.mxu0 %v13160_v25 }
 0x16e   : > { %v516_v17 = vpop.xlane.xlu0 %515  ;;  %v1010_v19 = vmul.f32 %v12774_v9, %v818_v7  ;;  %v1009_v20 = vmul.f32 %v12774_v9, %v817_v5  ;;  %v13170_v9 = vld [vmem:[#allocation5 + $0xcc] ss:$24 sps:$4 sm:$0xff]  }
 0x16f   : > { %v945_v16 = vadd.f32 1e-05, %v913_v12  ;;  %v914_v22 = vsub.f32 %v786_v15, %v882_v14  ;;  %v14004_v23 = vmul.f32 0.00390625, %v516_v17  ;;  %v13172_v12 = vld [vmem:[%s13876_s19 + $0x70] sm:$0xff]  ;;  %v13173_v15 = vld [vmem:[%s13876_s19 + $0x78] sm:$0xff] }
 0x170   : > { %v519_v13 = vpop.xlane.xlu1 %518  ;;  %v14006_v26 = vpack.c.bf16 %v1010_v19, %v1008_v18  ;;  %v14008_v30 = vpack.c.bf16 %v1009_v20, %v1007_v24  ;;  %1903 = vmatpush1.bf16.msra.mxu0 %v13161_v35  ;;  %v825_v14 = vsub.f32 %v13172_v12, %v13984_v60  ;;  %v826_v17 = vsub.f32 %v13173_v15, %v13984_v60  ;;  %v13174_v20 = vld [vmem:[%s13876_s19 + $0x60] sm:$0xff] }
 0x171   : > { %12779 = vrsqrt.f32 %v945_v16  ;;  %v946_v27 = vadd.f32 1e-05, %v914_v22  ;;  %v14010_v31 = vmul.f32 0.00390625, %v519_v13  ;;  %v883_v33 = vmul.f32 %v14004_v23, %v14004_v23  ;;  %1904 = vmatprep.subr.bf16.mxu0 %v13162_v38  ;;  %v13176_v38 = vld [vmem:[#allocation5 + $0xfc] ss:$24 sps:$4 sm:$0xff]  }
 0x172   : > { %1749 = vmatprep.mubr.bf16.mxu0 %v14006_v26  ;;  %v709_v34 = vpop.xlane.xlu0 %708  ;;  %v823_v21 = vsub.f32 %v13174_v20, %v13982_v53  ;;  %v13185_v20 = vld [vmem:[#allocation5 + $0x158] ss:$24 sps:$4 sm:$0xff]  }
 0x173   : > { %v12776_v36 = vpop.eup %12775  ;;  %12781 = vrsqrt.f32 %v946_v27  ;;  %v787_v37 = vmul.f32 0.00390625, %v709_v34  ;;  %1750 = vmatmul.mubr.bf16.gmra.mrb[4].mxu0 %v14008_v30  ;;  %v884_v50 = vmul.f32 %v14010_v31, %v14010_v31  ;;  %v13175_v34 = vld [vmem:[#allocation5 + $0xc8] ss:$24 sps:$4 sm:$0xff]  }
 0x174   : > { %v712_v45 = vpop.xlane.xlu1 %711  ;;  %v1012_v54 = vmul.f32 %v12776_v36, %v820_v40  ;;  %1905 = vmatpush1.bf16.msra.mxu0 %v13167_v57  ;;  %v1011_v62 = vmul.f32 %v12776_v36, %v819_v48  ;;  %v13178_v48 = vld [vmem:[#allocation5 + $0x12c] ss:$24 sps:$4 sm:$0xff]  }
 0x175   : > { %v12778_v46 = vpop.eup %12777  ;;  %v915_v49 = vsub.f32 %v787_v37, %v883_v33  ;;  %v788_v51 = vmul.f32 0.00390625, %v712_v45  ;;  %1906 = vmatprep.subr.bf16.mxu0 %v13168_v63  ;;  %v13177_v45 = vld [vmem:[#allocation5 + $0xf8] ss:$24 sps:$4 sm:$0xff]  }
 0x176   : > { %v522_v52 = vpop.xlane.xlu0 %521  ;;  %v1014_v55 = vmul.f32 %v12778_v46, %v822_v44  ;;  %v1013_v56 = vmul.f32 %v12778_v46, %v821_v42 }
 0x177   : > { %v947_v58 = vadd.f32 1e-05, %v915_v49  ;;  %v916_v32 = vsub.f32 %v788_v51, %v884_v50  ;;  %v14026_v59 = vmul.f32 0.00390625, %v522_v52  ;;  %v13179_v49 = vld [vmem:[%s13876_s19 + $0x88] sm:$0xff]  ;;  %v13180_v51 = vld [vmem:[%s13876_s19 + $0x90] sm:$0xff] }
 0x178   : > { %v525_v28 = vpop.xlane.xlu1 %524  ;;  %v14028_v1 = vpack.c.bf16 %v1014_v55, %v1012_v54  ;;  %v14030_v3 = vpack.c.bf16 %v1013_v56, %v1011_v62  ;;  %1907 = vmatpush1.bf16.msra.mxu0 %v13169_v6  ;;  %v828_v50 = vsub.f32 %v13179_v49, %v14004_v23  ;;  %v829_v52 = vsub.f32 %v13180_v51, %v14010_v31  ;;  %v13181_v54 = vld [vmem:[%s13876_s19 + $0x98] sm:$0xff] }
 0x179   : > { %12783 = vrsqrt.f32 %v947_v58  ;;  %v948_v2 = vadd.f32 1e-05, %v916_v32  ;;  %v14032_v4 = vmul.f32 0.00390625, %v525_v28  ;;  %v885_v29 = vmul.f32 %v14026_v59, %v14026_v59  ;;  %1908 = vmatprep.subr.bf16.mxu0 %v13170_v9  ;;  %v13182_v58 = vld [vmem:[%s13876_s19 + $0x80] sm:$0xff] }
 0x17a   : > { %1759 = vmatprep.mubr.bf16.mxu0 %v14028_v1  ;;  %v715_v5 = vpop.xlane.xlu0 %714  ;;  %v830_v55 = vsub.f32 %v13181_v54, %v14010_v31  ;;  %v827_v32 = vsub.f32 %v13182_v58, %v14004_v23 }
 0x17b   : > { %v12780_v7 = vpop.eup %12779  ;;  %12785 = vrsqrt.f32 %v948_v2  ;;  %v789_v8 = vmul.f32 0.00390625, %v715_v5  ;;  %1760 = vmatmul.mubr.bf16.gmra.mrb[8].mxu0 %v14030_v3  ;;  %v886_v22 = vmul.f32 %v14032_v4, %v14032_v4 }
 0x17c   : > { %v718_v18 = vpop.xlane.xlu1 %717  ;;  %v1016_v13 = vmul.f32 %v12780_v7, %v824_v11  ;;  %1909 = vmatpush1.bf16.msra.mxu0 %v13175_v34  ;;  %v1015_v37 = vmul.f32 %v12780_v7, %v823_v21  ;;  %v13183_v7 = vld [vmem:[#allocation5 + $0x128] ss:$24 sps:$4 sm:$0xff]   ;;  %v13184_v11 = vld [vmem:[#allocation5 + $0x15c] ss:$24 sps:$4 sm:$0xff]  }
 0x17d   : > { %v12782_v19 = vpop.eup %12781  ;;  %v917_v16 = vsub.f32 %v789_v8, %v885_v29  ;;  %v790_v24 = vmul.f32 0.00390625, %v718_v18  ;;  %1910 = vmatprep.subr.bf16.mxu0 %v13176_v38 }
 0x17e   : > { %v528_v25 = vpop.xlane.xlu0 %527  ;;  %v1018_v27 = vmul.f32 %v12782_v19, %v826_v17  ;;  %v1017_v33 = vmul.f32 %v12782_v19, %v825_v14 }
 0x17f   : > { %v949_v35 = vadd.f32 1e-05, %v917_v16  ;;  %v918_v60 = vsub.f32 %v790_v24, %v886_v22  ;;  %v14048_v36 = vmul.f32 0.00390625, %v528_v25  ;;  %v13186_v22 = vld [vmem:[#allocation5 + $0x18c] ss:$24 sps:$4 sm:$0xff]  }
 0x180   : > { %v531_v53 = vpop.xlane.xlu1 %530  ;;  %v14050_v39 = vpack.c.bf16 %v1018_v27, %v1016_v13  ;;  %v14052_v41 = vpack.c.bf16 %v1017_v33, %v1015_v37  ;;  %1911 = vmatpush1.bf16.msra.mxu0 %v13177_v45  ;;  %v13187_v24 = vld [vmem:[%s13876_s19 + $0xa8] sm:$0xff]  ;;  %v13188_v13 = vld [vmem:[%s13876_s19 + $0xb0] sm:$0xff]  ;;  %v13189_v33 = vld [vmem:[%s13876_s19 + $0xb8] sm:$0xff] }
 0x181   : > { %12787 = vrsqrt.f32 %v949_v35  ;;  %v950_v40 = vadd.f32 1e-05, %v918_v60  ;;  %v14054_v42 = vmul.f32 0.00390625, %v531_v53  ;;  %v887_v43 = vmul.f32 %v14048_v36, %v14048_v36  ;;  %1912 = vmatprep.subr.bf16.mxu0 %v13178_v48  ;;  %v13190_v37 = vld [vmem:[%s13876_s19 + $0xa0] sm:$0xff] }
 0x182   : > { %1769 = vmatprep.mubr.bf16.mxu0 %v14050_v39  ;;  %v721_v44 = vpop.xlane.xlu0 %720  ;;  %v832_v25 = vsub.f32 %v13187_v24, %v14026_v59  ;;  %v833_v27 = vsub.f32 %v13188_v13, %v14032_v4  ;;  %v834_v34 = vsub.f32 %v13189_v33, %v14032_v4  ;;  %v831_v38 = vsub.f32 %v13190_v37, %v14026_v59  ;;  %v13191_v48 = vld [vmem:[#allocation5 + $0x188] ss:$24 sps:$4 sm:$0xff]  }
 0x183   : > { %v12784_v46 = vpop.eup %12783  ;;  %12789 = vrsqrt.f32 %v950_v40  ;;  %v791_v47 = vmul.f32 0.00390625, %v721_v44  ;;  %1770 = vmatmul.mubr.bf16.gmra.mrb[12].mxu0 %v14052_v41  ;;  %v888_v63 = vmul.f32 %v14054_v42, %v14054_v42 }
 0x184   : > { %v724_v56 = vpop.xlane.xlu1 %723  ;;  %v1020_v29 = vmul.f32 %v12784_v46, %v828_v50  ;;  %1913 = vmatpush1.bf16.msra.mxu0 %v13183_v7  ;;  %v1019_v10 = vmul.f32 %v12784_v46, %v827_v32 }
 0x185   : > { %v12786_v57 = vpop.eup %12785  ;;  %v919_v62 = vsub.f32 %v791_v47, %v887_v43  ;;  %v792_v28 = vmul.f32 0.00390625, %v724_v56  ;;  %1914 = vmatprep.subr.bf16.mxu0 %v13184_v11 }
 0x186   : > { %v534_v2 = vpop.xlane.xlu0 %533  ;;  %v1022_v5 = vmul.f32 %v12786_v57, %v830_v55  ;;  %v1021_v6 = vmul.f32 %v12786_v57, %v829_v52  ;;  %v13192_v52 = vld [vmem:[#allocation5 + $0x1bc] ss:$24 sps:$4 sm:$0xff]  }
 0x187   : > { %v951_v8 = vadd.f32 1e-05, %v919_v62  ;;  %v920_v31 = vsub.f32 %v792_v28, %v888_v63  ;;  %v14070_v9 = vmul.f32 0.00390625, %v534_v2  ;;  %v13193_v62 = vld [vmem:[#allocation5 + $0x1b8] ss:$24 sps:$4 sm:$0xff]  }
 0x188   : > { %v537_v23 = vpop.xlane.xlu1 %536  ;;  %v14072_v12 = vpack.c.bf16 %v1022_v5, %v1020_v29  ;;  %v14074_v15 = vpack.c.bf16 %v1021_v6, %v1019_v10  ;;  %1915 = vmatpush1.bf16.msra.mxu0 %v13185_v20  ;;  %v13194_v2 = vld [vmem:[#allocation5 + $0x1ec] ss:$24 sps:$4 sm:$0xff]   ;;  %v13196_v6 = vld [vmem:[%s13876_s19 + $0xd0] sm:$0xff] }
 0x189   : > { %12791 = vrsqrt.f32 %v951_v8  ;;  %v952_v14 = vadd.f32 1e-05, %v920_v31  ;;  %v14076_v17 = vmul.f32 0.00390625, %v537_v23  ;;  %v889_v18 = vmul.f32 %v14070_v9, %v14070_v9  ;;  %1916 = vmatprep.subr.bf16.mxu0 %v13186_v22  ;;  %v13195_v29 = vld [vmem:[%s13876_s19 + $0xc8] sm:$0xff]  ;;  %v13197_v8 = vld [vmem:[%s13876_s19 + $0xd8] sm:$0xff]  ;;  %v13198_v23 = vld [vmem:[%s13876_s19 + $0xc0] sm:$0xff] }
 0x18a   : > { %1779 = vmatprep.mubr.bf16.mxu0 %v14072_v12  ;;  %v727_v19 = vpop.xlane.xlu0 %726  ;;  %v836_v5 = vsub.f32 %v13195_v29, %v14048_v36  ;;  %v837_v7 = vsub.f32 %v13196_v6, %v14054_v42  ;;  %v838_v31 = vsub.f32 %v13197_v8, %v14054_v42 }
 0x18b   : > { %v12788_v21 = vpop.eup %12787  ;;  %12793 = vrsqrt.f32 %v952_v14  ;;  %v793_v16 = vmul.f32 0.00390625, %v727_v19  ;;  %1780 = vmatmul.mubr.bf16.gmra.mrb[16].mxu0 %v14074_v15  ;;  %v890_v40 = vmul.f32 %v14076_v17, %v14076_v17  ;;  %v835_v14 = vsub.f32 %v13198_v23, %v14048_v36 }
 0x18c   : > { %v730_v35 = vpop.xlane.xlu1 %729  ;;  %v1024_v45 = vmul.f32 %v12788_v21, %v832_v25  ;;  %1917 = vmatpush1.bf16.msra.mxu0 %v13191_v48  ;;  %v1023_v51 = vmul.f32 %v12788_v21, %v831_v38  ;;  %v13199_v25 = vld [vmem:[#allocation5 + $0x1e8] ss:$24 sps:$4 sm:$0xff]  }
 0x18d   : > { %v12790_v60 = vpop.eup %12789  ;;  %v921_v53 = vsub.f32 %v793_v16, %v889_v18  ;;  %v794_v43 = vmul.f32 0.00390625, %v730_v35  ;;  %1918 = vmatprep.subr.bf16.mxu0 %v13192_v52 }
 0x18e   : > { %v540_v44 = vpop.xlane.xlu0 %539  ;;  %v1026_v46 = vmul.f32 %v12790_v60, %v834_v34  ;;  %v1025_v47 = vmul.f32 %v12790_v60, %v833_v27  ;;  %v13200_v34 = vld [vmem:[#allocation5 + $0x21c] ss:$24 sps:$4 sm:$0xff]  }
 0x18f   : > { %v953_v49 = vadd.f32 1e-05, %v921_v53  ;;  %v922_v4 = vsub.f32 %v794_v43, %v890_v40  ;;  %v14092_v50 = vmul.f32 0.00390625, %v540_v44  ;;  %v13201_v43 = vld [vmem:[#allocation5 + $0x218] ss:$24 sps:$4 sm:$0xff]  }
 0x190   : > { %v543_v59 = vpop.xlane.xlu1 %542  ;;  %v14094_v54 = vpack.c.bf16 %v1026_v46, %v1024_v45  ;;  %v14096_v56 = vpack.c.bf16 %v1025_v47, %v1023_v51  ;;  %1919 = vmatpush1.bf16.msra.mxu0 %v13193_v62  ;;  %v13202_v46 = vld [vmem:[#allocation5 + $0x24c] ss:$24 sps:$4 sm:$0xff]   ;;  %v13205_v51 = vld [vmem:[%s13876_s19 + $0xf8] sm:$0xff] }
 0x191   : > { %12795 = vrsqrt.f32 %v953_v49  ;;  %v954_v55 = vadd.f32 1e-05, %v922_v4  ;;  %v14098_v57 = vmul.f32 0.00390625, %v543_v59  ;;  %v891_v58 = vmul.f32 %v14092_v50, %v14092_v50  ;;  %1920 = vmatprep.subr.bf16.mxu0 %v13194_v2  ;;  %v13203_v47 = vld [vmem:[%s13876_s19 + $0xe8] sm:$0xff]  ;;  %v13204_v49 = vld [vmem:[%s13876_s19 + $0xf0] sm:$0xff] }
 0x192   : > { %1789 = vmatprep.mubr.bf16.mxu0 %v14094_v54  ;;  %v733_v32 = vpop.xlane.xlu0 %732  ;;  %v840_v48 = vsub.f32 %v13203_v47, %v14070_v9  ;;  %v841_v4 = vsub.f32 %v13204_v49, %v14076_v17  ;;  %v842_v52 = vsub.f32 %v13205_v51, %v14076_v17 }
 0x193   : > { %v12792_v63 = vpop.eup %12791  ;;  %12797 = vrsqrt.f32 %v954_v55  ;;  %v795_v28 = vmul.f32 0.00390625, %v733_v32  ;;  %1790 = vmatmul.mubr.bf16.gmra.mrb[20].mxu0 %v14096_v56  ;;  %v892_v19 = vmul.f32 %v14098_v57, %v14098_v57 }
 0x194   : > { %v736_v10 = vpop.xlane.xlu1 %735  ;;  %v1028_v16 = vmul.f32 %v12792_v63, %v836_v5  ;;  %1921 = vmatpush1.bf16.msra.mxu0 %v13199_v25  ;;  %v1027_v33 = vmul.f32 %v12792_v63, %v835_v14  ;;  %v13210_v25 = vld [vmem:[#allocation5 + $0x2ac] ss:$24 sps:$4 sm:$0xff]  }
 0x195   : > { %v12794_v11 = vpop.eup %12793  ;;  %v923_v18 = vsub.f32 %v795_v28, %v891_v58  ;;  %v796_v20 = vmul.f32 0.00390625, %v736_v10  ;;  %1922 = vmatprep.subr.bf16.mxu0 %v13200_v34  ;;  %v13206_v58 = vld [vmem:[%s13876_s19 + $0xe0] sm:$0xff] }
 0x196   : > { %v546_v21 = vpop.xlane.xlu0 %545  ;;  %v1030_v22 = vmul.f32 %v12794_v11, %v838_v31  ;;  %v1029_v24 = vmul.f32 %v12794_v11, %v837_v7  ;;  %v839_v32 = vsub.f32 %v13206_v58, %v14070_v9  ;;  %v13207_v7 = vld [vmem:[#allocation5 + $0x248] ss:$24 sps:$4 sm:$0xff]   ;;  %v13208_v11 = vld [vmem:[#allocation5 + $0x27c] ss:$24 sps:$4 sm:$0xff]  }
 0x197   : > { %v955_v13 = vadd.f32 1e-05, %v923_v18  ;;  %v924_v42 = vsub.f32 %v796_v20, %v892_v19  ;;  %v14114_v27 = vmul.f32 0.00390625, %v546_v21 }
 0x198   : > { %v549_v36 = vpop.xlane.xlu1 %548  ;;  %v14116_v35 = vpack.c.bf16 %v1030_v22, %v1028_v16  ;;  %v14118_v37 = vpack.c.bf16 %v1029_v24, %v1027_v33  ;;  %1923 = vmatpush1.bf16.msra.mxu0 %v13201_v43  ;;  %v13209_v16 = vld [vmem:[#allocation5 + $0x278] ss:$24 sps:$4 sm:$0xff]   ;;  %v13212_v33 = vld [vmem:[%s13876_s19 + $0x108] sm:$0xff] }
 0x199   : > { %12799 = vrsqrt.f32 %v955_v13  ;;  %v956_v60 = vadd.f32 1e-05, %v924_v42  ;;  %v14120_v38 = vmul.f32 0.00390625, %v549_v36  ;;  %v893_v53 = vmul.f32 %v14114_v27, %v14114_v27  ;;  %1924 = vmatprep.subr.bf16.mxu0 %v13202_v46  ;;  %v13211_v13 = vld [vmem:[%s13876_s19 + $0x100] sm:$0xff]  ;;  %v13213_v36 = vld [vmem:[%s13876_s19 + $0x110] sm:$0xff] }
 0x19a   : > { %1799 = vmatprep.mubr.bf16.mxu0 %v14116_v35  ;;  %v739_v40 = vpop.xlane.xlu0 %738  ;;  %v843_v42 = vsub.f32 %v13211_v13, %v14092_v50  ;;  %v844_v34 = vsub.f32 %v13212_v33, %v14092_v50 }
 0x19b   : > { %v12796_v44 = vpop.eup %12795  ;;  %12801 = vrsqrt.f32 %v956_v60  ;;  %v797_v45 = vmul.f32 0.00390625, %v739_v40  ;;  %1800 = vmatmul.mubr.bf16.gmra.mrb[24].mxu0 %v14118_v37  ;;  %v894_v63 = vmul.f32 %v14120_v38, %v14120_v38  ;;  %v845_v60 = vsub.f32 %v13213_v36, %v14098_v57 }
 0x19c   : > { %v742_v59 = vpop.xlane.xlu1 %741  ;;  %v1032_v29 = vmul.f32 %v12796_v44, %v840_v48  ;;  %1925 = vmatpush1.bf16.msra.mxu0 %v13207_v7  ;;  %v1031_v10 = vmul.f32 %v12796_v44, %v839_v32 }
 0x19d   : > { %v12798_v55 = vpop.eup %12797  ;;  %v925_v62 = vsub.f32 %v797_v45, %v893_v53  ;;  %v798_v28 = vmul.f32 0.00390625, %v742_v59  ;;  %1926 = vmatprep.subr.bf16.mxu0 %v13208_v11  ;;  %v13214_v53 = vld [vmem:[%s13876_s19 + $0x118] sm:$0xff] }
 0x19e   : > { %v552_v2 = vpop.xlane.xlu0 %551  ;;  %v1034_v5 = vmul.f32 %v12798_v55, %v842_v52  ;;  %v1033_v6 = vmul.f32 %v12798_v55, %v841_v4  ;;  %v846_v40 = vsub.f32 %v13214_v53, %v14098_v57  ;;  %v13215_v52 = vld [vmem:[#allocation5 + $0x2a8] ss:$24 sps:$4 sm:$0xff]   ;;  %v13216_v57 = vld [vmem:[#allocation5 + $0x2dc] ss:$24 sps:$4 sm:$0xff]  }
 0x19f   : > { %v957_v8 = vadd.f32 1e-05, %v925_v62  ;;  %v926_v17 = vsub.f32 %v798_v28, %v894_v63  ;;  %v14136_v31 = vmul.f32 0.00390625, %v552_v2  ;;  %v12289_v28 = vld [vmem:[#allocation5 + $0x14] ss:$24 sps:$4 sm:$0xff]  }
 0x1a0   : > { %v555_v9 = vpop.xlane.xlu1 %554  ;;  %v14138_v23 = vpack.c.bf16 %v1034_v5, %v1032_v29  ;;  %v14140_v18 = vpack.c.bf16 %v1033_v6, %v1031_v10  ;;  %1927 = vmatpush1.bf16.msra.mxu0 %v13209_v16  ;;  %v13218_v10 = vld [vmem:[%s13876_s19 + $0x120] sm:$0xff]  ;;  %v13221_v16 = vld [vmem:[%s13876_s19 + $0x138] sm:$0xff] }
 0x1a1   : > { %12803 = vrsqrt.f32 %v957_v8  ;;  %v958_v14 = vadd.f32 1e-05, %v926_v17  ;;  %v14142_v19 = vmul.f32 0.00390625, %v555_v9  ;;  %v895_v20 = vmul.f32 %v14136_v31, %v14136_v31  ;;  %1928 = vmatprep.subr.bf16.mxu0 %v13210_v25  ;;  %v13217_v17 = vld [vmem:[#allocation5 + $0x2d8] ss:$24 sps:$4 sm:$0xff]   ;;  %v13219_v9 = vld [vmem:[%s13876_s19 + $0x128] sm:$0xff] }
 0x1a2   : > { %1809 = vmatprep.mubr.bf16.mxu0 %v14138_v23  ;;  %v745_v21 = vpop.xlane.xlu0 %744  ;;  %v847_v11 = vsub.f32 %v13218_v10, %v14114_v27 }
 0x1a3   : > { %v12800_v22 = vpop.eup %12799  ;;  %12805 = vrsqrt.f32 %v958_v14  ;;  %v799_v24 = vmul.f32 0.00390625, %v745_v21  ;;  %1810 = vmatmul.mubr.bf16.gmra.mrb[28].mxu0 %v14140_v18  ;;  %v896_v46 = vmul.f32 %v14142_v19, %v14142_v19  ;;  %v848_v14 = vsub.f32 %v13219_v9, %v14114_v27 }
 0x1a4   : > { %v748_v43 = vpop.xlane.xlu1 %747  ;;  %v1036_v49 = vmul.f32 %v12800_v22, %v844_v34  ;;  %v1035_v51 = vmul.f32 %v12800_v22, %v843_v42  ;;  %1929 = vmatpush1.bf16.msra.mxu0 %v13215_v52  ;;  %v850_v22 = vsub.f32 %v13221_v16, %v14120_v38  ;;  %v13222_v52 = vld [vmem:[%s13876_s19 + $0x140] sm:$0xff] }
 0x1a5   : > { %v12802_v44 = vpop.eup %12801  ;;  %v927_v45 = vsub.f32 %v799_v24, %v895_v20  ;;  %v800_v47 = vmul.f32 0.00390625, %v748_v43  ;;  %1930 = vmatprep.subr.bf16.mxu0 %v13216_v57  ;;  %v13220_v20 = vld [vmem:[%s13876_s19 + $0x130] sm:$0xff] }
 0x1a6   : > { %v558_v48 = vpop.xlane.xlu0 %557  ;;  %v1038_v4 = vmul.f32 %v12802_v44, %v846_v40  ;;  %v1037_v50 = vmul.f32 %v12802_v44, %v845_v60  ;;  %v849_v21 = vsub.f32 %v13220_v20, %v14120_v38 }
 0x1a7   : > { %v959_v59 = vadd.f32 1e-05, %v927_v45  ;;  %v928_v55 = vsub.f32 %v800_v47, %v896_v46  ;;  %v14158_v58 = vmul.f32 0.00390625, %v558_v48 }
 0x1a8   : > { %v561_v32 = vpop.xlane.xlu1 %560  ;;  %v14160_v62 = vpack.c.bf16 %v1038_v4, %v1036_v49  ;;  %v14162_v63 = vpack.c.bf16 %v1037_v50, %v1035_v51  ;;  %1931 = vmatpush1.bf16.msra.mxu0 %v13217_v17 }
 0x1a9   : > { %12807 = vrsqrt.f32 %v959_v59  ;;  %v960_v2 = vadd.f32 1e-05, %v928_v55  ;;  %v14164_v29 = vmul.f32 0.00390625, %v561_v32  ;;  %v897_v5 = vmul.f32 %v14158_v58, %v14158_v58  ;;  %2093 = vmatprep.subr.bf16.mxu0 %v12289_v28  ;;  %v13223_v55 = vld [vmem:[%s13876_s19 + $0x148] sm:$0xff]  ;;  %v13224_v32 = vld [vmem:[%s13876_s19 + $0x150] sm:$0xff] }
 0x1aa   : > { %1819 = vmatprep.mubr.bf16.mxu0 %v14160_v62  ;;  %2012 = vmatprep.mubr.bf16.mxu1 %v14160_v62  ;;  %v751_v6 = vpop.xlane.xlu0 %750  ;;  %v851_v59 = vsub.f32 %v13222_v52, %v14136_v31  ;;  %v852_v57 = vsub.f32 %v13223_v55, %v14136_v31  ;;  %v853_v28 = vsub.f32 %v13224_v32, %v14142_v19 }
 0x1ab   : > { %v12804_v7 = vpop.eup %12803  ;;  %12809 = vrsqrt.f32 %v960_v2  ;;  %v801_v8 = vmul.f32 0.00390625, %v751_v6  ;;  %2013 = vmatmul.mubr.bf16.vlgmr.msra.gmra.mrb[0].mxu1 %v14162_v63  ;;  %1820 = vmatmul.mubr.bf16.gmra.mrb[32].mxu0 %v14162_v63  ;;  %v898_v42 = vmul.f32 %v14164_v29, %v14164_v29  ;;  %v13225_v2 = vld [vmem:[%s13876_s19 + $0x158] sm:$0xff] }
 0x1ac   : > { %v754_v24 = vpop.xlane.xlu1 %753  ;;  %v1040_v36 = vmul.f32 %v12804_v7, %v848_v14  ;;  %v1039_v27 = vmul.f32 %v12804_v7, %v847_v11 }
 0x1ad   : > { %v12806_v25 = vpop.eup %12805  ;;  %v929_v13 = vsub.f32 %v801_v8, %v897_v5  ;;  %v802_v33 = vmul.f32 0.00390625, %v754_v24  ;;  %v854_v5 = vsub.f32 %v13225_v2, %v14142_v19 }
 0x1ae   : > { %v564_v34 = vpop.xlane.xlu0 %563  ;;  %v1042_v60 = vmul.f32 %v12806_v25, %v850_v22  ;;  %v1041_v53 = vmul.f32 %v12806_v25, %v849_v21 }
 0x1af   : > { %v961_v40 = vadd.f32 1e-05, %v929_v13  ;;  %v930_v43 = vsub.f32 %v802_v33, %v898_v42  ;;  %v14182_v44 = vmul.f32 0.00390625, %v564_v34 }
 0x1b0   : > { %v567_v38 = vpop.xlane.xlu1 %566  ;;  %v14184_v45 = vpack.c.bf16 %v1042_v60, %v1040_v36  ;;  %v14186_v46 = vpack.c.bf16 %v1041_v53, %v1039_v27  ;;  %v13226_v27 = vld [vmem:[%s13876_s19 + $0x160] sm:$0xff] }
 0x1b1   : > { %12811 = vrsqrt.f32 %v961_v40  ;;  %v962_v47 = vadd.f32 1e-05, %v930_v43  ;;  %v14188_v48 = vmul.f32 0.00390625, %v567_v38  ;;  %v899_v49 = vmul.f32 %v14182_v44, %v14182_v44  ;;  %v13227_v40 = vld [vmem:[%s13876_s19 + $0x168] sm:$0xff]  ;;  %v13228_v38 = vld [vmem:[%s13876_s19 + $0x170] sm:$0xff] }
 0x1b2   : > { %1829 = vmatprep.mubr.bf16.mxu0 %v14184_v45  ;;  %2022 = vmatprep.mubr.bf16.mxu1 %v14184_v45  ;;  %v757_v4 = vpop.xlane.xlu0 %756  ;;  %v855_v53 = vsub.f32 %v13226_v27, %v14158_v58  ;;  %v856_v43 = vsub.f32 %v13227_v40, %v14158_v58 }
 0x1b3   : > { %v12808_v51 = vpop.eup %12807  ;;  %12813 = vrsqrt.f32 %v962_v47  ;;  %v803_v50 = vmul.f32 0.00390625, %v757_v4  ;;  %2023 = vmatmul.mubr.bf16.gmra.mrb[4].mxu1 %v14186_v46  ;;  %1830 = vmatmul.mubr.bf16.gmra.mrb[36].mxu0 %v14186_v46  ;;  %v900_v17 = vmul.f32 %v14188_v48, %v14188_v48  ;;  %v857_v47 = vsub.f32 %v13228_v38, %v14164_v29 }
 0x1b4   : > { %v760_v6 = vpop.xlane.xlu1 %759  ;;  %v1044_v9 = vmul.f32 %v12808_v51, %v852_v57  ;;  %v1043_v20 = vmul.f32 %v12808_v51, %v851_v59 }
 0x1b5   : > { %v12810_v7 = vpop.eup %12809  ;;  %v931_v8 = vsub.f32 %v803_v50, %v899_v49  ;;  %v804_v10 = vmul.f32 0.00390625, %v760_v6  ;;  %v13229_v49 = vld [vmem:[%s13876_s19 + $0x178] sm:$0xff] }
 0x1b6   : > { %v570_v11 = vpop.xlane.xlu0 %569  ;;  %v1046_v14 = vmul.f32 %v12810_v7, %v854_v5  ;;  %v1045_v31 = vmul.f32 %v12810_v7, %v853_v28  ;;  %v858_v4 = vsub.f32 %v13229_v49, %v14164_v29 }
 0x1b7   : > { %v963_v21 = vadd.f32 1e-05, %v931_v8  ;;  %v932_v16 = vsub.f32 %v804_v10, %v900_v17  ;;  %v14206_v22 = vmul.f32 0.00390625, %v570_v11 }
 0x1b8   : > { %v573_v19 = vpop.xlane.xlu1 %572  ;;  %v14208_v24 = vpack.c.bf16 %v1046_v14, %v1044_v9  ;;  %v14210_v25 = vpack.c.bf16 %v1045_v31, %v1043_v20 }
 0x1b9   : > { %12815 = vrsqrt.f32 %v963_v21  ;;  %v964_v13 = vadd.f32 1e-05, %v932_v16  ;;  %v14212_v42 = vmul.f32 0.00390625, %v573_v19  ;;  %v901_v33 = vmul.f32 %v14206_v22, %v14206_v22  ;;  %v13230_v21 = vld [vmem:[%s13876_s19 + $0x180] sm:$0xff]  ;;  %v13231_v19 = vld [vmem:[%s13876_s19 + $0x188] sm:$0xff] }
 0x1ba   : > { %1839 = vmatprep.mubr.bf16.mxu0 %v14208_v24  ;;  %2032 = vmatprep.mubr.bf16.mxu1 %v14208_v24  ;;  %v763_v34 = vpop.xlane.xlu0 %762  ;;  %v859_v16 = vsub.f32 %v13230_v21, %v14182_v44  ;;  %v13237_v21 = vld [vmem:[%s13876_s19 + $0x1b8] sm:$0xff] }
 0x1bb   : > { %v12812_v36 = vpop.eup %12811  ;;  %12817 = vrsqrt.f32 %v964_v13  ;;  %v805_v60 = vmul.f32 0.00390625, %v763_v34  ;;  %2033 = vmatmul.mubr.bf16.gmra.mrb[8].mxu1 %v14210_v25  ;;  %1840 = vmatmul.mubr.bf16.gmra.mrb[40].mxu0 %v14210_v25  ;;  %v902_v59 = vmul.f32 %v14212_v42, %v14212_v42  ;;  %v860_v13 = vsub.f32 %v13231_v19, %v14182_v44 }
 0x1bc   : > { %v766_v51 = vpop.xlane.xlu1 %765  ;;  %v1048_v32 = vmul.f32 %v12812_v36, %v856_v43  ;;  %v1047_v2 = vmul.f32 %v12812_v36, %v855_v53  ;;  %v13233_v36 = vld [vmem:[%s13876_s19 + $0x198] sm:$0xff] }
 0x1bd   : > { %v12814_v50 = vpop.eup %12813  ;;  %v933_v52 = vsub.f32 %v805_v60, %v901_v33  ;;  %v806_v55 = vmul.f32 0.00390625, %v766_v51  ;;  %v13232_v33 = vld [vmem:[%s13876_s19 + $0x190] sm:$0xff]  ;;  %v862_v60 = vsub.f32 %v13233_v36, %v14188_v48 }
 0x1be   : > { %v576_v57 = vpop.xlane.xlu0 %575  ;;  %v1050_v28 = vmul.f32 %v12814_v50, %v858_v4  ;;  %v1049_v58 = vmul.f32 %v12814_v50, %v857_v47  ;;  %v861_v34 = vsub.f32 %v13232_v33, %v14188_v48 }
 0x1bf   : > { %v965_v5 = vadd.f32 1e-05, %v933_v52  ;;  %v934_v6 = vsub.f32 %v806_v55, %v902_v59  ;;  %v14230_v7 = vmul.f32 0.00390625, %v576_v57 }
 0x1c0   : > { %v579_v29 = vpop.xlane.xlu1 %578  ;;  %v14232_v8 = vpack.c.bf16 %v1050_v28, %v1048_v32  ;;  %v14234_v17 = vpack.c.bf16 %v1049_v58, %v1047_v2 }
 0x1c1   : > { %12819 = vrsqrt.f32 %v965_v5  ;;  %v966_v10 = vadd.f32 1e-05, %v934_v6  ;;  %v14236_v11 = vmul.f32 0.00390625, %v579_v29  ;;  %v903_v9 = vmul.f32 %v14230_v7, %v14230_v7  ;;  %v13234_v29 = vld [vmem:[%s13876_s19 + $0x1a0] sm:$0xff] }
 0x1c2   : > { %1849 = vmatprep.mubr.bf16.mxu0 %v14232_v8  ;;  %2042 = vmatprep.mubr.bf16.mxu1 %v14232_v8  ;;  %v769_v14 = vpop.xlane.xlu0 %768 }
 0x1c3   : > { %v12816_v20 = vpop.eup %12815  ;;  %12821 = vrsqrt.f32 %v966_v10  ;;  %v807_v31 = vmul.f32 0.00390625, %v769_v14  ;;  %2043 = vmatmul.mubr.bf16.gmra.mrb[12].mxu1 %v14234_v17  ;;  %1850 = vmatmul.mubr.bf16.gmra.mrb[44].mxu0 %v14234_v17  ;;  %v904_v43 = vmul.f32 %v14236_v11, %v14236_v11  ;;  %v863_v10 = vsub.f32 %v13234_v29, %v14206_v22 }
 0x1c4   : > { %v772_v27 = vpop.xlane.xlu1 %771  ;;  %v1052_v49 = vmul.f32 %v12816_v20, %v860_v13  ;;  %v1051_v51 = vmul.f32 %v12816_v20, %v859_v16  ;;  %v13236_v20 = vld [vmem:[%s13876_s19 + $0x1b0] sm:$0xff]  ;;  %v866_v16 = vsub.f32 %v13237_v21, %v14212_v42 }
 0x1c5   : > { %v12818_v53 = vpop.eup %12817  ;;  %v935_v40 = vsub.f32 %v807_v31, %v903_v9  ;;  %v808_v38 = vmul.f32 0.00390625, %v772_v27  ;;  %v13235_v9 = vld [vmem:[%s13876_s19 + $0x1a8] sm:$0xff]  ;;  %v865_v31 = vsub.f32 %v13236_v20, %v14212_v42 }
 0x1c6   : > { %v582_v47 = vpop.xlane.xlu0 %581  ;;  %v1054_v4 = vmul.f32 %v12818_v53, %v862_v60  ;;  %v1053_v44 = vmul.f32 %v12818_v53, %v861_v34  ;;  %v864_v14 = vsub.f32 %v13235_v9, %v14206_v22 }
 0x1c7   : > { %v967_v50 = vadd.f32 1e-05, %v935_v40  ;;  %v936_v52 = vsub.f32 %v808_v38, %v904_v43  ;;  %v14254_v59 = vmul.f32 0.00390625, %v582_v47 }
 0x1c8   : > { %v585_v48 = vpop.xlane.xlu1 %584  ;;  %v14256_v55 = vpack.c.bf16 %v1054_v4, %v1052_v49  ;;  %v14258_v57 = vpack.c.bf16 %v1053_v44, %v1051_v51  ;;  %v13238_v4 = vld [vmem:[%s13876_s19 + $0x1c0] sm:$0xff]  ;;  %v13239_v44 = vld [vmem:[%s13876_s19 + $0x1c8] sm:$0xff] }
 0x1c9   : > { %12823 = vrsqrt.f32 %v967_v50  ;;  %v968_v32 = vadd.f32 1e-05, %v936_v52  ;;  %v14260_v28 = vmul.f32 0.00390625, %v585_v48  ;;  %v905_v2 = vmul.f32 %v14254_v59, %v14254_v59  ;;  %v13240_v52 = vld [vmem:[%s13876_s19 + $0x1d0] sm:$0xff] }
 0x1ca   : > { %1859 = vmatprep.mubr.bf16.mxu0 %v14256_v55  ;;  %2052 = vmatprep.mubr.bf16.mxu1 %v14256_v55  ;;  %v775_v58 = vpop.xlane.xlu0 %774  ;;  %v867_v51 = vsub.f32 %v13238_v4, %v14230_v7  ;;  %v868_v50 = vsub.f32 %v13239_v44, %v14230_v7  ;;  %v869_v48 = vsub.f32 %v13240_v52, %v14236_v11  ;;  %v12298_v4 = vld [vmem:[#allocation5 + $0xa4] ss:$24 sps:$4 sm:$0xff]   ;;  %v12301_v44 = vld [vmem:[#allocation5 + $0xd4] ss:$24 sps:$4 sm:$0xff]  }
 0x1cb   : > { %v12820_v5 = vpop.eup %12819  ;;  %12825 = vrsqrt.f32 %v968_v32  ;;  %v809_v6 = vmul.f32 0.00390625, %v775_v58  ;;  %2053 = vmatmul.mubr.bf16.gmra.mrb[16].mxu1 %v14258_v57  ;;  %1860 = vmatmul.mubr.bf16.gmra.mrb[48].mxu0 %v14258_v57  ;;  %v906_v34 = vmul.f32 %v14260_v28, %v14260_v28  ;;  %v13241_v32 = vld [vmem:[%s13876_s19 + $0x1d8] sm:$0xff] }
 0x1cc   : > { %v778_v19 = vpop.xlane.xlu1 %777  ;;  %v1056_v60 = vmul.f32 %v12820_v5, %v864_v14  ;;  %v1055_v22 = vmul.f32 %v12820_v5, %v863_v10  ;;  %v12304_v52 = vld [vmem:[#allocation5 + $0x104] ss:$24 sps:$4 sm:$0xff]  }
 0x1cd   : > { %v12822_v13 = vpop.eup %12821  ;;  %v937_v33 = vsub.f32 %v809_v6, %v905_v2  ;;  %v810_v36 = vmul.f32 0.00390625, %v778_v19  ;;  %v870_v2 = vsub.f32 %v13241_v32, %v14236_v11  ;;  %v13242_v11 = vld [vmem:[%s13876_s19 + $0x1e0] sm:$0xff]  ;;  %v12307_v32 = vld [vmem:[#allocation5 + $0x134] ss:$24 sps:$4 sm:$0xff]  }
 0x1ce   : > { %v1058_v27 = vmul.f32 %v12822_v13, %v866_v16  ;;  %v1057_v53 = vmul.f32 %v12822_v13, %v865_v31  ;;  %v871_v20 = vsub.f32 %v13242_v11, %v14254_v59  ;;  %v13243_v31 = vld [vmem:[%s13876_s19 + $0x1e8] sm:$0xff]  ;;  %v13244_v16 = vld [vmem:[%s13876_s19 + $0x1f0] sm:$0xff]  ;;  %v13245_v13 = vld [vmem:[%s13876_s19 + $0x1f8] sm:$0xff] }
 0x1cf   : > { %v969_v40 = vadd.f32 1e-05, %v937_v33  ;;  %v938_v43 = vsub.f32 %v810_v36, %v906_v34  ;;  %v872_v21 = vsub.f32 %v13243_v31, %v14254_v59  ;;  %v873_v19 = vsub.f32 %v13244_v16, %v14260_v28  ;;  %v12287_v59 = vld [vmem:[#allocation5 + $0x10] ss:$24 sps:$4 sm:$0xff]   ;;  %v12319_v11 = vld [vmem:[#allocation5 + $0x1f4] ss:$24 sps:$4 sm:$0xff]  }
 0x1d0   : > { %v14278_v42 = vpack.c.bf16 %v1058_v27, %v1056_v60  ;;  %v14280_v38 = vpack.c.bf16 %v1057_v53, %v1055_v22  ;;  %v874_v33 = vsub.f32 %v13245_v13, %v14260_v28  ;;  %v12292_v28 = vld [vmem:[#allocation5 + $0x44] ss:$24 sps:$4 sm:$0xff]   ;;  %v12325_v16 = vld [vmem:[#allocation5 + $0x254] ss:$24 sps:$4 sm:$0xff]  }
 0x1d1   : > { %12827 = vrsqrt.f32 %v969_v40  ;;  %v970_v47 = vadd.f32 1e-05, %v938_v43  ;;  %v12290_v43 = vld [vmem:[#allocation5 + $0x40] ss:$24 sps:$4 sm:$0xff]   ;;  %v12322_v31 = vld [vmem:[#allocation5 + $0x224] ss:$24 sps:$4 sm:$0xff]  }
 0x1d2   : > { %1869 = vmatprep.mubr.bf16.mxu0 %v14278_v42  ;;  %2062 = vmatprep.mubr.bf16.mxu1 %v14278_v42  ;;  %v12328_v13 = vld [vmem:[#allocation5 + $0x284] ss:$24 sps:$4 sm:$0xff]  }
 0x1d3   : > { %v12824_v49 = vpop.eup %12823  ;;  %12829 = vrsqrt.f32 %v970_v47  ;;  %2063 = vmatmul.mubr.bf16.gmra.mrb[20].mxu1 %v14280_v38  ;;  %1870 = vmatmul.mubr.bf16.gmra.mrb[52].mxu0 %v14280_v38  ;;  %v12295_v47 = vld [vmem:[#allocation5 + $0x74] ss:$24 sps:$4 sm:$0xff]  }
 0x1d4   : > { %v1060_v5 = vmul.f32 %v12824_v49, %v868_v50  ;;  %v1059_v29 = vmul.f32 %v12824_v49, %v867_v51  ;;  %v12293_v49 = vld [vmem:[#allocation5 + $0x70] ss:$24 sps:$4 sm:$0xff]   ;;  %v12296_v51 = vld [vmem:[#allocation5 + $0xa0] ss:$24 sps:$4 sm:$0xff]  }
 0x1d5   : > { %v12826_v58 = vpop.eup %12825  ;;  %v12299_v50 = vld [vmem:[#allocation5 + $0xd0] ss:$24 sps:$4 sm:$0xff]  }
 0x1d6   : > { %v1062_v6 = vmul.f32 %v12826_v58, %v870_v2  ;;  %v1061_v10 = vmul.f32 %v12826_v58, %v869_v48  ;;  %v12302_v48 = vld [vmem:[#allocation5 + $0x100] ss:$24 sps:$4 sm:$0xff]   ;;  %v12305_v2 = vld [vmem:[#allocation5 + $0x130] ss:$24 sps:$4 sm:$0xff]   ;;  %v12310_v58 = vld [vmem:[#allocation5 + $0x164] ss:$24 sps:$4 sm:$0xff]  }
 0x1d8   : > { %v14294_v9 = vpack.c.bf16 %v1062_v6, %v1060_v5  ;;  %v14296_v7 = vpack.c.bf16 %v1061_v10, %v1059_v29  ;;  %v12308_v5 = vld [vmem:[#allocation5 + $0x160] ss:$24 sps:$4 sm:$0xff]   ;;  %v12313_v6 = vld [vmem:[#allocation5 + $0x194] ss:$24 sps:$4 sm:$0xff]   ;;  %v12311_v29 = vld [vmem:[#allocation5 + $0x190] ss:$24 sps:$4 sm:$0xff]  }
 0x1d9   : > { %v12316_v10 = vld [vmem:[#allocation5 + $0x1c4] ss:$24 sps:$4 sm:$0xff]  }
 0x1da   : > { %1879 = vmatprep.mubr.bf16.mxu0 %v14294_v9  ;;  %2072 = vmatprep.mubr.bf16.mxu1 %v14294_v9 }
 0x1db   : > { %v12828_v14 = vpop.eup %12827  ;;  %2073 = vmatmul.mubr.bf16.gmra.mrb[24].mxu1 %v14296_v7  ;;  %1880 = vmatmul.mubr.bf16.gmra.mrb[56].mxu0 %v14296_v7 }
 0x1dc   : > { %v1064_v36 = vmul.f32 %v12828_v14, %v872_v21  ;;  %v1063_v27 = vmul.f32 %v12828_v14, %v871_v20  ;;  %v12314_v14 = vld [vmem:[#allocation5 + $0x1c0] ss:$24 sps:$4 sm:$0xff]   ;;  %v12317_v20 = vld [vmem:[#allocation5 + $0x1f0] ss:$24 sps:$4 sm:$0xff]  }
 0x1dd   : > { %v12830_v34 = vpop.eup %12829  ;;  %v12320_v21 = vld [vmem:[#allocation5 + $0x220] ss:$24 sps:$4 sm:$0xff]  }
 0x1de   : > { %v1066_v60 = vmul.f32 %v12830_v34, %v874_v33  ;;  %v1065_v22 = vmul.f32 %v12830_v34, %v873_v19  ;;  %v12323_v19 = vld [vmem:[#allocation5 + $0x250] ss:$24 sps:$4 sm:$0xff]   ;;  %v12326_v33 = vld [vmem:[#allocation5 + $0x280] ss:$24 sps:$4 sm:$0xff]   ;;  %v12331_v34 = vld [vmem:[#allocation5 + $0x2b4] ss:$24 sps:$4 sm:$0xff]  }
 0x1e0   : > { %v14310_v53 = vpack.c.bf16 %v1066_v60, %v1064_v36  ;;  %v14312_v40 = vpack.c.bf16 %v1065_v22, %v1063_v27  ;;  %v12329_v36 = vld [vmem:[#allocation5 + $0x2b0] ss:$24 sps:$4 sm:$0xff]   ;;  %v12334_v60 = vld [vmem:[#allocation5 + $0x2e4] ss:$24 sps:$4 sm:$0xff]   ;;  %v12332_v27 = vld [vmem:[#allocation5 + $0x2e0] ss:$24 sps:$4 sm:$0xff]   ;;  %v1197_v22 = vlaneseq }
 0x1e2   : > { %1889 = vmatprep.mubr.bf16.mxu0 %v14310_v53  ;;  %2082 = vmatprep.mubr.bf16.mxu1 %v14310_v53 }
 0x1e3   : > { %2083 = vmatmul.mubr.bf16.gmra.mrb[28].mxu1 %v14312_v40  ;;  %1890 = vmatmul.mubr.bf16.gmra.mrb[60].mxu0 %v14312_v40 }
 0x1e4   : > { %1932 = vmatprep.mubr.bf16.mxu0 %v13986_v61 }
 0x1eb   : > { %1933 = vmatmul.mubr.bf16.vlgmr.msra.gmra.mrb[64].mxu0 %v13990_v0 }
 0x1ec   : > { %1942 = vmatprep.mubr.bf16.mxu0 %v14006_v26  ;;  %2094 = vmatpush1.bf16.msra.mxu0 %v12287_v59  ;;  %v14339_v59 = vshrl.u32 %v1197_v22, 7 }
 0x1ed   : > { %2095 = vmatprep.subr.bf16.mxu0 %v12292_v28 }
 0x1ee   : > { %v14342_v28 = vsub.s32 0, %v14339_v59 }
 0x1f0   : > { %2096 = vmatpush1.bf16.msra.mxu0 %v12290_v43  ;;  %18203 = vst [vmem:[#allocation19_spill] sm:$0xff] %v14342_v28  ;;  %v14350_v43 = vsub.s32 1, %v14339_v59 }
 0x1f1   : > { %2097 = vmatprep.subr.bf16.mxu0 %v12295_v47 }
 0x1f2   : > { %18204 = vst [vmem:[#allocation20_spill] sm:$0xff] %v14350_v43 }
 0x1f3   : > { %1943 = vmatmul.mubr.bf16.gmra.mrb[68].mxu0 %v14008_v30 }
 0x1f4   : > { %1952 = vmatprep.mubr.bf16.mxu0 %v14028_v1  ;;  %2098 = vmatpush1.bf16.msra.mxu0 %v12293_v49 }
 0x1f5   : > { %2099 = vmatprep.subr.bf16.mxu0 %v12298_v4 }
 0x1f8   : > { %2100 = vmatpush1.bf16.msra.mxu0 %v12296_v51 }
 0x1f9   : > { %2101 = vmatprep.subr.bf16.mxu0 %v12301_v44 }
 0x1fb   : > { %1953 = vmatmul.mubr.bf16.gmra.mrb[72].mxu0 %v14030_v3 }
 0x1fc   : > { %1962 = vmatprep.mubr.bf16.mxu0 %v14050_v39  ;;  %2102 = vmatpush1.bf16.msra.mxu0 %v12299_v50 }
 0x1fd   : > { %2103 = vmatprep.subr.bf16.mxu0 %v12304_v52  ;;  %v17959_v52 = vmov 0.0  }
 0x1fe   : > { %11412 = vmatprep.subr.bf16.mxu1 %v17959_v52  ;;  %11414 = vmatprep.mubr.msk.bf16.mxu1 %vm13573_vm0, %v17959_v52 }
 0x200   : > { %2104 = vmatpush1.bf16.msra.mxu0 %v12302_v48 }
 0x201   : > { %2105 = vmatprep.subr.bf16.mxu0 %v12307_v32 }
 0x203   : > { %1963 = vmatmul.mubr.bf16.gmra.mrb[76].mxu0 %v14052_v41 }
 0x204   : > { %1972 = vmatprep.mubr.bf16.mxu0 %v14072_v12  ;;  %2106 = vmatpush1.bf16.msra.mxu0 %v12305_v2 }
 0x205   : > { %2107 = vmatprep.subr.bf16.mxu0 %v12310_v58 }
 0x208   : > { %2108 = vmatpush1.bf16.msra.mxu0 %v12308_v5 }
 0x209   : > { %2109 = vmatprep.subr.bf16.mxu0 %v12313_v6 }
 0x20b   : > { %1973 = vmatmul.mubr.bf16.gmra.mrb[80].mxu0 %v14074_v15 }
 0x20c   : > { %1982 = vmatprep.mubr.bf16.mxu0 %v14094_v54  ;;  %2110 = vmatpush1.bf16.msra.mxu0 %v12311_v29 }
 0x20d   : > { %2111 = vmatprep.subr.bf16.mxu0 %v12316_v10 }
 0x210   : > { %2112 = vmatpush1.bf16.msra.mxu0 %v12314_v14 }
 0x211   : > { %2113 = vmatprep.subr.bf16.mxu0 %v12319_v11 }
 0x213   : > { %1983 = vmatmul.mubr.bf16.gmra.mrb[84].mxu0 %v14096_v56 }
 0x214   : > { %1992 = vmatprep.mubr.bf16.mxu0 %v14116_v35  ;;  %2114 = vmatpush1.bf16.msra.mxu0 %v12317_v20 }
 0x215   : > { %2115 = vmatprep.subr.bf16.mxu0 %v12322_v31 }
 0x218   : > { %2116 = vmatpush1.bf16.msra.mxu0 %v12320_v21 }
 0x219   : > { %2117 = vmatprep.subr.bf16.mxu0 %v12325_v16 }
 0x21b   : > { %1993 = vmatmul.mubr.bf16.gmra.mrb[88].mxu0 %v14118_v37 }
 0x21c   : > { %2002 = vmatprep.mubr.bf16.mxu0 %v14138_v23  ;;  %2118 = vmatpush1.bf16.msra.mxu0 %v12323_v19 }
 0x21d   : > { %2119 = vmatprep.subr.bf16.mxu0 %v12328_v13 }
 0x220   : > { %2120 = vmatpush1.bf16.msra.mxu0 %v12326_v33 }
 0x221   : > { %2121 = vmatprep.subr.bf16.mxu0 %v12331_v34 }
 0x223   : > { %2003 = vmatmul.mubr.bf16.gmra.mrb[92].mxu0 %v14140_v18 }
 0x224   : > { %2122 = vmatpush1.bf16.msra.mxu0 %v12329_v36  ;;  %2125 = vmatprep.mubr.bf16.mxu0 %v13986_v61  ;;  %v14347_v61 = vld [vmem:[%s17943_s2] sm:$0x3f] }
 0x225   : > { %2123 = vmatprep.subr.bf16.mxu0 %v12334_v60 }
 0x228   : > { %2124 = vmatpush1.bf16.msra.mxu0 %v12332_v27 }
 0x229   : > { %11508 = vmatprep.subr.bf16.mxu0 %v17959_v52 }
 0x22b   : > { %2126 = vmatmul.mubr.bf16.vlgmr.msra.gmra.mrb[96].mxu0 %v13990_v0  ;;  %v14356_v0 = vrot.slane %v14347_v61, %v14342_v28 }
 0x22c   : > { %2135 = vmatprep.mubr.bf16.mxu0 %v14006_v26 }
 0x233   : > { %2136 = vmatmul.mubr.bf16.gmra.mrb[100].mxu0 %v14008_v30  ;;  %v14360_v30 = vrot.slane %v14347_v61, %v14350_v43 }
 0x234   : > { %2145 = vmatprep.mubr.bf16.mxu0 %v14028_v1 }
 0x23b   : > { %2146 = vmatmul.mubr.bf16.gmra.mrb[104].mxu0 %v14030_v3 }
 0x23c   : > { %2155 = vmatprep.mubr.bf16.mxu0 %v14050_v39 }
 0x23e   : > { %v1741_v26 = vpop.f32.mrb[0].mxu0 }
 0x23f   : > { %v1743_v1 = vpop.f32.mrb[1].mxu0  ;;  %v14363_v49 = vadd.f32 %v1741_v26, %v14356_v0 }
 0x240   : > { %v1745_v47 = vpop.f32.mrb[2].mxu0  ;;  %v14369_v39 = vadd.f32 %v1743_v1, %v14360_v30 }
 0x241   : > { %v14366_v4 = vadd.f32 %v1745_v47, %v14356_v0  ;;  %v1747_v3 = vpop.f32.mrb[3].mxu0 }
 0x242   : > { %18205 = vst [vmem:[#allocation21_spill] sm:$0xff] %v14369_v39  ;;  %v14372_v51 = vadd.f32 %v1747_v3, %v14360_v30 }
 0x243   : > { %2156 = vmatmul.mubr.bf16.gmra.mrb[108].mxu0 %v14052_v41 }
 0x244   : > { %18206 = vst [vmem:[#allocation22_spill] sm:$0xff] %v14372_v51  ;;  %2165 = vmatprep.mubr.bf16.mxu0 %v14072_v12 }
 0x246   : > { %v1751_v48 = vpop.f32.mrb[4].mxu0 }
 0x247   : > { %v1753_v32 = vpop.f32.mrb[5].mxu0  ;;  %v14383_v58 = vadd.f32 %v1751_v48, %v14356_v0 }
 0x248   : > { %v1755_v2 = vpop.f32.mrb[6].mxu0  ;;  %v14389_v6 = vadd.f32 %v1753_v32, %v14360_v30 }
 0x249   : > { %v14386_v5 = vadd.f32 %v1755_v2, %v14356_v0  ;;  %v1757_v41 = vpop.f32.mrb[7].mxu0 }
 0x24a   : > { %18207 = vst [vmem:[#allocation23_spill] sm:$0xff] %v14389_v6  ;;  %v14392_v12 = vadd.f32 %v1757_v41, %v14360_v30 }
 0x24b   : > { %2166 = vmatmul.mubr.bf16.gmra.mrb[112].mxu0 %v14074_v15 }
 0x24c   : > { %18208 = vst [vmem:[#allocation24_spill] sm:$0xff] %v14392_v12  ;;  %2175 = vmatprep.mubr.bf16.mxu0 %v14094_v54  ;;  %v14496_v54 = vsub.s32 3, %v14339_v59 }
 0x24e   : > { %v1761_v14 = vpop.f32.mrb[8].mxu0  ;;  %18220 = vst [vmem:[#allocation36_spill] sm:$0xff] %v14496_v54 }
 0x24f   : > { %v1763_v11 = vpop.f32.mrb[9].mxu0  ;;  %v14403_v31 = vadd.f32 %v1761_v14, %v14356_v0 }
 0x250   : > { %v1765_v20 = vpop.f32.mrb[10].mxu0  ;;  %v14409_v15 = vadd.f32 %v1763_v11, %v14360_v30 }
 0x251   : > { %v14406_v21 = vadd.f32 %v1765_v20, %v14356_v0  ;;  %v1767_v16 = vpop.f32.mrb[11].mxu0 }
 0x252   : > { %18209 = vst [vmem:[#allocation25_spill] sm:$0xff] %v14409_v15  ;;  %v14412_v19 = vadd.f32 %v1767_v16, %v14360_v30 }
 0x253   : > { %2176 = vmatmul.mubr.bf16.gmra.mrb[116].mxu0 %v14096_v56 }
 0x254   : > { %18210 = vst [vmem:[#allocation26_spill] sm:$0xff] %v14412_v19  ;;  %2185 = vmatprep.mubr.bf16.mxu0 %v14116_v35  ;;  %v14493_v35 = vsub.s32 2, %v14339_v59 }
 0x256   : > { %v1771_v33 = vpop.f32.mrb[12].mxu0  ;;  %18219 = vst [vmem:[#allocation35_spill] sm:$0xff] %v14493_v35 }
 0x257   : > { %v1773_v34 = vpop.f32.mrb[13].mxu0  ;;  %v14421_v60 = vadd.f32 %v1771_v33, %v14356_v0 }
 0x258   : > { %v1775_v36 = vpop.f32.mrb[14].mxu0  ;;  %v14427_v26 = vadd.f32 %v1773_v34, %v14360_v30 }
 0x259   : > { %v14424_v27 = vadd.f32 %v1775_v36, %v14356_v0  ;;  %v1777_v22 = vpop.f32.mrb[15].mxu0 }
 0x25a   : > { %18211 = vst [vmem:[#allocation27_spill] sm:$0xff] %v14427_v26  ;;  %v14430_v56 = vadd.f32 %v1777_v22, %v14360_v30 }
 0x25b   : > { %2186 = vmatmul.mubr.bf16.gmra.mrb[120].mxu0 %v14118_v37 }
 0x25c   : > { %18212 = vst [vmem:[#allocation28_spill] sm:$0xff] %v14430_v56  ;;  %2195 = vmatprep.mubr.bf16.mxu0 %v14138_v23 }
 0x25e   : > { %v1781_v47 = vpop.f32.mrb[16].mxu0 }
 0x25f   : > { %v1783_v3 = vpop.f32.mrb[17].mxu0  ;;  %v14439_v32 = vadd.f32 %v1781_v47, %v14356_v0 }
 0x260   : > { %v1785_v48 = vpop.f32.mrb[18].mxu0  ;;  %v14445_v14 = vadd.f32 %v1783_v3, %v14360_v30 }
 0x261   : > { %v14442_v2 = vadd.f32 %v1785_v48, %v14356_v0  ;;  %v1787_v41 = vpop.f32.mrb[19].mxu0 }
 0x262   : > { %18213 = vst [vmem:[#allocation29_spill] sm:$0xff] %v14445_v14  ;;  %v14448_v37 = vadd.f32 %v1787_v41, %v14360_v30  ;;  %v18243_v14 = vmov 0.0  }
 0x263   : > { %2196 = vmatmul.mubr.bf16.gmra.mrb[124].mxu0 %v14140_v18 }
 0x264   : > { %18214 = vst [vmem:[#allocation30_spill] sm:$0xff] %v14448_v37  ;;  %2205 = vmatprep.mubr.bf16.mxu0 %v14160_v62  ;;  %v14515_v62 = vrot.slane %v14347_v61, %v14493_v35 }
 0x266   : > { %v1791_v20 = vpop.f32.mrb[20].mxu0 }
 0x267   : > { %v1793_v16 = vpop.f32.mrb[21].mxu0  ;;  %v14457_v34 = vadd.f32 %v1791_v20, %v14356_v0 }
 0x268   : > { %v1795_v33 = vpop.f32.mrb[22].mxu0  ;;  %v14463_v47 = vadd.f32 %v1793_v16, %v14360_v30 }
 0x269   : > { %v14460_v36 = vadd.f32 %v1795_v33, %v14356_v0  ;;  %v1797_v22 = vpop.f32.mrb[23].mxu0 }
 0x26a   : > { %18215 = vst [vmem:[#allocation31_spill] sm:$0xff] %v14463_v47  ;;  %v14466_v18 = vadd.f32 %v1797_v22, %v14360_v30 }
 0x26b   : > { %2206 = vmatmul.mubr.bf16.gmra.mrb[128].mxu0 %v14162_v63 }
 0x26c   : > { %18216 = vst [vmem:[#allocation32_spill] sm:$0xff] %v14466_v18  ;;  %2215 = vmatprep.mubr.bf16.mxu0 %v14184_v45 }
 0x26e   : > { %v1801_v48 = vpop.f32.mrb[24].mxu0 }
 0x26f   : > { %v1803_v41 = vpop.f32.mrb[25].mxu0  ;;  %v14475_v33 = vadd.f32 %v1801_v48, %v14356_v0 }
 0x270   : > { %v1805_v20 = vpop.f32.mrb[26].mxu0  ;;  %v14481_v23 = vadd.f32 %v1803_v41, %v14360_v30 }
 0x271   : > { %v14478_v16 = vadd.f32 %v1805_v20, %v14356_v0  ;;  %v1807_v22 = vpop.f32.mrb[27].mxu0 }
 0x272   : > { %18217 = vst [vmem:[#allocation33_spill] sm:$0xff] %v14481_v23  ;;  %v14484_v63 = vadd.f32 %v1807_v22, %v14360_v30 }
 0x273   : > { %2216 = vmatmul.mubr.bf16.gmra.mrb[132].mxu0 %v14186_v46 }
 0x274   : > { %18218 = vst [vmem:[#allocation34_spill] sm:$0xff] %v14484_v63  ;;  %2225 = vmatprep.mubr.bf16.mxu0 %v14208_v24 }
 0x276   : > { %v1811_v48 = vpop.f32.mrb[28].mxu0 }
 0x277   : > { %v1813_v20 = vpop.f32.mrb[29].mxu0  ;;  %v14499_v22 = vadd.f32 %v1811_v48, %v14356_v0 }
 0x278   : > { %v1815_v41 = vpop.f32.mrb[30].mxu0  ;;  %v14505_v45 = vadd.f32 %v1813_v20, %v14360_v30  ;;  %v14522_v20 = vrot.slane %v14347_v61, %v14496_v54 }
 0x279   : > { %v14502_v10 = vadd.f32 %v1815_v41, %v14356_v0  ;;  %v1817_v46 = vpop.f32.mrb[31].mxu0 }
 0x27a   : > { %18221 = vst [vmem:[#allocation37_spill] sm:$0xff] %v14505_v45  ;;  %v14508_v24 = vadd.f32 %v1817_v46, %v14360_v30 }
 0x27b   : > { %2226 = vmatmul.mubr.bf16.gmra.mrb[136].mxu0 %v14210_v25 }
 0x27c   : > { %18222 = vst [vmem:[#allocation38_spill] sm:$0xff] %v14508_v24  ;;  %2235 = vmatprep.mubr.bf16.mxu0 %v14232_v8 }
 0x27e   : > { %v2014_v41 = vpop.f32.mrb[0].mxu1  ;;  %v1821_v3 = vpop.f32.mrb[32].mxu0 }
 0x27f   : > { %v2016_v46 = vpop.f32.mrb[1].mxu1  ;;  %v14525_v50 = vadd.f32 %v2014_v41, %v14515_v62  ;;  %v1823_v25 = vpop.f32.mrb[33].mxu0  ;;  %v14537_v44 = vadd.f32 %v1821_v3, %v14356_v0 }
 0x280   : > { %v2018_v11 = vpop.f32.mrb[2].mxu1  ;;  %v14531_v48 = vadd.f32 %v2016_v46, %v14522_v20  ;;  %v1825_v8 = vpop.f32.mrb[34].mxu0 }
 0x281   : > { %v14528_v1 = vadd.f32 %v2018_v11, %v14515_v62  ;;  %v2020_v13 = vpop.f32.mrb[3].mxu1  ;;  %v14540_v52 = vadd.f32 %v1825_v8, %v14356_v0  ;;  %v1827_v41 = vpop.f32.mrb[35].mxu0  ;;  %v14545_v11 = vadd.f32 %v1823_v25, %v14360_v30 }
 0x282   : > { %18223 = vst [vmem:[#allocation39_spill] sm:$0xff] %v14531_v48  ;;  %v14534_v29 = vadd.f32 %v2020_v13, %v14522_v20  ;;  %v14548_v46 = vadd.f32 %v1827_v41, %v14360_v30 }
 0x283   : > { %18225 = vst [vmem:[#allocation41_spill] sm:$0xff] %v14545_v11  ;;  %2236 = vmatmul.mubr.bf16.gmra.mrb[140].mxu0 %v14234_v17 }
 0x284   : > { %18224 = vst [vmem:[#allocation40_spill] sm:$0xff] %v14534_v29  ;;  %18226 = vst [vmem:[#allocation42_spill] sm:$0xff] %v14548_v46  ;;  %2245 = vmatprep.mubr.bf16.mxu0 %v14256_v55 }
 0x286   : > { %v2024_v54 = vpop.f32.mrb[4].mxu1  ;;  %v1831_v25 = vpop.f32.mrb[36].mxu0 }
 0x287   : > { %v2026_v35 = vpop.f32.mrb[5].mxu1  ;;  %v14559_v41 = vadd.f32 %v2024_v54, %v14515_v62  ;;  %v1833_v28 = vpop.f32.mrb[37].mxu0  ;;  %v14571_v55 = vadd.f32 %v1831_v25, %v14356_v0 }
 0x288   : > { %v2028_v43 = vpop.f32.mrb[6].mxu1  ;;  %v14565_v3 = vadd.f32 %v2026_v35, %v14522_v20  ;;  %v1835_v17 = vpop.f32.mrb[38].mxu0 }
 0x289   : > { %v14562_v13 = vadd.f32 %v2028_v43, %v14515_v62  ;;  %v2030_v45 = vpop.f32.mrb[7].mxu1  ;;  %v14574_v11 = vadd.f32 %v1835_v17, %v14356_v0  ;;  %v1837_v54 = vpop.f32.mrb[39].mxu0  ;;  %v14579_v43 = vadd.f32 %v1833_v28, %v14360_v30 }
 0x28a   : > { %18227 = vst [vmem:[#allocation43_spill] sm:$0xff] %v14565_v3  ;;  %v14568_v8 = vadd.f32 %v2030_v45, %v14522_v20  ;;  %v14582_v35 = vadd.f32 %v1837_v54, %v14360_v30 }
 0x28b   : > { %18229 = vst [vmem:[#allocation45_spill] sm:$0xff] %v14579_v43  ;;  %2246 = vmatmul.mubr.bf16.gmra.mrb[144].mxu0 %v14258_v57 }
 0x28c   : > { %18228 = vst [vmem:[#allocation44_spill] sm:$0xff] %v14568_v8  ;;  %18230 = vst [vmem:[#allocation46_spill] sm:$0xff] %v14582_v35  ;;  %2255 = vmatprep.mubr.bf16.mxu0 %v14278_v42 }
 0x28e   : > { %v2034_v46 = vpop.f32.mrb[8].mxu1  ;;  %v1841_v28 = vpop.f32.mrb[40].mxu0 }
 0x28f   : > { %v2036_v24 = vpop.f32.mrb[9].mxu1  ;;  %v14593_v54 = vadd.f32 %v2034_v46, %v14515_v62  ;;  %v1843_v29 = vpop.f32.mrb[41].mxu0  ;;  %v14605_v42 = vadd.f32 %v1841_v28, %v14356_v0 }
 0x290   : > { %v2038_v48 = vpop.f32.mrb[10].mxu1  ;;  %v14599_v25 = vadd.f32 %v2036_v24, %v14522_v20  ;;  %v1845_v57 = vpop.f32.mrb[42].mxu0 }
 0x291   : > { %v14596_v45 = vadd.f32 %v2038_v48, %v14515_v62  ;;  %v2040_v3 = vpop.f32.mrb[11].mxu1  ;;  %v14608_v43 = vadd.f32 %v1845_v57, %v14356_v0  ;;  %v1847_v46 = vpop.f32.mrb[43].mxu0  ;;  %v14613_v48 = vadd.f32 %v1843_v29, %v14360_v30 }
 0x292   : > { %18231 = vst [vmem:[#allocation47_spill] sm:$0xff] %v14599_v25  ;;  %v14602_v17 = vadd.f32 %v2040_v3, %v14522_v20  ;;  %v14616_v24 = vadd.f32 %v1847_v46, %v14360_v30 }
 0x293   : > { %18233 = vst [vmem:[#allocation49_spill] sm:$0xff] %v14613_v48  ;;  %2256 = vmatmul.mubr.bf16.gmra.mrb[148].mxu0 %v14280_v38 }
 0x294   : > { %18232 = vst [vmem:[#allocation48_spill] sm:$0xff] %v14602_v17  ;;  %18234 = vst [vmem:[#allocation50_spill] sm:$0xff] %v14616_v24  ;;  %2265 = vmatprep.mubr.bf16.mxu0 %v14294_v9 }
 0x296   : > { %v2044_v35 = vpop.f32.mrb[12].mxu1  ;;  %v1851_v29 = vpop.f32.mrb[44].mxu0 }
 0x297   : > { %v2046_v8 = vpop.f32.mrb[13].mxu1  ;;  %v14627_v46 = vadd.f32 %v2044_v35, %v14515_v62  ;;  %v1853_v63 = vpop.f32.mrb[45].mxu0  ;;  %v14639_v9 = vadd.f32 %v1851_v29, %v14356_v0 }
 0x298   : > { %v2048_v23 = vpop.f32.mrb[14].mxu1  ;;  %v14633_v28 = vadd.f32 %v2046_v8, %v14522_v20  ;;  %v1855_v38 = vpop.f32.mrb[46].mxu0 }
 0x299   : > { %v14630_v3 = vadd.f32 %v2048_v23, %v14515_v62  ;;  %v2050_v25 = vpop.f32.mrb[15].mxu1  ;;  %v14642_v48 = vadd.f32 %v1855_v38, %v14356_v0  ;;  %v1857_v35 = vpop.f32.mrb[47].mxu0  ;;  %v14647_v23 = vadd.f32 %v1853_v63, %v14360_v30 }
 0x29a   : > { %18235 = vst [vmem:[#allocation51_spill] sm:$0xff] %v14633_v28  ;;  %v14636_v57 = vadd.f32 %v2050_v25, %v14522_v20  ;;  %v14650_v8 = vadd.f32 %v1857_v35, %v14360_v30 }
 0x29b   : > { %18237 = vst [vmem:[#allocation53_spill] sm:$0xff] %v14647_v23  ;;  %2266 = vmatmul.mubr.bf16.gmra.mrb[152].mxu0 %v14296_v7 }
 0x29c   : > { %18236 = vst [vmem:[#allocation52_spill] sm:$0xff] %v14636_v57  ;;  %18238 = vst [vmem:[#allocation54_spill] sm:$0xff] %v14650_v8  ;;  %2275 = vmatprep.mubr.bf16.mxu0 %v14310_v53 }
 0x29e   : > { %v2054_v24 = vpop.f32.mrb[16].mxu1  ;;  %v1861_v63 = vpop.f32.mrb[48].mxu0 }
 0x29f   : > { %v2056_v17 = vpop.f32.mrb[17].mxu1  ;;  %v14661_v35 = vadd.f32 %v2054_v24, %v14515_v62  ;;  %v1863_v18 = vpop.f32.mrb[49].mxu0  ;;  %v14673_v53 = vadd.f32 %v1861_v63, %v14356_v0 }
 0x2a0   : > { %v2058_v47 = vpop.f32.mrb[18].mxu1  ;;  %v14667_v29 = vadd.f32 %v2056_v17, %v14522_v20  ;;  %v1865_v7 = vpop.f32.mrb[50].mxu0 }
 0x2a1   : > { %v14664_v25 = vadd.f32 %v2058_v47, %v14515_v62  ;;  %v2060_v28 = vpop.f32.mrb[19].mxu1  ;;  %v14676_v23 = vadd.f32 %v1865_v7, %v14356_v0  ;;  %v1867_v24 = vpop.f32.mrb[51].mxu0  ;;  %v14681_v47 = vadd.f32 %v1863_v18, %v14360_v30 }
 0x2a2   : > { %18239 = vst [vmem:[#allocation55_spill] sm:$0xff] %v14667_v29  ;;  %v14670_v38 = vadd.f32 %v2060_v28, %v14522_v20  ;;  %v14684_v17 = vadd.f32 %v1867_v24, %v14360_v30 }
 0x2a3   : > { %18241 = vst [vmem:[#allocation57_spill] sm:$0xff] %v14681_v47  ;;  %2276 = vmatmul.mubr.bf16.gmra.mrb[156].mxu0 %v14312_v40 }
 0x2a4   : > { %18240 = vst [vmem:[#allocation56_spill] sm:$0xff] %v14670_v38  ;;  %18242 = vst [vmem:[#allocation58_spill] sm:$0xff] %v14684_v17  ;;  %11510 = vmatprep.mubr.msk.bf16.mxu0 %vm13573_vm0, %v18243_v14 }
 0x2a6   : > { %v2064_v57 = vpop.f32.mrb[20].mxu1  ;;  %v1871_v8 = vpop.f32.mrb[52].mxu0 }
 0x2a7   : > { %v2066_v18 = vpop.f32.mrb[21].mxu1  ;;  %v14696_v24 = vadd.f32 %v2064_v57, %v14515_v62  ;;  %v1873_v26 = vpop.f32.mrb[53].mxu0  ;;  %v14708_v47 = vadd.f32 %v1871_v8, %v14356_v0 }
 0x2a8   : > { %v2068_v37 = vpop.f32.mrb[22].mxu1  ;;  %v14702_v40 = vadd.f32 %v2066_v18, %v14522_v20  ;;  %v1875_v29 = vpop.f32.mrb[54].mxu0 }
 0x2a9   : > { %v14699_v28 = vadd.f32 %v2068_v37, %v14515_v62  ;;  %v2070_v63 = vpop.f32.mrb[23].mxu1  ;;  %v14711_v17 = vadd.f32 %v1875_v29, %v14356_v0  ;;  %v1877_v57 = vpop.f32.mrb[55].mxu0  ;;  %v14716_v37 = vadd.f32 %v1873_v26, %v14360_v30 }
 0x2aa   : > { %18244 = vst [vmem:[#allocation59_spill] sm:$0xff] %v14702_v40  ;;  %v14705_v7 = vadd.f32 %v2070_v63, %v14522_v20  ;;  %v14719_v18 = vadd.f32 %v1877_v57, %v14360_v30 }
 0x2ab   : > { %18246 = vst [vmem:[#allocation61_spill] sm:$0xff] %v14716_v37 }
 0x2ac   : > { %18245 = vst [vmem:[#allocation60_spill] sm:$0xff] %v14705_v7  ;;  %18247 = vst [vmem:[#allocation62_spill] sm:$0xff] %v14719_v18 }
 0x2ae   : > { %v2074_v56 = vpop.f32.mrb[24].mxu1  ;;  %v1881_v19 = vpop.f32.mrb[56].mxu0 }
 0x2af   : > { %v2076_v15 = vpop.f32.mrb[25].mxu1  ;;  %v14728_v38 = vadd.f32 %v2074_v56, %v14515_v62  ;;  %v1883_v26 = vpop.f32.mrb[57].mxu0  ;;  %v14740_v29 = vadd.f32 %v1881_v19, %v14356_v0 }
 0x2b0   : > { %v2078_v6 = vpop.f32.mrb[26].mxu1  ;;  %v14734_v63 = vadd.f32 %v2076_v15, %v14522_v20  ;;  %v1885_v40 = vpop.f32.mrb[58].mxu0 }
 0x2b1   : > { %18248 = vst [vmem:[#allocation63_spill] sm:$0xff] %v14728_v38  ;;  %v14731_v57 = vadd.f32 %v2078_v6, %v14515_v62  ;;  %v2080_v12 = vpop.f32.mrb[27].mxu1  ;;  %18252 = vst [vmem:[#allocation67_spill] sm:$0xff] %v14740_v29  ;;  %v14743_v37 = vadd.f32 %v1885_v40, %v14356_v0  ;;  %v1887_v56 = vpop.f32.mrb[59].mxu0  ;;  %v14748_v6 = vadd.f32 %v1883_v26, %v14360_v30 }
 0x2b2   : > { %18250 = vst [vmem:[#allocation65_spill] sm:$0xff] %v14734_v63  ;;  %v14737_v8 = vadd.f32 %v2080_v12, %v14522_v20  ;;  %v14751_v15 = vadd.f32 %v1887_v56, %v14360_v30 }
 0x2b3   : > { %18249 = vst [vmem:[#allocation64_spill] sm:$0xff] %v14731_v57  ;;  %18253 = vst [vmem:[#allocation68_spill] sm:$0xff] %v14743_v37 }
 0x2b4   : > { %18251 = vst [vmem:[#allocation66_spill] sm:$0xff] %v14737_v8  ;;  %18254 = vst [vmem:[#allocation69_spill] sm:$0xff] %v14748_v6 }
 0x2b5   : > { %18255 = vst [vmem:[#allocation70_spill] sm:$0xff] %v14751_v15 }
 0x2b6   : > { %v2084_v7 = vpop.f32.mrb[28].mxu1  ;;  %v1891_v51 = vpop.f32.mrb[60].mxu0 }
 0x2b7   : > { %v2086_v39 = vpop.f32.mrb[29].mxu1  ;;  %v14763_v38 = vadd.f32 %v2084_v7, %v14515_v62  ;;  %v1893_v56 = vpop.f32.mrb[61].mxu0  ;;  %v14775_v6 = vadd.f32 %v1891_v51, %v14356_v0 }
 0x2b8   : > { %v14760_v18 = vadd.f32 %v2086_v39, %v14522_v20  ;;  %v2088_v26 = vpop.f32.mrb[30].mxu1  ;;  %v14769_v19 = vadd.f32 %v1893_v56, %v14360_v30  ;;  %v1895_v63 = vpop.f32.mrb[62].mxu0 }
 0x2b9   : > { %v14766_v57 = vadd.f32 %v2088_v26, %v14515_v62  ;;  %v2090_v12 = vpop.f32.mrb[31].mxu1  ;;  %v14778_v39 = vadd.f32 %v1895_v63, %v14356_v0  ;;  %v1897_v7 = vpop.f32.mrb[63].mxu0 }
 0x2ba   : > { %18256 = vst [vmem:[#allocation71_spill] sm:$0xff] %v14760_v18  ;;  %18257 = vst [vmem:[#allocation72_spill] sm:$0xff] %v14769_v19  ;;  %v14772_v40 = vadd.f32 %v2090_v12, %v14522_v20  ;;  %v14783_v26 = vadd.f32 %v1897_v7, %v14360_v30 }
 0x2bc   : > { %18258 = vst [vmem:[#allocation73_spill] sm:$0xff] %v14772_v40  ;;  %18259 = vst [vmem:[#allocation74_spill] sm:$0xff] %v14783_v26 }
 0x2be   : > { %v1934_v8 = vpop.f32.mrb[64].mxu0 }
 0x2bf   : > { %v1936_v29 = vpop.f32.mrb[65].mxu0  ;;  %v1935_v63 = vadd.f32 %v1934_v8, %v14515_v62 }
 0x2c0   : > { %v1938_v0 = vpop.f32.mrb[66].mxu0  ;;  %v14794_v30 = vadd.f32 %v1936_v29, %v14522_v20 }
 0x2c1   : > { %v1939_v37 = vadd.f32 %v1938_v0, %v14515_v62  ;;  %v1940_v15 = vpop.f32.mrb[67].mxu0 }
 0x2c2   : > { %18260 = vst [vmem:[#allocation75_spill] sm:$0xff] %v14794_v30  ;;  %v14797_v7 = vadd.f32 %v1940_v15, %v14522_v20 }
 0x2c3   : > { %v2302_v56 = vpack.c.bf16 %v1939_v37, %v1935_v63  ;;  %v18264_v63 = vpack.c.bf16 %v14366_v4, %v14363_v49 }
 0x2c4   : > { %18261 = vst [vmem:[#allocation76_spill] sm:$0xff] %v14797_v7 }
 0x2c5   : > { %11413 = vmatpush3.bf16.xpose.msra.mxu1 %v2302_v56 }
 0x2c6   : > { %v1944_v51 = vpop.f32.mrb[68].mxu0  ;;  %11418 = vmatprep.subr.bf16.mxu1 %v18243_v14 }
 0x2c7   : > { %v1946_v19 = vpop.f32.mrb[69].mxu0  ;;  %v1945_v8 = vadd.f32 %v1944_v51, %v14515_v62 }
 0x2c8   : > { %v1948_v26 = vpop.f32.mrb[70].mxu0  ;;  %v14805_v29 = vadd.f32 %v1946_v19, %v14522_v20 }
 0x2c9   : > { %v1949_v0 = vadd.f32 %v1948_v26, %v14515_v62  ;;  %v1950_v18 = vpop.f32.mrb[71].mxu0 }
 0x2ca   : > { %18262 = vst [vmem:[#allocation77_spill] sm:$0xff] %v14805_v29  ;;  %v14808_v15 = vadd.f32 %v1950_v18, %v14522_v20 }
 0x2cb   : > { %v2303_v37 = vpack.c.bf16 %v1949_v0, %v1945_v8 }
 0x2cc   : > { %18263 = vst [vmem:[#allocation78_spill] sm:$0xff] %v14808_v15  ;;  %11415 = vmatmul.mubr.bf16.vlgmr.msra.gmra.mrb[32].mxu1 %v18264_v63  ;;  %v18267_v63 = vpack.c.bf16 %v14386_v5, %v14383_v58 }
 0x2cd   : > { %11419 = vmatpush3.bf16.xpose.msra.mxu1 %v2303_v37  ;;  %11420 = vmatprep.mubr.msk.bf16.mxu1 %vm13573_vm0, %v18243_v14 }
 0x2ce   : > { %v1954_v26 = vpop.f32.mrb[72].mxu0  ;;  %11424 = vmatprep.subr.bf16.mxu1 %v18243_v14 }
 0x2cf   : > { %v1956_v19 = vpop.f32.mrb[73].mxu0  ;;  %v1955_v18 = vadd.f32 %v1954_v26, %v14515_v62 }
 0x2d0   : > { %v1958_v51 = vpop.f32.mrb[74].mxu0  ;;  %v14821_v56 = vadd.f32 %v1956_v19, %v14522_v20 }
 0x2d1   : > { %v1959_v8 = vadd.f32 %v1958_v51, %v14515_v62  ;;  %v1960_v0 = vpop.f32.mrb[75].mxu0 }
 0x2d2   : > { %18265 = vst [vmem:[#allocation79_spill] sm:$0xff] %v14821_v56  ;;  %v14824_v49 = vadd.f32 %v1960_v0, %v14522_v20 }
 0x2d3   : > { %v2304_v4 = vpack.c.bf16 %v1959_v8, %v1955_v18 }
 0x2d4   : > { %18266 = vst [vmem:[#allocation80_spill] sm:$0xff] %v14824_v49  ;;  %11421 = vmatmul.mubr.bf16.vlgmr.msra.gmra.mrb[36].mxu1 %v18267_v63  ;;  %v18270_v63 = vpack.c.bf16 %v14406_v21, %v14403_v31 }
 0x2d5   : > { %11425 = vmatpush3.bf16.xpose.msra.mxu1 %v2304_v4  ;;  %11426 = vmatprep.mubr.msk.bf16.mxu1 %vm13573_vm0, %v18243_v14 }
 0x2d6   : > { %v1964_v26 = vpop.f32.mrb[76].mxu0  ;;  %11430 = vmatprep.subr.bf16.mxu1 %v18243_v14 }
 0x2d7   : > { %v1966_v19 = vpop.f32.mrb[77].mxu0  ;;  %v1965_v0 = vadd.f32 %v1964_v26, %v14515_v62 }
 0x2d8   : > { %v1968_v51 = vpop.f32.mrb[78].mxu0  ;;  %v14837_v37 = vadd.f32 %v1966_v19, %v14522_v20 }
 0x2d9   : > { %v1969_v18 = vadd.f32 %v1968_v51, %v14515_v62  ;;  %v1970_v8 = vpop.f32.mrb[79].mxu0 }
 0x2da   : > { %18268 = vst [vmem:[#allocation81_spill] sm:$0xff] %v14837_v37  ;;  %v14840_v58 = vadd.f32 %v1970_v8, %v14522_v20 }
 0x2db   : > { %v2305_v5 = vpack.c.bf16 %v1969_v18, %v1965_v0 }
 0x2dc   : > { %18269 = vst [vmem:[#allocation82_spill] sm:$0xff] %v14840_v58  ;;  %11427 = vmatmul.mubr.bf16.vlgmr.msra.gmra.mrb[40].mxu1 %v18270_v63  ;;  %v18273_v63 = vpack.c.bf16 %v14424_v27, %v14421_v60 }
 0x2dd   : > { %11431 = vmatpush3.bf16.xpose.msra.mxu1 %v2305_v5  ;;  %11432 = vmatprep.mubr.msk.bf16.mxu1 %vm13573_vm0, %v18243_v14 }
 0x2de   : > { %v1974_v26 = vpop.f32.mrb[80].mxu0  ;;  %11436 = vmatprep.subr.bf16.mxu1 %v18243_v14 }
 0x2df   : > { %v1976_v19 = vpop.f32.mrb[81].mxu0  ;;  %v1975_v8 = vadd.f32 %v1974_v26, %v14515_v62 }
 0x2e0   : > { %v1978_v51 = vpop.f32.mrb[82].mxu0  ;;  %v14853_v4 = vadd.f32 %v1976_v19, %v14522_v20 }
 0x2e1   : > { %v1979_v0 = vadd.f32 %v1978_v51, %v14515_v62  ;;  %v1980_v18 = vpop.f32.mrb[83].mxu0 }
 0x2e2   : > { %18271 = vst [vmem:[#allocation83_spill] sm:$0xff] %v14853_v4  ;;  %v14856_v31 = vadd.f32 %v1980_v18, %v14522_v20 }
 0x2e3   : > { %v2306_v21 = vpack.c.bf16 %v1979_v0, %v1975_v8 }
 0x2e4   : > { %18272 = vst [vmem:[#allocation84_spill] sm:$0xff] %v14856_v31  ;;  %11433 = vmatmul.mubr.bf16.vlgmr.msra.gmra.mrb[44].mxu1 %v18273_v63  ;;  %v18276_v63 = vpack.c.bf16 %v14442_v2, %v14439_v32 }
 0x2e5   : > { %11437 = vmatpush3.bf16.xpose.msra.mxu1 %v2306_v21  ;;  %11438 = vmatprep.mubr.msk.bf16.mxu1 %vm13573_vm0, %v18243_v14 }
 0x2e6   : > { %v1984_v26 = vpop.f32.mrb[84].mxu0  ;;  %11442 = vmatprep.subr.bf16.mxu1 %v18243_v14 }
 0x2e7   : > { %v1986_v19 = vpop.f32.mrb[85].mxu0  ;;  %v1985_v18 = vadd.f32 %v1984_v26, %v14515_v62 }
 0x2e8   : > { %v1988_v51 = vpop.f32.mrb[86].mxu0  ;;  %v14869_v5 = vadd.f32 %v1986_v19, %v14522_v20 }
 0x2e9   : > { %v1989_v8 = vadd.f32 %v1988_v51, %v14515_v62  ;;  %v1990_v0 = vpop.f32.mrb[87].mxu0 }
 0x2ea   : > { %18274 = vst [vmem:[#allocation85_spill] sm:$0xff] %v14869_v5  ;;  %v14872_v60 = vadd.f32 %v1990_v0, %v14522_v20 }
 0x2eb   : > { %v2307_v27 = vpack.c.bf16 %v1989_v8, %v1985_v18 }
 0x2ec   : > { %18275 = vst [vmem:[#allocation86_spill] sm:$0xff] %v14872_v60  ;;  %11439 = vmatmul.mubr.bf16.vlgmr.msra.gmra.mrb[48].mxu1 %v18276_v63  ;;  %v18279_v63 = vpack.c.bf16 %v14460_v36, %v14457_v34  ;;  %v1219_v36 = vsub.s32 5, %v14339_v59 }
 0x2ed   : > { %11443 = vmatpush3.bf16.xpose.msra.mxu1 %v2307_v27  ;;  %11444 = vmatprep.mubr.msk.bf16.mxu1 %vm13573_vm0, %v18243_v14  ;;  %v1215_v27 = vsub.s32 4, %v14339_v59 }
 0x2ee   : > { %v1994_v26 = vpop.f32.mrb[88].mxu0  ;;  %11448 = vmatprep.subr.bf16.mxu1 %v18243_v14 }
 0x2ef   : > { %v1996_v19 = vpop.f32.mrb[89].mxu0  ;;  %v1995_v0 = vadd.f32 %v1994_v26, %v14515_v62 }
 0x2f0   : > { %v1998_v51 = vpop.f32.mrb[90].mxu0  ;;  %v14885_v21 = vadd.f32 %v1996_v19, %v14522_v20 }
 0x2f1   : > { %v1999_v18 = vadd.f32 %v1998_v51, %v14515_v62  ;;  %v2000_v8 = vpop.f32.mrb[91].mxu0 }
 0x2f2   : > { %18277 = vst [vmem:[#allocation87_spill] sm:$0xff] %v14885_v21  ;;  %v14888_v32 = vadd.f32 %v2000_v8, %v14522_v20 }
 0x2f3   : > { %v2308_v2 = vpack.c.bf16 %v1999_v18, %v1995_v0 }
 0x2f4   : > { %18278 = vst [vmem:[#allocation88_spill] sm:$0xff] %v14888_v32  ;;  %11445 = vmatmul.mubr.bf16.vlgmr.msra.gmra.mrb[52].mxu1 %v18279_v63 }
 0x2f5   : > { %11449 = vmatpush3.bf16.xpose.msra.mxu1 %v2308_v2  ;;  %11450 = vmatprep.mubr.msk.bf16.mxu1 %vm13573_vm0, %v18243_v14 }
 0x2f6   : > { %v2004_v26 = vpop.f32.mrb[92].mxu0  ;;  %11454 = vmatprep.subr.bf16.mxu1 %v18243_v14 }
 0x2f7   : > { %v2006_v19 = vpop.f32.mrb[93].mxu0  ;;  %v2005_v8 = vadd.f32 %v2004_v26, %v14515_v62  ;;  %v18282_v26 = vpack.c.bf16 %v14478_v16, %v14475_v33 }
 0x2f8   : > { %v2008_v51 = vpop.f32.mrb[94].mxu0  ;;  %v14902_v12 = vadd.f32 %v2006_v19, %v14522_v20 }
 0x2f9   : > { %v2009_v0 = vadd.f32 %v2008_v51, %v14515_v62  ;;  %v2010_v18 = vpop.f32.mrb[95].mxu0  ;;  %v14914_v62 = vrot.slane %v14347_v61, %v1215_v27 }
 0x2fa   : > { %18280 = vst [vmem:[#allocation89_spill] sm:$0xff] %v14902_v12  ;;  %v14905_v34 = vadd.f32 %v2010_v18, %v14522_v20  ;;  %v14919_v20 = vrot.slane %v14347_v61, %v1219_v36  ;;  %v18285_v36 = vpack.c.bf16 %v14502_v10, %v14499_v22 }
 0x2fb   : > { %v2309_v2 = vpack.c.bf16 %v2009_v0, %v2005_v8 }
 0x2fc   : > { %18281 = vst [vmem:[#allocation90_spill] sm:$0xff] %v14905_v34  ;;  %11451 = vmatmul.mubr.bf16.vlgmr.msra.gmra.mrb[56].mxu1 %v18282_v26 }
 0x2fd   : > { %11455 = vmatpush3.bf16.xpose.msra.mxu1 %v2309_v2  ;;  %11456 = vmatprep.mubr.msk.bf16.mxu1 %vm13573_vm0, %v18243_v14  ;;  %v18286_v2 = vpack.c.bf16 %v14528_v1, %v14525_v50 }
 0x2fe   : > { %v2127_v19 = vpop.f32.mrb[96].mxu0  ;;  %11460 = vmatprep.subr.bf16.mxu1 %v18243_v14 }
 0x2ff   : > { %v2129_v59 = vpop.f32.mrb[97].mxu0  ;;  %v2128_v8 = vadd.f32 %v2127_v19, %v14914_v62 }
 0x300   : > { %v2131_v51 = vpop.f32.mrb[98].mxu0  ;;  %v14925_v0 = vadd.f32 %v2129_v59, %v14919_v20 }
 0x301   : > { %v2132_v33 = vadd.f32 %v2131_v51, %v14914_v62  ;;  %v2133_v16 = vpop.f32.mrb[99].mxu0 }
 0x302   : > { %18283 = vst [vmem:[#allocation91_spill] sm:$0xff] %v14925_v0  ;;  %v14928_v27 = vadd.f32 %v2133_v16, %v14919_v20  ;;  %v18289_v16 = vpack.c.bf16 %v14540_v52, %v14537_v44 }
 0x303   : > { %v3375_v18 = vpack.c.bf16 %v2132_v33, %v2128_v8 }
 0x304   : > { %18284 = vst [vmem:[#allocation92_spill] sm:$0xff] %v14928_v27  ;;  %11457 = vmatmul.mubr.bf16.vlgmr.msra.gmra.mrb[60].mxu1 %v18285_v36 }
 0x305   : > { %11461 = vmatpush3.bf16.xpose.msra.mxu1 %v18286_v2  ;;  %11509 = vmatpush3.bf16.msra.mxu0 %v3375_v18  ;;  %v18290_v18 = vpack.c.bf16 %v14562_v13, %v14559_v41 }
 0x306   : > { %v2137_v26 = vpop.f32.mrb[100].mxu0  ;;  %11462 = vmatprep.mubr.msk.bf16.mxu1 %vm13573_vm0, %v18243_v14  ;;  %11466 = vmatprep.subr.bf16.mxu1 %v18243_v14 }
 0x307   : > { %v2139_v19 = vpop.f32.mrb[101].mxu0  ;;  %11520 = vmatprep.subr.bf16.mxu0 %v18243_v14  ;;  %v14943_v51 = vadd.f32 %v2137_v26, %v14914_v62 }
 0x308   : > { %v2141_v59 = vpop.f32.mrb[102].mxu0  ;;  %v14949_v50 = vadd.f32 %v2139_v19, %v14919_v20 }
 0x309   : > { %v14946_v10 = vadd.f32 %v2141_v59, %v14914_v62  ;;  %v2143_v22 = vpop.f32.mrb[103].mxu0 }
 0x30a   : > { %18287 = vst [vmem:[#allocation93_spill] sm:$0xff] %v14949_v50  ;;  %v14952_v1 = vadd.f32 %v2143_v22, %v14919_v20 }
 0x30b   : > { %v3376_v8 = vpack.c.bf16 %v14946_v10, %v14943_v51 }
 0x30c   : > { %18288 = vst [vmem:[#allocation94_spill] sm:$0xff] %v14952_v1  ;;  %11463 = vmatmul.mubr.bf16.vlgmr.msra.gmra.mrb[64].mxu1 %v18289_v16  ;;  %v18293_v16 = vpack.c.bf16 %v14574_v11, %v14571_v55 }
 0x30d   : > { %11467 = vmatpush3.bf16.xpose.msra.mxu1 %v18290_v18  ;;  %11468 = vmatprep.mubr.msk.bf16.mxu1 %vm13573_vm0, %v18243_v14  ;;  %v18294_v18 = vpack.c.bf16 %v14596_v45, %v14593_v54  ;;  %v18316_v54 = vld [vmem:[#allocation67_spill] sm:$0xff] }
 0x30e   : > { %v2147_v36 = vpop.f32.mrb[104].mxu0  ;;  %11472 = vmatprep.subr.bf16.mxu1 %v18243_v14 }
 0x30f   : > { %v2149_v2 = vpop.f32.mrb[105].mxu0  ;;  %v14968_v19 = vadd.f32 %v2147_v36, %v14914_v62 }
 0x310   : > { %v2151_v26 = vpop.f32.mrb[106].mxu0  ;;  %v14974_v52 = vadd.f32 %v2149_v2, %v14919_v20 }
 0x311   : > { %v14971_v59 = vadd.f32 %v2151_v26, %v14914_v62  ;;  %v2153_v44 = vpop.f32.mrb[107].mxu0 }
 0x312   : > { %18291 = vst [vmem:[#allocation95_spill] sm:$0xff] %v14974_v52  ;;  %v14977_v13 = vadd.f32 %v2153_v44, %v14919_v20 }
 0x314   : > { %18292 = vst [vmem:[#allocation96_spill] sm:$0xff] %v14977_v13  ;;  %11469 = vmatmul.mubr.bf16.vlgmr.msra.gmra.mrb[68].mxu1 %v18293_v16 }
 0x315   : > { %11473 = vmatpush3.bf16.xpose.msra.mxu1 %v18294_v18  ;;  %11474 = vmatprep.mubr.msk.bf16.mxu1 %vm13573_vm0, %v18243_v14  ;;  %v18297_v18 = vpack.c.bf16 %v14608_v43, %v14605_v42 }
 0x316   : > { %v2157_v36 = vpop.f32.mrb[108].mxu0  ;;  %11478 = vmatprep.subr.bf16.mxu1 %v18243_v14 }
 0x317   : > { %v2159_v2 = vpop.f32.mrb[109].mxu0  ;;  %v14993_v44 = vadd.f32 %v2157_v36, %v14914_v62  ;;  %v18298_v36 = vpack.c.bf16 %v14630_v3, %v14627_v46 }
 0x318   : > { %v2161_v26 = vpop.f32.mrb[110].mxu0  ;;  %v14999_v55 = vadd.f32 %v2159_v2, %v14919_v20 }
 0x319   : > { %v14996_v22 = vadd.f32 %v2161_v26, %v14914_v62  ;;  %v2163_v11 = vpop.f32.mrb[111].mxu0 }
 0x31a   : > { %18295 = vst [vmem:[#allocation97_spill] sm:$0xff] %v14999_v55  ;;  %v15002_v45 = vadd.f32 %v2163_v11, %v14919_v20 }
 0x31c   : > { %18296 = vst [vmem:[#allocation98_spill] sm:$0xff] %v15002_v45  ;;  %11475 = vmatmul.mubr.bf16.vlgmr.msra.gmra.mrb[72].mxu1 %v18297_v18 }
 0x31d   : > { %11479 = vmatpush3.bf16.xpose.msra.mxu1 %v18298_v36  ;;  %11480 = vmatprep.mubr.msk.bf16.mxu1 %vm13573_vm0, %v18243_v14  ;;  %v18301_v36 = vpack.c.bf16 %v14642_v48, %v14639_v9 }
 0x31e   : > { %v2167_v2 = vpop.f32.mrb[112].mxu0  ;;  %11484 = vmatprep.subr.bf16.mxu1 %v18243_v14 }
 0x31f   : > { %v2169_v26 = vpop.f32.mrb[113].mxu0  ;;  %v15018_v33 = vadd.f32 %v2167_v2, %v14914_v62  ;;  %v18302_v2 = vpack.c.bf16 %v14664_v25, %v14661_v35 }
 0x320   : > { %v2171_v11 = vpop.f32.mrb[114].mxu0  ;;  %v15024_v42 = vadd.f32 %v2169_v26, %v14919_v20 }
 0x321   : > { %v15021_v16 = vadd.f32 %v2171_v11, %v14914_v62  ;;  %v2173_v43 = vpop.f32.mrb[115].mxu0 }
 0x322   : > { %18299 = vst [vmem:[#allocation99_spill] sm:$0xff] %v15024_v42  ;;  %v15027_v3 = vadd.f32 %v2173_v43, %v14919_v20 }
 0x324   : > { %18300 = vst [vmem:[#allocation100_spill] sm:$0xff] %v15027_v3  ;;  %11481 = vmatmul.mubr.bf16.vlgmr.msra.gmra.mrb[76].mxu1 %v18301_v36 }
 0x325   : > { %11485 = vmatpush3.bf16.xpose.msra.mxu1 %v18302_v2  ;;  %11486 = vmatprep.mubr.msk.bf16.mxu1 %vm13573_vm0, %v18243_v14  ;;  %v18305_v2 = vpack.c.bf16 %v14676_v23, %v14673_v53 }
 0x326   : > { %v2177_v26 = vpop.f32.mrb[116].mxu0  ;;  %11490 = vmatprep.subr.bf16.mxu1 %v18243_v14 }
 0x327   : > { %v2179_v11 = vpop.f32.mrb[117].mxu0  ;;  %v15043_v61 = vadd.f32 %v2177_v26, %v14914_v62  ;;  %v18306_v26 = vpack.c.bf16 %v14699_v28, %v14696_v24 }
 0x328   : > { %v2181_v43 = vpop.f32.mrb[118].mxu0  ;;  %v15049_v9 = vadd.f32 %v2179_v11, %v14919_v20 }
 0x329   : > { %v15046_v18 = vadd.f32 %v2181_v43, %v14914_v62  ;;  %v2183_v48 = vpop.f32.mrb[119].mxu0 }
 0x32a   : > { %18303 = vst [vmem:[#allocation101_spill] sm:$0xff] %v15049_v9  ;;  %v15052_v25 = vadd.f32 %v2183_v48, %v14919_v20 }
 0x32c   : > { %18304 = vst [vmem:[#allocation102_spill] sm:$0xff] %v15052_v25  ;;  %11487 = vmatmul.mubr.bf16.vlgmr.msra.gmra.mrb[80].mxu1 %v18305_v2 }
 0x32d   : > { %11491 = vmatpush3.bf16.xpose.msra.mxu1 %v18306_v26  ;;  %11492 = vmatprep.mubr.msk.bf16.mxu1 %vm13573_vm0, %v18243_v14  ;;  %v18309_v26 = vpack.c.bf16 %v14711_v17, %v14708_v47 }
 0x32e   : > { %v2187_v11 = vpop.f32.mrb[120].mxu0  ;;  %11496 = vmatprep.subr.bf16.mxu1 %v18243_v14 }
 0x32f   : > { %v2189_v43 = vpop.f32.mrb[121].mxu0  ;;  %v15068_v63 = vadd.f32 %v2187_v11, %v14914_v62  ;;  %v18310_v11 = vld [vmem:[#allocation64_spill] sm:$0xff] }
 0x330   : > { %v2191_v48 = vpop.f32.mrb[122].mxu0  ;;  %v15074_v53 = vadd.f32 %v2189_v43, %v14919_v20 }
 0x331   : > { %v15071_v36 = vadd.f32 %v2191_v48, %v14914_v62  ;;  %v2193_v23 = vpop.f32.mrb[123].mxu0  ;;  %v18311_v48 = vld [vmem:[#allocation63_spill] sm:$0xff] }
 0x332   : > { %18307 = vst [vmem:[#allocation103_spill] sm:$0xff] %v15074_v53  ;;  %v15077_v28 = vadd.f32 %v2193_v23, %v14919_v20  ;;  %v18312_v35 = vpack.c.bf16 %v18310_v11, %v18311_v48  ;;  %v18315_v48 = vld [vmem:[#allocation68_spill] sm:$0xff] }
 0x334   : > { %18308 = vst [vmem:[#allocation104_spill] sm:$0xff] %v15077_v28  ;;  %11493 = vmatmul.mubr.bf16.vlgmr.msra.gmra.mrb[84].mxu1 %v18309_v26 }
 0x335   : > { %11497 = vmatpush3.bf16.xpose.msra.mxu1 %v18312_v35  ;;  %11498 = vmatprep.mubr.msk.bf16.mxu1 %vm13573_vm0, %v18243_v14 }
 0x336   : > { %v2197_v43 = vpop.f32.mrb[124].mxu0  ;;  %11502 = vmatprep.subr.bf16.mxu1 %v18243_v14 }
 0x337   : > { %v2199_v23 = vpop.f32.mrb[125].mxu0  ;;  %v15093_v24 = vadd.f32 %v2197_v43, %v14914_v62  ;;  %v18317_v43 = vpack.c.bf16 %v18315_v48, %v18316_v54 }
 0x338   : > { %v2201_v46 = vpop.f32.mrb[126].mxu0  ;;  %v15099_v17 = vadd.f32 %v2199_v23, %v14919_v20 }
 0x339   : > { %v15096_v2 = vadd.f32 %v2201_v46, %v14914_v62  ;;  %v2203_v47 = vpop.f32.mrb[127].mxu0  ;;  %v18318_v46 = vpack.c.bf16 %v14766_v57, %v14763_v38 }
 0x33a   : > { %18313 = vst [vmem:[#allocation64_spill] sm:$0xff] %v15099_v17  ;;  %v15102_v35 = vadd.f32 %v2203_v47, %v14919_v20 }
 0x33c   : > { %18314 = vst [vmem:[#allocation63_spill] sm:$0xff] %v15102_v35  ;;  %11499 = vmatmul.mubr.bf16.vlgmr.msra.gmra.mrb[88].mxu1 %v18317_v43 }
 0x33d   : > { %11503 = vmatpush3.bf16.xpose.msra.mxu1 %v18318_v46  ;;  %11504 = vmatprep.mubr.msk.bf16.mxu1 %vm13573_vm0, %v18243_v14  ;;  %v18321_v46 = vpack.c.bf16 %v14778_v39, %v14775_v6 }
 0x33e   : > { %v2207_v23 = vpop.f32.mrb[128].mxu0  ;;  %11514 = vmatprep.subr.bf16.mxu1 %v18243_v14 }
 0x33f   : > { %v2209_v47 = vpop.f32.mrb[129].mxu0  ;;  %v15118_v26 = vadd.f32 %v2207_v23, %v14914_v62 }
 0x340   : > { %v2211_v41 = vpop.f32.mrb[130].mxu0  ;;  %v15124_v48 = vadd.f32 %v2209_v47, %v14919_v20 }
 0x341   : > { %v15121_v11 = vadd.f32 %v2211_v41, %v14914_v62  ;;  %v2213_v54 = vpop.f32.mrb[131].mxu0 }
 0x342   : > { %18319 = vst [vmem:[#allocation68_spill] sm:$0xff] %v15124_v48  ;;  %v15127_v38 = vadd.f32 %v2213_v54, %v14919_v20 }
 0x344   : > { %18320 = vst [vmem:[#allocation67_spill] sm:$0xff] %v15127_v38  ;;  %11505 = vmatmul.mubr.bf16.vlgmr.msra.gmra.mrb[92].mxu1 %v18321_v46 }
 0x345   : > { %11515 = vmatpush3.bf16.msra.mxu1 %v3376_v8  ;;  %11516 = vmatprep.mubr.msk.bf16.mxu1 %vm13573_vm0, %v18243_v14 }
 0x346   : > { %v2217_v41 = vpop.f32.mrb[132].mxu0  ;;  %11526 = vmatprep.subr.bf16.mxu1 %v18243_v14 }
 0x347   : > { %v2219_v23 = vpop.f32.mrb[133].mxu0  ;;  %v15143_v54 = vadd.f32 %v2217_v41, %v14914_v62 }
 0x348   : > { %v2221_v47 = vpop.f32.mrb[134].mxu0  ;;  %v15149_v39 = vadd.f32 %v2219_v23, %v14919_v20 }
 0x349   : > { %v15146_v43 = vadd.f32 %v2221_v47, %v14914_v62  ;;  %v2223_v6 = vpop.f32.mrb[135].mxu0 }
 0x34a   : > { %18322 = vst [vmem:[#allocation105_spill] sm:$0xff] %v15149_v39  ;;  %v15152_v51 = vadd.f32 %v2223_v6, %v14919_v20 }
 0x34c   : > { %18323 = vst [vmem:[#allocation106_spill] sm:$0xff] %v15152_v51 }
 0x34e   : > { %v2227_v46 = vpop.f32.mrb[136].mxu0 }
 0x34f   : > { %v2229_v57 = vpop.f32.mrb[137].mxu0  ;;  %v15159_v48 = vadd.f32 %v2227_v46, %v14914_v62 }
 0x350   : > { %v2231_v41 = vpop.f32.mrb[138].mxu0  ;;  %v15165_v38 = vadd.f32 %v2229_v57, %v14919_v20 }
 0x351   : > { %v15162_v47 = vadd.f32 %v2231_v41, %v14914_v62  ;;  %v2233_v23 = vpop.f32.mrb[139].mxu0 }
 0x352   : > { %18324 = vst [vmem:[#allocation107_spill] sm:$0xff] %v15165_v38  ;;  %v15168_v6 = vadd.f32 %v2233_v23, %v14919_v20 }
 0x354   : > { %18325 = vst [vmem:[#allocation108_spill] sm:$0xff] %v15168_v6 }
 0x356   : > { %v2237_v39 = vpop.f32.mrb[140].mxu0 }
 0x357   : > { %v2239_v51 = vpop.f32.mrb[141].mxu0  ;;  %v15175_v17 = vadd.f32 %v2237_v39, %v14914_v62 }
 0x358   : > { %v2241_v46 = vpop.f32.mrb[142].mxu0  ;;  %v15181_v35 = vadd.f32 %v2239_v51, %v14919_v20 }
 0x359   : > { %18326 = vst [vmem:[#allocation109_spill] sm:$0xff] %v15175_v17  ;;  %v15178_v41 = vadd.f32 %v2241_v46, %v14914_v62  ;;  %v2243_v57 = vpop.f32.mrb[143].mxu0 }
 0x35a   : > { %18328 = vst [vmem:[#allocation111_spill] sm:$0xff] %v15181_v35  ;;  %v15184_v23 = vadd.f32 %v2243_v57, %v14919_v20 }
 0x35b   : > { %18327 = vst [vmem:[#allocation110_spill] sm:$0xff] %v15178_v41 }
 0x35c   : > { %18329 = vst [vmem:[#allocation112_spill] sm:$0xff] %v15184_v23 }
 0x35e   : > { %v2247_v38 = vpop.f32.mrb[144].mxu0 }
 0x35f   : > { %v2249_v6 = vpop.f32.mrb[145].mxu0  ;;  %v15191_v53 = vadd.f32 %v2247_v38, %v14914_v62 }
 0x360   : > { %v2251_v39 = vpop.f32.mrb[146].mxu0  ;;  %v15197_v28 = vadd.f32 %v2249_v6, %v14919_v20 }
 0x361   : > { %18330 = vst [vmem:[#allocation113_spill] sm:$0xff] %v15191_v53  ;;  %v15194_v46 = vadd.f32 %v2251_v39, %v14914_v62  ;;  %v2253_v51 = vpop.f32.mrb[147].mxu0 }
 0x362   : > { %18332 = vst [vmem:[#allocation115_spill] sm:$0xff] %v15197_v28  ;;  %v15200_v57 = vadd.f32 %v2253_v51, %v14919_v20 }
 0x363   : > { %18331 = vst [vmem:[#allocation114_spill] sm:$0xff] %v15194_v46 }
 0x364   : > { %18333 = vst [vmem:[#allocation116_spill] sm:$0xff] %v15200_v57 }
 0x366   : > { %v2257_v35 = vpop.f32.mrb[148].mxu0 }
 0x367   : > { %v2259_v23 = vpop.f32.mrb[149].mxu0  ;;  %v15207_v9 = vadd.f32 %v2257_v35, %v14914_v62 }
 0x368   : > { %v2261_v38 = vpop.f32.mrb[150].mxu0  ;;  %v15213_v25 = vadd.f32 %v2259_v23, %v14919_v20 }
 0x369   : > { %18334 = vst [vmem:[#allocation117_spill] sm:$0xff] %v15207_v9  ;;  %v15210_v39 = vadd.f32 %v2261_v38, %v14914_v62  ;;  %v2263_v6 = vpop.f32.mrb[151].mxu0 }
 0x36a   : > { %18336 = vst [vmem:[#allocation119_spill] sm:$0xff] %v15213_v25  ;;  %v15216_v51 = vadd.f32 %v2263_v6, %v14919_v20 }
 0x36b   : > { %18335 = vst [vmem:[#allocation118_spill] sm:$0xff] %v15210_v39 }
 0x36c   : > { %18337 = vst [vmem:[#allocation120_spill] sm:$0xff] %v15216_v51 }
 0x36e   : > { %v2267_v28 = vpop.f32.mrb[152].mxu0 }
 0x36f   : > { %v2269_v57 = vpop.f32.mrb[153].mxu0  ;;  %v15223_v42 = vadd.f32 %v2267_v28, %v14914_v62 }
 0x370   : > { %v2271_v35 = vpop.f32.mrb[154].mxu0  ;;  %v15229_v3 = vadd.f32 %v2269_v57, %v14919_v20 }
 0x371   : > { %18338 = vst [vmem:[#allocation121_spill] sm:$0xff] %v15223_v42  ;;  %v15226_v38 = vadd.f32 %v2271_v35, %v14914_v62  ;;  %v2273_v23 = vpop.f32.mrb[155].mxu0 }
 0x372   : > { %18340 = vst [vmem:[#allocation123_spill] sm:$0xff] %v15229_v3  ;;  %v15232_v6 = vadd.f32 %v2273_v23, %v14919_v20 }
 0x373   : > { %18339 = vst [vmem:[#allocation122_spill] sm:$0xff] %v15226_v38 }
 0x374   : > { %18341 = vst [vmem:[#allocation124_spill] sm:$0xff] %v15232_v6 }
 0x376   : > { %v2277_v25 = vpop.f32.mrb[156].mxu0 }
 0x377   : > { %v2279_v51 = vpop.f32.mrb[157].mxu0  ;;  %v15239_v55 = vadd.f32 %v2277_v25, %v14914_v62 }
 0x378   : > { %v2281_v28 = vpop.f32.mrb[158].mxu0  ;;  %v15245_v45 = vadd.f32 %v2279_v51, %v14919_v20 }
 0x379   : > { %18342 = vst [vmem:[#allocation125_spill] sm:$0xff] %v15239_v55  ;;  %v15242_v35 = vadd.f32 %v2281_v28, %v14914_v62  ;;  %v2283_v57 = vpop.f32.mrb[159].mxu0 }
 0x37a   : > { %18344 = vst [vmem:[#allocation127_spill] sm:$0xff] %v15245_v45  ;;  %v15248_v23 = vadd.f32 %v2283_v57, %v14919_v20 }
 0x37b   : > { %18343 = vst [vmem:[#allocation126_spill] sm:$0xff] %v15242_v35 }
 0x37c   : > { %18345 = vst [vmem:[#allocation128_spill] sm:$0xff] %v15248_v23 }
 0x39f   : > { %v2352_v3 = vpop.f32.mrb[32].mxu1 }
 0x3a0   : > { %v11416_v25 = vpop.f32.mrb[33].mxu1  ;;  %v15254_v6 = vmul.f32 0.088388346, %v2352_v3 }
 0x3a1   : > { %v2355_v62 = vpop.f32.mrb[34].mxu1 }
 0x3a2   : > { %v11417_v28 = vpop.f32.mrb[35].mxu1  ;;  %v3007_v51 = vsel %vm3006_vm1, %v15254_v6, -inf  ;;  %v15258_v52 = vmul.f32 0.088388346, %v2355_v62 }
 0x3a3   : > { %3008 = vmax.xlane.f32.xlu0 %v3007_v51 }
 0x3a4   : > { %v3010_v20 = vsel %vm3006_vm1, %v15258_v52, -inf }
 0x3a5   : > { %3011 = vmax.xlane.f32.xlu1 %v3010_v20 }
 0x3a7   : > { %v2393_v57 = vpop.f32.mrb[36].mxu1 }
 0x3a8   : > { %v11422_v10 = vpop.f32.mrb[37].mxu1  ;;  %v15262_v8 = vmul.f32 0.088388346, %v2393_v57 }
 0x3a9   : > { %v2396_v45 = vpop.f32.mrb[38].mxu1 }
 0x3aa   : > { %v11423_v25 = vpop.f32.mrb[39].mxu1  ;;  %v3013_v3 = vsel %vm3006_vm1, %v15262_v8, -inf  ;;  %v15266_v28 = vmul.f32 0.088388346, %v2396_v45 }
 0x3ab   : > { %3014 = vmax.xlane.f32.xlu0 %v3013_v3 }
 0x3ac   : > { %v3016_v62 = vsel %vm3006_vm1, %v15266_v28, -inf }
 0x3ad   : > { %3017 = vmax.xlane.f32.xlu1 %v3016_v62 }
 0x3af   : > { %v2434_v51 = vpop.f32.mrb[40].mxu1 }
 0x3b0   : > { %v11428_v23 = vpop.f32.mrb[41].mxu1  ;;  %v15270_v13 = vmul.f32 0.088388346, %v2434_v51 }
 0x3b1   : > { %v2437_v20 = vpop.f32.mrb[42].mxu1 }
 0x3b2   : > { %v11429_v10 = vpop.f32.mrb[43].mxu1  ;;  %v3019_v57 = vsel %vm3006_vm1, %v15270_v13, -inf  ;;  %v15274_v25 = vmul.f32 0.088388346, %v2437_v20 }
 0x3b3   : > { %3020 = vmax.xlane.f32.xlu0 %v3019_v57 }
 0x3b4   : > { %v3022_v45 = vsel %vm3006_vm1, %v15274_v25, -inf }
 0x3b5   : > { %3023 = vmax.xlane.f32.xlu1 %v3022_v45 }
 0x3b7   : > { %v2475_v3 = vpop.f32.mrb[44].mxu1 }
 0x3b8   : > { %v11434_v50 = vpop.f32.mrb[45].mxu1  ;;  %v15278_v1 = vmul.f32 0.088388346, %v2475_v3 }
 0x3b9   : > { %v2478_v62 = vpop.f32.mrb[46].mxu1 }
 0x3ba   : > { %v11435_v23 = vpop.f32.mrb[47].mxu1  ;;  %v3025_v51 = vsel %vm3006_vm1, %v15278_v1, -inf  ;;  %v15282_v10 = vmul.f32 0.088388346, %v2478_v62 }
 0x3bb   : > { %3026 = vmax.xlane.f32.xlu0 %v3025_v51 }
 0x3bc   : > { %v3028_v20 = vsel %vm3006_vm1, %v15282_v10, -inf }
 0x3bd   : > { %3029 = vmax.xlane.f32.xlu1 %v3028_v20 }
 0x3bf   : > { %v2516_v57 = vpop.f32.mrb[48].mxu1 }
 0x3c0   : > { %v11440_v0 = vpop.f32.mrb[49].mxu1  ;;  %v15286_v27 = vmul.f32 0.088388346, %v2516_v57 }
 0x3c1   : > { %v2519_v45 = vpop.f32.mrb[50].mxu1 }
 0x3c2   : > { %v11441_v50 = vpop.f32.mrb[51].mxu1  ;;  %v3031_v3 = vsel %vm3006_vm1, %v15286_v27, -inf  ;;  %v15290_v23 = vmul.f32 0.088388346, %v2519_v45 }
 0x3c3   : > { %3032 = vmax.xlane.f32.xlu0 %v3031_v3 }
 0x3c4   : > { %v3034_v62 = vsel %vm3006_vm1, %v15290_v23, -inf }
 0x3c5   : > { %3035 = vmax.xlane.f32.xlu1 %v3034_v62 }
 0x3c7   : > { %v2557_v51 = vpop.f32.mrb[52].mxu1 }
 0x3c8   : > { %v11446_v40 = vpop.f32.mrb[53].mxu1  ;;  %v15294_v12 = vmul.f32 0.088388346, %v2557_v51 }
 0x3c9   : > { %v2560_v20 = vpop.f32.mrb[54].mxu1 }
 0x3ca   : > { %v11447_v0 = vpop.f32.mrb[55].mxu1  ;;  %v3037_v57 = vsel %vm3006_vm1, %v15294_v12, -inf  ;;  %v15298_v50 = vmul.f32 0.088388346, %v2560_v20 }
 0x3cb   : > { %3038 = vmax.xlane.f32.xlu0 %v3037_v57 }
 0x3cc   : > { %v3040_v45 = vsel %vm3006_vm1, %v15298_v50, -inf }
 0x3cd   : > { %3041 = vmax.xlane.f32.xlu1 %v3040_v45 }
 0x3cf   : > { %v2598_v3 = vpop.f32.mrb[56].mxu1 }
 0x3d0   : > { %v11452_v34 = vpop.f32.mrb[57].mxu1  ;;  %v15302_v21 = vmul.f32 0.088388346, %v2598_v3 }
 0x3d1   : > { %v2601_v62 = vpop.f32.mrb[58].mxu1 }
 0x3d2   : > { %v11453_v40 = vpop.f32.mrb[59].mxu1  ;;  %v3043_v51 = vsel %vm3006_vm1, %v15302_v21, -inf  ;;  %v15306_v0 = vmul.f32 0.088388346, %v2601_v62 }
 0x3d3   : > { %3044 = vmax.xlane.f32.xlu0 %v3043_v51 }
 0x3d4   : > { %v3046_v20 = vsel %vm3006_vm1, %v15306_v0, -inf }
 0x3d5   : > { %3047 = vmax.xlane.f32.xlu1 %v3046_v20 }
 0x3d7   : > { %v2639_v57 = vpop.f32.mrb[60].mxu1 }
 0x3d8   : > { %v11458_v32 = vpop.f32.mrb[61].mxu1  ;;  %v15310_v5 = vmul.f32 0.088388346, %v2639_v57 }
 0x3d9   : > { %v2642_v45 = vpop.f32.mrb[62].mxu1 }
 0x3da   : > { %v11459_v34 = vpop.f32.mrb[63].mxu1  ;;  %v3049_v3 = vsel %vm3006_vm1, %v15310_v5, -inf  ;;  %v15314_v40 = vmul.f32 0.088388346, %v2642_v45 }
 0x3db   : > { %3050 = vmax.xlane.f32.xlu0 %v3049_v3 }
 0x3dc   : > { %v3052_v62 = vsel %vm3006_vm1, %v15314_v40, -inf }
 0x3dd   : > { %3053 = vmax.xlane.f32.xlu1 %v3052_v62 }
 0x3df   : > { %v2680_v51 = vpop.f32.mrb[64].mxu1 }
 0x3e0   : > { %v11464_v60 = vpop.f32.mrb[65].mxu1  ;;  %v15318_v4 = vmul.f32 0.088388346, %v2680_v51 }
 0x3e1   : > { %v2683_v20 = vpop.f32.mrb[66].mxu1 }
 0x3e2   : > { %v11465_v32 = vpop.f32.mrb[67].mxu1  ;;  %v3055_v57 = vsel %vm3006_vm1, %v15318_v4, -inf  ;;  %v15322_v34 = vmul.f32 0.088388346, %v2683_v20 }
 0x3e3   : > { %3056 = vmax.xlane.f32.xlu0 %v3055_v57 }
 0x3e4   : > { %v3058_v45 = vsel %vm3006_vm1, %v15322_v34, -inf }
 0x3e5   : > { %3059 = vmax.xlane.f32.xlu1 %v3058_v45 }
 0x3e7   : > { %v2721_v3 = vpop.f32.mrb[68].mxu1 }
 0x3e8   : > { %v11470_v31 = vpop.f32.mrb[69].mxu1  ;;  %v15326_v37 = vmul.f32 0.088388346, %v2721_v3 }
 0x3e9   : > { %v2724_v62 = vpop.f32.mrb[70].mxu1 }
 0x3ea   : > { %v11471_v60 = vpop.f32.mrb[71].mxu1  ;;  %v3061_v51 = vsel %vm3006_vm1, %v15326_v37, -inf  ;;  %v15330_v32 = vmul.f32 0.088388346, %v2724_v62 }
 0x3eb   : > { %3062 = vmax.xlane.f32.xlu0 %v3061_v51 }
 0x3ec   : > { %v3064_v20 = vsel %vm3006_vm1, %v15330_v32, -inf }
 0x3ed   : > { %3065 = vmax.xlane.f32.xlu1 %v3064_v20 }
 0x3ef   : > { %v2762_v57 = vpop.f32.mrb[72].mxu1 }
 0x3f0   : > { %v11476_v58 = vpop.f32.mrb[73].mxu1  ;;  %v15334_v56 = vmul.f32 0.088388346, %v2762_v57 }
 0x3f1   : > { %v2765_v45 = vpop.f32.mrb[74].mxu1 }
 0x3f2   : > { %v11477_v31 = vpop.f32.mrb[75].mxu1  ;;  %v3067_v3 = vsel %vm3006_vm1, %v15334_v56, -inf  ;;  %v15338_v60 = vmul.f32 0.088388346, %v2765_v45 }
 0x3f3   : > { %3068 = vmax.xlane.f32.xlu0 %v3067_v3 }
 0x3f4   : > { %v3070_v62 = vsel %vm3006_vm1, %v15338_v60, -inf }
 0x3f5   : > { %3071 = vmax.xlane.f32.xlu1 %v3070_v62 }
 0x3f7   : > { %v2803_v51 = vpop.f32.mrb[76].mxu1 }
 0x3f8   : > { %v11482_v49 = vpop.f32.mrb[77].mxu1  ;;  %v15342_v29 = vmul.f32 0.088388346, %v2803_v51 }
 0x3f9   : > { %v2806_v20 = vpop.f32.mrb[78].mxu1 }
 0x3fa   : > { %v11483_v58 = vpop.f32.mrb[79].mxu1  ;;  %v3073_v57 = vsel %vm3006_vm1, %v15342_v29, -inf  ;;  %v15346_v31 = vmul.f32 0.088388346, %v2806_v20 }
 0x3fb   : > { %3074 = vmax.xlane.f32.xlu0 %v3073_v57 }
 0x3fc   : > { %v3076_v45 = vsel %vm3006_vm1, %v15346_v31, -inf }
 0x3fd   : > { %3077 = vmax.xlane.f32.xlu1 %v3076_v45 }
 0x3ff   : > { %v2844_v3 = vpop.f32.mrb[80].mxu1 }
 0x400   : > { %v11488_v15 = vpop.f32.mrb[81].mxu1  ;;  %v15350_v30 = vmul.f32 0.088388346, %v2844_v3 }
 0x401   : > { %v2847_v62 = vpop.f32.mrb[82].mxu1 }
 0x402   : > { %v11489_v49 = vpop.f32.mrb[83].mxu1  ;;  %v3079_v51 = vsel %vm3006_vm1, %v15350_v30, -inf  ;;  %v15354_v58 = vmul.f32 0.088388346, %v2847_v62 }
 0x403   : > { %3080 = vmax.xlane.f32.xlu0 %v3079_v51 }
 0x404   : > { %v3082_v20 = vsel %vm3006_vm1, %v15354_v58, -inf }
 0x405   : > { %3083 = vmax.xlane.f32.xlu1 %v3082_v20 }
 0x407   : > { %v2885_v57 = vpop.f32.mrb[84].mxu1 }
 0x408   : > { %v11494_v7 = vpop.f32.mrb[85].mxu1  ;;  %v15358_v55 = vmul.f32 0.088388346, %v2885_v57 }
 0x409   : > { %v2888_v45 = vpop.f32.mrb[86].mxu1 }
 0x40a   : > { %v11495_v15 = vpop.f32.mrb[87].mxu1  ;;  %v3085_v3 = vsel %vm3006_vm1, %v15358_v55, -inf  ;;  %v15362_v49 = vmul.f32 0.088388346, %v2888_v45 }
 0x40b   : > { %3086 = vmax.xlane.f32.xlu0 %v3085_v3 }
 0x40c   : > { %v3088_v62 = vsel %vm3006_vm1, %v15362_v49, -inf }
 0x40d   : > { %3089 = vmax.xlane.f32.xlu1 %v3088_v62 }
 0x40f   : > { %v2926_v51 = vpop.f32.mrb[88].mxu1 }
 0x410   : > { %v11500_v35 = vpop.f32.mrb[89].mxu1  ;;  %v15366_v42 = vmul.f32 0.088388346, %v2926_v51 }
 0x411   : > { %v2929_v20 = vpop.f32.mrb[90].mxu1 }
 0x412   : > { %v11501_v7 = vpop.f32.mrb[91].mxu1  ;;  %v3091_v57 = vsel %vm3006_vm1, %v15366_v42, -inf  ;;  %v15370_v15 = vmul.f32 0.088388346, %v2929_v20 }
 0x413   : > { %3092 = vmax.xlane.f32.xlu0 %v3091_v57 }
 0x414   : > { %v3094_v45 = vsel %vm3006_vm1, %v15370_v15, -inf }
 0x415   : > { %3095 = vmax.xlane.f32.xlu1 %v3094_v45 }
 0x417   : > { %v2967_v3 = vpop.f32.mrb[92].mxu1 }
 0x418   : > { %v11506_v38 = vpop.f32.mrb[93].mxu1  ;;  %v15374_v9 = vmul.f32 0.088388346, %v2967_v3 }
 0x419   : > { %v2970_v62 = vpop.f32.mrb[94].mxu1 }
 0x41a   : > { %v11507_v35 = vpop.f32.mrb[95].mxu1  ;;  %v3097_v51 = vsel %vm3006_vm1, %v15374_v9, -inf  ;;  %v15378_v7 = vmul.f32 0.088388346, %v2970_v62 }
 0x41b   : > { %3098 = vmax.xlane.f32.xlu0 %v3097_v51 }
 0x41c   : > { %v3100_v20 = vsel %vm3006_vm1, %v15378_v7, -inf }
 0x41d   : > { %3101 = vmax.xlane.f32.xlu1 %v3100_v20 }
 0x430   : > { %v3009_v57 = vpop.xlane.xlu0 %3008 }
 0x431   : > { %v3103_v39 = vsub.f32 %v15254_v6, %v3009_v57 }
 0x432   : > { %v3012_v45 = vpop.xlane.xlu1 %3011 }
 0x433   : > { %v3135_v53 = vmul.f32 1.442695, %v3103_v39  ;;  %v3104_v38 = vsub.f32 %v15258_v52, %v3012_v45 }
 0x435   : > { %12831 = vpow2.f32 %v3135_v53  ;;  %v3137_v3 = vmul.f32 1.442695, %v3104_v38 }
 0x437   : > { %12833 = vpow2.f32 %v3137_v3 }
 0x438   : > { %v3015_v35 = vpop.xlane.xlu0 %3014 }
 0x439   : > { %v3105_v46 = vsub.f32 %v15262_v8, %v3015_v35 }
 0x43a   : > { %v3018_v62 = vpop.xlane.xlu1 %3017 }
 0x43b   : > { %v3139_v17 = vmul.f32 1.442695, %v3105_v46  ;;  %v3106_v51 = vsub.f32 %v15266_v28, %v3018_v62 }
 0x43d   : > { %12835 = vpow2.f32 %v3139_v17  ;;  %v3141_v41 = vmul.f32 1.442695, %v3106_v51 }
 0x43f   : > { %v15386_v20 = vpop.eup %12831  ;;  %12837 = vpow2.f32 %v3141_v41 }
 0x440   : > { %v3021_v6 = vpop.xlane.xlu0 %3020  ;;  %v3199_v39 = vsel %vm3006_vm1, %v15386_v20, 0.0 }
 0x441   : > { %v15390_v52 = vpop.eup %12833  ;;  %v3107_v53 = vsub.f32 %v15270_v13, %v3021_v6  ;;  %3200 = vadd.xlane.f32.xlu0 %v3199_v39 }
 0x442   : > { %v3024_v57 = vpop.xlane.xlu1 %3023  ;;  %v3202_v8 = vsel %vm3006_vm1, %v15390_v52, 0.0 }
 0x443   : > { %v3143_v46 = vmul.f32 1.442695, %v3107_v53  ;;  %v3108_v17 = vsub.f32 %v15274_v25, %v3024_v57  ;;  %3203 = vadd.xlane.f32.xlu1 %v3202_v8 }
 0x445   : > { %12839 = vpow2.f32 %v3143_v46  ;;  %v3145_v28 = vmul.f32 1.442695, %v3108_v17 }
 0x447   : > { %v15396_v41 = vpop.eup %12835  ;;  %12841 = vpow2.f32 %v3145_v28 }
 0x448   : > { %v3027_v45 = vpop.xlane.xlu0 %3026  ;;  %v3205_v38 = vsel %vm3006_vm1, %v15396_v41, 0.0 }
 0x449   : > { %v15400_v3 = vpop.eup %12837  ;;  %v3109_v13 = vsub.f32 %v15278_v1, %v3027_v45  ;;  %3206 = vadd.xlane.f32.xlu0 %v3205_v38 }
 0x44a   : > { %v3030_v35 = vpop.xlane.xlu1 %3029  ;;  %v3208_v62 = vsel %vm3006_vm1, %v15400_v3, 0.0 }
 0x44b   : > { %v3147_v25 = vmul.f32 1.442695, %v3109_v13  ;;  %v3110_v51 = vsub.f32 %v15282_v10, %v3030_v35  ;;  %3209 = vadd.xlane.f32.xlu1 %v3208_v62 }
 0x44d   : > { %12843 = vpow2.f32 %v3147_v25  ;;  %v3149_v6 = vmul.f32 1.442695, %v3110_v51 }
 0x44f   : > { %v15406_v39 = vpop.eup %12839  ;;  %12845 = vpow2.f32 %v3149_v6 }
 0x450   : > { %v3033_v53 = vpop.xlane.xlu0 %3032  ;;  %v3211_v57 = vsel %vm3006_vm1, %v15406_v39, 0.0 }
 0x451   : > { %v15410_v8 = vpop.eup %12841  ;;  %v3111_v1 = vsub.f32 %v15286_v27, %v3033_v53  ;;  %3212 = vadd.xlane.f32.xlu0 %v3211_v57 }
 0x452   : > { %v3036_v46 = vpop.xlane.xlu1 %3035  ;;  %v3214_v17 = vsel %vm3006_vm1, %v15410_v8, 0.0 }
 0x453   : > { %v3151_v10 = vmul.f32 1.442695, %v3111_v1  ;;  %v3112_v28 = vsub.f32 %v15290_v23, %v3036_v46  ;;  %3215 = vadd.xlane.f32.xlu1 %v3214_v17 }
 0x455   : > { %12847 = vpow2.f32 %v3151_v10  ;;  %v3153_v45 = vmul.f32 1.442695, %v3112_v28 }
 0x457   : > { %v15416_v38 = vpop.eup %12843  ;;  %12849 = vpow2.f32 %v3153_v45 }
 0x458   : > { %v3039_v13 = vpop.xlane.xlu0 %3038  ;;  %v3217_v35 = vsel %vm3006_vm1, %v15416_v38, 0.0 }
 0x459   : > { %v15420_v62 = vpop.eup %12845  ;;  %v3113_v27 = vsub.f32 %v15294_v12, %v3039_v13  ;;  %3218 = vadd.xlane.f32.xlu0 %v3217_v35 }
 0x45a   : > { %v3042_v25 = vpop.xlane.xlu1 %3041  ;;  %v3220_v51 = vsel %vm3006_vm1, %v15420_v62, 0.0 }
 0x45b   : > { %v3155_v23 = vmul.f32 1.442695, %v3113_v27  ;;  %v3114_v6 = vsub.f32 %v15298_v50, %v3042_v25  ;;  %3221 = vadd.xlane.f32.xlu1 %v3220_v51 }
 0x45d   : > { %12851 = vpow2.f32 %v3155_v23  ;;  %v3157_v53 = vmul.f32 1.442695, %v3114_v6 }
 0x45f   : > { %v15426_v57 = vpop.eup %12847  ;;  %12853 = vpow2.f32 %v3157_v53 }
 0x460   : > { %v3045_v1 = vpop.xlane.xlu0 %3044  ;;  %v3223_v46 = vsel %vm3006_vm1, %v15426_v57, 0.0 }
 0x461   : > { %v15430_v17 = vpop.eup %12849  ;;  %v3115_v12 = vsub.f32 %v15302_v21, %v3045_v1  ;;  %3224 = vadd.xlane.f32.xlu0 %v3223_v46 }
 0x462   : > { %v3048_v10 = vpop.xlane.xlu1 %3047  ;;  %v3226_v28 = vsel %vm3006_vm1, %v15430_v17, 0.0 }
 0x463   : > { %v3159_v50 = vmul.f32 1.442695, %v3115_v12  ;;  %v3116_v45 = vsub.f32 %v15306_v0, %v3048_v10  ;;  %3227 = vadd.xlane.f32.xlu1 %v3226_v28 }
 0x465   : > { %12855 = vpow2.f32 %v3159_v50  ;;  %v3161_v13 = vmul.f32 1.442695, %v3116_v45 }
 0x467   : > { %v15436_v35 = vpop.eup %12851  ;;  %12857 = vpow2.f32 %v3161_v13 }
 0x468   : > { %v3051_v27 = vpop.xlane.xlu0 %3050  ;;  %v3229_v25 = vsel %vm3006_vm1, %v15436_v35, 0.0 }
 0x469   : > { %v15440_v51 = vpop.eup %12853  ;;  %v3117_v21 = vsub.f32 %v15310_v5, %v3051_v27  ;;  %3230 = vadd.xlane.f32.xlu0 %v3229_v25 }
 0x46a   : > { %v3054_v23 = vpop.xlane.xlu1 %3053  ;;  %v3232_v6 = vsel %vm3006_vm1, %v15440_v51, 0.0 }
 0x46b   : > { %v3163_v0 = vmul.f32 1.442695, %v3117_v21  ;;  %v3118_v53 = vsub.f32 %v15314_v40, %v3054_v23  ;;  %3233 = vadd.xlane.f32.xlu1 %v3232_v6 }
 0x46d   : > { %12859 = vpow2.f32 %v3163_v0  ;;  %v3165_v1 = vmul.f32 1.442695, %v3118_v53 }
 0x46f   : > { %v15446_v46 = vpop.eup %12855  ;;  %12861 = vpow2.f32 %v3165_v1 }
 0x470   : > { %v3057_v12 = vpop.xlane.xlu0 %3056  ;;  %v3235_v10 = vsel %vm3006_vm1, %v15446_v46, 0.0 }
 0x471   : > { %v15450_v28 = vpop.eup %12857  ;;  %v3119_v5 = vsub.f32 %v15318_v4, %v3057_v12  ;;  %3236 = vadd.xlane.f32.xlu0 %v3235_v10 }
 0x472   : > { %v3060_v50 = vpop.xlane.xlu1 %3059  ;;  %v3238_v45 = vsel %vm3006_vm1, %v15450_v28, 0.0 }
 0x473   : > { %v3167_v40 = vmul.f32 1.442695, %v3119_v5  ;;  %v3120_v13 = vsub.f32 %v15322_v34, %v3060_v50  ;;  %3239 = vadd.xlane.f32.xlu1 %v3238_v45 }
 0x475   : > { %12863 = vpow2.f32 %v3167_v40  ;;  %v3169_v27 = vmul.f32 1.442695, %v3120_v13 }
 0x477   : > { %v15456_v25 = vpop.eup %12859  ;;  %12865 = vpow2.f32 %v3169_v27 }
 0x478   : > { %v3063_v21 = vpop.xlane.xlu0 %3062  ;;  %v3241_v23 = vsel %vm3006_vm1, %v15456_v25, 0.0 }
 0x479   : > { %v15460_v6 = vpop.eup %12861  ;;  %v3121_v4 = vsub.f32 %v15326_v37, %v3063_v21  ;;  %3242 = vadd.xlane.f32.xlu0 %v3241_v23 }
 0x47a   : > { %v3066_v0 = vpop.xlane.xlu1 %3065  ;;  %v3244_v53 = vsel %vm3006_vm1, %v15460_v6, 0.0 }
 0x47b   : > { %v3171_v34 = vmul.f32 1.442695, %v3121_v4  ;;  %v3122_v1 = vsub.f32 %v15330_v32, %v3066_v0  ;;  %3245 = vadd.xlane.f32.xlu1 %v3244_v53 }
 0x47d   : > { %12867 = vpow2.f32 %v3171_v34  ;;  %v3173_v12 = vmul.f32 1.442695, %v3122_v1 }
 0x47f   : > { %v15466_v10 = vpop.eup %12863  ;;  %12869 = vpow2.f32 %v3173_v12 }
 0x480   : > { %v3069_v5 = vpop.xlane.xlu0 %3068  ;;  %v3247_v50 = vsel %vm3006_vm1, %v15466_v10, 0.0 }
 0x481   : > { %v15470_v45 = vpop.eup %12865  ;;  %v3123_v37 = vsub.f32 %v15334_v56, %v3069_v5  ;;  %3248 = vadd.xlane.f32.xlu0 %v3247_v50 }
 0x482   : > { %v3072_v40 = vpop.xlane.xlu1 %3071  ;;  %v3250_v13 = vsel %vm3006_vm1, %v15470_v45, 0.0 }
 0x483   : > { %v3175_v32 = vmul.f32 1.442695, %v3123_v37  ;;  %v3124_v27 = vsub.f32 %v15338_v60, %v3072_v40  ;;  %3251 = vadd.xlane.f32.xlu1 %v3250_v13 }
 0x485   : > { %12871 = vpow2.f32 %v3175_v32  ;;  %v3177_v21 = vmul.f32 1.442695, %v3124_v27 }
 0x487   : > { %v15476_v23 = vpop.eup %12867  ;;  %12873 = vpow2.f32 %v3177_v21 }
 0x488   : > { %v3075_v4 = vpop.xlane.xlu0 %3074  ;;  %v3253_v0 = vsel %vm3006_vm1, %v15476_v23, 0.0 }
 0x489   : > { %v15480_v53 = vpop.eup %12869  ;;  %v3125_v56 = vsub.f32 %v15342_v29, %v3075_v4  ;;  %3254 = vadd.xlane.f32.xlu0 %v3253_v0 }
 0x48a   : > { %v3078_v34 = vpop.xlane.xlu1 %3077  ;;  %v3256_v1 = vsel %vm3006_vm1, %v15480_v53, 0.0 }
 0x48b   : > { %v3179_v60 = vmul.f32 1.442695, %v3125_v56  ;;  %v3126_v12 = vsub.f32 %v15346_v31, %v3078_v34  ;;  %3257 = vadd.xlane.f32.xlu1 %v3256_v1 }
 0x48d   : > { %12875 = vpow2.f32 %v3179_v60  ;;  %v3181_v5 = vmul.f32 1.442695, %v3126_v12 }
 0x48f   : > { %v15486_v50 = vpop.eup %12871  ;;  %12877 = vpow2.f32 %v3181_v5 }
 0x490   : > { %v3081_v37 = vpop.xlane.xlu0 %3080  ;;  %v3259_v40 = vsel %vm3006_vm1, %v15486_v50, 0.0 }
 0x491   : > { %v15490_v13 = vpop.eup %12873  ;;  %v3127_v29 = vsub.f32 %v15350_v30, %v3081_v37  ;;  %3260 = vadd.xlane.f32.xlu0 %v3259_v40 }
 0x492   : > { %v3084_v32 = vpop.xlane.xlu1 %3083  ;;  %v3262_v27 = vsel %vm3006_vm1, %v15490_v13, 0.0 }
 0x493   : > { %v3183_v31 = vmul.f32 1.442695, %v3127_v29  ;;  %v3128_v21 = vsub.f32 %v15354_v58, %v3084_v32  ;;  %3263 = vadd.xlane.f32.xlu1 %v3262_v27 }
 0x495   : > { %12879 = vpow2.f32 %v3183_v31  ;;  %v3185_v4 = vmul.f32 1.442695, %v3128_v21 }
 0x497   : > { %v15496_v0 = vpop.eup %12875  ;;  %12881 = vpow2.f32 %v3185_v4 }
 0x498   : > { %v3087_v56 = vpop.xlane.xlu0 %3086  ;;  %v3265_v34 = vsel %vm3006_vm1, %v15496_v0, 0.0 }
 0x499   : > { %v15500_v1 = vpop.eup %12877  ;;  %v3129_v30 = vsub.f32 %v15358_v55, %v3087_v56  ;;  %3266 = vadd.xlane.f32.xlu0 %v3265_v34 }
 0x49a   : > { %v3090_v60 = vpop.xlane.xlu1 %3089  ;;  %v3268_v12 = vsel %vm3006_vm1, %v15500_v1, 0.0 }
 0x49b   : > { %v3187_v58 = vmul.f32 1.442695, %v3129_v30  ;;  %v3130_v5 = vsub.f32 %v15362_v49, %v3090_v60  ;;  %3269 = vadd.xlane.f32.xlu1 %v3268_v12 }
 0x49d   : > { %12883 = vpow2.f32 %v3187_v58  ;;  %v3189_v37 = vmul.f32 1.442695, %v3130_v5 }
 0x49f   : > { %v15506_v40 = vpop.eup %12879  ;;  %12885 = vpow2.f32 %v3189_v37 }
 0x4a0   : > { %v3093_v29 = vpop.xlane.xlu0 %3092  ;;  %v3271_v32 = vsel %vm3006_vm1, %v15506_v40, 0.0 }
 0x4a1   : > { %v15510_v27 = vpop.eup %12881  ;;  %v3131_v55 = vsub.f32 %v15366_v42, %v3093_v29  ;;  %3272 = vadd.xlane.f32.xlu0 %v3271_v32 }
 0x4a2   : > { %v3096_v31 = vpop.xlane.xlu1 %3095  ;;  %v3274_v21 = vsel %vm3006_vm1, %v15510_v27, 0.0 }
 0x4a3   : > { %v3191_v49 = vmul.f32 1.442695, %v3131_v55  ;;  %v3132_v4 = vsub.f32 %v15370_v15, %v3096_v31  ;;  %3275 = vadd.xlane.f32.xlu1 %v3274_v21 }
 0x4a5   : > { %12887 = vpow2.f32 %v3191_v49  ;;  %v3193_v56 = vmul.f32 1.442695, %v3132_v4 }
 0x4a7   : > { %v15516_v34 = vpop.eup %12883  ;;  %12889 = vpow2.f32 %v3193_v56 }
 0x4a8   : > { %v3099_v30 = vpop.xlane.xlu0 %3098  ;;  %v3277_v60 = vsel %vm3006_vm1, %v15516_v34, 0.0 }
 0x4a9   : > { %v15520_v12 = vpop.eup %12885  ;;  %v3133_v42 = vsub.f32 %v15374_v9, %v3099_v30  ;;  %3278 = vadd.xlane.f32.xlu0 %v3277_v60 }
 0x4aa   : > { %v3102_v58 = vpop.xlane.xlu1 %3101  ;;  %v3280_v5 = vsel %vm3006_vm1, %v15520_v12, 0.0 }
 0x4ab   : > { %v3195_v15 = vmul.f32 1.442695, %v3133_v42  ;;  %v3134_v37 = vsub.f32 %v15378_v7, %v3102_v58  ;;  %3281 = vadd.xlane.f32.xlu1 %v3280_v5 }
 0x4ad   : > { %12891 = vpow2.f32 %v3195_v15  ;;  %v3197_v29 = vmul.f32 1.442695, %v3134_v37 }
 0x4af   : > { %v15526_v32 = vpop.eup %12887  ;;  %12893 = vpow2.f32 %v3197_v29 }
 0x4b0   : > { %v3283_v55 = vsel %vm3006_vm1, %v15526_v32, 0.0 }
 0x4b1   : > { %v15530_v31 = vpop.eup %12889  ;;  %3284 = vadd.xlane.f32.xlu0 %v3283_v55 }
 0x4b2   : > { %v3286_v9 = vsel %vm3006_vm1, %v15530_v31, 0.0 }
 0x4b3   : > { %3287 = vadd.xlane.f32.xlu1 %v3286_v9 }
 0x4b7   : > { %v15534_v21 = vpop.eup %12891 }
 0x4b8   : > { %v3289_v7 = vsel %vm3006_vm1, %v15534_v21, 0.0 }
 0x4b9   : > { %v15538_v49 = vpop.eup %12893  ;;  %3290 = vadd.xlane.f32.xlu0 %v3289_v7 }
 0x4ba   : > { %v3292_v4 = vsel %vm3006_vm1, %v15538_v49, 0.0 }
 0x4bb   : > { %3293 = vadd.xlane.f32.xlu1 %v3292_v4  ;;  %v18346_v4 = vpack.c.bf16 %v14971_v59, %v14968_v19  ;;  %v18347_v19 = vpack.c.bf16 %v14996_v22, %v14993_v44  ;;  %v18348_v22 = vpack.c.bf16 %v15021_v16, %v15018_v33  ;;  %v18349_v33 = vpack.c.bf16 %v15046_v18, %v15043_v61 }
 0x4bc   : > { %v18350_v61 = vpack.c.bf16 %v15071_v36, %v15068_v63  ;;  %v18351_v63 = vpack.c.bf16 %v15096_v2, %v15093_v24  ;;  %v18352_v24 = vpack.c.bf16 %v15121_v11, %v15118_v26  ;;  %v18353_v26 = vpack.c.bf16 %v15146_v43, %v15143_v54 }
 0x4bd   : > { %v18354_v43 = vpack.c.bf16 %v15162_v47, %v15159_v48  ;;  %v18355_v48 = vld [vmem:[#allocation110_spill] sm:$0xff]  ;;  %v18356_v47 = vld [vmem:[#allocation109_spill] sm:$0xff] }
 0x4ce   : > { %v3201_v56 = vpop.xlane.xlu0 %3200 }
 0x4cf   : > { %12895 = vrcp.f32 %v3201_v56 }
 0x4d0   : > { %v3204_v30 = vpop.xlane.xlu1 %3203 }
 0x4d1   : > { %12897 = vrcp.f32 %v3204_v30 }
 0x4d6   : > { %v3207_v60 = vpop.xlane.xlu0 %3206 }
 0x4d7   : > { %12899 = vrcp.f32 %v3207_v60 }
 0x4d8   : > { %v3210_v42 = vpop.xlane.xlu1 %3209 }
 0x4d9   : > { %v12896_v58 = vpop.eup %12895  ;;  %12901 = vrcp.f32 %v3210_v42 }
 0x4da   : > { %v3327_v15 = vmul.f32 %v12896_v58, %v15386_v20 }
 0x4db   : > { %v12898_v5 = vpop.eup %12897 }
 0x4dc   : > { %v3328_v37 = vmul.f32 %v12898_v5, %v15390_v52 }
 0x4de   : > { %v3359_v29 = vpack.c.bf16 %v3328_v37, %v3327_v15  ;;  %v3213_v55 = vpop.xlane.xlu0 %3212 }
 0x4df   : > { %12903 = vrcp.f32 %v3213_v55 }
 0x4e0   : > { %11511 = vmatmul.mubr.msk.bf16.vlgmr.msra.gmra.mrb[160].mxu0 %vm3006_vm1, %v3359_v29  ;;  %v3216_v9 = vpop.xlane.xlu1 %3215 }
 0x4e1   : > { %v12900_v7 = vpop.eup %12899  ;;  %11521 = vmatpush3.bf16.msra.mxu0 %v18346_v4  ;;  %12905 = vrcp.f32 %v3216_v9  ;;  %11522 = vmatprep.mubr.msk.bf16.mxu0 %vm13573_vm0, %v18243_v14 }
 0x4e2   : > { %11532 = vmatprep.subr.bf16.mxu0 %v18243_v14  ;;  %v3329_v52 = vmul.f32 %v12900_v7, %v15396_v41 }
 0x4e3   : > { %v12902_v20 = vpop.eup %12901 }
 0x4e4   : > { %v3330_v56 = vmul.f32 %v12902_v20, %v15400_v3 }
 0x4e6   : > { %v3219_v30 = vpop.xlane.xlu0 %3218  ;;  %v3360_v60 = vpack.c.bf16 %v3330_v56, %v3329_v52 }
 0x4e7   : > { %12907 = vrcp.f32 %v3219_v30 }
 0x4e8   : > { %11517 = vmatmul.mubr.msk.bf16.vlgmr.msra.gmra.mrb[96].mxu1 %vm3006_vm1, %v3360_v60  ;;  %v3222_v42 = vpop.xlane.xlu1 %3221 }
 0x4e9   : > { %v12904_v58 = vpop.eup %12903  ;;  %11527 = vmatpush3.bf16.msra.mxu1 %v18347_v19  ;;  %12909 = vrcp.f32 %v3222_v42  ;;  %11528 = vmatprep.mubr.msk.bf16.mxu1 %vm13573_vm0, %v18243_v14 }
 0x4ea   : > { %11538 = vmatprep.subr.bf16.mxu1 %v18243_v14  ;;  %v3331_v41 = vmul.f32 %v12904_v58, %v15406_v39 }
 0x4eb   : > { %v12906_v59 = vpop.eup %12905 }
 0x4ec   : > { %v3332_v3 = vmul.f32 %v12906_v59, %v15410_v8 }
 0x4ee   : > { %v3225_v5 = vpop.xlane.xlu0 %3224  ;;  %v3361_v15 = vpack.c.bf16 %v3332_v3, %v3331_v41 }
 0x4ef   : > { %12911 = vrcp.f32 %v3225_v5 }
 0x4f0   : > { %11523 = vmatmul.mubr.msk.bf16.vlgmr.msra.gmra.mrb[164].mxu0 %vm3006_vm1, %v3361_v15  ;;  %v3228_v37 = vpop.xlane.xlu1 %3227 }
 0x4f1   : > { %v12908_v29 = vpop.eup %12907  ;;  %11533 = vmatpush3.bf16.msra.mxu0 %v18348_v22  ;;  %12913 = vrcp.f32 %v3228_v37  ;;  %11534 = vmatprep.mubr.msk.bf16.mxu0 %vm13573_vm0, %v18243_v14 }
 0x4f2   : > { %11544 = vmatprep.subr.bf16.mxu0 %v18243_v14  ;;  %v3333_v39 = vmul.f32 %v12908_v29, %v15416_v38 }
 0x4f3   : > { %v12910_v44 = vpop.eup %12909 }
 0x4f4   : > { %v3334_v8 = vmul.f32 %v12910_v44, %v15420_v62 }
 0x4f6   : > { %v3231_v55 = vpop.xlane.xlu0 %3230  ;;  %v3362_v9 = vpack.c.bf16 %v3334_v8, %v3333_v39 }
 0x4f7   : > { %12915 = vrcp.f32 %v3231_v55 }
 0x4f8   : > { %11529 = vmatmul.mubr.msk.bf16.vlgmr.msra.gmra.mrb[100].mxu1 %vm3006_vm1, %v3362_v9  ;;  %v3234_v7 = vpop.xlane.xlu1 %3233 }
 0x4f9   : > { %v12912_v4 = vpop.eup %12911  ;;  %11539 = vmatpush3.bf16.msra.mxu1 %v18349_v33  ;;  %12917 = vrcp.f32 %v3234_v7  ;;  %11540 = vmatprep.mubr.msk.bf16.mxu1 %vm13573_vm0, %v18243_v14 }
 0x4fa   : > { %11550 = vmatprep.subr.bf16.mxu1 %v18243_v14  ;;  %v3335_v38 = vmul.f32 %v12912_v4, %v15426_v57 }
 0x4fb   : > { %v12914_v16 = vpop.eup %12913 }
 0x4fc   : > { %v3336_v62 = vmul.f32 %v12914_v16, %v15430_v17  ;;  %v18357_v16 = vpack.c.bf16 %v18355_v48, %v18356_v47  ;;  %v18379_v48 = vld [vmem:[#allocation80_spill] sm:$0xff]  ;;  %v18380_v47 = vld [vmem:[#allocation79_spill] sm:$0xff] }
 0x4fe   : > { %v3237_v20 = vpop.xlane.xlu0 %3236  ;;  %v3363_v52 = vpack.c.bf16 %v3336_v62, %v3335_v38 }
 0x4ff   : > { %12919 = vrcp.f32 %v3237_v20 }
 0x500   : > { %11535 = vmatmul.mubr.msk.bf16.vlgmr.msra.gmra.mrb[168].mxu0 %vm3006_vm1, %v3363_v52  ;;  %v3240_v56 = vpop.xlane.xlu1 %3239 }
 0x501   : > { %v12916_v30 = vpop.eup %12915  ;;  %11545 = vmatpush3.bf16.msra.mxu0 %v18350_v61  ;;  %12921 = vrcp.f32 %v3240_v56  ;;  %11546 = vmatprep.mubr.msk.bf16.mxu0 %vm13573_vm0, %v18243_v14  ;;  %v18359_v61 = vld [vmem:[#allocation113_spill] sm:$0xff] }
 0x502   : > { %11556 = vmatprep.subr.bf16.mxu0 %v18243_v14  ;;  %v3337_v57 = vmul.f32 %v12916_v30, %v15436_v35  ;;  %v18358_v30 = vld [vmem:[#allocation114_spill] sm:$0xff] }
 0x503   : > { %v12918_v18 = vpop.eup %12917 }
 0x504   : > { %v3338_v17 = vmul.f32 %v12918_v18, %v15440_v51  ;;  %v18360_v18 = vpack.c.bf16 %v18358_v30, %v18359_v61  ;;  %v18391_v30 = vld [vmem:[#allocation84_spill] sm:$0xff]  ;;  %v18392_v61 = vld [vmem:[#allocation83_spill] sm:$0xff] }
 0x506   : > { %v3243_v60 = vpop.xlane.xlu0 %3242  ;;  %v3364_v42 = vpack.c.bf16 %v3338_v17, %v3337_v57 }
 0x507   : > { %12923 = vrcp.f32 %v3243_v60 }
 0x508   : > { %11541 = vmatmul.mubr.msk.bf16.vlgmr.msra.gmra.mrb[104].mxu1 %vm3006_vm1, %v3364_v42  ;;  %v3246_v58 = vpop.xlane.xlu1 %3245 }
 0x509   : > { %v12920_v19 = vpop.eup %12919  ;;  %11551 = vmatpush3.bf16.msra.mxu1 %v18351_v63  ;;  %12925 = vrcp.f32 %v3246_v58  ;;  %11552 = vmatprep.mubr.msk.bf16.mxu1 %vm13573_vm0, %v18243_v14  ;;  %v18362_v63 = vld [vmem:[#allocation117_spill] sm:$0xff] }
 0x50a   : > { %11562 = vmatprep.subr.bf16.mxu1 %v18243_v14  ;;  %v3339_v35 = vmul.f32 %v12920_v19, %v15446_v46  ;;  %v18361_v19 = vld [vmem:[#allocation118_spill] sm:$0xff] }
 0x50b   : > { %v12922_v36 = vpop.eup %12921 }
 0x50c   : > { %v3340_v51 = vmul.f32 %v12922_v36, %v15450_v28  ;;  %v18363_v36 = vpack.c.bf16 %v18361_v19, %v18362_v63  ;;  %v18401_v19 = vld [vmem:[#allocation85_spill] sm:$0xff] }
 0x50e   : > { %v3249_v59 = vpop.xlane.xlu0 %3248  ;;  %v3365_v41 = vpack.c.bf16 %v3340_v51, %v3339_v35 }
 0x50f   : > { %12927 = vrcp.f32 %v3249_v59 }
 0x510   : > { %11547 = vmatmul.mubr.msk.bf16.vlgmr.msra.gmra.mrb[172].mxu0 %vm3006_vm1, %v3365_v41  ;;  %v3252_v3 = vpop.xlane.xlu1 %3251 }
 0x511   : > { %v12924_v5 = vpop.eup %12923  ;;  %11557 = vmatpush3.bf16.msra.mxu0 %v18352_v24  ;;  %12929 = vrcp.f32 %v3252_v3  ;;  %11558 = vmatprep.mubr.msk.bf16.mxu0 %vm13573_vm0, %v18243_v14  ;;  %v18365_v24 = vld [vmem:[#allocation121_spill] sm:$0xff] }
 0x512   : > { %11568 = vmatprep.subr.bf16.mxu0 %v18243_v14  ;;  %v3341_v46 = vmul.f32 %v12924_v5, %v15456_v25  ;;  %v18364_v5 = vld [vmem:[#allocation122_spill] sm:$0xff] }
 0x513   : > { %v12926_v2 = vpop.eup %12925 }
 0x514   : > { %v3342_v28 = vmul.f32 %v12926_v2, %v15460_v6  ;;  %v18366_v2 = vpack.c.bf16 %v18364_v5, %v18365_v24  ;;  %v18412_v24 = vld [vmem:[#allocation90_spill] sm:$0xff] }
 0x516   : > { %v3255_v15 = vpop.xlane.xlu0 %3254  ;;  %v3366_v37 = vpack.c.bf16 %v3342_v28, %v3341_v46 }
 0x517   : > { %12931 = vrcp.f32 %v3255_v15 }
 0x518   : > { %11553 = vmatmul.mubr.msk.bf16.vlgmr.msra.gmra.mrb[108].mxu1 %vm3006_vm1, %v3366_v37  ;;  %v3258_v29 = vpop.xlane.xlu1 %3257 }
 0x519   : > { %v12928_v22 = vpop.eup %12927  ;;  %11563 = vmatpush3.bf16.msra.mxu1 %v18353_v26  ;;  %12933 = vrcp.f32 %v3258_v29  ;;  %11564 = vmatprep.mubr.msk.bf16.mxu1 %vm13573_vm0, %v18243_v14  ;;  %v18368_v26 = vld [vmem:[#allocation125_spill] sm:$0xff] }
 0x51a   : > { %11574 = vmatprep.subr.bf16.mxu1 %v18243_v14  ;;  %v3343_v25 = vmul.f32 %v12928_v22, %v15466_v10  ;;  %v18367_v22 = vld [vmem:[#allocation126_spill] sm:$0xff] }
 0x51b   : > { %v12930_v11 = vpop.eup %12929 }
 0x51c   : > { %v3344_v6 = vmul.f32 %v12930_v11, %v15470_v45  ;;  %v18369_v11 = vpack.c.bf16 %v18367_v22, %v18368_v26  ;;  %v18421_v22 = vld [vmem:[#allocation42_spill] sm:$0xff]  ;;  %v18422_v26 = vld [vmem:[#allocation41_spill] sm:$0xff] }
 0x51e   : > { %v3261_v44 = vpop.xlane.xlu0 %3260  ;;  %v3367_v39 = vpack.c.bf16 %v3344_v6, %v3343_v25 }
 0x51f   : > { %12935 = vrcp.f32 %v3261_v44 }
 0x520   : > { %11559 = vmatmul.mubr.msk.bf16.vlgmr.msra.gmra.mrb[176].mxu0 %vm3006_vm1, %v3367_v39  ;;  %v3264_v8 = vpop.xlane.xlu1 %3263  ;;  %v18370_v39 = vld [vmem:[#allocation76_spill] sm:$0xff] }
 0x521   : > { %v12932_v55 = vpop.eup %12931  ;;  %11569 = vmatpush3.bf16.msra.mxu0 %v18354_v43  ;;  %12937 = vrcp.f32 %v3264_v8  ;;  %11570 = vmatprep.mubr.msk.bf16.mxu0 %vm13573_vm0, %v18243_v14  ;;  %v18371_v8 = vld [vmem:[#allocation75_spill] sm:$0xff] }
 0x522   : > { %11580 = vmatprep.subr.bf16.mxu0 %v18243_v14  ;;  %v3345_v10 = vmul.f32 %v12932_v55, %v15476_v23  ;;  %v18372_v55 = vpack.c.bf16 %v18370_v39, %v18371_v8  ;;  %v18430_v8 = vld [vmem:[#allocation46_spill] sm:$0xff] }
 0x523   : > { %v12934_v54 = vpop.eup %12933 }
 0x524   : > { %v3346_v45 = vmul.f32 %v12934_v54, %v15480_v53 }
 0x526   : > { %v3267_v9 = vpop.xlane.xlu0 %3266  ;;  %v3368_v7 = vpack.c.bf16 %v3346_v45, %v3345_v10  ;;  %v18374_v45 = vld [vmem:[#allocation21_spill] sm:$0xff] }
 0x527   : > { %12939 = vrcp.f32 %v3267_v9 }
 0x528   : > { %11565 = vmatmul.mubr.msk.bf16.vlgmr.msra.gmra.mrb[112].mxu1 %vm3006_vm1, %v3368_v7  ;;  %v3270_v4 = vpop.xlane.xlu1 %3269  ;;  %v18376_v7 = vld [vmem:[#allocation78_spill] sm:$0xff] }
 0x529   : > { %v12936_v33 = vpop.eup %12935  ;;  %11575 = vmatpush3.bf16.msra.mxu1 %v18357_v16  ;;  %12941 = vrcp.f32 %v3270_v4  ;;  %11576 = vmatprep.mubr.msk.bf16.mxu1 %vm13573_vm0, %v18243_v14  ;;  %v18377_v4 = vld [vmem:[#allocation77_spill] sm:$0xff]  ;;  %v18381_v16 = vpack.c.bf16 %v18379_v48, %v18380_v47  ;;  %v18442_v48 = vld [vmem:[#allocation54_spill] sm:$0xff] }
 0x52a   : > { %11586 = vmatprep.subr.bf16.mxu1 %v18243_v14  ;;  %v3347_v53 = vmul.f32 %v12936_v33, %v15486_v50  ;;  %v18378_v33 = vpack.c.bf16 %v18376_v7, %v18377_v4  ;;  %v18439_v7 = vld [vmem:[#allocation56_spill] sm:$0xff]  ;;  %v18440_v4 = vld [vmem:[#allocation55_spill] sm:$0xff]  ;;  %v18443_v47 = vld [vmem:[#allocation53_spill] sm:$0xff] }
 0x52b   : > { %v12938_v23 = vpop.eup %12937 }
 0x52c   : > { %v3348_v38 = vmul.f32 %v12938_v23, %v15490_v13 }
 0x52e   : > { %v3273_v62 = vpop.xlane.xlu0 %3272  ;;  %v3369_v20 = vpack.c.bf16 %v3348_v38, %v3347_v53  ;;  %v18385_v53 = vld [vmem:[#allocation26_spill] sm:$0xff]  ;;  %v18386_v38 = vld [vmem:[#allocation25_spill] sm:$0xff] }
 0x52f   : > { %12943 = vrcp.f32 %v3273_v62  ;;  %v18387_v62 = vpack.c.bf16 %v18385_v53, %v18386_v38  ;;  %v18448_v53 = vld [vmem:[#allocation60_spill] sm:$0xff]  ;;  %v18449_v38 = vld [vmem:[#allocation59_spill] sm:$0xff] }
 0x530   : > { %11571 = vmatmul.mubr.msk.bf16.vlgmr.msra.gmra.mrb[180].mxu0 %vm3006_vm1, %v3369_v20  ;;  %v3276_v52 = vpop.xlane.xlu1 %3275  ;;  %v18388_v20 = vld [vmem:[#allocation82_spill] sm:$0xff] }
 0x531   : > { %v12940_v56 = vpop.eup %12939  ;;  %11581 = vmatpush3.bf16.msra.mxu0 %v18360_v18  ;;  %12945 = vrcp.f32 %v3276_v52  ;;  %11582 = vmatprep.mubr.msk.bf16.mxu0 %vm13573_vm0, %v18243_v14  ;;  %v18389_v52 = vld [vmem:[#allocation81_spill] sm:$0xff]  ;;  %v18393_v18 = vpack.c.bf16 %v18391_v30, %v18392_v61  ;;  %v18454_v30 = vld [vmem:[#allocation62_spill] sm:$0xff] }
 0x532   : > { %11592 = vmatprep.subr.bf16.mxu0 %v18243_v14  ;;  %v3349_v13 = vmul.f32 %v12940_v56, %v15496_v0  ;;  %v18390_v56 = vpack.c.bf16 %v18388_v20, %v18389_v52  ;;  %v18451_v20 = vld [vmem:[#allocation66_spill] sm:$0xff]  ;;  %v18452_v52 = vld [vmem:[#allocation65_spill] sm:$0xff] }
 0x533   : > { %v12942_v50 = vpop.eup %12941  ;;  %v18455_v61 = vld [vmem:[#allocation61_spill] sm:$0xff] }
 0x534   : > { %v3350_v57 = vmul.f32 %v12942_v50, %v15500_v1  ;;  %v18394_v50 = vld [vmem:[#allocation28_spill] sm:$0xff] }
 0x536   : > { %v3279_v17 = vpop.xlane.xlu0 %3278  ;;  %v3370_v60 = vpack.c.bf16 %v3350_v57, %v3349_v13  ;;  %v18395_v13 = vld [vmem:[#allocation27_spill] sm:$0xff] }
 0x537   : > { %12947 = vrcp.f32 %v3279_v17  ;;  %v18396_v57 = vpack.c.bf16 %v18394_v50, %v18395_v13  ;;  %v18397_v17 = vld [vmem:[#allocation30_spill] sm:$0xff]  ;;  %v18458_v13 = vld [vmem:[#allocation69_spill] sm:$0xff] }
 0x538   : > { %11577 = vmatmul.mubr.msk.bf16.vlgmr.msra.gmra.mrb[116].mxu1 %vm3006_vm1, %v3370_v60  ;;  %v3282_v42 = vpop.xlane.xlu1 %3281  ;;  %v18398_v60 = vld [vmem:[#allocation29_spill] sm:$0xff]  ;;  %v18457_v50 = vld [vmem:[#allocation70_spill] sm:$0xff] }
 0x539   : > { %v12944_v58 = vpop.eup %12943  ;;  %11587 = vmatpush3.bf16.msra.mxu1 %v18363_v36  ;;  %12949 = vrcp.f32 %v3282_v42  ;;  %11588 = vmatprep.mubr.msk.bf16.mxu1 %vm13573_vm0, %v18243_v14  ;;  %v18399_v42 = vpack.c.bf16 %v18397_v17, %v18398_v60  ;;  %v18403_v36 = vld [vmem:[#allocation88_spill] sm:$0xff]  ;;  %v18460_v17 = vld [vmem:[#allocation73_spill] sm:$0xff]  ;;  %v18461_v60 = vld [vmem:[#allocation71_spill] sm:$0xff] }
 0x53a   : > { %11598 = vmatprep.subr.bf16.mxu1 %v18243_v14  ;;  %v3351_v1 = vmul.f32 %v12944_v58, %v15506_v40  ;;  %v18400_v58 = vld [vmem:[#allocation86_spill] sm:$0xff] }
 0x53b   : > { %v12946_v0 = vpop.eup %12945  ;;  %v18402_v63 = vpack.c.bf16 %v18400_v58, %v18401_v19  ;;  %v18463_v58 = vld [vmem:[#allocation92_spill] sm:$0xff]  ;;  %v18464_v19 = vld [vmem:[#allocation91_spill] sm:$0xff] }
 0x53c   : > { %v3352_v35 = vmul.f32 %v12946_v0, %v15510_v27  ;;  %v18404_v0 = vld [vmem:[#allocation87_spill] sm:$0xff] }
 0x53e   : > { %v3285_v51 = vpop.xlane.xlu0 %3284  ;;  %v3371_v59 = vpack.c.bf16 %v3352_v35, %v3351_v1  ;;  %v18405_v1 = vpack.c.bf16 %v18403_v36, %v18404_v0  ;;  %v18406_v35 = vld [vmem:[#allocation32_spill] sm:$0xff]  ;;  %v18466_v36 = vld [vmem:[#allocation74_spill] sm:$0xff] }
 0x53f   : > { %12951 = vrcp.f32 %v3285_v51  ;;  %v18407_v51 = vld [vmem:[#allocation31_spill] sm:$0xff]  ;;  %v18467_v0 = vld [vmem:[#allocation72_spill] sm:$0xff] }
 0x540   : > { %11583 = vmatmul.mubr.msk.bf16.vlgmr.msra.gmra.mrb[184].mxu0 %vm3006_vm1, %v3371_v59  ;;  %v3288_v41 = vpop.xlane.xlu1 %3287  ;;  %v18408_v59 = vpack.c.bf16 %v18406_v35, %v18407_v51  ;;  %v18469_v35 = vld [vmem:[#allocation94_spill] sm:$0xff]  ;;  %v18470_v51 = vld [vmem:[#allocation93_spill] sm:$0xff] }
 0x541   : > { %v12948_v3 = vpop.eup %12947  ;;  %11593 = vmatpush3.bf16.msra.mxu0 %v18366_v2  ;;  %12953 = vrcp.f32 %v3288_v41  ;;  %11594 = vmatprep.mubr.msk.bf16.mxu0 %vm13573_vm0, %v18243_v14  ;;  %v18409_v41 = vld [vmem:[#allocation34_spill] sm:$0xff]  ;;  %v18413_v2 = vld [vmem:[#allocation89_spill] sm:$0xff] }
 0x542   : > { %11604 = vmatprep.subr.bf16.mxu0 %v18243_v14  ;;  %v3353_v27 = vmul.f32 %v12948_v3, %v15516_v34  ;;  %v18410_v3 = vld [vmem:[#allocation33_spill] sm:$0xff] }
 0x543   : > { %v12950_v40 = vpop.eup %12949  ;;  %v18411_v5 = vpack.c.bf16 %v18409_v41, %v18410_v3 }
 0x544   : > { %v3354_v46 = vmul.f32 %v12950_v40, %v15520_v12  ;;  %v18414_v40 = vpack.c.bf16 %v18412_v24, %v18413_v2 }
 0x546   : > { %v3291_v28 = vpop.xlane.xlu0 %3290  ;;  %v3372_v15 = vpack.c.bf16 %v3354_v46, %v3353_v27  ;;  %v18415_v27 = vld [vmem:[#allocation40_spill] sm:$0xff]  ;;  %v18416_v46 = vld [vmem:[#allocation39_spill] sm:$0xff] }
 0x547   : > { %12955 = vrcp.f32 %v3291_v28  ;;  %v18417_v28 = vpack.c.bf16 %v18415_v27, %v18416_v46 }
 0x548   : > { %11589 = vmatmul.mubr.msk.bf16.vlgmr.msra.gmra.mrb[120].mxu1 %vm3006_vm1, %v3372_v15  ;;  %v3294_v37 = vpop.xlane.xlu1 %3293  ;;  %v18418_v15 = vld [vmem:[#allocation38_spill] sm:$0xff] }
 0x549   : > { %v12952_v29 = vpop.eup %12951  ;;  %11599 = vmatpush3.bf16.msra.mxu1 %v18369_v11  ;;  %12957 = vrcp.f32 %v3294_v37  ;;  %11600 = vmatprep.mubr.msk.bf16.mxu1 %vm13573_vm0, %v18243_v14  ;;  %v18419_v37 = vld [vmem:[#allocation37_spill] sm:$0xff]  ;;  %v18423_v11 = vpack.c.bf16 %v18421_v22, %v18422_v26 }
 0x54a   : > { %11610 = vmatprep.subr.bf16.mxu1 %v18243_v14  ;;  %v3355_v12 = vmul.f32 %v12952_v29, %v15526_v32  ;;  %v18420_v29 = vpack.c.bf16 %v18418_v15, %v18419_v37 }
 0x54b   : > { %v12954_v34 = vpop.eup %12953 }
 0x54c   : > { %v3356_v25 = vmul.f32 %v12954_v34, %v15530_v31  ;;  %v18373_v31 = vld [vmem:[#allocation22_spill] sm:$0xff]  ;;  %v18424_v34 = vld [vmem:[#allocation44_spill] sm:$0xff] }
 0x54d   : > { %v18375_v9 = vpack.c.bf16 %v18373_v31, %v18374_v45  ;;  %v18436_v31 = vld [vmem:[#allocation52_spill] sm:$0xff]  ;;  %v18437_v45 = vld [vmem:[#allocation51_spill] sm:$0xff] }
 0x54e   : > { %v3373_v6 = vpack.c.bf16 %v3356_v25, %v3355_v12  ;;  %v18425_v12 = vld [vmem:[#allocation43_spill] sm:$0xff] }
 0x54f   : > { %v18426_v25 = vpack.c.bf16 %v18424_v34, %v18425_v12 }
 0x550   : > { %11595 = vmatmul.mubr.msk.bf16.vlgmr.msra.gmra.mrb[188].mxu0 %vm3006_vm1, %v3373_v6  ;;  %v18427_v6 = vld [vmem:[#allocation48_spill] sm:$0xff] }
 0x551   : > { %v12956_v44 = vpop.eup %12955  ;;  %11605 = vmatpush3.bf16.xpose.msra.mxu0 %v18372_v55  ;;  %11606 = vmatprep.mubr.msk.bf16.mxu0 %vm13573_vm0, %v18243_v14  ;;  %v18431_v55 = vld [vmem:[#allocation45_spill] sm:$0xff] }
 0x552   : > { %11616 = vmatprep.subr.bf16.mxu0 %v18243_v14  ;;  %v3357_v54 = vmul.f32 %v12956_v44, %v15534_v21  ;;  %v18382_v21 = vld [vmem:[#allocation24_spill] sm:$0xff]  ;;  %v18428_v44 = vld [vmem:[#allocation47_spill] sm:$0xff] }
 0x553   : > { %v12958_v43 = vpop.eup %12957  ;;  %v18429_v39 = vpack.c.bf16 %v18427_v6, %v18428_v44 }
 0x554   : > { %v3358_v32 = vmul.f32 %v12958_v43, %v15538_v49  ;;  %v18383_v49 = vld [vmem:[#allocation23_spill] sm:$0xff]  ;;  %v18432_v43 = vpack.c.bf16 %v18430_v8, %v18431_v55 }
 0x555   : > { %v18384_v23 = vpack.c.bf16 %v18382_v21, %v18383_v49  ;;  %v18445_v21 = vld [vmem:[#allocation58_spill] sm:$0xff]  ;;  %v18446_v49 = vld [vmem:[#allocation57_spill] sm:$0xff] }
 0x556   : > { %v3374_v10 = vpack.c.bf16 %v3358_v32, %v3357_v54  ;;  %v18433_v54 = vld [vmem:[#allocation50_spill] sm:$0xff]  ;;  %v18434_v32 = vld [vmem:[#allocation49_spill] sm:$0xff] }
 0x558   : > { %11601 = vmatmul.mubr.msk.bf16.vlgmr.msra.gmra.mrb[124].mxu1 %vm3006_vm1, %v3374_v10  ;;  %11607 = vmatmul.mubr.bf16.vlgmr.msra.gmra.mrb[192].mxu0 %v18375_v9  ;;  %v18435_v10 = vpack.c.bf16 %v18433_v54, %v18434_v32  ;;  %v18438_v9 = vpack.c.bf16 %v18436_v31, %v18437_v45 }
 0x559   : > { %11611 = vmatpush3.bf16.xpose.msra.mxu1 %v18378_v33  ;;  %11617 = vmatpush3.bf16.xpose.msra.mxu0 %v18381_v16  ;;  %v18441_v33 = vpack.c.bf16 %v18439_v7, %v18440_v4  ;;  %v18444_v16 = vpack.c.bf16 %v18442_v48, %v18443_v47 }
 0x55a   : > { %11612 = vmatprep.mubr.msk.bf16.mxu1 %vm13573_vm0, %v18243_v14  ;;  %11618 = vmatprep.mubr.msk.bf16.mxu0 %vm13573_vm0, %v18243_v14 }
 0x55b   : > { %11622 = vmatprep.subr.bf16.mxu1 %v18243_v14  ;;  %11628 = vmatprep.subr.bf16.mxu0 %v18243_v14 }
 0x560   : > { %11613 = vmatmul.mubr.bf16.vlgmr.msra.gmra.mrb[128].mxu1 %v18384_v23  ;;  %11619 = vmatmul.mubr.bf16.vlgmr.msra.gmra.mrb[196].mxu0 %v18387_v62  ;;  %v18447_v23 = vpack.c.bf16 %v18445_v21, %v18446_v49  ;;  %v18450_v62 = vpack.c.bf16 %v18448_v53, %v18449_v38 }
 0x561   : > { %11623 = vmatpush3.bf16.xpose.msra.mxu1 %v18390_v56  ;;  %11629 = vmatpush3.bf16.xpose.msra.mxu0 %v18393_v18  ;;  %v18453_v56 = vpack.c.bf16 %v18451_v20, %v18452_v52  ;;  %v18456_v18 = vpack.c.bf16 %v18454_v30, %v18455_v61 }
 0x562   : > { %11624 = vmatprep.mubr.msk.bf16.mxu1 %vm13573_vm0, %v18243_v14  ;;  %11630 = vmatprep.mubr.msk.bf16.mxu0 %vm13573_vm0, %v18243_v14 }
 0x563   : > { %11634 = vmatprep.subr.bf16.mxu1 %v18243_v14  ;;  %11640 = vmatprep.subr.bf16.mxu0 %v18243_v14 }
 0x568   : > { %11625 = vmatmul.mubr.bf16.vlgmr.msra.gmra.mrb[132].mxu1 %v18396_v57  ;;  %11631 = vmatmul.mubr.bf16.vlgmr.msra.gmra.mrb[200].mxu0 %v18399_v42  ;;  %v18459_v57 = vpack.c.bf16 %v18457_v50, %v18458_v13  ;;  %v18462_v42 = vpack.c.bf16 %v18460_v17, %v18461_v60 }
 0x569   : > { %11635 = vmatpush3.bf16.xpose.msra.mxu1 %v18402_v63  ;;  %11641 = vmatpush3.bf16.xpose.msra.mxu0 %v18405_v1  ;;  %v18465_v63 = vpack.c.bf16 %v18463_v58, %v18464_v19  ;;  %v18468_v1 = vpack.c.bf16 %v18466_v36, %v18467_v0 }
 0x56a   : > { %11636 = vmatprep.mubr.msk.bf16.mxu1 %vm13573_vm0, %v18243_v14  ;;  %11642 = vmatprep.mubr.msk.bf16.mxu0 %vm13573_vm0, %v18243_v14 }
 0x56b   : > { %11646 = vmatprep.subr.bf16.mxu1 %v18243_v14  ;;  %11652 = vmatprep.subr.bf16.mxu0 %v18243_v14 }
 0x570   : > { %11637 = vmatmul.mubr.bf16.vlgmr.msra.gmra.mrb[136].mxu1 %v18408_v59  ;;  %11643 = vmatmul.mubr.bf16.vlgmr.msra.gmra.mrb[204].mxu0 %v18411_v5  ;;  %v18471_v59 = vpack.c.bf16 %v18469_v35, %v18470_v51 }
 0x571   : > { %11647 = vmatpush3.bf16.xpose.msra.mxu1 %v18414_v40  ;;  %11653 = vmatpush3.bf16.xpose.msra.mxu0 %v18417_v28 }
 0x572   : > { %11648 = vmatprep.mubr.msk.bf16.mxu1 %vm13573_vm0, %v18243_v14  ;;  %11654 = vmatprep.mubr.msk.bf16.mxu0 %vm13573_vm0, %v18243_v14 }
 0x573   : > { %11658 = vmatprep.subr.bf16.mxu1 %v18243_v14  ;;  %11664 = vmatprep.subr.bf16.mxu0 %v18243_v14 }
 0x578   : > { %11649 = vmatmul.mubr.bf16.vlgmr.msra.gmra.mrb[140].mxu1 %v18420_v29  ;;  %11655 = vmatmul.mubr.bf16.vlgmr.msra.gmra.mrb[208].mxu0 %v18423_v11 }
 0x579   : > { %11659 = vmatpush3.bf16.xpose.msra.mxu1 %v18426_v25  ;;  %11665 = vmatpush3.bf16.xpose.msra.mxu0 %v18429_v39 }
 0x57a   : > { %11660 = vmatprep.mubr.msk.bf16.mxu1 %vm13573_vm0, %v18243_v14  ;;  %11666 = vmatprep.mubr.msk.bf16.mxu0 %vm13573_vm0, %v18243_v14 }
 0x57b   : > { %11670 = vmatprep.subr.bf16.mxu1 %v18243_v14  ;;  %11676 = vmatprep.subr.bf16.mxu0 %v18243_v14 }
 0x580   : > { %11661 = vmatmul.mubr.bf16.vlgmr.msra.gmra.mrb[144].mxu1 %v18432_v43  ;;  %11667 = vmatmul.mubr.bf16.vlgmr.msra.gmra.mrb[212].mxu0 %v18435_v10 }
 0x581   : > { %11671 = vmatpush3.bf16.xpose.msra.mxu1 %v18438_v9  ;;  %11677 = vmatpush3.bf16.xpose.msra.mxu0 %v18441_v33 }
 0x582   : > { %11672 = vmatprep.mubr.msk.bf16.mxu1 %vm13573_vm0, %v18243_v14  ;;  %11678 = vmatprep.mubr.msk.bf16.mxu0 %vm13573_vm0, %v18243_v14 }
 0x583   : > { %11682 = vmatprep.subr.bf16.mxu1 %v18243_v14  ;;  %11688 = vmatprep.subr.bf16.mxu0 %v18243_v14 }
 0x588   : > { %11673 = vmatmul.mubr.bf16.vlgmr.msra.gmra.mrb[148].mxu1 %v18444_v16  ;;  %11679 = vmatmul.mubr.bf16.vlgmr.msra.gmra.mrb[216].mxu0 %v18447_v23 }
 0x589   : > { %11683 = vmatpush3.bf16.xpose.msra.mxu1 %v18450_v62  ;;  %11689 = vmatpush3.bf16.xpose.msra.mxu0 %v18453_v56 }
 0x58a   : > { %11684 = vmatprep.mubr.msk.bf16.mxu1 %vm13573_vm0, %v18243_v14  ;;  %11690 = vmatprep.mubr.msk.bf16.mxu0 %vm13573_vm0, %v18243_v14 }
 0x58b   : > { %11694 = vmatprep.subr.bf16.mxu1 %v18243_v14  ;;  %11700 = vmatprep.subr.bf16.mxu0 %v18243_v14 }
 0x590   : > { %11685 = vmatmul.mubr.bf16.vlgmr.msra.gmra.mrb[152].mxu1 %v18456_v18  ;;  %11691 = vmatmul.mubr.bf16.vlgmr.msra.gmra.mrb[220].mxu0 %v18459_v57 }
 0x591   : > { %11695 = vmatpush3.bf16.xpose.msra.mxu1 %v18462_v42  ;;  %11701 = vmatpush3.bf16.msra.mxu0 %v18465_v63 }
 0x592   : > { %11696 = vmatprep.mubr.msk.bf16.mxu1 %vm13573_vm0, %v18243_v14  ;;  %11706 = vmatprep.subr.bf16.mxu1 %v18243_v14 }
 0x593   : > { %11702 = vmatprep.mubr.msk.bf16.mxu0 %vm13573_vm0, %v18243_v14  ;;  %11712 = vmatprep.subr.bf16.mxu0 %v18243_v14 }
 0x598   : > { %11697 = vmatmul.mubr.bf16.vlgmr.msra.gmra.mrb[156].mxu1 %v18468_v1 }
 0x599   : > { %11707 = vmatpush3.bf16.msra.mxu1 %v18471_v59  ;;  %11708 = vmatprep.mubr.msk.bf16.mxu1 %vm13573_vm0, %v18243_v14 }
 0x59a   : > { %11718 = vmatprep.subr.bf16.mxu1 %v18243_v14 }
 0x5b3   : > { %v15830_v41 = vpop.f32.mrb[160].mxu0 }
 0x5b4   : > { %v11512_v3 = vpop.f32.mrb[161].mxu0 }
 0x5b5   : > { %v15832_v5 = vpop.f32.mrb[162].mxu0 }
 0x5b6   : > { %v11513_v2 = vpop.f32.mrb[163].mxu0 }
 0x5bb   : > { %v15836_v40 = vpop.f32.mrb[96].mxu1 }
 0x5bc   : > { %v11518_v27 = vpop.f32.mrb[97].mxu1 }
 0x5bd   : > { %v15838_v46 = vpop.f32.mrb[98].mxu1 }
 0x5be   : > { %v11519_v15 = vpop.f32.mrb[99].mxu1 }
 0x5c3   : > { %v15842_v37 = vpop.f32.mrb[164].mxu0 }
 0x5c4   : > { %v11524_v29 = vpop.f32.mrb[165].mxu0 }
 0x5c5   : > { %v15844_v22 = vpop.f32.mrb[166].mxu0 }
 0x5c6   : > { %v11525_v11 = vpop.f32.mrb[167].mxu0 }
 0x5cb   : > { %v15848_v34 = vpop.f32.mrb[100].mxu1 }
 0x5cc   : > { %v11530_v12 = vpop.f32.mrb[101].mxu1 }
 0x5cd   : > { %v15850_v25 = vpop.f32.mrb[102].mxu1 }
 0x5ce   : > { %v11531_v44 = vpop.f32.mrb[103].mxu1 }
 0x5d3   : > { %v15854_v39 = vpop.f32.mrb[168].mxu0 }
 0x5d4   : > { %v11536_v8 = vpop.f32.mrb[169].mxu0 }
 0x5d5   : > { %v15856_v55 = vpop.f32.mrb[170].mxu0 }
 0x5d6   : > { %v11537_v54 = vpop.f32.mrb[171].mxu0 }
 0x5db   : > { %v15860_v32 = vpop.f32.mrb[104].mxu1 }
 0x5dc   : > { %v11542_v10 = vpop.f32.mrb[105].mxu1 }
 0x5dd   : > { %v15862_v31 = vpop.f32.mrb[106].mxu1 }
 0x5de   : > { %v11543_v9 = vpop.f32.mrb[107].mxu1 }
 0x5e3   : > { %v15866_v7 = vpop.f32.mrb[172].mxu0 }
 0x5e4   : > { %v11548_v4 = vpop.f32.mrb[173].mxu0 }
 0x5e5   : > { %v15868_v33 = vpop.f32.mrb[174].mxu0 }
 0x5e6   : > { %v11549_v47 = vpop.f32.mrb[175].mxu0 }
 0x5eb   : > { %v15872_v16 = vpop.f32.mrb[108].mxu1 }
 0x5ec   : > { %v11554_v21 = vpop.f32.mrb[109].mxu1 }
 0x5ed   : > { %v15874_v49 = vpop.f32.mrb[110].mxu1 }
 0x5ee   : > { %v11555_v53 = vpop.f32.mrb[111].mxu1 }
 0x5f3   : > { %v15878_v38 = vpop.f32.mrb[176].mxu0 }
 0x5f4   : > { %18472 = vst [vmem:[#allocation110_spill] sm:$0xff] %v15878_v38  ;;  %v11560_v62 = vpop.f32.mrb[177].mxu0 }
 0x5f5   : > { %v15880_v20 = vpop.f32.mrb[178].mxu0 }
 0x5f6   : > { %v11561_v56 = vpop.f32.mrb[179].mxu0 }
 0x5fb   : > { %v15884_v30 = vpop.f32.mrb[112].mxu1 }
 0x5fc   : > { %18473 = vst [vmem:[#allocation109_spill] sm:$0xff] %v15884_v30  ;;  %v11566_v61 = vpop.f32.mrb[113].mxu1 }
 0x5fd   : > { %v15886_v18 = vpop.f32.mrb[114].mxu1 }
 0x5fe   : > { %18474 = vst [vmem:[#allocation114_spill] sm:$0xff] %v15886_v18  ;;  %v11567_v13 = vpop.f32.mrb[115].mxu1 }
 0x603   : > { %v15890_v57 = vpop.f32.mrb[180].mxu0 }
 0x604   : > { %18475 = vst [vmem:[#allocation113_spill] sm:$0xff] %v15890_v57  ;;  %v11572_v17 = vpop.f32.mrb[181].mxu0 }
 0x605   : > { %v15892_v60 = vpop.f32.mrb[182].mxu0 }
 0x606   : > { %18476 = vst [vmem:[#allocation118_spill] sm:$0xff] %v15892_v60  ;;  %v11573_v58 = vpop.f32.mrb[183].mxu0 }
 0x60b   : > { %v15896_v19 = vpop.f32.mrb[116].mxu1 }
 0x60c   : > { %18477 = vst [vmem:[#allocation117_spill] sm:$0xff] %v15896_v19  ;;  %v11578_v63 = vpop.f32.mrb[117].mxu1 }
 0x60d   : > { %v15898_v36 = vpop.f32.mrb[118].mxu1 }
 0x60e   : > { %18478 = vst [vmem:[#allocation122_spill] sm:$0xff] %v15898_v36  ;;  %v11579_v1 = vpop.f32.mrb[119].mxu1 }
 0x613   : > { %v15902_v35 = vpop.f32.mrb[184].mxu0 }
 0x614   : > { %18479 = vst [vmem:[#allocation121_spill] sm:$0xff] %v15902_v35  ;;  %v11584_v51 = vpop.f32.mrb[185].mxu0 }
 0x615   : > { %v15904_v59 = vpop.f32.mrb[186].mxu0 }
 0x616   : > { %18480 = vst [vmem:[#allocation126_spill] sm:$0xff] %v15904_v59  ;;  %v11585_v2 = vpop.f32.mrb[187].mxu0 }
 0x61b   : > { %v15908_v27 = vpop.f32.mrb[120].mxu1 }
 0x61c   : > { %18481 = vst [vmem:[#allocation125_spill] sm:$0xff] %v15908_v27  ;;  %v11590_v15 = vpop.f32.mrb[121].mxu1 }
 0x61d   : > { %v15910_v29 = vpop.f32.mrb[122].mxu1 }
 0x61e   : > { %18482 = vst [vmem:[#allocation76_spill] sm:$0xff] %v15910_v29  ;;  %v11591_v12 = vpop.f32.mrb[123].mxu1 }
 0x623   : > { %v15914_v44 = vpop.f32.mrb[188].mxu0 }
 0x624   : > { %18483 = vst [vmem:[#allocation75_spill] sm:$0xff] %v15914_v44  ;;  %v11596_v8 = vpop.f32.mrb[189].mxu0 }
 0x625   : > { %v15916_v54 = vpop.f32.mrb[190].mxu0 }
 0x626   : > { %18484 = vst [vmem:[#allocation22_spill] sm:$0xff] %v15916_v54  ;;  %v11597_v9 = vpop.f32.mrb[191].mxu0 }
 0x62b   : > { %v15920_v4 = vpop.f32.mrb[124].mxu1  ;;  %v4161_v47 = vpop.f32.mrb[192].mxu0 }
 0x62c   : > { %18485 = vst [vmem:[#allocation21_spill] sm:$0xff] %v15920_v4  ;;  %v15922_v21 = vmul.f32 0.088388346, %v4161_v47  ;;  %v11602_v53 = vpop.f32.mrb[125].mxu1  ;;  %v11608_v62 = vpop.f32.mrb[193].mxu0 }
 0x62d   : > { %v15924_v56 = vpop.f32.mrb[126].mxu1  ;;  %v4164_v61 = vpop.f32.mrb[194].mxu0 }
 0x62e   : > { %18486 = vst [vmem:[#allocation78_spill] sm:$0xff] %v15924_v56  ;;  %v15928_v17 = vmul.f32 0.088388346, %v4164_v61  ;;  %v11603_v58 = vpop.f32.mrb[127].mxu1  ;;  %v11609_v63 = vpop.f32.mrb[195].mxu0  ;;  %v4815_v1 = vsel %vm3006_vm1, %v15922_v21, -inf }
 0x62f   : > { %4816 = vmax.xlane.f32.xlu0 %v4815_v1 }
 0x630   : > { %v4818_v51 = vsel %vm3006_vm1, %v15928_v17, -inf }
 0x631   : > { %4819 = vmax.xlane.f32.xlu1 %v4818_v51 }
 0x633   : > { %v4202_v2 = vpop.f32.mrb[128].mxu1  ;;  %v4243_v15 = vpop.f32.mrb[196].mxu0 }
 0x634   : > { %v15934_v12 = vmul.f32 0.088388346, %v4202_v2  ;;  %v11614_v8 = vpop.f32.mrb[129].mxu1  ;;  %v11620_v9 = vpop.f32.mrb[197].mxu0  ;;  %v15938_v63 = vmul.f32 0.088388346, %v4243_v15 }
 0x635   : > { %v4205_v47 = vpop.f32.mrb[130].mxu1  ;;  %v4246_v53 = vpop.f32.mrb[198].mxu0 }
 0x636   : > { %v15936_v62 = vmul.f32 0.088388346, %v4205_v47  ;;  %v11615_v61 = vpop.f32.mrb[131].mxu1  ;;  %v11621_v58 = vpop.f32.mrb[199].mxu0  ;;  %v4821_v1 = vsel %vm3006_vm1, %v15934_v12, -inf  ;;  %v4827_v8 = vsel %vm3006_vm1, %v15938_v63, -inf }
 0x637   : > { %v15942_v13 = vmul.f32 0.088388346, %v4246_v53  ;;  %4822 = vmax.xlane.f32.xlu0 %v4821_v1 }
 0x638   : > { %v4824_v51 = vsel %vm3006_vm1, %v15936_v62, -inf }
 0x639   : > { %4825 = vmax.xlane.f32.xlu1 %v4824_v51  ;;  %v4830_v58 = vsel %vm3006_vm1, %v15942_v13, -inf }
 0x63b   : > { %v4325_v2 = vpop.f32.mrb[200].mxu0  ;;  %v4284_v9 = vpop.f32.mrb[132].mxu1  ;;  %4828 = vmax.xlane.f32.xlu0 %v4827_v8 }
 0x63c   : > { %v15948_v47 = vmul.f32 0.088388346, %v4284_v9  ;;  %v11626_v15 = vpop.f32.mrb[133].mxu1  ;;  %v11632_v61 = vpop.f32.mrb[201].mxu0  ;;  %v15954_v3 = vmul.f32 0.088388346, %v4325_v2 }
 0x63d   : > { %v4328_v53 = vpop.f32.mrb[202].mxu0  ;;  %4831 = vmax.xlane.f32.xlu1 %v4830_v58  ;;  %v4287_v1 = vpop.f32.mrb[134].mxu1 }
 0x63e   : > { %v15952_v10 = vmul.f32 0.088388346, %v4287_v1  ;;  %v11627_v11 = vpop.f32.mrb[135].mxu1  ;;  %v11633_v51 = vpop.f32.mrb[203].mxu0  ;;  %v4833_v0 = vsel %vm3006_vm1, %v15948_v47, -inf  ;;  %v4839_v61 = vsel %vm3006_vm1, %v15954_v3, -inf }
 0x63f   : > { %v15958_v8 = vmul.f32 0.088388346, %v4328_v53  ;;  %4834 = vmax.xlane.f32.xlu0 %v4833_v0 }
 0x640   : > { %v4836_v9 = vsel %vm3006_vm1, %v15952_v10, -inf }
 0x641   : > { %4837 = vmax.xlane.f32.xlu1 %v4836_v9  ;;  %v4842_v51 = vsel %vm3006_vm1, %v15958_v8, -inf }
 0x643   : > { %v4407_v15 = vpop.f32.mrb[204].mxu0  ;;  %v4366_v58 = vpop.f32.mrb[136].mxu1  ;;  %4840 = vmax.xlane.f32.xlu0 %v4839_v61 }
 0x644   : > { %v15964_v11 = vmul.f32 0.088388346, %v4366_v58  ;;  %v11638_v2 = vpop.f32.mrb[137].mxu1  ;;  %v11644_v1 = vpop.f32.mrb[205].mxu0  ;;  %v15970_v52 = vmul.f32 0.088388346, %v4407_v15 }
 0x645   : > { %v4410_v53 = vpop.f32.mrb[206].mxu0  ;;  %4843 = vmax.xlane.f32.xlu1 %v4842_v51  ;;  %v4369_v0 = vpop.f32.mrb[138].mxu1 }
 0x646   : > { %v15968_v42 = vmul.f32 0.088388346, %v4369_v0  ;;  %v11639_v50 = vpop.f32.mrb[139].mxu1  ;;  %v11645_v9 = vpop.f32.mrb[207].mxu0  ;;  %v4845_v23 = vsel %vm3006_vm1, %v15964_v11, -inf  ;;  %v4851_v1 = vsel %vm3006_vm1, %v15970_v52, -inf }
 0x647   : > { %v15974_v61 = vmul.f32 0.088388346, %v4410_v53  ;;  %4846 = vmax.xlane.f32.xlu0 %v4845_v23 }
 0x648   : > { %v4848_v58 = vsel %vm3006_vm1, %v15968_v42, -inf }
 0x649   : > { %4849 = vmax.xlane.f32.xlu1 %v4848_v58  ;;  %v4854_v9 = vsel %vm3006_vm1, %v15974_v61, -inf }
 0x64b   : > { %v4489_v2 = vpop.f32.mrb[208].mxu0  ;;  %v4448_v51 = vpop.f32.mrb[140].mxu1  ;;  %4852 = vmax.xlane.f32.xlu0 %v4851_v1 }
 0x64c   : > { %v15980_v50 = vmul.f32 0.088388346, %v4448_v51  ;;  %v11650_v15 = vpop.f32.mrb[141].mxu1  ;;  %v11656_v0 = vpop.f32.mrb[209].mxu0  ;;  %v15986_v43 = vmul.f32 0.088388346, %v4489_v2 }
 0x64d   : > { %v4492_v53 = vpop.f32.mrb[210].mxu0  ;;  %4855 = vmax.xlane.f32.xlu1 %v4854_v9  ;;  %v4451_v23 = vpop.f32.mrb[142].mxu1 }
 0x64e   : > { %v15984_v48 = vmul.f32 0.088388346, %v4451_v23  ;;  %v11651_v45 = vpop.f32.mrb[143].mxu1  ;;  %v11657_v58 = vpop.f32.mrb[211].mxu0  ;;  %v4857_v6 = vsel %vm3006_vm1, %v15980_v50, -inf  ;;  %v4863_v0 = vsel %vm3006_vm1, %v15986_v43, -inf }
 0x64f   : > { %v15990_v1 = vmul.f32 0.088388346, %v4492_v53  ;;  %4858 = vmax.xlane.f32.xlu0 %v4857_v6 }
 0x650   : > { %v4860_v51 = vsel %vm3006_vm1, %v15984_v48, -inf }
 0x651   : > { %4861 = vmax.xlane.f32.xlu1 %v4860_v51  ;;  %v4866_v58 = vsel %vm3006_vm1, %v15990_v1, -inf }
 0x653   : > { %v4571_v15 = vpop.f32.mrb[212].mxu0  ;;  %v4530_v9 = vpop.f32.mrb[144].mxu1  ;;  %4864 = vmax.xlane.f32.xlu0 %v4863_v0 }
 0x654   : > { %v15996_v45 = vmul.f32 0.088388346, %v4530_v9  ;;  %v11662_v2 = vpop.f32.mrb[145].mxu1  ;;  %v11668_v23 = vpop.f32.mrb[213].mxu0  ;;  %v16002_v24 = vmul.f32 0.088388346, %v4571_v15 }
 0x655   : > { %v4574_v53 = vpop.f32.mrb[214].mxu0  ;;  %4867 = vmax.xlane.f32.xlu1 %v4866_v58  ;;  %v4533_v6 = vpop.f32.mrb[146].mxu1 }
 0x656   : > { %v16000_v26 = vmul.f32 0.088388346, %v4533_v6  ;;  %v11663_v28 = vpop.f32.mrb[147].mxu1  ;;  %v11669_v51 = vpop.f32.mrb[215].mxu0  ;;  %v4869_v4 = vsel %vm3006_vm1, %v15996_v45, -inf  ;;  %v4875_v23 = vsel %vm3006_vm1, %v16002_v24, -inf }
 0x657   : > { %v16006_v0 = vmul.f32 0.088388346, %v4574_v53  ;;  %4870 = vmax.xlane.f32.xlu0 %v4869_v4 }
 0x658   : > { %v4872_v9 = vsel %vm3006_vm1, %v16000_v26, -inf }
 0x659   : > { %4873 = vmax.xlane.f32.xlu1 %v4872_v9  ;;  %v4878_v51 = vsel %vm3006_vm1, %v16006_v0, -inf }
 0x65b   : > { %v4653_v2 = vpop.f32.mrb[216].mxu0  ;;  %v4612_v58 = vpop.f32.mrb[148].mxu1  ;;  %4876 = vmax.xlane.f32.xlu0 %v4875_v23 }
 0x65c   : > { %v16012_v28 = vmul.f32 0.088388346, %v4612_v58  ;;  %v11674_v15 = vpop.f32.mrb[149].mxu1  ;;  %v11680_v6 = vpop.f32.mrb[217].mxu0 }
 0x65d   : > { %v4656_v53 = vpop.f32.mrb[218].mxu0  ;;  %4879 = vmax.xlane.f32.xlu1 %v4878_v51  ;;  %v4615_v4 = vpop.f32.mrb[150].mxu1 }
 0x65e   : > { %v16016_v56 = vmul.f32 0.088388346, %v4615_v4  ;;  %v11675_v44 = vpop.f32.mrb[151].mxu1  ;;  %v11681_v9 = vpop.f32.mrb[219].mxu0  ;;  %v4881_v54 = vsel %vm3006_vm1, %v16012_v28, -inf }
 0x65f   : > { %4882 = vmax.xlane.f32.xlu0 %v4881_v54 }
 0x660   : > { %v4884_v23 = vsel %vm3006_vm1, %v16016_v56, -inf }
 0x661   : > { %4885 = vmax.xlane.f32.xlu1 %v4884_v23 }
 0x663   : > { %v4694_v58 = vpop.f32.mrb[152].mxu1  ;;  %v16022_v15 = vpop.f32.mrb[220].mxu0 }
 0x664   : > { %v11686_v6 = vpop.f32.mrb[153].mxu1  ;;  %v11692_v27 = vpop.f32.mrb[221].mxu0 }
 0x665   : > { %v4697_v29 = vpop.f32.mrb[154].mxu1  ;;  %v16024_v51 = vpop.f32.mrb[222].mxu0 }
 0x666   : > { %v11687_v4 = vpop.f32.mrb[155].mxu1  ;;  %v11693_v35 = vpop.f32.mrb[223].mxu0 }
 0x66b   : > { %v16026_v44 = vpop.f32.mrb[156].mxu1 }
 0x66c   : > { %v11698_v9 = vpop.f32.mrb[157].mxu1 }
 0x66d   : > { %v16028_v59 = vpop.f32.mrb[158].mxu1 }
 0x66e   : > { %v11699_v54 = vpop.f32.mrb[159].mxu1 }
 0x6bc   : > { %v4817_v19 = vpop.xlane.xlu0 %4816 }
 0x6bd   : > { %v4911_v36 = vsub.f32 %v15922_v21, %v4817_v19 }
 0x6be   : > { %v4820_v23 = vpop.xlane.xlu1 %4819 }
 0x6bf   : > { %v4943_v57 = vmul.f32 1.442695, %v4911_v36  ;;  %v4912_v60 = vsub.f32 %v15928_v17, %v4820_v23  ;;  %v16044_v23 = vmul.f32 0.088388346, %v4656_v53 }
 0x6c1   : > { %12959 = vpow2.f32 %v4943_v57  ;;  %v4945_v27 = vmul.f32 1.442695, %v4912_v60  ;;  %v16038_v60 = vmul.f32 0.088388346, %v4653_v2  ;;  %v4890_v53 = vsel %vm3006_vm1, %v16044_v23, -inf }
 0x6c3   : > { %12961 = vpow2.f32 %v4945_v27 }
 0x6c4   : > { %v4823_v6 = vpop.xlane.xlu0 %4822 }
 0x6c5   : > { %v4913_v4 = vsub.f32 %v15934_v12, %v4823_v6 }
 0x6c6   : > { %v4826_v35 = vpop.xlane.xlu1 %4825 }
 0x6c7   : > { %v4914_v30 = vsub.f32 %v15936_v62, %v4826_v35  ;;  %v4947_v9 = vmul.f32 1.442695, %v4913_v4 }
 0x6c8   : > { %v4829_v38 = vpop.xlane.xlu0 %4828 }
 0x6c9   : > { %v4949_v18 = vmul.f32 1.442695, %v4914_v30  ;;  %12963 = vpow2.f32 %v4947_v9  ;;  %v4915_v54 = vsub.f32 %v15938_v63, %v4829_v38 }
 0x6ca   : > { %v4832_v19 = vpop.xlane.xlu1 %4831 }
 0x6cb   : > { %v16035_v21 = vpop.eup %12959  ;;  %12965 = vpow2.f32 %v4949_v18  ;;  %v4916_v57 = vsub.f32 %v15942_v13, %v4832_v19  ;;  %v4951_v36 = vmul.f32 1.442695, %v4915_v54  ;;  %v4887_v13 = vsel %vm3006_vm1, %v16038_v60, -inf }
 0x6cc   : > { %v5007_v17 = vsel %vm3006_vm1, %v16035_v21, 0.0  ;;  %v4835_v30 = vpop.xlane.xlu0 %4834  ;;  %v16058_v54 = vmul.f32 0.088388346, %v4694_v58 }
 0x6cd   : > { %v16042_v12 = vpop.eup %12961  ;;  %v4953_v62 = vmul.f32 1.442695, %v4916_v57  ;;  %5008 = vadd.xlane.f32.xlu0 %v5007_v17  ;;  %12967 = vpow2.f32 %v4951_v36  ;;  %v4917_v18 = vsub.f32 %v15948_v47, %v4835_v30 }
 0x6ce   : > { %v4838_v38 = vpop.xlane.xlu1 %4837  ;;  %v5010_v63 = vsel %vm3006_vm1, %v16042_v12, 0.0 }
 0x6cf   : > { %5011 = vadd.xlane.f32.xlu1 %v5010_v63  ;;  %12969 = vpow2.f32 %v4953_v62  ;;  %v4918_v2 = vsub.f32 %v15952_v10, %v4838_v38  ;;  %v4955_v35 = vmul.f32 1.442695, %v4917_v18  ;;  %v16062_v10 = vmul.f32 0.088388346, %v4697_v29 }
 0x6d0   : > { %v4841_v27 = vpop.xlane.xlu0 %4840  ;;  %v4893_v38 = vsel %vm3006_vm1, %v16058_v54, -inf }
 0x6d1   : > { %4888 = vmax.xlane.f32.xlu0 %v4887_v13  ;;  %v4957_v47 = vmul.f32 1.442695, %v4918_v2  ;;  %12971 = vpow2.f32 %v4955_v35  ;;  %v4919_v62 = vsub.f32 %v15954_v3, %v4841_v27  ;;  %v4896_v18 = vsel %vm3006_vm1, %v16062_v10, -inf }
 0x6d2   : > { %v4844_v6 = vpop.xlane.xlu1 %4843  ;;  %v16078_v27 = vmul.f32 0.088388346, %v16022_v15 }
 0x6d3   : > { %4891 = vmax.xlane.f32.xlu1 %v4890_v53  ;;  %v16054_v4 = vpop.eup %12963  ;;  %12973 = vpow2.f32 %v4957_v47  ;;  %v4920_v58 = vsub.f32 %v15958_v8, %v4844_v6  ;;  %v4959_v2 = vmul.f32 1.442695, %v4919_v62  ;;  %v16084_v47 = vmul.f32 0.088388346, %v16024_v51 }
 0x6d4   : > { %v4847_v19 = vpop.xlane.xlu0 %4846  ;;  %v5013_v57 = vsel %vm3006_vm1, %v16054_v4, 0.0  ;;  %v4899_v62 = vsel %vm3006_vm1, %v16078_v27, -inf }
 0x6d5   : > { %v16056_v9 = vpop.eup %12965  ;;  %5014 = vadd.xlane.f32.xlu0 %v5013_v57  ;;  %v4921_v3 = vsub.f32 %v15964_v11, %v4847_v19  ;;  %v4961_v8 = vmul.f32 1.442695, %v4920_v58  ;;  %12975 = vpow2.f32 %v4959_v2 }
 0x6d6   : > { %v4850_v36 = vpop.xlane.xlu1 %4849  ;;  %v5016_v17 = vsel %vm3006_vm1, %v16056_v9, 0.0 }
 0x6d7   : > { %5017 = vadd.xlane.f32.xlu1 %v5016_v17  ;;  %v16070_v63 = vpop.eup %12967  ;;  %v4922_v6 = vsub.f32 %v15968_v42, %v4850_v36  ;;  %v4963_v11 = vmul.f32 1.442695, %v4921_v3  ;;  %12977 = vpow2.f32 %v4961_v8 }
 0x6d8   : > { %v4853_v30 = vpop.xlane.xlu0 %4852  ;;  %v5019_v35 = vsel %vm3006_vm1, %v16070_v63, 0.0 }
 0x6d9   : > { %4894 = vmax.xlane.f32.xlu0 %v4893_v38  ;;  %v16074_v13 = vpop.eup %12969  ;;  %v4923_v15 = vsub.f32 %v15970_v52, %v4853_v30  ;;  %v4965_v19 = vmul.f32 1.442695, %v4922_v6  ;;  %v4902_v38 = vsel %vm3006_vm1, %v16084_v47, -inf  ;;  %v16099_v52 = vmul.f32 0.088388346, %v16026_v44 }
 0x6da   : > { %v4856_v29 = vpop.xlane.xlu1 %4855  ;;  %v5022_v17 = vsel %vm3006_vm1, %v16074_v13, 0.0  ;;  %12979 = vpow2.f32 %v4963_v11  ;;  %v16106_v6 = vmul.f32 0.088388346, %v16028_v59 }
 0x6db   : > { %4897 = vmax.xlane.f32.xlu1 %v4896_v18  ;;  %v4924_v42 = vsub.f32 %v15974_v61, %v4856_v29  ;;  %v16092_v51 = vpop.eup %12971  ;;  %v4967_v30 = vmul.f32 1.442695, %v4923_v15  ;;  %12981 = vpow2.f32 %v4965_v19 }
 0x6dc   : > { %v4859_v53 = vpop.xlane.xlu0 %4858  ;;  %v5025_v8 = vsel %vm3006_vm1, %v16092_v51, 0.0  ;;  %v4908_v59 = vsel %vm3006_vm1, %v16106_v6, -inf }
 0x6dd   : > { %5020 = vadd.xlane.f32.xlu0 %v5019_v35  ;;  %v16096_v18 = vpop.eup %12973  ;;  %v4925_v61 = vsub.f32 %v15980_v50, %v4859_v53  ;;  %v4969_v29 = vmul.f32 1.442695, %v4924_v42  ;;  %12983 = vpow2.f32 %v4967_v30 }
 0x6de   : > { %v4862_v57 = vpop.xlane.xlu1 %4861  ;;  %v5028_v44 = vsel %vm3006_vm1, %v16096_v18, 0.0 }
 0x6df   : > { %5023 = vadd.xlane.f32.xlu1 %v5022_v17  ;;  %v4926_v2 = vsub.f32 %v15984_v48, %v4862_v57  ;;  %v4971_v17 = vmul.f32 1.442695, %v4925_v61  ;;  %12985 = vpow2.f32 %v4969_v29  ;;  %v4905_v57 = vsel %vm3006_vm1, %v16099_v52, -inf  ;;  %v16114_v11 = vpop.eup %12975 }
 0x6e0   : > { %v4865_v36 = vpop.xlane.xlu0 %4864 }
 0x6e1   : > { %4900 = vmax.xlane.f32.xlu0 %v4899_v62  ;;  %v4927_v50 = vsub.f32 %v15986_v43, %v4865_v36  ;;  %v4973_v53 = vmul.f32 1.442695, %v4926_v2  ;;  %v16118_v15 = vpop.eup %12977  ;;  %12987 = vpow2.f32 %v4971_v17 }
 0x6e2   : > { %v4868_v58 = vpop.xlane.xlu1 %4867  ;;  %v5034_v30 = vsel %vm3006_vm1, %v16118_v15, 0.0 }
 0x6e3   : > { %4903 = vmax.xlane.f32.xlu1 %v4902_v38  ;;  %v4928_v48 = vsub.f32 %v15990_v1, %v4868_v58  ;;  %v4975_v42 = vmul.f32 1.442695, %v4927_v50  ;;  %12989 = vpow2.f32 %v4973_v53  ;;  %v5031_v58 = vsel %vm3006_vm1, %v16114_v11, 0.0 }
 0x6e4   : > { %v4871_v3 = vpop.xlane.xlu0 %4870  ;;  %v16124_v38 = vpop.eup %12979 }
 0x6e5   : > { %5026 = vadd.xlane.f32.xlu0 %v5025_v8  ;;  %v4929_v43 = vsub.f32 %v15996_v45, %v4871_v3  ;;  %v4977_v1 = vmul.f32 1.442695, %v4928_v48  ;;  %v16128_v61 = vpop.eup %12981  ;;  %12991 = vpow2.f32 %v4975_v42  ;;  %v5037_v8 = vsel %vm3006_vm1, %v16124_v38, 0.0 }
 0x6e6   : > { %v4874_v35 = vpop.xlane.xlu1 %4873  ;;  %v5040_v17 = vsel %vm3006_vm1, %v16128_v61, 0.0 }
 0x6e7   : > { %5029 = vadd.xlane.f32.xlu1 %v5028_v44  ;;  %v4930_v62 = vsub.f32 %v16000_v26, %v4874_v35  ;;  %v4979_v29 = vmul.f32 1.442695, %v4929_v43  ;;  %12993 = vpow2.f32 %v4977_v1  ;;  %v16134_v35 = vpop.eup %12983 }
 0x6e8   : > { %v4877_v19 = vpop.xlane.xlu0 %4876 }
 0x6e9   : > { %4906 = vmax.xlane.f32.xlu0 %v4905_v57  ;;  %v4931_v45 = vsub.f32 %v16002_v24, %v4877_v19  ;;  %v4981_v2 = vmul.f32 1.442695, %v4930_v62  ;;  %v16138_v50 = vpop.eup %12985  ;;  %12995 = vpow2.f32 %v4979_v29  ;;  %v5043_v57 = vsel %vm3006_vm1, %v16134_v35, 0.0 }
 0x6ea   : > { %v4880_v36 = vpop.xlane.xlu1 %4879  ;;  %v5046_v19 = vsel %vm3006_vm1, %v16138_v50, 0.0 }
 0x6eb   : > { %4909 = vmax.xlane.f32.xlu1 %v4908_v59  ;;  %v4932_v26 = vsub.f32 %v16006_v0, %v4880_v36  ;;  %v4983_v24 = vmul.f32 1.442695, %v4931_v45  ;;  %12997 = vpow2.f32 %v4981_v2  ;;  %v16144_v59 = vpop.eup %12987 }
 0x6ec   : > { %v4883_v3 = vpop.xlane.xlu0 %4882  ;;  %v5049_v36 = vsel %vm3006_vm1, %v16144_v59, 0.0 }
 0x6ed   : > { %5032 = vadd.xlane.f32.xlu0 %v5031_v58  ;;  %v4933_v53 = vsub.f32 %v16012_v28, %v4883_v3  ;;  %v4985_v0 = vmul.f32 1.442695, %v4932_v26  ;;  %v16148_v42 = vpop.eup %12989  ;;  %12999 = vpow2.f32 %v4983_v24 }
 0x6ee   : > { %v4886_v44 = vpop.xlane.xlu1 %4885  ;;  %v5052_v1 = vsel %vm3006_vm1, %v16148_v42, 0.0 }
 0x6ef   : > { %5035 = vadd.xlane.f32.xlu1 %v5034_v30  ;;  %v4934_v48 = vsub.f32 %v16016_v56, %v4886_v44  ;;  %v4987_v43 = vmul.f32 1.442695, %v4933_v53  ;;  %13001 = vpow2.f32 %v4985_v0  ;;  %v16152_v56 = vpop.eup %12991 }
 0x6f0   : > { %v5055_v58 = vsel %vm3006_vm1, %v16152_v56, 0.0 }
 0x6f1   : > { %5038 = vadd.xlane.f32.xlu0 %v5037_v8  ;;  %v4989_v28 = vmul.f32 1.442695, %v4934_v48  ;;  %v16156_v62 = vpop.eup %12993  ;;  %13003 = vpow2.f32 %v4987_v43 }
 0x6f2   : > { %v5058_v29 = vsel %vm3006_vm1, %v16156_v62, 0.0 }
 0x6f3   : > { %5041 = vadd.xlane.f32.xlu1 %v5040_v17  ;;  %13005 = vpow2.f32 %v4989_v28  ;;  %v16160_v30 = vpop.eup %12995 }
 0x6f4   : > { %v5061_v2 = vsel %vm3006_vm1, %v16160_v30, 0.0 }
 0x6f5   : > { %5044 = vadd.xlane.f32.xlu0 %v5043_v57  ;;  %v16164_v45 = vpop.eup %12997 }
 0x6f6   : > { %v5064_v3 = vsel %vm3006_vm1, %v16164_v45, 0.0 }
 0x6f7   : > { %5047 = vadd.xlane.f32.xlu1 %v5046_v19  ;;  %v16168_v26 = vpop.eup %12999 }
 0x6f8   : > { %v5067_v44 = vsel %vm3006_vm1, %v16168_v26, 0.0 }
 0x6f9   : > { %5050 = vadd.xlane.f32.xlu0 %v5049_v36  ;;  %v16172_v8 = vpop.eup %13001 }
 0x6fa   : > { %v5070_v24 = vsel %vm3006_vm1, %v16172_v8, 0.0 }
 0x6fb   : > { %5053 = vadd.xlane.f32.xlu1 %v5052_v1  ;;  %v16176_v17 = vpop.eup %13003 }
 0x6fc   : > { %v5073_v0 = vsel %vm3006_vm1, %v16176_v17, 0.0 }
 0x6fd   : > { %5056 = vadd.xlane.f32.xlu0 %v5055_v58  ;;  %v16180_v53 = vpop.eup %13005 }
 0x6fe   : > { %v5076_v48 = vsel %vm3006_vm1, %v16180_v53, 0.0 }
 0x6ff   : > { %5059 = vadd.xlane.f32.xlu1 %v5058_v29 }
 0x701   : > { %5062 = vadd.xlane.f32.xlu0 %v5061_v2 }
 0x703   : > { %5065 = vadd.xlane.f32.xlu1 %v5064_v3 }
 0x705   : > { %5068 = vadd.xlane.f32.xlu0 %v5067_v44 }
 0x707   : > { %5071 = vadd.xlane.f32.xlu1 %v5070_v24 }
 0x709   : > { %5074 = vadd.xlane.f32.xlu0 %v5073_v0 }
 0x70b   : > { %5077 = vadd.xlane.f32.xlu1 %v5076_v48 }
 0x75a   : > { %v5009_v57 = vpop.xlane.xlu0 %5008 }
 0x75b   : > { %13007 = vrcp.f32 %v5009_v57 }
 0x75c   : > { %v5012_v19 = vpop.xlane.xlu1 %5011 }
 0x75d   : > { %13009 = vrcp.f32 %v5012_v19 }
 0x75e   : > { %v4889_v43 = vpop.xlane.xlu0 %4888 }
 0x75f   : > { %v4935_v28 = vsub.f32 %v16038_v60, %v4889_v43 }
 0x760   : > { %v4892_v36 = vpop.xlane.xlu1 %4891 }
 0x761   : > { %v4991_v1 = vmul.f32 1.442695, %v4935_v28  ;;  %v4936_v58 = vsub.f32 %v16044_v23, %v4892_v36 }
 0x762   : > { %v5015_v2 = vpop.xlane.xlu0 %5014 }
 0x763   : > { %13011 = vpow2.f32 %v4991_v1  ;;  %v4993_v29 = vmul.f32 1.442695, %v4936_v58 }
 0x764   : > { %13013 = vrcp.f32 %v5015_v2  ;;  %v5018_v3 = vpop.xlane.xlu1 %5017  ;;  %v18487_v2 = vld [vmem:[#allocation96_spill] sm:$0xff] }
 0x765   : > { %v13008_v44 = vpop.eup %13007  ;;  %13015 = vpow2.f32 %v4993_v29 }
 0x766   : > { %13017 = vrcp.f32 %v5018_v3  ;;  %v4895_v0 = vpop.xlane.xlu0 %4894  ;;  %v5135_v48 = vmul.f32 %v13008_v44, %v16035_v21  ;;  %v18488_v21 = vld [vmem:[#allocation95_spill] sm:$0xff] }
 0x767   : > { %v13010_v24 = vpop.eup %13009  ;;  %v4937_v60 = vsub.f32 %v16058_v54, %v4895_v0  ;;  %v18489_v3 = vpack.c.bf16 %v18487_v2, %v18488_v21  ;;  %v18490_v2 = vld [vmem:[#allocation98_spill] sm:$0xff]  ;;  %v18491_v21 = vld [vmem:[#allocation97_spill] sm:$0xff] }
 0x768   : > { %v5136_v57 = vmul.f32 %v13010_v24, %v16042_v12  ;;  %v4898_v19 = vpop.xlane.xlu1 %4897 }
 0x769   : > { %v4938_v43 = vsub.f32 %v16062_v10, %v4898_v19  ;;  %v4995_v23 = vmul.f32 1.442695, %v4937_v60 }
 0x76a   : > { %v5167_v28 = vpack.c.bf16 %v5136_v57, %v5135_v48  ;;  %v5021_v1 = vpop.xlane.xlu0 %5020 }
 0x76b   : > { %v4997_v36 = vmul.f32 1.442695, %v4938_v43  ;;  %13019 = vpow2.f32 %v4995_v23 }
 0x76c   : > { %11703 = vmatmul.mubr.msk.bf16.vlgmr.msra.gmra.mrb[224].mxu0 %vm3006_vm1, %v5167_v28  ;;  %v5024_v58 = vpop.xlane.xlu1 %5023 }
 0x76d   : > { %v16193_v29 = vpop.eup %13011  ;;  %13021 = vpow2.f32 %v4997_v36  ;;  %11713 = vmatpush3.bf16.msra.mxu0 %v18489_v3  ;;  %11714 = vmatprep.mubr.msk.bf16.mxu0 %vm13573_vm0, %v18243_v14 }
 0x76e   : > { %v13014_v12 = vpop.eup %13013  ;;  %13023 = vrcp.f32 %v5021_v1  ;;  %v5079_v54 = vsel %vm3006_vm1, %v16193_v29, 0.0  ;;  %11724 = vmatprep.subr.bf16.mxu0 %v18243_v14  ;;  %v4901_v44 = vpop.xlane.xlu0 %4900 }
 0x76f   : > { %v16203_v10 = vpop.eup %13015  ;;  %13025 = vrcp.f32 %v5024_v58  ;;  %5080 = vadd.xlane.f32.xlu0 %v5079_v54  ;;  %v4939_v0 = vsub.f32 %v16078_v27, %v4901_v44  ;;  %v5137_v60 = vmul.f32 %v13014_v12, %v16054_v4  ;;  %v18492_v4 = vpack.c.bf16 %v18490_v2, %v18491_v21 }
 0x770   : > { %v13018_v24 = vpop.eup %13017  ;;  %v4904_v48 = vpop.xlane.xlu1 %4903  ;;  %v5082_v57 = vsel %vm3006_vm1, %v16203_v10, 0.0 }
 0x771   : > { %v5138_v19 = vmul.f32 %v13018_v24, %v16056_v9  ;;  %v4940_v43 = vsub.f32 %v16084_v47, %v4904_v48  ;;  %5083 = vadd.xlane.f32.xlu1 %v5082_v57  ;;  %v4999_v23 = vmul.f32 1.442695, %v4939_v0 }
 0x772   : > { %v5027_v36 = vpop.xlane.xlu0 %5026 }
 0x773   : > { %v5001_v28 = vmul.f32 1.442695, %v4940_v43  ;;  %v5168_v1 = vpack.c.bf16 %v5138_v19, %v5137_v60  ;;  %13027 = vpow2.f32 %v4999_v23 }
 0x774   : > { %v5030_v58 = vpop.xlane.xlu1 %5029 }
 0x775   : > { %13029 = vpow2.f32 %v5001_v28  ;;  %11709 = vmatmul.mubr.msk.bf16.vlgmr.msra.gmra.mrb[160].mxu1 %vm3006_vm1, %v5168_v1  ;;  %v16212_v27 = vpop.eup %13019 }
 0x776   : > { %13031 = vrcp.f32 %v5027_v36  ;;  %11719 = vmatpush3.bf16.msra.mxu1 %v18492_v4  ;;  %11720 = vmatprep.mubr.msk.bf16.mxu1 %vm13573_vm0, %v18243_v14  ;;  %v4907_v47 = vpop.xlane.xlu0 %4906  ;;  %v5085_v3 = vsel %vm3006_vm1, %v16212_v27, 0.0 }
 0x777   : > { %v16219_v9 = vpop.eup %13021  ;;  %13033 = vrcp.f32 %v5030_v58  ;;  %11730 = vmatprep.subr.bf16.mxu1 %v18243_v14  ;;  %v4941_v54 = vsub.f32 %v16099_v52, %v4907_v47  ;;  %5086 = vadd.xlane.f32.xlu0 %v5085_v3  ;;  %v18494_v58 = vld [vmem:[#allocation99_spill] sm:$0xff] }
 0x778   : > { %v13024_v12 = vpop.eup %13023  ;;  %v4910_v44 = vpop.xlane.xlu1 %4909  ;;  %v5088_v24 = vsel %vm3006_vm1, %v16219_v9, 0.0 }
 0x779   : > { %v13026_v0 = vpop.eup %13025  ;;  %v4942_v48 = vsub.f32 %v16106_v6, %v4910_v44  ;;  %5089 = vadd.xlane.f32.xlu1 %v5088_v24  ;;  %v5139_v57 = vmul.f32 %v13024_v12, %v16070_v63  ;;  %v5003_v19 = vmul.f32 1.442695, %v4941_v54  ;;  %v18493_v6 = vld [vmem:[#allocation100_spill] sm:$0xff] }
 0x77a   : > { %v5140_v60 = vmul.f32 %v13026_v0, %v16074_v13  ;;  %v5033_v23 = vpop.xlane.xlu0 %5032  ;;  %v18495_v2 = vpack.c.bf16 %v18493_v6, %v18494_v58 }
 0x77b   : > { %v5005_v43 = vmul.f32 1.442695, %v4942_v48  ;;  %13035 = vpow2.f32 %v5003_v19  ;;  %v18497_v19 = vld [vmem:[#allocation101_spill] sm:$0xff] }
 0x77c   : > { %v5169_v28 = vpack.c.bf16 %v5140_v60, %v5139_v57  ;;  %v5036_v36 = vpop.xlane.xlu1 %5035  ;;  %v18496_v60 = vld [vmem:[#allocation102_spill] sm:$0xff] }
 0x77d   : > { %13037 = vpow2.f32 %v5005_v43  ;;  %v16230_v52 = vpop.eup %13027  ;;  %v18498_v43 = vpack.c.bf16 %v18496_v60, %v18497_v19  ;;  %v18500_v60 = vld [vmem:[#allocation103_spill] sm:$0xff] }
 0x77e   : > { %13039 = vrcp.f32 %v5033_v23  ;;  %11715 = vmatmul.mubr.msk.bf16.vlgmr.msra.gmra.mrb[228].mxu0 %vm3006_vm1, %v5169_v28  ;;  %v5039_v63 = vpop.xlane.xlu0 %5038  ;;  %v5091_v13 = vsel %vm3006_vm1, %v16230_v52, 0.0 }
 0x77f   : > { %v16233_v1 = vpop.eup %13029  ;;  %11725 = vmatpush3.bf16.msra.mxu0 %v18495_v2  ;;  %13041 = vrcp.f32 %v5036_v36  ;;  %11726 = vmatprep.mubr.msk.bf16.mxu0 %vm13573_vm0, %v18243_v14 }
 0x780   : > { %v13032_v21 = vpop.eup %13031  ;;  %13043 = vrcp.f32 %v5039_v63  ;;  %5092 = vadd.xlane.f32.xlu0 %v5091_v13  ;;  %v5042_v4 = vpop.xlane.xlu1 %5041  ;;  %v5094_v47 = vsel %vm3006_vm1, %v16233_v1, 0.0  ;;  %11736 = vmatprep.subr.bf16.mxu0 %v18243_v14 }
 0x781   : > { %v13034_v3 = vpop.eup %13033  ;;  %13045 = vrcp.f32 %v5042_v4  ;;  %5095 = vadd.xlane.f32.xlu1 %v5094_v47  ;;  %v5141_v12 = vmul.f32 %v13032_v21, %v16092_v51 }
 0x782   : > { %v5142_v54 = vmul.f32 %v13034_v3, %v16096_v18  ;;  %v5045_v44 = vpop.xlane.xlu0 %5044 }
 0x783   : > { %13047 = vrcp.f32 %v5045_v44 }
 0x784   : > { %v5170_v24 = vpack.c.bf16 %v5142_v54, %v5141_v12  ;;  %v5048_v0 = vpop.xlane.xlu1 %5047 }
 0x785   : > { %13049 = vrcp.f32 %v5048_v0  ;;  %v16247_v48 = vpop.eup %13035  ;;  %v18499_v0 = vld [vmem:[#allocation104_spill] sm:$0xff] }
 0x786   : > { %11721 = vmatmul.mubr.msk.bf16.vlgmr.msra.gmra.mrb[164].mxu1 %vm3006_vm1, %v5170_v24  ;;  %v5051_v23 = vpop.xlane.xlu0 %5050  ;;  %v5097_v51 = vsel %vm3006_vm1, %v16247_v48, 0.0 }
 0x787   : > { %v16250_v57 = vpop.eup %13037  ;;  %11731 = vmatpush3.bf16.msra.mxu1 %v18498_v43  ;;  %11732 = vmatprep.mubr.msk.bf16.mxu1 %vm13573_vm0, %v18243_v14  ;;  %13051 = vrcp.f32 %v5051_v23  ;;  %v18502_v43 = vld [vmem:[#allocation63_spill] sm:$0xff]  ;;  %v18503_v23 = vld [vmem:[#allocation64_spill] sm:$0xff] }
 0x788   : > { %v13040_v18 = vpop.eup %13039  ;;  %5098 = vadd.xlane.f32.xlu0 %v5097_v51  ;;  %v5054_v28 = vpop.xlane.xlu1 %5053  ;;  %v5100_v36 = vsel %vm3006_vm1, %v16250_v57, 0.0  ;;  %11742 = vmatprep.subr.bf16.mxu1 %v18243_v14  ;;  %v18504_v51 = vpack.c.bf16 %v18502_v43, %v18503_v23  ;;  %v18512_v43 = vld [vmem:[#allocation107_spill] sm:$0xff] }
 0x789   : > { %v13042_v6 = vpop.eup %13041  ;;  %13053 = vrcp.f32 %v5054_v28  ;;  %5101 = vadd.xlane.f32.xlu1 %v5100_v36  ;;  %v5143_v2 = vmul.f32 %v13040_v18, %v16114_v11  ;;  %v18501_v11 = vpack.c.bf16 %v18499_v0, %v18500_v60 }
 0x78a   : > { %v13044_v58 = vpop.eup %13043  ;;  %v5144_v63 = vmul.f32 %v13042_v6, %v16118_v15  ;;  %v5057_v21 = vpop.xlane.xlu0 %5056 }
 0x78b   : > { %v13046_v13 = vpop.eup %13045  ;;  %v5145_v4 = vmul.f32 %v13044_v58, %v16124_v38  ;;  %13055 = vrcp.f32 %v5057_v21  ;;  %v18505_v21 = vld [vmem:[#allocation67_spill] sm:$0xff] }
 0x78c   : > { %v5146_v47 = vmul.f32 %v13046_v13, %v16128_v61  ;;  %v5171_v3 = vpack.c.bf16 %v5144_v63, %v5143_v2  ;;  %v5060_v12 = vpop.xlane.xlu1 %5059 }
 0x78d   : > { %13057 = vrcp.f32 %v5060_v12  ;;  %v13048_v54 = vpop.eup %13047 }
 0x78e   : > { %11727 = vmatmul.mubr.msk.bf16.vlgmr.msra.gmra.mrb[232].mxu0 %vm3006_vm1, %v5171_v3  ;;  %v5172_v44 = vpack.c.bf16 %v5146_v47, %v5145_v4  ;;  %v5063_v15 = vpop.xlane.xlu0 %5062  ;;  %v5147_v38 = vmul.f32 %v13048_v54, %v16134_v35  ;;  %v18506_v4 = vld [vmem:[#allocation68_spill] sm:$0xff]  ;;  %v18508_v54 = vld [vmem:[#allocation106_spill] sm:$0xff] }
 0x78f   : > { %v13050_v24 = vpop.eup %13049  ;;  %11737 = vmatpush3.bf16.msra.mxu0 %v18501_v11  ;;  %11738 = vmatprep.mubr.msk.bf16.mxu0 %vm13573_vm0, %v18243_v14  ;;  %13059 = vrcp.f32 %v5063_v15  ;;  %v18507_v47 = vpack.c.bf16 %v18505_v21, %v18506_v4  ;;  %v18521_v21 = vld [vmem:[#allocation119_spill] sm:$0xff] }
 0x790   : > { %v5148_v61 = vmul.f32 %v13050_v24, %v16138_v50  ;;  %11733 = vmatmul.mubr.msk.bf16.vlgmr.msra.gmra.mrb[168].mxu1 %vm3006_vm1, %v5172_v44  ;;  %v5066_v19 = vpop.xlane.xlu1 %5065  ;;  %11748 = vmatprep.subr.bf16.mxu0 %v18243_v14  ;;  %v18509_v44 = vld [vmem:[#allocation105_spill] sm:$0xff] }
 0x791   : > { %11743 = vmatpush3.bf16.msra.mxu1 %v18504_v51  ;;  %13061 = vrcp.f32 %v5066_v19  ;;  %11744 = vmatprep.mubr.msk.bf16.mxu1 %vm13573_vm0, %v18243_v14  ;;  %v13052_v18 = vpop.eup %13051  ;;  %v18510_v24 = vpack.c.bf16 %v18508_v54, %v18509_v44  ;;  %v18511_v19 = vld [vmem:[#allocation108_spill] sm:$0xff] }
 0x792   : > { %v5173_v28 = vpack.c.bf16 %v5148_v61, %v5147_v38  ;;  %11754 = vmatprep.subr.bf16.mxu1 %v18243_v14  ;;  %v5069_v50 = vpop.xlane.xlu0 %5068  ;;  %v5149_v36 = vmul.f32 %v13052_v18, %v16144_v59  ;;  %v18513_v23 = vpack.c.bf16 %v18511_v19, %v18512_v43 }
 0x793   : > { %v13054_v35 = vpop.eup %13053  ;;  %13063 = vrcp.f32 %v5069_v50 }
 0x794   : > { %v5150_v6 = vmul.f32 %v13054_v35, %v16148_v42  ;;  %v5072_v58 = vpop.xlane.xlu1 %5071 }
 0x795   : > { %13065 = vrcp.f32 %v5072_v58  ;;  %v13056_v2 = vpop.eup %13055  ;;  %v18517_v58 = vld [vmem:[#allocation116_spill] sm:$0xff] }
 0x796   : > { %11739 = vmatmul.mubr.msk.bf16.vlgmr.msra.gmra.mrb[236].mxu0 %vm3006_vm1, %v5173_v28  ;;  %v5174_v63 = vpack.c.bf16 %v5150_v6, %v5149_v36  ;;  %v5075_v3 = vpop.xlane.xlu0 %5074  ;;  %v5151_v59 = vmul.f32 %v13056_v2, %v16152_v56  ;;  %v18518_v2 = vld [vmem:[#allocation115_spill] sm:$0xff] }
 0x797   : > { %v13058_v13 = vpop.eup %13057  ;;  %11749 = vmatpush3.bf16.msra.mxu0 %v18507_v47  ;;  %11750 = vmatprep.mubr.msk.bf16.mxu0 %vm13573_vm0, %v18243_v14  ;;  %13067 = vrcp.f32 %v5075_v3 }
 0x798   : > { %v5152_v42 = vmul.f32 %v13058_v13, %v16156_v62  ;;  %11745 = vmatmul.mubr.msk.bf16.vlgmr.msra.gmra.mrb[172].mxu1 %vm3006_vm1, %v5174_v63  ;;  %v5078_v12 = vpop.xlane.xlu1 %5077  ;;  %11760 = vmatprep.subr.bf16.mxu0 %v18243_v14  ;;  %v18519_v63 = vpack.c.bf16 %v18517_v58, %v18518_v2  ;;  %v18520_v13 = vld [vmem:[#allocation120_spill] sm:$0xff] }
 0x799   : > { %11755 = vmatpush3.bf16.msra.mxu1 %v18510_v24  ;;  %13069 = vrcp.f32 %v5078_v12  ;;  %11756 = vmatprep.mubr.msk.bf16.mxu1 %vm13573_vm0, %v18243_v14  ;;  %v13060_v0 = vpop.eup %13059  ;;  %v18522_v4 = vpack.c.bf16 %v18520_v13, %v18521_v21  ;;  %v12337_v24 = vld [vmem:[#allocation7 + $0x4] ss:$8 sps:$4 sm:$0xff]   ;;  %v12341_v2 = vld [vmem:[#allocation7 + $0x20] ss:$8 sps:$4 sm:$0xff]  }
 0x79a   : > { %v5175_v60 = vpack.c.bf16 %v5152_v42, %v5151_v59  ;;  %11766 = vmatprep.subr.bf16.mxu1 %v18243_v14  ;;  %v5153_v62 = vmul.f32 %v13060_v0, %v16160_v30  ;;  %v18514_v30 = vld [vmem:[#allocation112_spill] sm:$0xff] }
 0x79b   : > { %v13062_v56 = vpop.eup %13061  ;;  %v12349_v13 = vld [vmem:[#allocation7 + $0x44] ss:$8 sps:$4 sm:$0xff]   ;;  %v12347_v21 = vld [vmem:[#allocation7 + $0x40] ss:$8 sps:$4 sm:$0xff]  }
 0x79c   : > { %v5154_v11 = vmul.f32 %v13062_v56, %v16164_v45  ;;  %v18515_v45 = vld [vmem:[#allocation111_spill] sm:$0xff]  ;;  %v18523_v56 = vld [vmem:[#allocation124_spill] sm:$0xff] }
 0x79d   : > { %v13064_v15 = vpop.eup %13063  ;;  %v18516_v28 = vpack.c.bf16 %v18514_v30, %v18515_v45 }
 0x79e   : > { %11751 = vmatmul.mubr.msk.bf16.vlgmr.msra.gmra.mrb[240].mxu0 %vm3006_vm1, %v5175_v60  ;;  %v5176_v38 = vpack.c.bf16 %v5154_v11, %v5153_v62  ;;  %v5155_v51 = vmul.f32 %v13064_v15, %v16168_v26  ;;  %v18524_v62 = vld [vmem:[#allocation123_spill] sm:$0xff] }
 0x79f   : > { %v13066_v61 = vpop.eup %13065  ;;  %11761 = vmatpush3.bf16.msra.mxu0 %v18513_v23  ;;  %11762 = vmatprep.mubr.msk.bf16.mxu0 %vm13573_vm0, %v18243_v14  ;;  %v18525_v11 = vpack.c.bf16 %v18523_v56, %v18524_v62  ;;  %v18526_v23 = vld [vmem:[#allocation128_spill] sm:$0xff] }
 0x7a0   : > { %v5156_v18 = vmul.f32 %v13066_v61, %v16172_v8  ;;  %11757 = vmatmul.mubr.msk.bf16.vlgmr.msra.gmra.mrb[176].mxu1 %vm3006_vm1, %v5176_v38  ;;  %11772 = vmatprep.subr.bf16.mxu0 %v18243_v14  ;;  %v12365_v62 = vld [vmem:[#allocation7 + $0xa0] ss:$8 sps:$4 sm:$0xff]  }
 0x7a1   : > { %11767 = vmatpush3.bf16.msra.mxu1 %v18516_v28  ;;  %11768 = vmatprep.mubr.msk.bf16.mxu1 %vm13573_vm0, %v18243_v14  ;;  %v13068_v35 = vpop.eup %13067  ;;  %v12335_v28 = vld [vmem:[#allocation7] ss:$8 sps:$4 sm:$0xff]  }
 0x7a2   : > { %v5177_v50 = vpack.c.bf16 %v5156_v18, %v5155_v51  ;;  %11778 = vmatprep.subr.bf16.mxu1 %v18243_v14  ;;  %v5157_v26 = vmul.f32 %v13068_v35, %v16176_v17  ;;  %v18527_v51 = vld [vmem:[#allocation127_spill] sm:$0xff] }
 0x7a3   : > { %v13070_v36 = vpop.eup %13069  ;;  %v18528_v18 = vpack.c.bf16 %v18526_v23, %v18527_v51  ;;  %v12371_v23 = vld [vmem:[#allocation7 + $0xc0] ss:$8 sps:$4 sm:$0xff]   ;;  %v12376_v51 = vld [vmem:[#allocation7 + $0xd4] ss:$8 sps:$4 sm:$0xff]  }
 0x7a4   : > { %v5158_v8 = vmul.f32 %v13070_v36, %v16180_v53  ;;  %v12338_v36 = vld [vmem:[#allocation7 + $0x10] ss:$8 sps:$4 sm:$0xff]  }
 0x7a6   : > { %11763 = vmatmul.mubr.msk.bf16.vlgmr.msra.gmra.mrb[244].mxu0 %vm3006_vm1, %v5177_v50  ;;  %v5178_v6 = vpack.c.bf16 %v5158_v8, %v5157_v26  ;;  %v12340_v50 = vld [vmem:[#allocation7 + $0x14] ss:$8 sps:$4 sm:$0xff]   ;;  %v12343_v8 = vld [vmem:[#allocation7 + $0x24] ss:$8 sps:$4 sm:$0xff]  }
 0x7a7   : > { %11773 = vmatpush3.bf16.msra.mxu0 %v18519_v63  ;;  %11774 = vmatprep.mubr.msk.bf16.mxu0 %vm13573_vm0, %v18243_v14  ;;  %v12344_v63 = vld [vmem:[#allocation7 + $0x30] ss:$8 sps:$4 sm:$0xff]  }
 0x7a8   : > { %11769 = vmatmul.mubr.msk.bf16.vlgmr.msra.gmra.mrb[180].mxu1 %vm3006_vm1, %v5178_v6  ;;  %11784 = vmatprep.subr.bf16.mxu0 %v18243_v14 }
 0x7a9   : > { %11779 = vmatpush3.bf16.msra.mxu1 %v18522_v4  ;;  %11780 = vmatprep.mubr.msk.bf16.mxu1 %vm13573_vm0, %v18243_v14  ;;  %v12352_v4 = vld [vmem:[#allocation7 + $0x54] ss:$8 sps:$4 sm:$0xff]  }
 0x7aa   : > { %11790 = vmatprep.subr.bf16.mxu1 %v18243_v14 }
 0x7fc   : > { %v5081_v17 = vpop.xlane.xlu0 %5080 }
 0x7fd   : > { %13071 = vrcp.f32 %v5081_v17  ;;  %v12350_v17 = vld [vmem:[#allocation7 + $0x50] ss:$8 sps:$4 sm:$0xff]  }
 0x7fe   : > { %v5084_v53 = vpop.xlane.xlu1 %5083 }
 0x7ff   : > { %13073 = vrcp.f32 %v5084_v53  ;;  %v12358_v53 = vld [vmem:[#allocation7 + $0x74] ss:$8 sps:$4 sm:$0xff]  }
 0x804   : > { %v5087_v47 = vpop.xlane.xlu0 %5086 }
 0x805   : > { %13075 = vrcp.f32 %v5087_v47  ;;  %v12356_v47 = vld [vmem:[#allocation7 + $0x70] ss:$8 sps:$4 sm:$0xff]  }
 0x806   : > { %v5090_v3 = vpop.xlane.xlu1 %5089 }
 0x807   : > { %v13072_v59 = vpop.eup %13071  ;;  %13077 = vrcp.f32 %v5090_v3  ;;  %v12361_v3 = vld [vmem:[#allocation7 + $0x84] ss:$8 sps:$4 sm:$0xff]  }
 0x808   : > { %v5159_v12 = vmul.f32 %v13072_v59, %v16193_v29  ;;  %v12359_v59 = vld [vmem:[#allocation7 + $0x80] ss:$8 sps:$4 sm:$0xff]  }
 0x809   : > { %v13074_v42 = vpop.eup %13073 }
 0x80a   : > { %v5160_v54 = vmul.f32 %v13074_v42, %v16203_v10  ;;  %v12364_v42 = vld [vmem:[#allocation7 + $0x94] ss:$8 sps:$4 sm:$0xff]  }
 0x80c   : > { %v5179_v44 = vpack.c.bf16 %v5160_v54, %v5159_v12  ;;  %v12362_v54 = vld [vmem:[#allocation7 + $0x90] ss:$8 sps:$4 sm:$0xff]  }
 0x80d   : > { %v5093_v0 = vpop.xlane.xlu0 %5092 }
 0x80e   : > { %13079 = vrcp.f32 %v5093_v0  ;;  %11775 = vmatmul.mubr.msk.bf16.vlgmr.msra.gmra.mrb[248].mxu0 %vm3006_vm1, %v5179_v44  ;;  %v5096_v60 = vpop.xlane.xlu1 %5095 }
 0x80f   : > { %11785 = vmatpush3.bf16.msra.mxu0 %v18525_v11  ;;  %13081 = vrcp.f32 %v5096_v60  ;;  %11786 = vmatprep.mubr.msk.bf16.mxu0 %vm13573_vm0, %v18243_v14  ;;  %v13076_v15 = vpop.eup %13075  ;;  %v12370_v11 = vld [vmem:[#allocation7 + $0xb4] ss:$8 sps:$4 sm:$0xff]  }
 0x810   : > { %6139 = vmatprep.subr.bf16.mxu0 %v12337_v24  ;;  %v5161_v10 = vmul.f32 %v13076_v15, %v16212_v27  ;;  %v12367_v24 = vld [vmem:[#allocation7 + $0xa4] ss:$8 sps:$4 sm:$0xff]   ;;  %v12368_v15 = vld [vmem:[#allocation7 + $0xb0] ss:$8 sps:$4 sm:$0xff]  }
 0x811   : > { %v13078_v29 = vpop.eup %13077 }
 0x812   : > { %v5162_v38 = vmul.f32 %v13078_v29, %v16219_v9 }
 0x814   : > { %v5180_v61 = vpack.c.bf16 %v5162_v38, %v5161_v10  ;;  %v12373_v10 = vld [vmem:[#allocation7 + $0xc4] ss:$8 sps:$4 sm:$0xff]  }
 0x815   : > { %v5099_v19 = vpop.xlane.xlu0 %5098 }
 0x816   : > { %13083 = vrcp.f32 %v5099_v19  ;;  %11781 = vmatmul.mubr.msk.bf16.vlgmr.msra.gmra.mrb[184].mxu1 %vm3006_vm1, %v5180_v61  ;;  %v5102_v43 = vpop.xlane.xlu1 %5101 }
 0x817   : > { %11791 = vmatpush3.bf16.msra.mxu1 %v18528_v18  ;;  %13085 = vrcp.f32 %v5102_v43  ;;  %11792 = vmatprep.mubr.msk.bf16.mxu1 %vm13573_vm0, %v18243_v14  ;;  %v12374_v18 = vld [vmem:[#allocation7 + $0xd0] ss:$8 sps:$4 sm:$0xff]  }
 0x818   : > { %v13080_v30 = vpop.eup %13079 }
 0x819   : > { %v13082_v45 = vpop.eup %13081  ;;  %v5163_v27 = vmul.f32 %v13080_v30, %v16230_v52  ;;  %v12379_v30 = vld [vmem:[#allocation7 + $0xe4] ss:$8 sps:$4 sm:$0xff]  }
 0x81a   : > { %v5164_v9 = vmul.f32 %v13082_v45, %v16233_v1  ;;  %v12346_v1 = vld [vmem:[#allocation7 + $0x34] ss:$8 sps:$4 sm:$0xff]  }
 0x81c   : > { %v5181_v35 = vpack.c.bf16 %v5164_v9, %v5163_v27 }
 0x81e   : > { %11787 = vmatmul.mubr.msk.bf16.vlgmr.msra.gmra.mrb[252].mxu0 %vm3006_vm1, %v5181_v35 }
 0x81f   : > { %6140 = vmatpush1.bf16.msra.mxu0 %v12335_v28  ;;  %v12377_v28 = vld [vmem:[#allocation7 + $0xe0] ss:$8 sps:$4 sm:$0xff]  }
 0x820   : > { %v13084_v26 = vpop.eup %13083  ;;  %6141 = vmatprep.subr.bf16.mxu0 %v12340_v50 }
 0x821   : > { %v13086_v6 = vpop.eup %13085  ;;  %v5165_v58 = vmul.f32 %v13084_v26, %v16247_v48  ;;  %v12355_v48 = vld [vmem:[#allocation7 + $0x64] ss:$8 sps:$4 sm:$0xff]   ;;  %v12380_v26 = vld [vmem:[#allocation7 + $0xf0] ss:$8 sps:$4 sm:$0xff]  }
 0x822   : > { %v5166_v14 = vmul.f32 %v13086_v6, %v16250_v57  ;;  %v12353_v57 = vld [vmem:[#allocation7 + $0x60] ss:$8 sps:$4 sm:$0xff]  }
 0x823   : > { %6142 = vmatpush1.bf16.msra.mxu0 %v12338_v36  ;;  %v12382_v36 = vld [vmem:[#allocation7 + $0xf4] ss:$8 sps:$4 sm:$0xff]  }
 0x824   : > { %6143 = vmatprep.subr.bf16.mxu0 %v12343_v8  ;;  %v5182_v52 = vpack.c.bf16 %v5166_v14, %v5165_v58 }
 0x826   : > { %11793 = vmatmul.mubr.msk.bf16.vlgmr.msra.gmra.mrb[188].mxu1 %vm3006_vm1, %v5182_v52  ;;  %v18529_v52 = vpack.c.bf16 %v15832_v5, %v15830_v41 }
 0x827   : > { %6144 = vmatpush1.bf16.msra.mxu0 %v12341_v2 }
 0x828   : > { %6145 = vmatprep.subr.bf16.mxu0 %v12346_v1 }
 0x82b   : > { %6146 = vmatpush1.bf16.msra.mxu0 %v12344_v63 }
 0x82c   : > { %6147 = vmatprep.subr.bf16.mxu0 %v12349_v13 }
 0x82f   : > { %6148 = vmatpush1.bf16.msra.mxu0 %v12347_v21 }
 0x830   : > { %6149 = vmatprep.subr.bf16.mxu0 %v12352_v4 }
 0x833   : > { %6150 = vmatpush1.bf16.msra.mxu0 %v12350_v17 }
 0x834   : > { %6151 = vmatprep.subr.bf16.mxu0 %v12355_v48 }
 0x837   : > { %6152 = vmatpush1.bf16.msra.mxu0 %v12353_v57 }
 0x838   : > { %6153 = vmatprep.subr.bf16.mxu0 %v12358_v53 }
 0x83b   : > { %6154 = vmatpush1.bf16.msra.mxu0 %v12356_v47  ;;  %v18530_v47 = vpack.c.bf16 %v15838_v46, %v15836_v40 }
 0x83c   : > { %6155 = vmatprep.subr.bf16.mxu0 %v12361_v3 }
 0x83f   : > { %6156 = vmatpush1.bf16.msra.mxu0 %v12359_v59  ;;  %v5236_v12 = vpop.f32.mrb[224].mxu0 }
 0x840   : > { %v11704_v44 = vpop.f32.mrb[225].mxu0  ;;  %6157 = vmatprep.subr.bf16.mxu0 %v12364_v42 }
 0x841   : > { %v5239_v0 = vpop.f32.mrb[226].mxu0 }
 0x842   : > { %v5904_v60 = vpack.c.bf16 %v5239_v0, %v5236_v12  ;;  %v11705_v56 = vpop.f32.mrb[227].mxu0 }
 0x843   : > { %6158 = vmatpush1.bf16.msra.mxu0 %v12362_v54 }
 0x844   : > { %6171 = vmatprep.mubr.bf16.mxu0 %v5904_v60  ;;  %6159 = vmatprep.subr.bf16.mxu0 %v12367_v24  ;;  %v18531_v60 = vpack.c.bf16 %v15844_v22, %v15842_v37 }
 0x847   : > { %6160 = vmatpush1.bf16.msra.mxu0 %v12365_v62 }
 0x848   : > { %v5280_v29 = vpop.f32.mrb[160].mxu1  ;;  %6161 = vmatprep.subr.bf16.mxu0 %v12370_v11 }
 0x849   : > { %v11710_v38 = vpop.f32.mrb[161].mxu1 }
 0x84a   : > { %v5283_v61 = vpop.f32.mrb[162].mxu1 }
 0x84b   : > { %v5906_v19 = vpack.c.bf16 %v5283_v61, %v5280_v29  ;;  %v11711_v43 = vpop.f32.mrb[163].mxu1  ;;  %6162 = vmatpush1.bf16.msra.mxu0 %v12368_v15 }
 0x84c   : > { %6163 = vmatprep.subr.bf16.mxu0 %v12373_v10 }
 0x84f   : > { %6164 = vmatpush1.bf16.msra.mxu0 %v12371_v23 }
 0x850   : > { %6165 = vmatprep.subr.bf16.mxu0 %v12376_v51 }
 0x851   : > { %v5324_v45 = vpop.f32.mrb[228].mxu0 }
 0x852   : > { %v11716_v27 = vpop.f32.mrb[229].mxu0 }
 0x853   : > { %v5327_v9 = vpop.f32.mrb[230].mxu0  ;;  %6166 = vmatpush1.bf16.msra.mxu0 %v12374_v18 }
 0x854   : > { %v5908_v35 = vpack.c.bf16 %v5327_v9, %v5324_v45  ;;  %v11717_v50 = vpop.f32.mrb[231].mxu0  ;;  %6167 = vmatprep.subr.bf16.mxu0 %v12379_v30 }
 0x855   : > { %v18536_v50 = vpack.c.bf16 %v15874_v49, %v15872_v16 }
 0x857   : > { %6168 = vmatpush1.bf16.msra.mxu0 %v12377_v28  ;;  %v18533_v28 = vpack.c.bf16 %v15856_v55, %v15854_v39  ;;  %v18537_v39 = vld [vmem:[#allocation110_spill] sm:$0xff] }
 0x858   : > { %6169 = vmatprep.subr.bf16.mxu0 %v12382_v36  ;;  %v18538_v55 = vpack.c.bf16 %v15880_v20, %v18537_v39  ;;  %v18539_v36 = vld [vmem:[#allocation114_spill] sm:$0xff] }
 0x859   : > { %v5368_v8 = vpop.f32.mrb[164].mxu1  ;;  %v12418_v39 = vld [vmem:[#allocation10 + $0xac] ss:$16 sps:$4 sm:$0xff]  }
 0x85a   : > { %v11722_v6 = vpop.f32.mrb[165].mxu1 }
 0x85b   : > { %v5371_v58 = vpop.f32.mrb[166].mxu1  ;;  %6170 = vmatpush1.bf16.msra.mxu0 %v12380_v26  ;;  %v18540_v26 = vld [vmem:[#allocation109_spill] sm:$0xff] }
 0x85c   : > { %v5910_v14 = vpack.c.bf16 %v5371_v58, %v5368_v8  ;;  %v11723_v2 = vpop.f32.mrb[167].mxu1  ;;  %v18543_v8 = vld [vmem:[#allocation113_spill] sm:$0xff] }
 0x85d   : > { %v18546_v6 = vld [vmem:[#allocation117_spill] sm:$0xff] }
 0x85e   : > { %6172 = vmatmul.mubr.bf16.vlgmr.msra.gmra.mrb[0].mxu0 %v18529_v52  ;;  %v18548_v52 = vld [vmem:[#allocation126_spill] sm:$0xff] }
 0x85f   : > { %6181 = vmatprep.mubr.bf16.mxu0 %v5906_v19  ;;  %v18532_v19 = vpack.c.bf16 %v15850_v25, %v15848_v34  ;;  %v18534_v34 = vpack.c.bf16 %v15862_v31, %v15860_v32  ;;  %v18535_v25 = vpack.c.bf16 %v15868_v33, %v15866_v7  ;;  %v18541_v32 = vpack.c.bf16 %v18539_v36, %v18540_v26  ;;  %v18542_v31 = vld [vmem:[#allocation118_spill] sm:$0xff] }
 0x860   : > { %v18544_v7 = vpack.c.bf16 %v18542_v31, %v18543_v8  ;;  %v18545_v33 = vld [vmem:[#allocation122_spill] sm:$0xff]  ;;  %v18561_v8 = vld [vmem:[#allocation20_spill] sm:$0xff] }
 0x861   : > { %v5412_v1 = vpop.f32.mrb[232].mxu0  ;;  %v18547_v16 = vpack.c.bf16 %v18545_v33, %v18546_v6  ;;  %v5967_v36 = vld [vmem:[#allocation8] sm:$0x3]  ;;  %v12416_v26 = vld [vmem:[#allocation10 + $0xa8] ss:$16 sps:$4 sm:$0xff]  }
 0x862   : > { %v11728_v63 = vpop.f32.mrb[233].mxu0 }
 0x863   : > { %v5415_v13 = vpop.f32.mrb[234].mxu0  ;;  %v5456_v21 = vpop.f32.mrb[168].mxu1 }
 0x864   : > { %v5912_v4 = vpack.c.bf16 %v5415_v13, %v5412_v1  ;;  %v11729_v17 = vpop.f32.mrb[235].mxu0  ;;  %v11734_v48 = vpop.f32.mrb[169].mxu1  ;;  %v18549_v1 = vld [vmem:[#allocation121_spill] sm:$0xff] }
 0x865   : > { %v5459_v57 = vpop.f32.mrb[170].mxu1  ;;  %v18550_v63 = vpack.c.bf16 %v18548_v52, %v18549_v1  ;;  %v13247_v1 = vld [vmem:[%s13876_s19 + $0x8] sm:$0xff] }
 0x866   : > { %v5914_v53 = vpack.c.bf16 %v5459_v57, %v5456_v21  ;;  %6182 = vmatmul.mubr.bf16.gmra.mrb[4].mxu0 %v18530_v47  ;;  %v11735_v3 = vpop.f32.mrb[171].mxu1  ;;  %v18551_v57 = vld [vmem:[#allocation76_spill] sm:$0xff] }
 0x867   : > { %6191 = vmatprep.mubr.bf16.mxu0 %v5908_v35 }
 0x869   : > { %v5500_v59 = vpop.f32.mrb[236].mxu0 }
 0x86a   : > { %v11740_v42 = vpop.f32.mrb[237].mxu0 }
 0x86b   : > { %v5503_v41 = vpop.f32.mrb[238].mxu0  ;;  %v5544_v5 = vpop.f32.mrb[172].mxu1 }
 0x86c   : > { %v5916_v12 = vpack.c.bf16 %v5503_v41, %v5500_v59  ;;  %v11741_v54 = vpop.f32.mrb[239].mxu0  ;;  %v11746_v44 = vpop.f32.mrb[173].mxu1 }
 0x86d   : > { %v5547_v24 = vpop.f32.mrb[174].mxu1  ;;  %v18555_v54 = vld [vmem:[#allocation75_spill] sm:$0xff] }
 0x86e   : > { %v5918_v0 = vpack.c.bf16 %v5547_v24, %v5544_v5  ;;  %6192 = vmatmul.mubr.bf16.gmra.mrb[8].mxu0 %v18531_v60  ;;  %v11747_v56 = vpop.f32.mrb[175].mxu1 }
 0x86f   : > { %6201 = vmatprep.mubr.bf16.mxu0 %v5910_v14 }
 0x871   : > { %v5588_v62 = vpop.f32.mrb[240].mxu0 }
 0x872   : > { %v11752_v40 = vpop.f32.mrb[241].mxu0 }
 0x873   : > { %v5591_v46 = vpop.f32.mrb[242].mxu0  ;;  %v5632_v11 = vpop.f32.mrb[176].mxu1  ;;  %v18557_v40 = vld [vmem:[#allocation78_spill] sm:$0xff] }
 0x874   : > { %v5920_v15 = vpack.c.bf16 %v5591_v46, %v5588_v62  ;;  %v11753_v29 = vpop.f32.mrb[243].mxu0  ;;  %v11758_v10 = vpop.f32.mrb[177].mxu1  ;;  %v18558_v46 = vld [vmem:[#allocation21_spill] sm:$0xff] }
 0x875   : > { %v5635_v38 = vpop.f32.mrb[178].mxu1  ;;  %v12385_v29 = vld [vmem:[#allocation10 + $0x4] ss:$16 sps:$4 sm:$0xff]   ;;  %v12386_v10 = vld [vmem:[#allocation10 + $0x8] ss:$16 sps:$4 sm:$0xff]  }
 0x876   : > { %v5922_v61 = vpack.c.bf16 %v5635_v38, %v5632_v11  ;;  %6202 = vmatmul.mubr.bf16.gmra.mrb[12].mxu0 %v18532_v19  ;;  %v11759_v43 = vpop.f32.mrb[179].mxu1  ;;  %v18559_v11 = vpack.c.bf16 %v18557_v40, %v18558_v46  ;;  %v12388_v38 = vld [vmem:[#allocation10 + $0xc] ss:$16 sps:$4 sm:$0xff]   ;;  %7410 = vmatprep.subr.bf16.mxu1 %v12385_v29 }
 0x877   : > { %6211 = vmatprep.mubr.bf16.mxu0 %v5912_v4  ;;  %v12394_v19 = vld [vmem:[#allocation10 + $0x2c] ss:$16 sps:$4 sm:$0xff]   ;;  %7603 = vmatprep.subr.bf16.mxu0 %v12388_v38  ;;  %v12389_v43 = vld [vmem:[#allocation10 + $0x20] ss:$16 sps:$4 sm:$0xff]  }
 0x878   : > { %7604 = vmatpush1.bf16.msra.mxu0 %v12386_v10  ;;  %v13251_v29 = vld [vmem:[%s13876_s19 + $0x28] sm:$0xff] }
 0x879   : > { %v5676_v23 = vpop.f32.mrb[244].mxu0  ;;  %7605 = vmatprep.subr.bf16.mxu0 %v12394_v19  ;;  %v13252_v19 = vld [vmem:[%s13876_s19 + $0x30] sm:$0xff] }
 0x87a   : > { %v11764_v37 = vpop.f32.mrb[245].mxu0 }
 0x87b   : > { %v5679_v22 = vpop.f32.mrb[246].mxu0  ;;  %v5720_v51 = vpop.f32.mrb[180].mxu1  ;;  %v12397_v37 = vld [vmem:[#allocation10 + $0x44] ss:$16 sps:$4 sm:$0xff]  }
 0x87c   : > { %v5924_v18 = vpack.c.bf16 %v5679_v22, %v5676_v23  ;;  %v11765_v30 = vpop.f32.mrb[247].mxu0  ;;  %v11770_v45 = vpop.f32.mrb[181].mxu1  ;;  %v12392_v23 = vld [vmem:[#allocation10 + $0x28] ss:$16 sps:$4 sm:$0xff]   ;;  %v12400_v22 = vld [vmem:[#allocation10 + $0x4c] ss:$16 sps:$4 sm:$0xff]  }
 0x87d   : > { %v5723_v27 = vpop.f32.mrb[182].mxu1  ;;  %7606 = vmatpush1.bf16.msra.mxu0 %v12392_v23  ;;  %v12403_v30 = vld [vmem:[#allocation10 + $0x64] ss:$16 sps:$4 sm:$0xff]   ;;  %v12406_v45 = vld [vmem:[#allocation10 + $0x6c] ss:$16 sps:$4 sm:$0xff]  }
 0x87e   : > { %v5926_v9 = vpack.c.bf16 %v5723_v27, %v5720_v51  ;;  %6212 = vmatmul.mubr.bf16.gmra.mrb[16].mxu0 %v18533_v28  ;;  %v11771_v35 = vpop.f32.mrb[183].mxu1  ;;  %v12395_v51 = vld [vmem:[#allocation10 + $0x40] ss:$16 sps:$4 sm:$0xff]   ;;  %7607 = vmatprep.subr.bf16.mxu0 %v12400_v22  ;;  %v12409_v28 = vld [vmem:[#allocation10 + $0x84] ss:$16 sps:$4 sm:$0xff]  }
 0x87f   : > { %6221 = vmatprep.mubr.bf16.mxu0 %v5914_v53  ;;  %v18552_v53 = vld [vmem:[#allocation125_spill] sm:$0xff]  ;;  %v12412_v35 = vld [vmem:[#allocation10 + $0x8c] ss:$16 sps:$4 sm:$0xff]  }
 0x880   : > { %v18553_v47 = vpack.c.bf16 %v18551_v57, %v18552_v53  ;;  %v12401_v27 = vld [vmem:[#allocation10 + $0x60] ss:$16 sps:$4 sm:$0xff]  }
 0x886   : > { %6222 = vmatmul.mubr.bf16.gmra.mrb[20].mxu0 %v18534_v34  ;;  %v12407_v34 = vld [vmem:[#allocation10 + $0x80] ss:$16 sps:$4 sm:$0xff]  }
 0x887   : > { %6231 = vmatprep.mubr.bf16.mxu0 %v5916_v12  ;;  %v18554_v12 = vld [vmem:[#allocation22_spill] sm:$0xff] }
 0x888   : > { %v18556_v44 = vpack.c.bf16 %v18554_v12, %v18555_v54 }
 0x88e   : > { %6232 = vmatmul.mubr.bf16.gmra.mrb[24].mxu0 %v18535_v25  ;;  %v12410_v25 = vld [vmem:[#allocation10 + $0x88] ss:$16 sps:$4 sm:$0xff]  }
 0x88f   : > { %6241 = vmatprep.mubr.bf16.mxu0 %v5918_v0 }
 0x896   : > { %6242 = vmatmul.mubr.bf16.gmra.mrb[28].mxu0 %v18536_v50  ;;  %v12415_v50 = vld [vmem:[#allocation10 + $0xa4] ss:$16 sps:$4 sm:$0xff]  }
 0x897   : > { %6251 = vmatprep.mubr.bf16.mxu0 %v5920_v15  ;;  %v12383_v15 = vld [vmem:[#allocation10] ss:$16 sps:$4 sm:$0xff]  }
 0x898   : > { %7411 = vmatpush1.bf16.msra.mxu1 %v12383_v15  ;;  %v12422_v15 = vld [vmem:[#allocation10 + $0xc8] ss:$16 sps:$4 sm:$0xff]  }
 0x89e   : > { %6252 = vmatmul.mubr.bf16.gmra.mrb[32].mxu0 %v18538_v55  ;;  %v12413_v55 = vld [vmem:[#allocation10 + $0xa0] ss:$16 sps:$4 sm:$0xff]  }
 0x89f   : > { %6261 = vmatprep.mubr.bf16.mxu0 %v5922_v61  ;;  %v12391_v61 = vld [vmem:[#allocation10 + $0x24] ss:$16 sps:$4 sm:$0xff]  }
 0x8a0   : > { %7412 = vmatprep.subr.bf16.mxu1 %v12391_v61 }
 0x8a1   : > { %7413 = vmatpush1.bf16.msra.mxu1 %v12389_v43 }
 0x8a2   : > { %7414 = vmatprep.subr.bf16.mxu1 %v12397_v37  ;;  %v13253_v37 = vld [vmem:[%s13876_s19 + $0x38] sm:$0xff] }
 0x8a5   : > { %7415 = vmatpush1.bf16.msra.mxu1 %v12395_v51 }
 0x8a6   : > { %6262 = vmatmul.mubr.bf16.gmra.mrb[36].mxu0 %v18541_v32  ;;  %7416 = vmatprep.subr.bf16.mxu1 %v12403_v30  ;;  %v18560_v32 = vld [vmem:[#allocation19_spill] sm:$0xff] }
 0x8a7   : > { %6271 = vmatprep.mubr.bf16.mxu0 %v5924_v18  ;;  %v12398_v18 = vld [vmem:[#allocation10 + $0x48] ss:$16 sps:$4 sm:$0xff]   ;;  %v16405_v31 = vrot.slane %v5967_v36, %v18560_v32  ;;  %v12427_v30 = vld [vmem:[#allocation10 + $0xe4] ss:$16 sps:$4 sm:$0xff]  }
 0x8a8   : > { %7608 = vmatpush1.bf16.msra.mxu0 %v12398_v18 }
 0x8a9   : > { %7609 = vmatprep.subr.bf16.mxu0 %v12406_v45  ;;  %7417 = vmatpush1.bf16.msra.mxu1 %v12401_v27  ;;  %v12430_v45 = vld [vmem:[#allocation10 + $0xec] ss:$16 sps:$4 sm:$0xff]   ;;  %v12425_v27 = vld [vmem:[#allocation10 + $0xe0] ss:$16 sps:$4 sm:$0xff]  }
 0x8aa   : > { %7418 = vmatprep.subr.bf16.mxu1 %v12409_v28 }
 0x8ad   : > { %7419 = vmatpush1.bf16.msra.mxu1 %v12407_v34 }
 0x8ae   : > { %6272 = vmatmul.mubr.bf16.gmra.mrb[40].mxu0 %v18544_v7  ;;  %7420 = vmatprep.subr.bf16.mxu1 %v12415_v50  ;;  %v16408_v7 = vrot.slane %v5967_v36, %v18561_v8  ;;  %v12433_v50 = vld [vmem:[#allocation10 + $0x104] ss:$16 sps:$4 sm:$0xff]   ;;  %v12431_v36 = vld [vmem:[#allocation10 + $0x100] ss:$16 sps:$4 sm:$0xff]  }
 0x8af   : > { %6281 = vmatprep.mubr.bf16.mxu0 %v5926_v9  ;;  %v12404_v9 = vld [vmem:[#allocation10 + $0x68] ss:$16 sps:$4 sm:$0xff]  }
 0x8b0   : > { %7610 = vmatpush1.bf16.msra.mxu0 %v12404_v9  ;;  %v12428_v9 = vld [vmem:[#allocation10 + $0xe8] ss:$16 sps:$4 sm:$0xff]  }
 0x8b1   : > { %7611 = vmatprep.subr.bf16.mxu0 %v12412_v35  ;;  %7421 = vmatpush1.bf16.msra.mxu1 %v12413_v55 }
 0x8b4   : > { %7612 = vmatpush1.bf16.msra.mxu0 %v12410_v25 }
 0x8b5   : > { %7613 = vmatprep.subr.bf16.mxu0 %v12418_v39 }
 0x8b6   : > { %6282 = vmatmul.mubr.bf16.gmra.mrb[44].mxu0 %v18547_v16 }
 0x8b8   : > { %7614 = vmatpush1.bf16.msra.mxu0 %v12416_v26  ;;  %v12436_v26 = vld [vmem:[#allocation10 + $0x10c] ss:$16 sps:$4 sm:$0xff]  }
 0x8e1   : > { %v5764_v49 = vpop.f32.mrb[248].mxu0 }
 0x8e2   : > { %v11776_v58 = vpop.f32.mrb[249].mxu0 }
 0x8e3   : > { %v5767_v14 = vpop.f32.mrb[250].mxu0 }
 0x8e4   : > { %v5928_v20 = vpack.c.bf16 %v5767_v14, %v5764_v49  ;;  %v11777_v2 = vpop.f32.mrb[251].mxu0  ;;  %v13246_v14 = vld [vmem:[%s13876_s19] sm:$0xff] }
 0x8e6   : > { %6291 = vmatprep.mubr.bf16.mxu0 %v5928_v20 }
 0x8e7   : > { %6292 = vmatmul.mubr.bf16.gmra.mrb[48].mxu0 %v18550_v63 }
 0x8e9   : > { %v5808_v13 = vpop.f32.mrb[184].mxu1 }
 0x8ea   : > { %v11782_v21 = vpop.f32.mrb[185].mxu1 }
 0x8eb   : > { %v5811_v4 = vpop.f32.mrb[186].mxu1  ;;  %v13248_v21 = vld [vmem:[%s13876_s19 + $0x10] sm:$0xff] }
 0x8ec   : > { %v5930_v17 = vpack.c.bf16 %v5811_v4, %v5808_v13  ;;  %v11783_v48 = vpop.f32.mrb[187].mxu1 }
 0x8ee   : > { %6301 = vmatprep.mubr.bf16.mxu0 %v5930_v17  ;;  %v13249_v17 = vld [vmem:[%s13876_s19 + $0x18] sm:$0xff] }
 0x8ef   : > { %6302 = vmatmul.mubr.bf16.gmra.mrb[52].mxu0 %v18553_v47 }
 0x8f1   : > { %v5852_v3 = vpop.f32.mrb[252].mxu0 }
 0x8f2   : > { %v11788_v59 = vpop.f32.mrb[253].mxu0 }
 0x8f3   : > { %v5855_v42 = vpop.f32.mrb[254].mxu0 }
 0x8f4   : > { %v5932_v41 = vpack.c.bf16 %v5855_v42, %v5852_v3  ;;  %v11789_v5 = vpop.f32.mrb[255].mxu0 }
 0x8f6   : > { %6311 = vmatprep.mubr.bf16.mxu0 %v5932_v41 }
 0x8f7   : > { %6312 = vmatmul.mubr.bf16.gmra.mrb[56].mxu0 %v18556_v44 }
 0x8f9   : > { %v5896_v24 = vpop.f32.mrb[188].mxu1 }
 0x8fa   : > { %v11794_v0 = vpop.f32.mrb[189].mxu1 }
 0x8fb   : > { %v5899_v60 = vpop.f32.mrb[190].mxu1  ;;  %v12421_v0 = vld [vmem:[#allocation10 + $0xc4] ss:$16 sps:$4 sm:$0xff]  }
 0x8fc   : > { %v5934_v56 = vpack.c.bf16 %v5899_v60, %v5896_v24  ;;  %v11795_v62 = vpop.f32.mrb[191].mxu1  ;;  %v12424_v60 = vld [vmem:[#allocation10 + $0xcc] ss:$16 sps:$4 sm:$0xff]   ;;  %7422 = vmatprep.subr.bf16.mxu1 %v12421_v0 }
 0x8fd   : > { %7615 = vmatprep.subr.bf16.mxu0 %v12424_v60 }
 0x8fe   : > { %6321 = vmatprep.mubr.bf16.mxu0 %v5934_v56  ;;  %v13250_v56 = vld [vmem:[%s13876_s19 + $0x20] sm:$0xff]  ;;  %7616 = vmatpush1.bf16.msra.mxu0 %v12422_v15 }
 0x8ff   : > { %6322 = vmatmul.mubr.bf16.gmra.mrb[60].mxu0 %v18559_v11  ;;  %v12419_v11 = vld [vmem:[#allocation10 + $0xc0] ss:$16 sps:$4 sm:$0xff]   ;;  %7617 = vmatprep.subr.bf16.mxu0 %v12430_v45  ;;  %v13259_v45 = vld [vmem:[%s13876_s19 + $0x68] sm:$0xff] }
 0x900   : > { %7423 = vmatpush1.bf16.msra.mxu1 %v12419_v11 }
 0x901   : > { %7424 = vmatprep.subr.bf16.mxu1 %v12427_v30  ;;  %v12446_v30 = vld [vmem:[#allocation10 + $0x148] ss:$16 sps:$4 sm:$0xff]  }
 0x902   : > { %7618 = vmatpush1.bf16.msra.mxu0 %v12428_v9 }
 0x903   : > { %7619 = vmatprep.subr.bf16.mxu0 %v12436_v26  ;;  %v12451_v26 = vld [vmem:[#allocation10 + $0x164] ss:$16 sps:$4 sm:$0xff]  }
 0x904   : > { %7425 = vmatpush1.bf16.msra.mxu1 %v12425_v27 }
 0x905   : > { %7426 = vmatprep.subr.bf16.mxu1 %v12433_v50  ;;  %v13261_v50 = vld [vmem:[%s13876_s19 + $0x78] sm:$0xff] }
 0x908   : > { %7427 = vmatpush1.bf16.msra.mxu1 %v12431_v36 }
 0x931   : > { %v6173_v33 = vpop.f32.mrb[0].mxu0 }
 0x932   : > { %v6174_v6 = vadd.f32 %v6173_v33, %v16405_v31  ;;  %v6175_v16 = vpop.f32.mrb[1].mxu0 }
 0x933   : > { %v6176_v49 = vadd.f32 %v6175_v16, %v16408_v7  ;;  %v6177_v58 = vpop.f32.mrb[2].mxu0 }
 0x934   : > { %v16413_v20 = vadd.f32 %v13246_v14, %v6174_v6  ;;  %v6178_v2 = vadd.f32 %v6177_v58, %v16405_v31  ;;  %v6179_v52 = vpop.f32.mrb[3].mxu0  ;;  %v13254_v58 = vld [vmem:[%s13876_s19 + $0x40] sm:$0xff] }
 0x935   : > { %v16417_v63 = vadd.f32 %v13247_v1, %v6176_v49  ;;  %v6180_v13 = vadd.f32 %v6179_v52, %v16408_v7  ;;  %v12434_v49 = vld [vmem:[#allocation10 + $0x108] ss:$16 sps:$4 sm:$0xff]  }
 0x936   : > { %18562 = vst [vmem:[#allocation77_spill] sm:$0xff] %v16413_v20  ;;  %v16421_v4 = vadd.f32 %v13248_v21, %v6178_v2  ;;  %v6524_v53 = vmul.f32 %v16413_v20, %v16413_v20  ;;  %v13255_v1 = vld [vmem:[%s13876_s19 + $0x48] sm:$0xff]  ;;  %7620 = vmatpush1.bf16.msra.mxu0 %v12434_v49 }
 0x937   : > { %18563 = vst [vmem:[#allocation80_spill] sm:$0xff] %v16417_v63  ;;  %v16424_v48 = vadd.f32 %v13249_v17, %v6180_v13  ;;  %v6396_v57 = vadd.f32 %v16417_v63, %v16413_v20  ;;  %v6525_v47 = vmul.f32 %v16417_v63, %v16417_v63 }
 0x938   : > { %18564 = vst [vmem:[#allocation79_spill] sm:$0xff] %v16421_v4  ;;  %v6526_v42 = vmul.f32 %v16421_v4, %v16421_v4 }
 0x939   : > { %18565 = vst [vmem:[#allocation24_spill] sm:$0xff] %v16424_v48  ;;  %6397 = vadd.xlane.f32.xlu0 %v6396_v57  ;;  %v6183_v3 = vpop.f32.mrb[4].mxu0  ;;  %v6399_v59 = vadd.f32 %v16424_v48, %v16421_v4  ;;  %v6527_v41 = vmul.f32 %v16424_v48, %v16424_v48  ;;  %v6588_v24 = vadd.f32 %v6525_v47, %v6524_v53  ;;  %v13256_v57 = vld [vmem:[%s13876_s19 + $0x50] sm:$0xff] }
 0x93a   : > { %v6184_v5 = vadd.f32 %v6183_v3, %v16405_v31  ;;  %v6185_v12 = vpop.f32.mrb[5].mxu0  ;;  %v13257_v3 = vld [vmem:[%s13876_s19 + $0x58] sm:$0xff] }
 0x93b   : > { %v6186_v54 = vadd.f32 %v6185_v12, %v16408_v7  ;;  %6400 = vadd.xlane.f32.xlu1 %v6399_v59  ;;  %v6187_v44 = vpop.f32.mrb[6].mxu0  ;;  %v6591_v61 = vadd.f32 %v6527_v41, %v6526_v42  ;;  %v12442_v12 = vld [vmem:[#allocation10 + $0x12c] ss:$16 sps:$4 sm:$0xff]  }
 0x93c   : > { %v16441_v62 = vadd.f32 %v13250_v56, %v6184_v5  ;;  %v6188_v40 = vadd.f32 %v6187_v44, %v16405_v31  ;;  %v6189_v46 = vpop.f32.mrb[7].mxu0  ;;  %v12439_v5 = vld [vmem:[#allocation10 + $0x124] ss:$16 sps:$4 sm:$0xff]   ;;  %v12440_v44 = vld [vmem:[#allocation10 + $0x128] ss:$16 sps:$4 sm:$0xff]   ;;  %7621 = vmatprep.subr.bf16.mxu0 %v12442_v12 }
 0x93d   : > { %v16445_v10 = vadd.f32 %v13251_v29, %v6186_v54  ;;  %v6190_v38 = vadd.f32 %v6189_v46, %v16408_v7  ;;  %6589 = vadd.xlane.f32.xlu0 %v6588_v24  ;;  %v12437_v54 = vld [vmem:[#allocation10 + $0x120] ss:$16 sps:$4 sm:$0xff]   ;;  %7428 = vmatprep.subr.bf16.mxu1 %v12439_v5 }
 0x93e   : > { %v16449_v43 = vadd.f32 %v13252_v19, %v6188_v40  ;;  %v6528_v23 = vmul.f32 %v16441_v62, %v16441_v62  ;;  %7429 = vmatpush1.bf16.msra.mxu1 %v12437_v54  ;;  %7622 = vmatpush1.bf16.msra.mxu0 %v12440_v44  ;;  %v13258_v19 = vld [vmem:[%s13876_s19 + $0x60] sm:$0xff] }
 0x93f   : > { %v16454_v22 = vadd.f32 %v13253_v37, %v6190_v38  ;;  %6592 = vadd.xlane.f32.xlu1 %v6591_v61  ;;  %v6402_v51 = vadd.f32 %v16445_v10, %v16441_v62  ;;  %v6529_v18 = vmul.f32 %v16445_v10, %v16445_v10  ;;  %v12445_v38 = vld [vmem:[#allocation10 + $0x144] ss:$16 sps:$4 sm:$0xff]   ;;  %v12448_v61 = vld [vmem:[#allocation10 + $0x14c] ss:$16 sps:$4 sm:$0xff]   ;;  %v12455_v44 = vld [vmem:[#allocation10 + $0x180] ss:$16 sps:$4 sm:$0xff]  }
 0x940   : > { %v6530_v34 = vmul.f32 %v16449_v43, %v16449_v43  ;;  %7430 = vmatprep.subr.bf16.mxu1 %v12445_v38  ;;  %7623 = vmatprep.subr.bf16.mxu0 %v12448_v61 }
 0x941   : > { %18566 = vst [vmem:[#allocation23_spill] sm:$0xff] %v16454_v22  ;;  %v6193_v28 = vpop.f32.mrb[8].mxu0  ;;  %6403 = vadd.xlane.f32.xlu0 %v6402_v51  ;;  %v6405_v35 = vadd.f32 %v16454_v22, %v16449_v43  ;;  %v6531_v25 = vmul.f32 %v16454_v22, %v16454_v22  ;;  %v6594_v16 = vadd.f32 %v6529_v18, %v6528_v23  ;;  %v12443_v18 = vld [vmem:[#allocation10 + $0x140] ss:$16 sps:$4 sm:$0xff]  }
 0x942   : > { %v6194_v39 = vadd.f32 %v6193_v28, %v16405_v31  ;;  %v6195_v55 = vpop.f32.mrb[9].mxu0  ;;  %7431 = vmatpush1.bf16.msra.mxu1 %v12443_v18  ;;  %7624 = vmatpush1.bf16.msra.mxu0 %v12446_v30  ;;  %v12461_v18 = vld [vmem:[#allocation10 + $0x1a0] ss:$16 sps:$4 sm:$0xff]   ;;  %v12464_v30 = vld [vmem:[#allocation10 + $0x1a8] ss:$16 sps:$4 sm:$0xff]  }
 0x943   : > { %v6196_v33 = vadd.f32 %v6195_v55, %v16408_v7  ;;  %v6197_v6 = vpop.f32.mrb[10].mxu0  ;;  %6406 = vadd.xlane.f32.xlu1 %v6405_v35  ;;  %v6597_v17 = vadd.f32 %v6531_v25, %v6530_v34  ;;  %v13260_v35 = vld [vmem:[%s13876_s19 + $0x70] sm:$0xff]  ;;  %7432 = vmatprep.subr.bf16.mxu1 %v12451_v26 }
 0x944   : > { %v16469_v14 = vadd.f32 %v13254_v58, %v6194_v39  ;;  %v6198_v2 = vadd.f32 %v6197_v6, %v16405_v31  ;;  %v6199_v52 = vpop.f32.mrb[11].mxu0  ;;  %v12449_v6 = vld [vmem:[#allocation10 + $0x160] ss:$16 sps:$4 sm:$0xff]  }
 0x945   : > { %v16473_v13 = vadd.f32 %v13255_v1, %v6196_v33  ;;  %v6200_v21 = vadd.f32 %v6199_v52, %v16408_v7  ;;  %6595 = vadd.xlane.f32.xlu0 %v6594_v16  ;;  %v12454_v33 = vld [vmem:[#allocation10 + $0x16c] ss:$16 sps:$4 sm:$0xff]   ;;  %v12452_v16 = vld [vmem:[#allocation10 + $0x168] ss:$16 sps:$4 sm:$0xff]  }
 0x946   : > { %18567 = vst [vmem:[#allocation26_spill] sm:$0xff] %v16469_v14  ;;  %v16477_v53 = vadd.f32 %v13256_v57, %v6198_v2  ;;  %v6532_v47 = vmul.f32 %v16469_v14, %v16469_v14  ;;  %7625 = vmatprep.subr.bf16.mxu0 %v12454_v33  ;;  %7433 = vmatpush1.bf16.msra.mxu1 %v12449_v6  ;;  %v13266_v33 = vld [vmem:[%s13876_s19 + $0xa0] sm:$0xff] }
 0x947   : > { %18568 = vst [vmem:[#allocation25_spill] sm:$0xff] %v16473_v13  ;;  %v16482_v59 = vadd.f32 %v13257_v3, %v6200_v21  ;;  %6598 = vadd.xlane.f32.xlu1 %v6597_v17  ;;  %v6408_v42 = vadd.f32 %v16473_v13, %v16469_v14  ;;  %v6533_v41 = vmul.f32 %v16473_v13, %v16473_v13  ;;  %v12457_v3 = vld [vmem:[#allocation10 + $0x184] ss:$16 sps:$4 sm:$0xff]  }
 0x948   : > { %18569 = vst [vmem:[#allocation82_spill] sm:$0xff] %v16477_v53  ;;  %v6534_v60 = vmul.f32 %v16477_v53, %v16477_v53  ;;  %7626 = vmatpush1.bf16.msra.mxu0 %v12452_v16  ;;  %7434 = vmatprep.subr.bf16.mxu1 %v12457_v3  ;;  %v13268_v3 = vld [vmem:[%s13876_s19 + $0xb0] sm:$0xff] }
 0x949   : > { %18570 = vst [vmem:[#allocation81_spill] sm:$0xff] %v16482_v59  ;;  %6409 = vadd.xlane.f32.xlu0 %v6408_v42  ;;  %v6203_v24 = vpop.f32.mrb[12].mxu0  ;;  %v6411_v0 = vadd.f32 %v16482_v59, %v16477_v53  ;;  %v6535_v56 = vmul.f32 %v16482_v59, %v16482_v59  ;;  %v6600_v29 = vadd.f32 %v6533_v41, %v6532_v47  ;;  %v12460_v42 = vld [vmem:[#allocation10 + $0x18c] ss:$16 sps:$4 sm:$0xff]  }
 0x94a   : > { %v6204_v40 = vadd.f32 %v6203_v24, %v16405_v31  ;;  %v6205_v46 = vpop.f32.mrb[13].mxu0  ;;  %v13262_v41 = vld [vmem:[%s13876_s19 + $0x80] sm:$0xff]  ;;  %v12458_v24 = vld [vmem:[#allocation10 + $0x188] ss:$16 sps:$4 sm:$0xff]   ;;  %7627 = vmatprep.subr.bf16.mxu0 %v12460_v42  ;;  %7435 = vmatpush1.bf16.msra.mxu1 %v12455_v44 }
 0x94b   : > { %v6206_v11 = vadd.f32 %v6205_v46, %v16408_v7  ;;  %6412 = vadd.xlane.f32.xlu1 %v6411_v0  ;;  %v6207_v15 = vpop.f32.mrb[14].mxu0  ;;  %v6603_v28 = vadd.f32 %v6535_v56, %v6534_v60  ;;  %v13263_v0 = vld [vmem:[%s13876_s19 + $0x88] sm:$0xff]  ;;  %v13264_v46 = vld [vmem:[%s13876_s19 + $0x90] sm:$0xff] }
 0x94c   : > { %v16497_v23 = vadd.f32 %v13258_v19, %v6204_v40  ;;  %v6208_v37 = vadd.f32 %v6207_v15, %v16405_v31  ;;  %v6209_v51 = vpop.f32.mrb[15].mxu0  ;;  %7628 = vmatpush1.bf16.msra.mxu0 %v12458_v24 }
 0x94d   : > { %v16501_v27 = vadd.f32 %v13259_v45, %v6206_v11  ;;  %v6210_v9 = vadd.f32 %v6209_v51, %v16408_v7  ;;  %6601 = vadd.xlane.f32.xlu0 %v6600_v29  ;;  %v13265_v29 = vld [vmem:[%s13876_s19 + $0x98] sm:$0xff] }
 0x94e   : > { %18571 = vst [vmem:[#allocation84_spill] sm:$0xff] %v16497_v23  ;;  %v16505_v34 = vadd.f32 %v13260_v35, %v6208_v37  ;;  %v6536_v25 = vmul.f32 %v16497_v23, %v16497_v23  ;;  %v12463_v37 = vld [vmem:[#allocation10 + $0x1a4] ss:$16 sps:$4 sm:$0xff]   ;;  %v12466_v51 = vld [vmem:[#allocation10 + $0x1ac] ss:$16 sps:$4 sm:$0xff]  }
 0x94f   : > { %18572 = vst [vmem:[#allocation83_spill] sm:$0xff] %v16501_v27  ;;  %v16510_v39 = vadd.f32 %v13261_v50, %v6210_v9  ;;  %6604 = vadd.xlane.f32.xlu1 %v6603_v28  ;;  %v6414_v55 = vadd.f32 %v16501_v27, %v16497_v23  ;;  %v6537_v36 = vmul.f32 %v16501_v27, %v16501_v27 }
 0x950   : > { %18573 = vst [vmem:[#allocation28_spill] sm:$0xff] %v16505_v34  ;;  %v6538_v2 = vmul.f32 %v16505_v34, %v16505_v34  ;;  %7436 = vmatprep.subr.bf16.mxu1 %v12463_v37  ;;  %7629 = vmatprep.subr.bf16.mxu0 %v12466_v51 }
 0x951   : > { %18574 = vst [vmem:[#allocation27_spill] sm:$0xff] %v16510_v39  ;;  %v6213_v49 = vpop.f32.mrb[16].mxu0  ;;  %6415 = vadd.xlane.f32.xlu0 %v6414_v55  ;;  %v6417_v58 = vadd.f32 %v16510_v39, %v16505_v34  ;;  %v6539_v52 = vmul.f32 %v16510_v39, %v16510_v39  ;;  %v6606_v47 = vadd.f32 %v6537_v36, %v6536_v25 }
 0x952   : > { %v6214_v1 = vadd.f32 %v6213_v49, %v16405_v31  ;;  %v6215_v21 = vpop.f32.mrb[17].mxu0  ;;  %7437 = vmatpush1.bf16.msra.mxu1 %v12461_v18  ;;  %7630 = vmatpush1.bf16.msra.mxu0 %v12464_v30 }
 0x953   : > { %v6216_v17 = vadd.f32 %v6215_v21, %v16408_v7  ;;  %v6217_v57 = vpop.f32.mrb[18].mxu0  ;;  %6418 = vadd.xlane.f32.xlu1 %v6417_v58  ;;  %v6609_v40 = vadd.f32 %v6539_v52, %v6538_v2  ;;  %v12469_v58 = vld [vmem:[#allocation10 + $0x1c4] ss:$16 sps:$4 sm:$0xff]   ;;  %v12472_v2 = vld [vmem:[#allocation10 + $0x1cc] ss:$16 sps:$4 sm:$0xff]  }
 0x954   : > { %v16525_v5 = vadd.f32 %v13262_v41, %v6214_v1  ;;  %v6218_v12 = vadd.f32 %v6217_v57, %v16405_v31  ;;  %v6219_v54 = vpop.f32.mrb[19].mxu0  ;;  %v13267_v52 = vld [vmem:[%s13876_s19 + $0xa8] sm:$0xff]  ;;  %v12467_v57 = vld [vmem:[#allocation10 + $0x1c0] ss:$16 sps:$4 sm:$0xff]   ;;  %7438 = vmatprep.subr.bf16.mxu1 %v12469_v58  ;;  %7631 = vmatprep.subr.bf16.mxu0 %v12472_v2 }
 0x955   : > { %v16529_v60 = vadd.f32 %v13263_v0, %v6216_v17  ;;  %v6220_v56 = vadd.f32 %v6219_v54, %v16408_v7  ;;  %6607 = vadd.xlane.f32.xlu0 %v6606_v47  ;;  %v12470_v47 = vld [vmem:[#allocation10 + $0x1c8] ss:$16 sps:$4 sm:$0xff]   ;;  %v12475_v0 = vld [vmem:[#allocation10 + $0x1e4] ss:$16 sps:$4 sm:$0xff]  }
 0x956   : > { %18575 = vst [vmem:[#allocation30_spill] sm:$0xff] %v16525_v5  ;;  %v16533_v11 = vadd.f32 %v13264_v46, %v6218_v12  ;;  %v6540_v15 = vmul.f32 %v16525_v5, %v16525_v5  ;;  %v13269_v12 = vld [vmem:[%s13876_s19 + $0xb8] sm:$0xff]  ;;  %7439 = vmatpush1.bf16.msra.mxu1 %v12467_v57  ;;  %7632 = vmatpush1.bf16.msra.mxu0 %v12470_v47 }
 0x957   : > { %18576 = vst [vmem:[#allocation29_spill] sm:$0xff] %v16529_v60  ;;  %v16538_v38 = vadd.f32 %v13265_v29, %v6220_v56  ;;  %6610 = vadd.xlane.f32.xlu1 %v6609_v40  ;;  %v6420_v61 = vadd.f32 %v16529_v60, %v16525_v5  ;;  %v6541_v19 = vmul.f32 %v16529_v60, %v16529_v60  ;;  %v12478_v56 = vld [vmem:[#allocation10 + $0x1ec] ss:$16 sps:$4 sm:$0xff]  }
 0x958   : > { %18577 = vst [vmem:[#allocation86_spill] sm:$0xff] %v16533_v11  ;;  %v6542_v28 = vmul.f32 %v16533_v11, %v16533_v11  ;;  %7440 = vmatprep.subr.bf16.mxu1 %v12475_v0  ;;  %7633 = vmatprep.subr.bf16.mxu0 %v12478_v56  ;;  %v13274_v56 = vld [vmem:[%s13876_s19 + $0xe0] sm:$0xff] }
 0x959   : > { %18578 = vst [vmem:[#allocation85_spill] sm:$0xff] %v16538_v38  ;;  %6421 = vadd.xlane.f32.xlu0 %v6420_v61  ;;  %v6223_v45 = vpop.f32.mrb[20].mxu0  ;;  %v6423_v9 = vadd.f32 %v16538_v38, %v16533_v11  ;;  %v6543_v35 = vmul.f32 %v16538_v38, %v16538_v38  ;;  %v6612_v26 = vadd.f32 %v6541_v19, %v6540_v15  ;;  %v12473_v61 = vld [vmem:[#allocation10 + $0x1e0] ss:$16 sps:$4 sm:$0xff]   ;;  %v12476_v19 = vld [vmem:[#allocation10 + $0x1e8] ss:$16 sps:$4 sm:$0xff]  }
 0x95a   : > { %v6224_v25 = vadd.f32 %v6223_v45, %v16405_v31  ;;  %v6225_v50 = vpop.f32.mrb[21].mxu0  ;;  %7441 = vmatpush1.bf16.msra.mxu1 %v12473_v61  ;;  %7634 = vmatpush1.bf16.msra.mxu0 %v12476_v19 }
 0x95b   : > { %v6226_v55 = vadd.f32 %v6225_v50, %v16408_v7  ;;  %6424 = vadd.xlane.f32.xlu1 %v6423_v9  ;;  %v6227_v36 = vpop.f32.mrb[22].mxu0  ;;  %v6615_v17 = vadd.f32 %v6543_v35, %v6542_v28  ;;  %v13270_v9 = vld [vmem:[%s13876_s19 + $0xc0] sm:$0xff]  ;;  %v13271_v50 = vld [vmem:[%s13876_s19 + $0xc8] sm:$0xff] }
 0x95c   : > { %v16553_v6 = vadd.f32 %v13266_v33, %v6224_v25  ;;  %v6228_v16 = vadd.f32 %v6227_v36, %v16405_v31  ;;  %v6229_v49 = vpop.f32.mrb[23].mxu0  ;;  %v13272_v33 = vld [vmem:[%s13876_s19 + $0xd0] sm:$0xff] }
 0x95d   : > { %v16557_v1 = vadd.f32 %v13267_v52, %v6226_v55  ;;  %v6230_v21 = vadd.f32 %v6229_v49, %v16408_v7  ;;  %6613 = vadd.xlane.f32.xlu0 %v6612_v26  ;;  %v13273_v49 = vld [vmem:[%s13876_s19 + $0xd8] sm:$0xff] }
 0x95e   : > { %18579 = vst [vmem:[#allocation88_spill] sm:$0xff] %v16553_v6  ;;  %v16561_v42 = vadd.f32 %v13268_v3, %v6228_v16  ;;  %v6544_v41 = vmul.f32 %v16553_v6, %v16553_v6 }
 0x95f   : > { %18580 = vst [vmem:[#allocation87_spill] sm:$0xff] %v16557_v1  ;;  %v16566_v54 = vadd.f32 %v13269_v12, %v6230_v21  ;;  %6616 = vadd.xlane.f32.xlu1 %v6615_v17  ;;  %v6426_v44 = vadd.f32 %v16557_v1, %v16553_v6  ;;  %v6545_v24 = vmul.f32 %v16557_v1, %v16557_v1 }
 0x960   : > { %18581 = vst [vmem:[#allocation32_spill] sm:$0xff] %v16561_v42  ;;  %v6546_v15 = vmul.f32 %v16561_v42, %v16561_v42 }
 0x961   : > { %18582 = vst [vmem:[#allocation31_spill] sm:$0xff] %v16566_v54  ;;  %v6233_v40 = vpop.f32.mrb[24].mxu0  ;;  %6427 = vadd.xlane.f32.xlu0 %v6426_v44  ;;  %v6429_v46 = vadd.f32 %v16566_v54, %v16561_v42  ;;  %v6547_v29 = vmul.f32 %v16566_v54, %v16566_v54  ;;  %v6618_v45 = vadd.f32 %v6545_v24, %v6544_v41 }
 0x962   : > { %v6234_v37 = vadd.f32 %v6233_v40, %v16405_v31  ;;  %v6235_v51 = vpop.f32.mrb[25].mxu0 }
 0x963   : > { %v6236_v18 = vadd.f32 %v6235_v51, %v16408_v7  ;;  %v6237_v30 = vpop.f32.mrb[26].mxu0  ;;  %6430 = vadd.xlane.f32.xlu1 %v6429_v46  ;;  %v6621_v26 = vadd.f32 %v6547_v29, %v6546_v15  ;;  %v13275_v29 = vld [vmem:[%s13876_s19 + $0xe8] sm:$0xff]  ;;  %v13276_v51 = vld [vmem:[%s13876_s19 + $0xf0] sm:$0xff] }
 0x964   : > { %v16581_v28 = vadd.f32 %v13270_v9, %v6234_v37  ;;  %v6238_v35 = vadd.f32 %v6237_v30, %v16405_v31  ;;  %v6239_v25 = vpop.f32.mrb[27].mxu0  ;;  %v13277_v30 = vld [vmem:[%s13876_s19 + $0xf8] sm:$0xff] }
 0x965   : > { %v16585_v55 = vadd.f32 %v13271_v50, %v6236_v18  ;;  %v6240_v36 = vadd.f32 %v6239_v25, %v16408_v7  ;;  %6619 = vadd.xlane.f32.xlu0 %v6618_v45 }
 0x966   : > { %18583 = vst [vmem:[#allocation34_spill] sm:$0xff] %v16581_v28  ;;  %v16589_v16 = vadd.f32 %v13272_v33, %v6238_v35  ;;  %v6548_v52 = vmul.f32 %v16581_v28, %v16581_v28 }
 0x967   : > { %18584 = vst [vmem:[#allocation33_spill] sm:$0xff] %v16585_v55  ;;  %v16592_v58 = vadd.f32 %v13273_v49, %v6240_v36  ;;  %6622 = vadd.xlane.f32.xlu1 %v6621_v26  ;;  %v6432_v2 = vadd.f32 %v16585_v55, %v16581_v28  ;;  %v6549_v21 = vmul.f32 %v16585_v55, %v16585_v55 }
 0x968   : > { %18585 = vst [vmem:[#allocation90_spill] sm:$0xff] %v16589_v16  ;;  %v6550_v47 = vmul.f32 %v16589_v16, %v16589_v16 }
 0x969   : > { %18586 = vst [vmem:[#allocation89_spill] sm:$0xff] %v16592_v58  ;;  %6433 = vadd.xlane.f32.xlu0 %v6432_v2  ;;  %v6243_v17 = vpop.f32.mrb[28].mxu0  ;;  %v6435_v57 = vadd.f32 %v16592_v58, %v16589_v16  ;;  %v6551_v3 = vmul.f32 %v16592_v58, %v16592_v58  ;;  %v6624_v0 = vadd.f32 %v6549_v21, %v6548_v52 }
 0x96a   : > { %v6244_v41 = vadd.f32 %v6243_v17, %v16405_v31  ;;  %v6245_v12 = vpop.f32.mrb[29].mxu0 }
 0x96b   : > { %v6246_v44 = vadd.f32 %v6245_v12, %v16408_v7  ;;  %6436 = vadd.xlane.f32.xlu1 %v6435_v57  ;;  %v6247_v24 = vpop.f32.mrb[30].mxu0  ;;  %v6627_v37 = vadd.f32 %v6551_v3, %v6550_v47  ;;  %v13278_v57 = vld [vmem:[%s13876_s19 + $0x100] sm:$0xff]  ;;  %v13279_v12 = vld [vmem:[%s13876_s19 + $0x108] sm:$0xff] }
 0x96c   : > { %v16609_v40 = vadd.f32 %v13274_v56, %v6244_v41  ;;  %v6248_v46 = vadd.f32 %v6247_v24, %v16405_v31  ;;  %v6249_v15 = vpop.f32.mrb[31].mxu0  ;;  %v13280_v56 = vld [vmem:[%s13876_s19 + $0x110] sm:$0xff] }
 0x96d   : > { %v16613_v61 = vadd.f32 %v13275_v29, %v6246_v44  ;;  %v6250_v19 = vadd.f32 %v6249_v15, %v16408_v7  ;;  %6625 = vadd.xlane.f32.xlu0 %v6624_v0  ;;  %v13281_v15 = vld [vmem:[%s13876_s19 + $0x118] sm:$0xff] }
 0x96e   : > { %18587 = vst [vmem:[#allocation40_spill] sm:$0xff] %v16609_v40  ;;  %v16617_v18 = vadd.f32 %v13276_v51, %v6248_v46  ;;  %v6552_v35 = vmul.f32 %v16609_v40, %v16609_v40 }
 0x96f   : > { %18588 = vst [vmem:[#allocation39_spill] sm:$0xff] %v16613_v61  ;;  %v16620_v45 = vadd.f32 %v13277_v30, %v6250_v19  ;;  %6628 = vadd.xlane.f32.xlu1 %v6627_v37  ;;  %v6438_v9 = vadd.f32 %v16613_v61, %v16609_v40  ;;  %v6553_v25 = vmul.f32 %v16613_v61, %v16613_v61 }
 0x970   : > { %18589 = vst [vmem:[#allocation38_spill] sm:$0xff] %v16617_v18  ;;  %v6554_v26 = vmul.f32 %v16617_v18, %v16617_v18 }
 0x971   : > { %18590 = vst [vmem:[#allocation37_spill] sm:$0xff] %v16620_v45  ;;  %v6253_v50 = vpop.f32.mrb[32].mxu0  ;;  %6439 = vadd.xlane.f32.xlu0 %v6438_v9  ;;  %v6441_v36 = vadd.f32 %v16620_v45, %v16617_v18  ;;  %v6555_v33 = vmul.f32 %v16620_v45, %v16620_v45  ;;  %v6630_v17 = vadd.f32 %v6553_v25, %v6552_v35 }
 0x972   : > { %v6254_v49 = vadd.f32 %v6253_v50, %v16405_v31  ;;  %v6255_v2 = vpop.f32.mrb[33].mxu0 }
 0x973   : > { %v6256_v52 = vadd.f32 %v6255_v2, %v16408_v7  ;;  %v6257_v21 = vpop.f32.mrb[34].mxu0  ;;  %6442 = vadd.xlane.f32.xlu1 %v6441_v36  ;;  %v6633_v0 = vadd.f32 %v6555_v33, %v6554_v26  ;;  %v13282_v2 = vld [vmem:[%s13876_s19 + $0x120] sm:$0xff] }
 0x974   : > { %v16637_v47 = vadd.f32 %v13278_v57, %v6254_v49  ;;  %v6258_v3 = vadd.f32 %v6257_v21, %v16405_v31  ;;  %v6259_v41 = vpop.f32.mrb[35].mxu0  ;;  %v13283_v57 = vld [vmem:[%s13876_s19 + $0x128] sm:$0xff] }
 0x975   : > { %v16641_v44 = vadd.f32 %v13279_v12, %v6256_v52  ;;  %v6260_v24 = vadd.f32 %v6259_v41, %v16408_v7  ;;  %6631 = vadd.xlane.f32.xlu0 %v6630_v17 }
 0x976   : > { %18591 = vst [vmem:[#allocation42_spill] sm:$0xff] %v16637_v47  ;;  %v16645_v46 = vadd.f32 %v13280_v56, %v6258_v3  ;;  %v6556_v37 = vmul.f32 %v16637_v47, %v16637_v47  ;;  %v13285_v56 = vld [vmem:[%s13876_s19 + $0x138] sm:$0xff] }
 0x977   : > { %18592 = vst [vmem:[#allocation41_spill] sm:$0xff] %v16641_v44  ;;  %v16648_v29 = vadd.f32 %v13281_v15, %v6260_v24  ;;  %6634 = vadd.xlane.f32.xlu1 %v6633_v0  ;;  %v6444_v19 = vadd.f32 %v16641_v44, %v16637_v47  ;;  %v6557_v51 = vmul.f32 %v16641_v44, %v16641_v44  ;;  %v13284_v24 = vld [vmem:[%s13876_s19 + $0x130] sm:$0xff] }
 0x978   : > { %18593 = vst [vmem:[#allocation44_spill] sm:$0xff] %v16645_v46  ;;  %v6558_v35 = vmul.f32 %v16645_v46, %v16645_v46 }
 0x979   : > { %18594 = vst [vmem:[#allocation43_spill] sm:$0xff] %v16648_v29  ;;  %6445 = vadd.xlane.f32.xlu0 %v6444_v19  ;;  %v6263_v30 = vpop.f32.mrb[36].mxu0  ;;  %v6447_v9 = vadd.f32 %v16648_v29, %v16645_v46  ;;  %v6559_v25 = vmul.f32 %v16648_v29, %v16648_v29  ;;  %v6636_v49 = vadd.f32 %v6557_v51, %v6556_v37 }
 0x97a   : > { %v6264_v50 = vadd.f32 %v6263_v30, %v16405_v31  ;;  %v6265_v36 = vpop.f32.mrb[37].mxu0 }
 0x97b   : > { %v6266_v26 = vadd.f32 %v6265_v36, %v16408_v7  ;;  %6448 = vadd.xlane.f32.xlu1 %v6447_v9  ;;  %v6267_v33 = vpop.f32.mrb[38].mxu0  ;;  %v6639_v12 = vadd.f32 %v6559_v25, %v6558_v35 }
 0x97c   : > { %v16665_v52 = vadd.f32 %v13282_v2, %v6264_v50  ;;  %v6268_v21 = vadd.f32 %v6267_v33, %v16405_v31  ;;  %v6269_v17 = vpop.f32.mrb[39].mxu0  ;;  %v13286_v2 = vld [vmem:[%s13876_s19 + $0x140] sm:$0xff] }
 0x97d   : > { %v16669_v3 = vadd.f32 %v13283_v57, %v6266_v26  ;;  %v6270_v41 = vadd.f32 %v6269_v17, %v16408_v7  ;;  %6637 = vadd.xlane.f32.xlu0 %v6636_v49 }
 0x97e   : > { %18595 = vst [vmem:[#allocation48_spill] sm:$0xff] %v16665_v52  ;;  %v16673_v0 = vadd.f32 %v13284_v24, %v6268_v21  ;;  %v6560_v37 = vmul.f32 %v16665_v52, %v16665_v52 }
 0x97f   : > { %18596 = vst [vmem:[#allocation47_spill] sm:$0xff] %v16669_v3  ;;  %v16676_v15 = vadd.f32 %v13285_v56, %v6270_v41  ;;  %6640 = vadd.xlane.f32.xlu1 %v6639_v12  ;;  %v6450_v19 = vadd.f32 %v16669_v3, %v16665_v52  ;;  %v6561_v51 = vmul.f32 %v16669_v3, %v16669_v3  ;;  %v13287_v41 = vld [vmem:[%s13876_s19 + $0x148] sm:$0xff] }
 0x980   : > { %18597 = vst [vmem:[#allocation46_spill] sm:$0xff] %v16673_v0  ;;  %v6562_v35 = vmul.f32 %v16673_v0, %v16673_v0 }
 0x981   : > { %18598 = vst [vmem:[#allocation45_spill] sm:$0xff] %v16676_v15  ;;  %v6273_v30 = vpop.f32.mrb[40].mxu0  ;;  %6451 = vadd.xlane.f32.xlu0 %v6450_v19  ;;  %v6453_v9 = vadd.f32 %v16676_v15, %v16673_v0  ;;  %v6563_v25 = vmul.f32 %v16676_v15, %v16676_v15  ;;  %v6642_v49 = vadd.f32 %v6561_v51, %v6560_v37  ;;  %v13288_v19 = vld [vmem:[%s13876_s19 + $0x150] sm:$0xff]  ;;  %v13303_v15 = vld [vmem:[%s13876_s19 + $0x1c8] sm:$0xff] }
 0x982   : > { %v6274_v50 = vadd.f32 %v6273_v30, %v16405_v31  ;;  %v6275_v36 = vpop.f32.mrb[41].mxu0 }
 0x983   : > { %v6276_v26 = vadd.f32 %v6275_v36, %v16408_v7  ;;  %v6277_v33 = vpop.f32.mrb[42].mxu0  ;;  %6454 = vadd.xlane.f32.xlu1 %v6453_v9  ;;  %v6645_v56 = vadd.f32 %v6563_v25, %v6562_v35  ;;  %v13289_v36 = vld [vmem:[%s13876_s19 + $0x158] sm:$0xff] }
 0x984   : > { %v16693_v21 = vadd.f32 %v13286_v2, %v6274_v50  ;;  %v6278_v17 = vadd.f32 %v6277_v33, %v16405_v31  ;;  %v6279_v57 = vpop.f32.mrb[43].mxu0 }
 0x985   : > { %v16697_v12 = vadd.f32 %v13287_v41, %v6276_v26  ;;  %v6280_v24 = vadd.f32 %v6279_v57, %v16408_v7  ;;  %6643 = vadd.xlane.f32.xlu0 %v6642_v49  ;;  %v13290_v41 = vld [vmem:[%s13876_s19 + $0x160] sm:$0xff] }
 0x986   : > { %18599 = vst [vmem:[#allocation50_spill] sm:$0xff] %v16693_v21  ;;  %v16701_v30 = vadd.f32 %v13288_v19, %v6278_v17  ;;  %v6564_v51 = vmul.f32 %v16693_v21, %v16693_v21 }
 0x987   : > { %18600 = vst [vmem:[#allocation49_spill] sm:$0xff] %v16697_v12  ;;  %v16704_v8 = vadd.f32 %v13289_v36, %v6280_v24  ;;  %6646 = vadd.xlane.f32.xlu1 %v6645_v56  ;;  %v6456_v37 = vadd.f32 %v16697_v12, %v16693_v21  ;;  %v6565_v9 = vmul.f32 %v16697_v12, %v16697_v12  ;;  %v13291_v36 = vld [vmem:[%s13876_s19 + $0x168] sm:$0xff] }
 0x988   : > { %18601 = vst [vmem:[#allocation52_spill] sm:$0xff] %v16701_v30  ;;  %v6566_v50 = vmul.f32 %v16701_v30, %v16701_v30 }
 0x989   : > { %18602 = vst [vmem:[#allocation51_spill] sm:$0xff] %v16704_v8  ;;  %6457 = vadd.xlane.f32.xlu0 %v6456_v37  ;;  %v6283_v35 = vpop.f32.mrb[44].mxu0  ;;  %v6459_v25 = vadd.f32 %v16704_v8, %v16701_v30  ;;  %v6567_v26 = vmul.f32 %v16704_v8, %v16704_v8  ;;  %v6648_v57 = vadd.f32 %v6565_v9, %v6564_v51  ;;  %v13292_v8 = vld [vmem:[%s13876_s19 + $0x170] sm:$0xff] }
 0x98a   : > { %v6284_v33 = vadd.f32 %v6283_v35, %v16405_v31  ;;  %v6285_v49 = vpop.f32.mrb[45].mxu0 }
 0x98b   : > { %v6286_v2 = vadd.f32 %v6285_v49, %v16408_v7  ;;  %6460 = vadd.xlane.f32.xlu1 %v6459_v25  ;;  %v6287_v17 = vpop.f32.mrb[46].mxu0  ;;  %v6651_v35 = vadd.f32 %v6567_v26, %v6566_v50  ;;  %v13293_v49 = vld [vmem:[%s13876_s19 + $0x178] sm:$0xff] }
 0x98c   : > { %v16721_v24 = vadd.f32 %v13290_v41, %v6284_v33  ;;  %v6288_v56 = vadd.f32 %v6287_v17, %v16405_v31  ;;  %v6289_v19 = vpop.f32.mrb[47].mxu0 }
 0x98d   : > { %v16725_v37 = vadd.f32 %v13291_v36, %v6286_v2  ;;  %v6290_v32 = vadd.f32 %v6289_v19, %v16408_v7  ;;  %6649 = vadd.xlane.f32.xlu0 %v6648_v57  ;;  %v13294_v36 = vld [vmem:[%s13876_s19 + $0x180] sm:$0xff] }
 0x98e   : > { %18603 = vst [vmem:[#allocation56_spill] sm:$0xff] %v16721_v24  ;;  %v16729_v30 = vadd.f32 %v13292_v8, %v6288_v56  ;;  %v6568_v9 = vmul.f32 %v16721_v24, %v16721_v24 }
 0x98f   : > { %18604 = vst [vmem:[#allocation55_spill] sm:$0xff] %v16725_v37  ;;  %v16732_v25 = vadd.f32 %v13293_v49, %v6290_v32  ;;  %6652 = vadd.xlane.f32.xlu1 %v6651_v35  ;;  %v6462_v51 = vadd.f32 %v16725_v37, %v16721_v24  ;;  %v6569_v33 = vmul.f32 %v16725_v37, %v16725_v37  ;;  %v13300_v24 = vld [vmem:[%s13876_s19 + $0x1b0] sm:$0xff] }
 0x990   : > { %18605 = vst [vmem:[#allocation54_spill] sm:$0xff] %v16729_v30  ;;  %v6570_v8 = vmul.f32 %v16729_v30, %v16729_v30 }
 0x991   : > { %18606 = vst [vmem:[#allocation53_spill] sm:$0xff] %v16732_v25  ;;  %6463 = vadd.xlane.f32.xlu0 %v6462_v51  ;;  %v6465_v50 = vadd.f32 %v16732_v25, %v16729_v30  ;;  %v6571_v32 = vmul.f32 %v16732_v25, %v16732_v25  ;;  %v6654_v26 = vadd.f32 %v6569_v33, %v6568_v9 }
 0x993   : > { %6466 = vadd.xlane.f32.xlu1 %v6465_v50  ;;  %v6657_v2 = vadd.f32 %v6571_v32, %v6570_v8  ;;  %v13295_v50 = vld [vmem:[%s13876_s19 + $0x188] sm:$0xff]  ;;  %v13296_v8 = vld [vmem:[%s13876_s19 + $0x190] sm:$0xff] }
 0x995   : > { %6655 = vadd.xlane.f32.xlu0 %v6654_v26  ;;  %v13297_v26 = vld [vmem:[%s13876_s19 + $0x198] sm:$0xff] }
 0x997   : > { %6658 = vadd.xlane.f32.xlu1 %v6657_v2 }
 0x9ba   : > { %v6293_v17 = vpop.f32.mrb[48].mxu0 }
 0x9bb   : > { %v6294_v57 = vadd.f32 %v6293_v17, %v16405_v31  ;;  %v6295_v41 = vpop.f32.mrb[49].mxu0 }
 0x9bc   : > { %v6296_v56 = vadd.f32 %v6295_v41, %v16408_v7  ;;  %v6297_v19 = vpop.f32.mrb[50].mxu0 }
 0x9bd   : > { %v16749_v35 = vadd.f32 %v13294_v36, %v6294_v57  ;;  %v6298_v49 = vadd.f32 %v6297_v19, %v16405_v31  ;;  %v6299_v51 = vpop.f32.mrb[51].mxu0 }
 0x9be   : > { %v16753_v9 = vadd.f32 %v13295_v50, %v6296_v56  ;;  %v6300_v33 = vadd.f32 %v6299_v51, %v16408_v7 }
 0x9bf   : > { %18607 = vst [vmem:[#allocation58_spill] sm:$0xff] %v16749_v35  ;;  %v16757_v32 = vadd.f32 %v13296_v8, %v6298_v49  ;;  %v6572_v57 = vmul.f32 %v16749_v35, %v16749_v35 }
 0x9c0   : > { %18608 = vst [vmem:[#allocation57_spill] sm:$0xff] %v16753_v9  ;;  %v16760_v2 = vadd.f32 %v13297_v26, %v6300_v33  ;;  %v6468_v17 = vadd.f32 %v16753_v9, %v16749_v35  ;;  %v6573_v41 = vmul.f32 %v16753_v9, %v16753_v9 }
 0x9c1   : > { %18609 = vst [vmem:[#allocation60_spill] sm:$0xff] %v16757_v32  ;;  %v6574_v36 = vmul.f32 %v16757_v32, %v16757_v32 }
 0x9c2   : > { %18610 = vst [vmem:[#allocation59_spill] sm:$0xff] %v16760_v2  ;;  %6469 = vadd.xlane.f32.xlu0 %v6468_v17  ;;  %v6303_v56 = vpop.f32.mrb[52].mxu0  ;;  %v6471_v19 = vadd.f32 %v16760_v2, %v16757_v32  ;;  %v6575_v49 = vmul.f32 %v16760_v2, %v16760_v2  ;;  %v6660_v26 = vadd.f32 %v6573_v41, %v6572_v57  ;;  %v13298_v17 = vld [vmem:[%s13876_s19 + $0x1a0] sm:$0xff]  ;;  %v13299_v32 = vld [vmem:[%s13876_s19 + $0x1a8] sm:$0xff]  ;;  %v13301_v57 = vld [vmem:[%s13876_s19 + $0x1b8] sm:$0xff] }
 0x9c3   : > { %v6304_v51 = vadd.f32 %v6303_v56, %v16405_v31  ;;  %v6305_v50 = vpop.f32.mrb[53].mxu0 }
 0x9c4   : > { %v6306_v33 = vadd.f32 %v6305_v50, %v16408_v7  ;;  %6472 = vadd.xlane.f32.xlu1 %v6471_v19  ;;  %v6307_v8 = vpop.f32.mrb[54].mxu0  ;;  %v6663_v37 = vadd.f32 %v6575_v49, %v6574_v36 }
 0x9c5   : > { %v16777_v9 = vadd.f32 %v13298_v17, %v6304_v51  ;;  %v6308_v35 = vadd.f32 %v6307_v8, %v16405_v31  ;;  %v6309_v25 = vpop.f32.mrb[55].mxu0 }
 0x9c6   : > { %v16781_v30 = vadd.f32 %v13299_v32, %v6306_v33  ;;  %v6398_v2 = vpop.xlane.xlu0 %6397  ;;  %v6310_v56 = vadd.f32 %v6309_v25, %v16408_v7  ;;  %6661 = vadd.xlane.f32.xlu0 %v6660_v26 }
 0x9c7   : > { %18611 = vst [vmem:[#allocation66_spill] sm:$0xff] %v16777_v9  ;;  %v16785_v50 = vadd.f32 %v13300_v24, %v6308_v35  ;;  %v16787_v19 = vmul.f32 0.00390625, %v6398_v2  ;;  %v6576_v32 = vmul.f32 %v16777_v9, %v16777_v9 }
 0x9c8   : > { %18612 = vst [vmem:[#allocation65_spill] sm:$0xff] %v16781_v30  ;;  %v16790_v41 = vadd.f32 %v13301_v57, %v6310_v56  ;;  %v6401_v51 = vpop.xlane.xlu1 %6400  ;;  %6664 = vadd.xlane.f32.xlu1 %v6663_v37  ;;  %v6474_v8 = vadd.f32 %v16781_v30, %v16777_v9  ;;  %v6577_v25 = vmul.f32 %v16781_v30, %v16781_v30 }
 0x9c9   : > { %18613 = vst [vmem:[#allocation62_spill] sm:$0xff] %v16785_v50  ;;  %v16798_v36 = vmul.f32 0.00390625, %v6401_v51  ;;  %v6578_v37 = vmul.f32 %v16785_v50, %v16785_v50  ;;  %v6780_v33 = vmul.f32 %v16787_v19, %v16787_v19 }
 0x9ca   : > { %18614 = vst [vmem:[#allocation61_spill] sm:$0xff] %v16790_v41  ;;  %v6590_v24 = vpop.xlane.xlu0 %6589  ;;  %v6313_v35 = vpop.f32.mrb[56].mxu0  ;;  %6475 = vadd.xlane.f32.xlu0 %v6474_v8  ;;  %v6477_v2 = vadd.f32 %v16790_v41, %v16785_v50  ;;  %v6579_v49 = vmul.f32 %v16790_v41, %v16790_v41  ;;  %v6666_v50 = vadd.f32 %v6577_v25, %v6576_v32  ;;  %v13302_v41 = vld [vmem:[%s13876_s19 + $0x1c0] sm:$0xff]  ;;  %v13304_v32 = vld [vmem:[%s13876_s19 + $0x1d0] sm:$0xff] }
 0x9cb   : > { %v6684_v26 = vmul.f32 0.00390625, %v6590_v24  ;;  %v6314_v17 = vadd.f32 %v6313_v35, %v16405_v31  ;;  %v6315_v56 = vpop.f32.mrb[57].mxu0  ;;  %v6781_v57 = vmul.f32 %v16798_v36, %v16798_v36 }
 0x9cc   : > { %v6593_v51 = vpop.xlane.xlu1 %6592  ;;  %v6316_v8 = vadd.f32 %v6315_v56, %v16408_v7  ;;  %v6317_v30 = vpop.f32.mrb[58].mxu0  ;;  %6478 = vadd.xlane.f32.xlu1 %v6477_v2  ;;  %v6669_v56 = vadd.f32 %v6579_v49, %v6578_v37 }
 0x9cd   : > { %v6812_v9 = vsub.f32 %v6684_v26, %v6780_v33  ;;  %v16813_v12 = vadd.f32 %v13302_v41, %v6314_v17  ;;  %v6685_v21 = vmul.f32 0.00390625, %v6593_v51  ;;  %v6318_v24 = vadd.f32 %v6317_v30, %v16405_v31  ;;  %v6319_v35 = vpop.f32.mrb[59].mxu0  ;;  %v13305_v41 = vld [vmem:[%s13876_s19 + $0x1d8] sm:$0xff] }
 0x9ce   : > { %v16817_v0 = vadd.f32 %v13303_v15, %v6316_v8  ;;  %v6404_v3 = vpop.xlane.xlu0 %6403  ;;  %v6320_v52 = vadd.f32 %v6319_v35, %v16408_v7  ;;  %6667 = vadd.xlane.f32.xlu0 %v6666_v50 }
 0x9cf   : > { %18615 = vst [vmem:[#allocation70_spill] sm:$0xff] %v16813_v12  ;;  %v6844_v2 = vadd.f32 1e-05, %v6812_v9  ;;  %v6813_v29 = vsub.f32 %v6685_v21, %v6781_v57  ;;  %v16821_v25 = vadd.f32 %v13304_v32, %v6318_v24  ;;  %v16823_v33 = vmul.f32 0.00390625, %v6404_v3 }
 0x9d0   : > { %18616 = vst [vmem:[#allocation69_spill] sm:$0xff] %v16817_v0  ;;  %v16826_v26 = vadd.f32 %v13305_v41, %v6320_v52  ;;  %v6407_v30 = vpop.xlane.xlu1 %6406  ;;  %6670 = vadd.xlane.f32.xlu1 %v6669_v56  ;;  %v6480_v15 = vadd.f32 %v16817_v0, %v16813_v12  ;;  %v6580_v17 = vmul.f32 %v16813_v12, %v16813_v12 }
 0x9d1   : > { %18617 = vst [vmem:[#allocation73_spill] sm:$0xff] %v16821_v25  ;;  %v6581_v9 = vmul.f32 %v16817_v0, %v16817_v0  ;;  %13087 = vrsqrt.f32 %v6844_v2  ;;  %v6845_v21 = vadd.f32 1e-05, %v6813_v29  ;;  %v16834_v50 = vmul.f32 0.00390625, %v6407_v30  ;;  %v13306_v30 = vld [vmem:[%s13876_s19 + $0x1e0] sm:$0xff]  ;;  %v13307_v0 = vld [vmem:[%s13876_s19 + $0x1e8] sm:$0xff] }
 0x9d2   : > { %18618 = vst [vmem:[#allocation71_spill] sm:$0xff] %v16826_v26  ;;  %v6596_v3 = vpop.xlane.xlu0 %6595  ;;  %6481 = vadd.xlane.f32.xlu0 %v6480_v15  ;;  %v6323_v52 = vpop.f32.mrb[60].mxu0  ;;  %v6483_v37 = vadd.f32 %v16826_v26, %v16821_v25  ;;  %v6782_v49 = vmul.f32 %v16823_v33, %v16823_v33  ;;  %v6582_v32 = vmul.f32 %v16821_v25, %v16821_v25 }
 0x9d3   : > { %13089 = vrsqrt.f32 %v6845_v21  ;;  %v6686_v57 = vmul.f32 0.00390625, %v6596_v3  ;;  %v6324_v51 = vadd.f32 %v6323_v52, %v16405_v31  ;;  %v6325_v8 = vpop.f32.mrb[61].mxu0  ;;  %v6783_v29 = vmul.f32 %v16834_v50, %v16834_v50 }
 0x9d4   : > { %v6599_v24 = vpop.xlane.xlu1 %6598  ;;  %v6326_v35 = vadd.f32 %v6325_v8, %v16408_v7  ;;  %6484 = vadd.xlane.f32.xlu1 %v6483_v37  ;;  %v6327_v56 = vpop.f32.mrb[62].mxu0  ;;  %v6672_v2 = vadd.f32 %v6581_v9, %v6580_v17  ;;  %v6583_v17 = vmul.f32 %v16826_v26, %v16826_v26 }
 0x9d5   : > { %v6814_v41 = vsub.f32 %v6686_v57, %v6782_v49  ;;  %v16847_v15 = vadd.f32 %v13306_v30, %v6324_v51  ;;  %v6687_v21 = vmul.f32 0.00390625, %v6599_v24  ;;  %v6328_v3 = vadd.f32 %v6327_v56, %v16405_v31  ;;  %v6329_v52 = vpop.f32.mrb[63].mxu0  ;;  %v13308_v57 = vld [vmem:[%s13876_s19 + $0x1f0] sm:$0xff]  ;;  %v13309_v24 = vld [vmem:[%s13876_s19 + $0x1f8] sm:$0xff]  ;;  %s17702_s19 = scalar_lea.vmem [#allocation13], %s10849_s18  ;;  %s11283_s18 = sshll.u32 %s13648_s15, 13 }
 0x9d6   : > { %v16851_v12 = vadd.f32 %v13307_v0, %v6326_v35  ;;  %v6410_v8 = vpop.xlane.xlu0 %6409  ;;  %v6330_v37 = vadd.f32 %v6329_v52, %v16408_v7  ;;  %6673 = vadd.xlane.f32.xlu0 %v6672_v2  ;;  %v6675_v0 = vadd.f32 %v6583_v17, %v6582_v32  ;;  %v6716_v2 = vsub.f32 %v16413_v20, %v16787_v19  ;;  %s10715_s16 = sshll.u32 %s17702_s19, 4  ;;  %s17891_s25 = scalar_lea.hbm %s18715_s13, %s11283_s18  ;;  %s17893_s16 = int_to_ptr.vmem [resolvable:$true] %s10715_s16 }
 0x9d7   : > { %18619 = vst [vmem:[#allocation92_spill] sm:$0xff] %v16847_v15  ;;  %v6846_v9 = vadd.f32 1e-05, %v6814_v41  ;;  %v6815_v49 = vsub.f32 %v6687_v21, %v6783_v29  ;;  %v16857_v25 = vadd.f32 %v13308_v57, %v6328_v3  ;;  %v16859_v51 = vmul.f32 0.00390625, %v6410_v8  ;;  %s10701_s15 = scalar_lea.sflag [#allocation4], %s13870_s23  ;;  %s13480_s17 = scalar_lea.vmem %s17893_s16, 8192 }
 0x9d8   : > { %18620 = vst [vmem:[#allocation91_spill] sm:$0xff] %v16851_v12  ;;  %v16862_v31 = vadd.f32 %v13309_v24, %v6330_v37  ;;  %v6413_v56 = vpop.xlane.xlu1 %6412  ;;  %v6486_v35 = vadd.f32 %v16851_v12, %v16847_v15  ;;  %v6584_v7 = vmul.f32 %v16847_v15, %v16847_v15  ;;  %v6717_v41 = vsub.f32 %v16417_v63, %v16787_v19  ;;  %p13481_p7 = scmp.ne.s32.totalorder %s17893_s16, %s13480_s17  ;;  %p13487_p13 = scmp.lt.s32.totalorder %s17893_s16, %s13485_s9 }
 0x9d9   : > { %18621 = vst [vmem:[#allocation74_spill] sm:$0xff] %v16857_v25  ;;  %13091 = vrsqrt.f32 %v6846_v9  ;;  %v6847_v29 = vadd.f32 1e-05, %v6815_v49  ;;  %v16872_v30 = vmul.f32 0.00390625, %v6413_v56  ;;  %6676 = vadd.xlane.f32.xlu1 %v6675_v0  ;;  %v6585_v3 = vmul.f32 %v16851_v12, %v16851_v12  ;;  %p13488_p0 = scmp.lt.s32.totalorder %s13486_s22, %s13480_s17 }
 0x9da   : > { %18622 = vst [vmem:[#allocation72_spill] sm:$0xff] %v16862_v31  ;;  %v6602_v21 = vpop.xlane.xlu0 %6601  ;;  %6487 = vadd.xlane.f32.xlu0 %v6486_v35  ;;  %v6489_v32 = vadd.f32 %v16862_v31, %v16857_v25  ;;  %v6718_v8 = vsub.f32 %v16421_v4, %v16798_v36  ;;  %v6784_v37 = vmul.f32 %v16859_v51, %v16859_v51  ;;  %p13482_p12 = pnand %p13481_p7, %p18717_p4 }
 0x9db   : > { %v13088_v52 = vpop.eup %13087  ;;  %13093 = vrsqrt.f32 %v6847_v29  ;;  %v6688_v19 = vmul.f32 0.00390625, %v6602_v21  ;;  %v6719_v17 = vsub.f32 %v16424_v48, %v16798_v36  ;;  %v6678_v49 = vadd.f32 %v6585_v3, %v6584_v7  ;;  %p13489_p2 = por %p13488_p0, %p13487_p13 }
 0x9dc   : > { %v6605_v9 = vpop.xlane.xlu1 %6604  ;;  %v6586_v57 = vmul.f32 %v16857_v25, %v16857_v25  ;;  %v6587_v24 = vmul.f32 %v16862_v31, %v16862_v31  ;;  %v6785_v35 = vmul.f32 %v16872_v30, %v16872_v30  ;;  %v6909_v4 = vmul.f32 %v13088_v52, %v6717_v41  ;;  %p13483_p1 = pneg %p13482_p12 }
 0x9dd   : > { %v13090_v56 = vpop.eup %13089  ;;  %v6816_v0 = vsub.f32 %v6688_v19, %v6784_v37  ;;  %v6689_v29 = vmul.f32 0.00390625, %v6605_v9  ;;  %6490 = vadd.xlane.f32.xlu1 %v6489_v32  ;;  %v6908_v36 = vmul.f32 %v13088_v52, %v6716_v2 }
 0x9de   : > { %v6416_v21 = vpop.xlane.xlu0 %6415  ;;  %6679 = vadd.xlane.f32.xlu0 %v6678_v49  ;;  %v6911_v63 = vmul.f32 %v13090_v56, %v6719_v17  ;;  %v6910_v48 = vmul.f32 %v13090_v56, %v6718_v8  ;;  %v6681_v12 = vadd.f32 %v6587_v24, %v6586_v57  ;;  %v6720_v8 = vsub.f32 %v16441_v62, %v16823_v33  ;;  %p13490_p8 = pnand %p13489_p2, %p13483_p1 }
 0x9df   : > { %v6848_v7 = vadd.f32 1e-05, %v6816_v0  ;;  %v6817_v3 = vsub.f32 %v6689_v29, %v6785_v35  ;;  %v16890_v20 = vmul.f32 0.00390625, %v6416_v21 }
 0x9e0   : > { %v6419_v25 = vpop.xlane.xlu1 %6418  ;;  %v6973_v31 = vpack.c.bf16 %v6911_v63, %v6909_v4  ;;  %v6972_v15 = vpack.c.bf16 %v6910_v48, %v6908_v36  ;;  %v6721_v63 = vsub.f32 %v16445_v10, %v16823_v33  ;;  %v6722_v4 = vsub.f32 %v16449_v43, %v16834_v50 }
 0x9e1   : > { %13095 = vrsqrt.f32 %v6848_v7  ;;  %v6849_v37 = vadd.f32 1e-05, %v6817_v3  ;;  %v16892_v19 = vmul.f32 0.00390625, %v6419_v25  ;;  %6682 = vadd.xlane.f32.xlu1 %v6681_v12  ;;  %v6786_v2 = vmul.f32 %v16890_v20, %v16890_v20 }
 0x9e2   : > { %7442 = vmatprep.mubr.bf16.mxu1 %v6973_v31  ;;  %v6608_v41 = vpop.xlane.xlu0 %6607  ;;  %7635 = vmatprep.mubr.bf16.mxu0 %v6973_v31  ;;  %v6723_v48 = vsub.f32 %v16454_v22, %v16834_v50 }
 0x9e3   : > { %v13092_v32 = vpop.eup %13091  ;;  %13097 = vrsqrt.f32 %v6849_v37  ;;  %v6690_v52 = vmul.f32 0.00390625, %v6608_v41  ;;  %7443 = vmatmul.mubr.bf16.vlgmr.msra.gmra.mrb[192].mxu1 %v6972_v15  ;;  %7636 = vmatmul.mubr.bf16.vlgmr.msra.gmra.mrb[64].mxu0 %v6972_v15  ;;  %v6787_v31 = vmul.f32 %v16892_v19, %v16892_v19 }
 0x9e4   : > { %v6611_v12 = vpop.xlane.xlu1 %6610  ;;  %v6913_v57 = vmul.f32 %v13092_v32, %v6721_v63  ;;  %v6912_v56 = vmul.f32 %v13092_v32, %v6720_v8  ;;  %v6726_v8 = vsub.f32 %v16477_v53, %v16872_v30  ;;  %v6727_v63 = vsub.f32 %v16482_v59, %v16872_v30 }
 0x9e5   : > { %v13094_v25 = vpop.eup %13093  ;;  %v6818_v17 = vsub.f32 %v6690_v52, %v6786_v2  ;;  %v6691_v9 = vmul.f32 0.00390625, %v6611_v12  ;;  %v6724_v2 = vsub.f32 %v16469_v14, %v16859_v51  ;;  %v6725_v52 = vsub.f32 %v16473_v13, %v16859_v51 }
 0x9e6   : > { %v6422_v49 = vpop.xlane.xlu0 %6421  ;;  %v6915_v24 = vmul.f32 %v13094_v25, %v6723_v48  ;;  %v6914_v0 = vmul.f32 %v13094_v25, %v6722_v4 }
 0x9e7   : > { %v6850_v33 = vadd.f32 1e-05, %v6818_v17  ;;  %v6819_v35 = vsub.f32 %v6691_v9, %v6787_v31  ;;  %v16906_v29 = vmul.f32 0.00390625, %v6422_v49 }
 0x9e8   : > { %v6425_v21 = vpop.xlane.xlu1 %6424  ;;  %v6975_v36 = vpack.c.bf16 %v6915_v24, %v6913_v57  ;;  %v6974_v50 = vpack.c.bf16 %v6914_v0, %v6912_v56 }
 0x9e9   : > { %13099 = vrsqrt.f32 %v6850_v33  ;;  %v6851_v15 = vadd.f32 1e-05, %v6819_v35  ;;  %v16908_v7 = vmul.f32 0.00390625, %v6425_v21  ;;  %v6788_v41 = vmul.f32 %v16906_v29, %v16906_v29 }
 0x9ea   : > { %7452 = vmatprep.mubr.bf16.mxu1 %v6975_v36  ;;  %v6614_v3 = vpop.xlane.xlu0 %6613  ;;  %7645 = vmatprep.mubr.bf16.mxu0 %v6975_v36 }
 0x9eb   : > { %v13096_v37 = vpop.eup %13095  ;;  %13101 = vrsqrt.f32 %v6851_v15  ;;  %v6692_v32 = vmul.f32 0.00390625, %v6614_v3  ;;  %7453 = vmatmul.mubr.bf16.gmra.mrb[196].mxu1 %v6974_v50  ;;  %7646 = vmatmul.mubr.bf16.gmra.mrb[68].mxu0 %v6974_v50  ;;  %v6789_v25 = vmul.f32 %v16908_v7, %v16908_v7 }
 0x9ec   : > { %v6617_v4 = vpop.xlane.xlu1 %6616  ;;  %v6917_v9 = vmul.f32 %v13096_v37, %v6725_v52  ;;  %v6916_v57 = vmul.f32 %v13096_v37, %v6724_v2  ;;  %v6730_v2 = vsub.f32 %v16505_v34, %v16892_v19  ;;  %v6731_v52 = vsub.f32 %v16510_v39, %v16892_v19 }
 0x9ed   : > { %v13098_v48 = vpop.eup %13097  ;;  %v6820_v12 = vsub.f32 %v6692_v32, %v6788_v41  ;;  %v6693_v17 = vmul.f32 0.00390625, %v6617_v4  ;;  %v6728_v41 = vsub.f32 %v16497_v23, %v16890_v20  ;;  %v6729_v32 = vsub.f32 %v16501_v27, %v16890_v20 }
 0x9ee   : > { %v6428_v31 = vpop.xlane.xlu0 %6427  ;;  %v6919_v49 = vmul.f32 %v13098_v48, %v6727_v63  ;;  %v6918_v24 = vmul.f32 %v13098_v48, %v6726_v8 }
 0x9ef   : > { %v6852_v51 = vadd.f32 1e-05, %v6820_v12  ;;  %v6821_v56 = vsub.f32 %v6693_v17, %v6789_v25  ;;  %v16922_v0 = vmul.f32 0.00390625, %v6428_v31 }
 0x9f0   : > { %v6431_v33 = vpop.xlane.xlu1 %6430  ;;  %v6977_v35 = vpack.c.bf16 %v6919_v49, %v6917_v9  ;;  %v6976_v30 = vpack.c.bf16 %v6918_v24, %v6916_v57 }
 0x9f1   : > { %13103 = vrsqrt.f32 %v6852_v51  ;;  %v6853_v21 = vadd.f32 1e-05, %v6821_v56  ;;  %v16924_v36 = vmul.f32 0.00390625, %v6431_v33  ;;  %v6790_v3 = vmul.f32 %v16922_v0, %v16922_v0 }
 0x9f2   : > { %7462 = vmatprep.mubr.bf16.mxu1 %v6977_v35  ;;  %v6620_v50 = vpop.xlane.xlu0 %6619  ;;  %7655 = vmatprep.mubr.bf16.mxu0 %v6977_v35 }
 0x9f3   : > { %v13100_v15 = vpop.eup %13099  ;;  %13105 = vrsqrt.f32 %v6853_v21  ;;  %v6694_v37 = vmul.f32 0.00390625, %v6620_v50  ;;  %7463 = vmatmul.mubr.bf16.gmra.mrb[200].mxu1 %v6976_v30  ;;  %7656 = vmatmul.mubr.bf16.gmra.mrb[72].mxu0 %v6976_v30  ;;  %v6791_v48 = vmul.f32 %v16924_v36, %v16924_v36 }
 0x9f4   : > { %v6623_v8 = vpop.xlane.xlu1 %6622  ;;  %v6921_v17 = vmul.f32 %v13100_v15, %v6729_v32  ;;  %v6920_v9 = vmul.f32 %v13100_v15, %v6728_v41  ;;  %v6734_v41 = vsub.f32 %v16533_v11, %v16908_v7  ;;  %v6735_v32 = vsub.f32 %v16538_v38, %v16908_v7 }
 0x9f5   : > { %v13102_v63 = vpop.eup %13101  ;;  %v6822_v4 = vsub.f32 %v6694_v37, %v6790_v3  ;;  %v6695_v12 = vmul.f32 0.00390625, %v6623_v8  ;;  %v6732_v3 = vsub.f32 %v16525_v5, %v16906_v29  ;;  %v6733_v37 = vsub.f32 %v16529_v60, %v16906_v29  ;;  %v12479_v29 = vld [vmem:[#allocation11] ss:$8 sps:$4 sm:$0xff]  }
 0x9f6   : > { %v6434_v25 = vpop.xlane.xlu0 %6433  ;;  %v6923_v31 = vmul.f32 %v13102_v63, %v6731_v52  ;;  %v6922_v49 = vmul.f32 %v13102_v63, %v6730_v2 }
 0x9f7   : > { %v6854_v20 = vadd.f32 1e-05, %v6822_v4  ;;  %v6823_v57 = vsub.f32 %v6695_v12, %v6791_v48  ;;  %v16938_v24 = vmul.f32 0.00390625, %v6434_v25 }
 0x9f8   : > { %v6437_v51 = vpop.xlane.xlu1 %6436  ;;  %v6979_v56 = vpack.c.bf16 %v6923_v31, %v6921_v17  ;;  %v6978_v19 = vpack.c.bf16 %v6922_v49, %v6920_v9  ;;  %v12481_v9 = vld [vmem:[#allocation11 + $0x4] ss:$8 sps:$4 sm:$0xff]  }
 0x9f9   : > { %13107 = vrsqrt.f32 %v6854_v20  ;;  %v6855_v33 = vadd.f32 1e-05, %v6823_v57  ;;  %v16940_v35 = vmul.f32 0.00390625, %v6437_v51  ;;  %v6792_v50 = vmul.f32 %v16938_v24, %v16938_v24  ;;  %8384 = vmatprep.subr.bf16.mxu1 %v12481_v9 }
 0x9fa   : > { %7472 = vmatprep.mubr.bf16.mxu1 %v6979_v56  ;;  %v6626_v30 = vpop.xlane.xlu0 %6625  ;;  %7665 = vmatprep.mubr.bf16.mxu0 %v6979_v56 }
 0x9fb   : > { %v13104_v21 = vpop.eup %13103  ;;  %13109 = vrsqrt.f32 %v6855_v33  ;;  %v6696_v15 = vmul.f32 0.00390625, %v6626_v30  ;;  %7473 = vmatmul.mubr.bf16.gmra.mrb[204].mxu1 %v6978_v19  ;;  %7666 = vmatmul.mubr.bf16.gmra.mrb[76].mxu0 %v6978_v19  ;;  %v6793_v63 = vmul.f32 %v16940_v35, %v16940_v35 }
 0x9fc   : > { %v6629_v2 = vpop.xlane.xlu1 %6628  ;;  %v6925_v12 = vmul.f32 %v13104_v21, %v6733_v37  ;;  %v6924_v17 = vmul.f32 %v13104_v21, %v6732_v3  ;;  %8385 = vmatpush1.bf16.msra.mxu1 %v12479_v29  ;;  %v6736_v3 = vsub.f32 %v16553_v6, %v16922_v0  ;;  %v6737_v37 = vsub.f32 %v16557_v1, %v16922_v0  ;;  %v12482_v0 = vld [vmem:[#allocation11 + $0x10] ss:$8 sps:$4 sm:$0xff]   ;;  %v12484_v29 = vld [vmem:[#allocation11 + $0x14] ss:$8 sps:$4 sm:$0xff]  }
 0x9fd   : > { %v13106_v52 = vpop.eup %13105  ;;  %v6824_v8 = vsub.f32 %v6696_v15, %v6792_v50  ;;  %v6697_v4 = vmul.f32 0.00390625, %v6629_v2  ;;  %8386 = vmatprep.subr.bf16.mxu1 %v12484_v29 }
 0x9fe   : > { %v6440_v48 = vpop.xlane.xlu0 %6439  ;;  %v6927_v25 = vmul.f32 %v13106_v52, %v6735_v32  ;;  %v6926_v31 = vmul.f32 %v13106_v52, %v6734_v41  ;;  %v6738_v41 = vsub.f32 %v16561_v42, %v16924_v36  ;;  %v6739_v32 = vsub.f32 %v16566_v54, %v16924_v36  ;;  %v12487_v36 = vld [vmem:[#allocation11 + $0x24] ss:$8 sps:$4 sm:$0xff]  }
 0x9ff   : > { %v6856_v49 = vadd.f32 1e-05, %v6824_v8  ;;  %v6825_v20 = vsub.f32 %v6697_v4, %v6793_v63  ;;  %v16954_v57 = vmul.f32 0.00390625, %v6440_v48 }
 0xa00   : > { %v6443_v7 = vpop.xlane.xlu1 %6442  ;;  %v6981_v51 = vpack.c.bf16 %v6927_v25, %v6925_v12  ;;  %v6980_v56 = vpack.c.bf16 %v6926_v31, %v6924_v17  ;;  %8387 = vmatpush1.bf16.msra.mxu1 %v12482_v0 }
 0xa01   : > { %13111 = vrsqrt.f32 %v6856_v49  ;;  %v6857_v19 = vadd.f32 1e-05, %v6825_v20  ;;  %v16956_v33 = vmul.f32 0.00390625, %v6443_v7  ;;  %v6794_v50 = vmul.f32 %v16954_v57, %v16954_v57  ;;  %8388 = vmatprep.subr.bf16.mxu1 %v12487_v36 }
 0xa02   : > { %7482 = vmatprep.mubr.bf16.mxu1 %v6981_v51  ;;  %v6632_v30 = vpop.xlane.xlu0 %6631  ;;  %7675 = vmatprep.mubr.bf16.mxu0 %v6981_v51 }
 0xa03   : > { %v13108_v21 = vpop.eup %13107  ;;  %13113 = vrsqrt.f32 %v6857_v19  ;;  %v6698_v15 = vmul.f32 0.00390625, %v6632_v30  ;;  %7483 = vmatmul.mubr.bf16.gmra.mrb[208].mxu1 %v6980_v56  ;;  %7676 = vmatmul.mubr.bf16.gmra.mrb[80].mxu0 %v6980_v56  ;;  %v6795_v63 = vmul.f32 %v16956_v33, %v16956_v33  ;;  %v12485_v30 = vld [vmem:[#allocation11 + $0x20] ss:$8 sps:$4 sm:$0xff]  }
 0xa04   : > { %v6635_v2 = vpop.xlane.xlu1 %6634  ;;  %v6929_v12 = vmul.f32 %v13108_v21, %v6737_v37  ;;  %v6928_v17 = vmul.f32 %v13108_v21, %v6736_v3  ;;  %8389 = vmatpush1.bf16.msra.mxu1 %v12485_v30 }
 0xa05   : > { %v13110_v52 = vpop.eup %13109  ;;  %v6826_v8 = vsub.f32 %v6698_v15, %v6794_v50  ;;  %v6699_v4 = vmul.f32 0.00390625, %v6635_v2  ;;  %v12490_v15 = vld [vmem:[#allocation11 + $0x34] ss:$8 sps:$4 sm:$0xff]   ;;  %v6741_v2 = vsub.f32 %v16585_v55, %v16938_v24 }
 0xa06   : > { %v6446_v48 = vpop.xlane.xlu0 %6445  ;;  %v6931_v25 = vmul.f32 %v13110_v52, %v6739_v32  ;;  %v6930_v31 = vmul.f32 %v13110_v52, %v6738_v41  ;;  %v6740_v32 = vsub.f32 %v16581_v28, %v16938_v24  ;;  %v6742_v52 = vsub.f32 %v16589_v16, %v16940_v35  ;;  %8390 = vmatprep.subr.bf16.mxu1 %v12490_v15 }
 0xa07   : > { %v6858_v9 = vadd.f32 1e-05, %v6826_v8  ;;  %v6827_v49 = vsub.f32 %v6699_v4, %v6795_v63  ;;  %v16970_v20 = vmul.f32 0.00390625, %v6446_v48  ;;  %v6743_v8 = vsub.f32 %v16592_v58, %v16940_v35  ;;  %v12493_v35 = vld [vmem:[#allocation11 + $0x44] ss:$8 sps:$4 sm:$0xff]  }
 0xa08   : > { %v6449_v7 = vpop.xlane.xlu1 %6448  ;;  %v6983_v51 = vpack.c.bf16 %v6931_v25, %v6929_v12  ;;  %v6982_v56 = vpack.c.bf16 %v6930_v31, %v6928_v17  ;;  %v12488_v17 = vld [vmem:[#allocation11 + $0x30] ss:$8 sps:$4 sm:$0xff]  }
 0xa09   : > { %13115 = vrsqrt.f32 %v6858_v9  ;;  %v6859_v19 = vadd.f32 1e-05, %v6827_v49  ;;  %v16972_v50 = vmul.f32 0.00390625, %v6449_v7  ;;  %v6796_v37 = vmul.f32 %v16970_v20, %v16970_v20  ;;  %8391 = vmatpush1.bf16.msra.mxu1 %v12488_v17 }
 0xa0a   : > { %7492 = vmatprep.mubr.bf16.mxu1 %v6983_v51  ;;  %v6638_v21 = vpop.xlane.xlu0 %6637  ;;  %7685 = vmatprep.mubr.bf16.mxu0 %v6983_v51 }
 0xa0b   : > { %v13112_v3 = vpop.eup %13111  ;;  %13117 = vrsqrt.f32 %v6859_v19  ;;  %v6700_v41 = vmul.f32 0.00390625, %v6638_v21  ;;  %7493 = vmatmul.mubr.bf16.gmra.mrb[212].mxu1 %v6982_v56  ;;  %7686 = vmatmul.mubr.bf16.gmra.mrb[84].mxu0 %v6982_v56  ;;  %v6797_v12 = vmul.f32 %v16972_v50, %v16972_v50 }
 0xa0c   : > { %v6641_v63 = vpop.xlane.xlu1 %6640  ;;  %v6933_v0 = vmul.f32 %v13112_v3, %v6741_v2  ;;  %v6932_v24 = vmul.f32 %v13112_v3, %v6740_v32  ;;  %v12496_v3 = vld [vmem:[#allocation11 + $0x54] ss:$8 sps:$4 sm:$0xff]   ;;  %8392 = vmatprep.subr.bf16.mxu1 %v12493_v35 }
 0xa0d   : > { %v13114_v4 = vpop.eup %13113  ;;  %v6828_v48 = vsub.f32 %v6700_v41, %v6796_v37  ;;  %v6701_v25 = vmul.f32 0.00390625, %v6641_v63  ;;  %v12491_v37 = vld [vmem:[#allocation11 + $0x40] ss:$8 sps:$4 sm:$0xff]   ;;  %v6746_v63 = vsub.f32 %v16617_v18, %v16956_v33 }
 0xa0e   : > { %v6452_v31 = vpop.xlane.xlu0 %6451  ;;  %v6935_v29 = vmul.f32 %v13114_v4, %v6743_v8  ;;  %v6934_v9 = vmul.f32 %v13114_v4, %v6742_v52  ;;  %v6744_v52 = vsub.f32 %v16609_v40, %v16954_v57  ;;  %v6745_v8 = vsub.f32 %v16613_v61, %v16954_v57  ;;  %8393 = vmatpush1.bf16.msra.mxu1 %v12491_v37 }
 0xa0f   : > { %v6860_v49 = vadd.f32 1e-05, %v6828_v48  ;;  %v6829_v36 = vsub.f32 %v6701_v25, %v6797_v12  ;;  %v16986_v7 = vmul.f32 0.00390625, %v6452_v31  ;;  %v6747_v4 = vsub.f32 %v16620_v45, %v16956_v33  ;;  %8394 = vmatprep.subr.bf16.mxu1 %v12496_v3  ;;  %v12499_v33 = vld [vmem:[#allocation11 + $0x64] ss:$8 sps:$4 sm:$0xff]  }
 0xa10   : > { %v6455_v51 = vpop.xlane.xlu1 %6454  ;;  %v6985_v56 = vpack.c.bf16 %v6935_v29, %v6933_v0  ;;  %v6984_v19 = vpack.c.bf16 %v6934_v9, %v6932_v24  ;;  %v12494_v0 = vld [vmem:[#allocation11 + $0x50] ss:$8 sps:$4 sm:$0xff]  }
 0xa11   : > { %13119 = vrsqrt.f32 %v6860_v49  ;;  %v6861_v21 = vadd.f32 1e-05, %v6829_v36  ;;  %v16988_v30 = vmul.f32 0.00390625, %v6455_v51  ;;  %v6798_v15 = vmul.f32 %v16986_v7, %v16986_v7 }
 0xa12   : > { %7502 = vmatprep.mubr.bf16.mxu1 %v6985_v56  ;;  %v6644_v41 = vpop.xlane.xlu0 %6643  ;;  %7695 = vmatprep.mubr.bf16.mxu0 %v6985_v56 }
 0xa13   : > { %v13116_v32 = vpop.eup %13115  ;;  %13121 = vrsqrt.f32 %v6861_v21  ;;  %v6702_v2 = vmul.f32 0.00390625, %v6644_v41  ;;  %7503 = vmatmul.mubr.bf16.gmra.mrb[216].mxu1 %v6984_v19  ;;  %7696 = vmatmul.mubr.bf16.gmra.mrb[88].mxu0 %v6984_v19  ;;  %v6799_v17 = vmul.f32 %v16988_v30, %v16988_v30 }
 0xa14   : > { %v6647_v48 = vpop.xlane.xlu1 %6646  ;;  %v6937_v24 = vmul.f32 %v13116_v32, %v6745_v8  ;;  %v6936_v57 = vmul.f32 %v13116_v32, %v6744_v52  ;;  %8395 = vmatpush1.bf16.msra.mxu1 %v12494_v0  ;;  %v12502_v32 = vld [vmem:[#allocation11 + $0x74] ss:$8 sps:$4 sm:$0xff]  }
 0xa15   : > { %v13118_v12 = vpop.eup %13117  ;;  %v6830_v25 = vsub.f32 %v6702_v2, %v6798_v15  ;;  %v6703_v31 = vmul.f32 0.00390625, %v6647_v48  ;;  %v12497_v15 = vld [vmem:[#allocation11 + $0x60] ss:$8 sps:$4 sm:$0xff]   ;;  %8396 = vmatprep.subr.bf16.mxu1 %v12499_v33  ;;  %v6750_v48 = vsub.f32 %v16645_v46, %v16972_v50 }
 0xa16   : > { %v6458_v29 = vpop.xlane.xlu0 %6457  ;;  %v6939_v9 = vmul.f32 %v13118_v12, %v6747_v4  ;;  %v6938_v49 = vmul.f32 %v13118_v12, %v6746_v63  ;;  %v6748_v63 = vsub.f32 %v16637_v47, %v16970_v20  ;;  %v6749_v4 = vsub.f32 %v16641_v44, %v16970_v20  ;;  %v18623_v12 = vld [vmem:[#allocation43_spill] sm:$0xff] }
 0xa17   : > { %v6862_v36 = vadd.f32 1e-05, %v6830_v25  ;;  %v6831_v35 = vsub.f32 %v6703_v31, %v6799_v17  ;;  %v17002_v51 = vmul.f32 0.00390625, %v6458_v29  ;;  %v6751_v25 = vsub.f32 %v18623_v12, %v16972_v50  ;;  %v12505_v50 = vld [vmem:[#allocation11 + $0x84] ss:$8 sps:$4 sm:$0xff]  }
 0xa18   : > { %v6461_v56 = vpop.xlane.xlu1 %6460  ;;  %v6987_v19 = vpack.c.bf16 %v6939_v9, %v6937_v24  ;;  %v6986_v21 = vpack.c.bf16 %v6938_v49, %v6936_v57  ;;  %8397 = vmatpush1.bf16.msra.mxu1 %v12497_v15  ;;  %v12500_v9 = vld [vmem:[#allocation11 + $0x70] ss:$8 sps:$4 sm:$0xff]   ;;  %v12532_v12 = vld [vmem:[#allocation11 + $0x114] ss:$8 sps:$4 sm:$0xff]  }
 0xa19   : > { %13123 = vrsqrt.f32 %v6862_v36  ;;  %v6863_v41 = vadd.f32 1e-05, %v6831_v35  ;;  %v17004_v37 = vmul.f32 0.00390625, %v6461_v56  ;;  %v6800_v3 = vmul.f32 %v17002_v51, %v17002_v51  ;;  %8398 = vmatprep.subr.bf16.mxu1 %v12502_v32 }
 0xa1a   : > { %7512 = vmatprep.mubr.bf16.mxu1 %v6987_v19  ;;  %v6650_v2 = vpop.xlane.xlu0 %6649  ;;  %7705 = vmatprep.mubr.bf16.mxu0 %v6987_v19 }
 0xa1b   : > { %v13120_v52 = vpop.eup %13119  ;;  %13125 = vrsqrt.f32 %v6863_v41  ;;  %v6704_v8 = vmul.f32 0.00390625, %v6650_v2  ;;  %7513 = vmatmul.mubr.bf16.gmra.mrb[220].mxu1 %v6986_v21  ;;  %7706 = vmatmul.mubr.bf16.gmra.mrb[92].mxu0 %v6986_v21  ;;  %v6801_v29 = vmul.f32 %v17004_v37, %v17004_v37 }
 0xa1c   : > { %v6653_v17 = vpop.xlane.xlu1 %6652  ;;  %v6941_v49 = vmul.f32 %v13120_v52, %v6749_v4  ;;  %v6940_v20 = vmul.f32 %v13120_v52, %v6748_v63  ;;  %8399 = vmatpush1.bf16.msra.mxu1 %v12500_v9  ;;  %v12508_v52 = vld [vmem:[#allocation11 + $0x94] ss:$8 sps:$4 sm:$0xff]  }
 0xa1d   : > { %v13122_v31 = vpop.eup %13121  ;;  %v6832_v0 = vsub.f32 %v6704_v8, %v6800_v3  ;;  %v6705_v24 = vmul.f32 0.00390625, %v6653_v17  ;;  %v12503_v8 = vld [vmem:[#allocation11 + $0x80] ss:$8 sps:$4 sm:$0xff]   ;;  %8400 = vmatprep.subr.bf16.mxu1 %v12505_v50  ;;  %v18627_v9 = vld [vmem:[#allocation45_spill] sm:$0xff] }
 0xa1e   : > { %v6464_v57 = vpop.xlane.xlu0 %6463  ;;  %v6943_v36 = vmul.f32 %v13122_v31, %v6751_v25  ;;  %v6942_v35 = vmul.f32 %v13122_v31, %v6750_v48  ;;  %v18624_v25 = vld [vmem:[#allocation48_spill] sm:$0xff]  ;;  %v18625_v31 = vld [vmem:[#allocation47_spill] sm:$0xff] }
 0xa1f   : > { %v6864_v33 = vadd.f32 1e-05, %v6832_v0  ;;  %v6833_v56 = vsub.f32 %v6705_v24, %v6801_v29  ;;  %v17018_v19 = vmul.f32 0.00390625, %v6464_v57  ;;  %v6752_v17 = vsub.f32 %v18624_v25, %v16986_v7  ;;  %v18626_v29 = vld [vmem:[#allocation46_spill] sm:$0xff]  ;;  %v12527_v25 = vld [vmem:[#allocation11 + $0x100] ss:$8 sps:$4 sm:$0xff]  }
 0xa20   : > { %v6467_v21 = vpop.xlane.xlu1 %6466  ;;  %v6989_v41 = vpack.c.bf16 %v6943_v36, %v6941_v49  ;;  %v6988_v2 = vpack.c.bf16 %v6942_v35, %v6940_v20  ;;  %v6753_v0 = vsub.f32 %v18625_v31, %v16986_v7  ;;  %v6754_v24 = vsub.f32 %v18626_v29, %v16988_v30  ;;  %8401 = vmatpush1.bf16.msra.mxu1 %v12503_v8  ;;  %v12511_v29 = vld [vmem:[#allocation11 + $0xa4] ss:$8 sps:$4 sm:$0xff]   ;;  %v18628_v8 = vld [vmem:[#allocation50_spill] sm:$0xff] }
 0xa21   : > { %13127 = vrsqrt.f32 %v6864_v33  ;;  %v6865_v3 = vadd.f32 1e-05, %v6833_v56  ;;  %v17020_v15 = vmul.f32 0.00390625, %v6467_v21  ;;  %v6802_v32 = vmul.f32 %v17018_v19, %v17018_v19  ;;  %v12506_v56 = vld [vmem:[#allocation11 + $0x90] ss:$8 sps:$4 sm:$0xff]   ;;  %8402 = vmatprep.subr.bf16.mxu1 %v12508_v52 }
 0xa22   : > { %7522 = vmatprep.mubr.bf16.mxu1 %v6989_v41  ;;  %v6656_v4 = vpop.xlane.xlu0 %6655  ;;  %7715 = vmatprep.mubr.bf16.mxu0 %v6989_v41  ;;  %v6755_v57 = vsub.f32 %v18627_v9, %v16988_v30  ;;  %v18629_v52 = vld [vmem:[#allocation49_spill] sm:$0xff] }
 0xa23   : > { %v13124_v63 = vpop.eup %13123  ;;  %13129 = vrsqrt.f32 %v6865_v3  ;;  %v6706_v48 = vmul.f32 0.00390625, %v6656_v4  ;;  %7523 = vmatmul.mubr.bf16.gmra.mrb[224].mxu1 %v6988_v2  ;;  %7716 = vmatmul.mubr.bf16.gmra.mrb[96].mxu0 %v6988_v2  ;;  %v6803_v35 = vmul.f32 %v17020_v15, %v17020_v15 }
 0xa24   : > { %v6659_v49 = vpop.xlane.xlu1 %6658  ;;  %v6945_v50 = vmul.f32 %v13124_v63, %v6753_v0  ;;  %v6944_v41 = vmul.f32 %v13124_v63, %v6752_v17  ;;  %8403 = vmatpush1.bf16.msra.mxu1 %v12506_v56  ;;  %v6756_v63 = vsub.f32 %v18628_v8, %v17002_v51  ;;  %v6757_v17 = vsub.f32 %v18629_v52, %v17002_v51  ;;  %v18630_v0 = vld [vmem:[#allocation52_spill] sm:$0xff] }
 0xa25   : > { %v13126_v36 = vpop.eup %13125  ;;  %v6834_v20 = vsub.f32 %v6706_v48, %v6802_v32  ;;  %v6707_v33 = vmul.f32 0.00390625, %v6659_v49  ;;  %v12509_v32 = vld [vmem:[#allocation11 + $0xa0] ss:$8 sps:$4 sm:$0xff]   ;;  %v12514_v48 = vld [vmem:[#allocation11 + $0xb4] ss:$8 sps:$4 sm:$0xff]   ;;  %8404 = vmatprep.subr.bf16.mxu1 %v12511_v29 }
 0xa26   : > { %v6947_v21 = vmul.f32 %v13126_v36, %v6755_v57  ;;  %v6946_v7 = vmul.f32 %v13126_v36, %v6754_v24  ;;  %v6758_v24 = vsub.f32 %v18630_v0, %v17004_v37  ;;  %v18631_v57 = vld [vmem:[#allocation51_spill] sm:$0xff] }
 0xa27   : > { %v6866_v3 = vadd.f32 1e-05, %v6834_v20  ;;  %v6835_v4 = vsub.f32 %v6707_v33, %v6803_v35  ;;  %v6759_v36 = vsub.f32 %v18631_v57, %v17004_v37  ;;  %v12515_v51 = vld [vmem:[#allocation11 + $0xc0] ss:$8 sps:$4 sm:$0xff]  }
 0xa28   : > { %v6991_v31 = vpack.c.bf16 %v6947_v21, %v6945_v50  ;;  %v6990_v30 = vpack.c.bf16 %v6946_v7, %v6944_v41  ;;  %8405 = vmatpush1.bf16.msra.mxu1 %v12509_v32  ;;  %v12517_v50 = vld [vmem:[#allocation11 + $0xc4] ss:$8 sps:$4 sm:$0xff]   ;;  %v12520_v7 = vld [vmem:[#allocation11 + $0xd4] ss:$8 sps:$4 sm:$0xff]  }
 0xa29   : > { %13131 = vrsqrt.f32 %v6866_v3  ;;  %v6867_v2 = vadd.f32 1e-05, %v6835_v4  ;;  %8406 = vmatprep.subr.bf16.mxu1 %v12514_v48  ;;  %v18632_v37 = vld [vmem:[#allocation56_spill] sm:$0xff]  ;;  %v18634_v32 = vld [vmem:[#allocation54_spill] sm:$0xff] }
 0xa2a   : > { %7532 = vmatprep.mubr.bf16.mxu1 %v6991_v31  ;;  %7725 = vmatprep.mubr.bf16.mxu0 %v6991_v31  ;;  %v12512_v31 = vld [vmem:[#allocation11 + $0xb0] ss:$8 sps:$4 sm:$0xff]   ;;  %v6760_v4 = vsub.f32 %v18632_v37, %v17018_v19  ;;  %v6762_v48 = vsub.f32 %v18634_v32, %v17020_v15 }
 0xa2b   : > { %v13128_v49 = vpop.eup %13127  ;;  %13133 = vrsqrt.f32 %v6867_v2  ;;  %7533 = vmatmul.mubr.bf16.gmra.mrb[228].mxu1 %v6990_v30  ;;  %7726 = vmatmul.mubr.bf16.gmra.mrb[100].mxu0 %v6990_v30  ;;  %v18633_v30 = vld [vmem:[#allocation55_spill] sm:$0xff] }
 0xa2c   : > { %v6949_v35 = vmul.f32 %v13128_v49, %v6757_v17  ;;  %v6948_v56 = vmul.f32 %v13128_v49, %v6756_v63  ;;  %8407 = vmatpush1.bf16.msra.mxu1 %v12512_v31  ;;  %v6761_v2 = vsub.f32 %v18633_v30, %v17018_v19  ;;  %v18635_v49 = vld [vmem:[#allocation53_spill] sm:$0xff]  ;;  %v12523_v19 = vld [vmem:[#allocation11 + $0xe4] ss:$8 sps:$4 sm:$0xff]  }
 0xa2d   : > { %v13130_v20 = vpop.eup %13129  ;;  %8408 = vmatprep.subr.bf16.mxu1 %v12517_v50  ;;  %v6763_v63 = vsub.f32 %v18635_v49, %v17020_v15  ;;  %v12526_v15 = vld [vmem:[#allocation11 + $0xf4] ss:$8 sps:$4 sm:$0xff]   ;;  %v12524_v50 = vld [vmem:[#allocation11 + $0xf0] ss:$8 sps:$4 sm:$0xff]  }
 0xa2e   : > { %v6951_v33 = vmul.f32 %v13130_v20, %v6759_v36  ;;  %v6950_v29 = vmul.f32 %v13130_v20, %v6758_v24  ;;  %v12518_v24 = vld [vmem:[#allocation11 + $0xd0] ss:$8 sps:$4 sm:$0xff]  }
 0xa30   : > { %v6993_v21 = vpack.c.bf16 %v6951_v33, %v6949_v35  ;;  %v6992_v41 = vpack.c.bf16 %v6950_v29, %v6948_v56  ;;  %8409 = vmatpush1.bf16.msra.mxu1 %v12515_v51  ;;  %v12521_v29 = vld [vmem:[#allocation11 + $0xe0] ss:$8 sps:$4 sm:$0xff]  }
 0xa31   : > { %8410 = vmatprep.subr.bf16.mxu1 %v12520_v7 }
 0xa32   : > { %7542 = vmatprep.mubr.bf16.mxu1 %v6993_v21  ;;  %7735 = vmatprep.mubr.bf16.mxu0 %v6993_v21 }
 0xa33   : > { %v13132_v3 = vpop.eup %13131  ;;  %7543 = vmatmul.mubr.bf16.gmra.mrb[232].mxu1 %v6992_v41  ;;  %7736 = vmatmul.mubr.bf16.gmra.mrb[104].mxu0 %v6992_v41 }
 0xa34   : > { %v6953_v36 = vmul.f32 %v13132_v3, %v6761_v2  ;;  %v6952_v31 = vmul.f32 %v13132_v3, %v6760_v4  ;;  %8411 = vmatpush1.bf16.msra.mxu1 %v12518_v24 }
 0xa35   : > { %v13134_v17 = vpop.eup %13133  ;;  %8412 = vmatprep.subr.bf16.mxu1 %v12523_v19 }
 0xa36   : > { %v6955_v20 = vmul.f32 %v13134_v17, %v6763_v63  ;;  %v6954_v35 = vmul.f32 %v13134_v17, %v6762_v48 }
 0xa38   : > { %v6995_v33 = vpack.c.bf16 %v6955_v20, %v6953_v36  ;;  %v6994_v56 = vpack.c.bf16 %v6954_v35, %v6952_v31  ;;  %8413 = vmatpush1.bf16.msra.mxu1 %v12521_v29 }
 0xa39   : > { %8414 = vmatprep.subr.bf16.mxu1 %v12526_v15 }
 0xa3a   : > { %7552 = vmatprep.mubr.bf16.mxu1 %v6995_v33  ;;  %7745 = vmatprep.mubr.bf16.mxu0 %v6995_v33 }
 0xa3b   : > { %7553 = vmatmul.mubr.bf16.gmra.mrb[236].mxu1 %v6994_v56  ;;  %7746 = vmatmul.mubr.bf16.gmra.mrb[108].mxu0 %v6994_v56 }
 0xa3c   : > { %8415 = vmatpush1.bf16.msra.mxu1 %v12524_v50 }
 0xa4f   : > { %v6470_v21 = vpop.xlane.xlu0 %6469 }
 0xa50   : > { %v6516_v41 = vmul.f32 0.00390625, %v6470_v21 }
 0xa51   : > { %v6473_v51 = vpop.xlane.xlu1 %6472 }
 0xa52   : > { %v6517_v3 = vmul.f32 0.00390625, %v6473_v51  ;;  %v6804_v4 = vmul.f32 %v6516_v41, %v6516_v41 }
 0xa53   : > { %v6662_v7 = vpop.xlane.xlu0 %6661 }
 0xa54   : > { %v6708_v2 = vmul.f32 0.00390625, %v6662_v7  ;;  %v6805_v17 = vmul.f32 %v6517_v3, %v6517_v3 }
 0xa55   : > { %v6665_v48 = vpop.xlane.xlu1 %6664 }
 0xa56   : > { %v6836_v63 = vsub.f32 %v6708_v2, %v6804_v4  ;;  %v6709_v24 = vmul.f32 0.00390625, %v6665_v48 }
 0xa57   : > { %v6476_v36 = vpop.xlane.xlu0 %6475 }
 0xa58   : > { %v6868_v20 = vadd.f32 1e-05, %v6836_v63  ;;  %v6837_v31 = vsub.f32 %v6709_v24, %v6805_v17  ;;  %v17050_v35 = vmul.f32 0.00390625, %v6476_v36 }
 0xa59   : > { %v6479_v33 = vpop.xlane.xlu1 %6478 }
 0xa5a   : > { %13135 = vrsqrt.f32 %v6868_v20  ;;  %v6869_v56 = vadd.f32 1e-05, %v6837_v31  ;;  %v17052_v19 = vmul.f32 0.00390625, %v6479_v33  ;;  %v6806_v15 = vmul.f32 %v17050_v35, %v17050_v35 }
 0xa5b   : > { %v6668_v29 = vpop.xlane.xlu0 %6667 }
 0xa5c   : > { %13137 = vrsqrt.f32 %v6869_v56  ;;  %v6710_v50 = vmul.f32 0.00390625, %v6668_v29  ;;  %v6807_v7 = vmul.f32 %v17052_v19, %v17052_v19 }
 0xa5d   : > { %v6671_v21 = vpop.xlane.xlu1 %6670 }
 0xa5e   : > { %v6838_v51 = vsub.f32 %v6710_v50, %v6806_v15  ;;  %v6711_v4 = vmul.f32 0.00390625, %v6671_v21  ;;  %v18636_v15 = vld [vmem:[#allocation58_spill] sm:$0xff]  ;;  %v18637_v21 = vld [vmem:[#allocation57_spill] sm:$0xff] }
 0xa5f   : > { %v6482_v2 = vpop.xlane.xlu0 %6481  ;;  %v6764_v50 = vsub.f32 %v18636_v15, %v6516_v41  ;;  %v6765_v49 = vsub.f32 %v18637_v21, %v6516_v41 }
 0xa60   : > { %v6870_v48 = vadd.f32 1e-05, %v6838_v51  ;;  %v6839_v63 = vsub.f32 %v6711_v4, %v6807_v7  ;;  %v17058_v17 = vmul.f32 0.00390625, %v6482_v2  ;;  %v18638_v51 = vld [vmem:[#allocation60_spill] sm:$0xff]  ;;  %v18639_v4 = vld [vmem:[#allocation59_spill] sm:$0xff] }
 0xa61   : > { %v6485_v24 = vpop.xlane.xlu1 %6484  ;;  %v6766_v7 = vsub.f32 %v18638_v51, %v6517_v3  ;;  %v6767_v2 = vsub.f32 %v18639_v4, %v6517_v3 }
 0xa62   : > { %13139 = vrsqrt.f32 %v6870_v48  ;;  %v6871_v36 = vadd.f32 1e-05, %v6839_v63  ;;  %v17060_v33 = vmul.f32 0.00390625, %v6485_v24  ;;  %v6808_v56 = vmul.f32 %v17058_v17, %v17058_v17 }
 0xa63   : > { %v6674_v20 = vpop.xlane.xlu0 %6673 }
 0xa64   : > { %v13136_v31 = vpop.eup %13135  ;;  %13141 = vrsqrt.f32 %v6871_v36  ;;  %v6712_v29 = vmul.f32 0.00390625, %v6674_v20  ;;  %v6809_v20 = vmul.f32 %v17060_v33, %v17060_v33 }
 0xa65   : > { %v6957_v37 = vmul.f32 %v13136_v31, %v6765_v49  ;;  %v6956_v24 = vmul.f32 %v13136_v31, %v6764_v50 }
 0xa66   : > { %v13138_v32 = vpop.eup %13137  ;;  %v6840_v48 = vsub.f32 %v6712_v29, %v6808_v56  ;;  %v6677_v63 = vpop.xlane.xlu1 %6676 }
 0xa67   : > { %v6488_v30 = vpop.xlane.xlu0 %6487  ;;  %v6959_v36 = vmul.f32 %v13138_v32, %v6767_v2  ;;  %v6958_v57 = vmul.f32 %v13138_v32, %v6766_v7  ;;  %v6713_v52 = vmul.f32 0.00390625, %v6677_v63  ;;  %v18643_v7 = vld [vmem:[#allocation61_spill] sm:$0xff] }
 0xa68   : > { %v6872_v0 = vadd.f32 1e-05, %v6840_v48  ;;  %v17070_v15 = vmul.f32 0.00390625, %v6488_v30  ;;  %v18640_v30 = vld [vmem:[#allocation66_spill] sm:$0xff]  ;;  %v6771_v48 = vsub.f32 %v18643_v7, %v17052_v19 }
 0xa69   : > { %v6997_v41 = vpack.c.bf16 %v6959_v36, %v6957_v37  ;;  %v6996_v21 = vpack.c.bf16 %v6958_v57, %v6956_v24  ;;  %v6841_v51 = vsub.f32 %v6713_v52, %v6809_v20  ;;  %v6768_v50 = vsub.f32 %v18640_v30, %v17050_v35  ;;  %v18641_v57 = vld [vmem:[#allocation65_spill] sm:$0xff] }
 0xa6a   : > { %13143 = vrsqrt.f32 %v6872_v0  ;;  %v6491_v3 = vpop.xlane.xlu1 %6490  ;;  %v6810_v32 = vmul.f32 %v17070_v15, %v17070_v15  ;;  %v6769_v52 = vsub.f32 %v18641_v57, %v17050_v35  ;;  %v18642_v0 = vld [vmem:[#allocation62_spill] sm:$0xff] }
 0xa6b   : > { %7562 = vmatprep.mubr.bf16.mxu1 %v6997_v41  ;;  %7755 = vmatprep.mubr.bf16.mxu0 %v6997_v41  ;;  %v6680_v56 = vpop.xlane.xlu0 %6679  ;;  %v6873_v49 = vadd.f32 1e-05, %v6841_v51  ;;  %v6523_v2 = vmul.f32 0.00390625, %v6491_v3  ;;  %v6770_v37 = vsub.f32 %v18642_v0, %v17052_v19 }
 0xa6c   : > { %v13140_v29 = vpop.eup %13139  ;;  %v6714_v31 = vmul.f32 0.00390625, %v6680_v56  ;;  %7563 = vmatmul.mubr.bf16.gmra.mrb[240].mxu1 %v6996_v21  ;;  %7756 = vmatmul.mubr.bf16.gmra.mrb[112].mxu0 %v6996_v21 }
 0xa6d   : > { %13145 = vrsqrt.f32 %v6873_v49  ;;  %v6961_v24 = vmul.f32 %v13140_v29, %v6769_v52  ;;  %v6960_v41 = vmul.f32 %v13140_v29, %v6768_v50  ;;  %v6811_v56 = vmul.f32 %v6523_v2, %v6523_v2  ;;  %v18644_v49 = vld [vmem:[#allocation70_spill] sm:$0xff]  ;;  %v18645_v29 = vld [vmem:[#allocation69_spill] sm:$0xff] }
 0xa6e   : > { %v13142_v51 = vpop.eup %13141  ;;  %v6842_v63 = vsub.f32 %v6714_v31, %v6810_v32  ;;  %v6683_v36 = vpop.xlane.xlu1 %6682  ;;  %v6772_v32 = vsub.f32 %v18644_v49, %v17058_v17  ;;  %v6773_v31 = vsub.f32 %v18645_v29, %v17058_v17  ;;  %v18646_v50 = vld [vmem:[#allocation73_spill] sm:$0xff]  ;;  %v18647_v17 = vld [vmem:[#allocation92_spill] sm:$0xff] }
 0xa6f   : > { %v6963_v20 = vmul.f32 %v13142_v51, %v6771_v48  ;;  %v6962_v21 = vmul.f32 %v13142_v51, %v6770_v37  ;;  %v6715_v30 = vmul.f32 0.00390625, %v6683_v36  ;;  %v6774_v52 = vsub.f32 %v18646_v50, %v17060_v33 }
 0xa70   : > { %v6874_v3 = vadd.f32 1e-05, %v6842_v63 }
 0xa71   : > { %v6999_v4 = vpack.c.bf16 %v6963_v20, %v6961_v24  ;;  %v6998_v8 = vpack.c.bf16 %v6962_v21, %v6960_v41  ;;  %v6843_v35 = vsub.f32 %v6715_v30, %v6811_v56  ;;  %v6775_v30 = vsub.f32 %v16826_v26, %v17060_v33  ;;  %v18648_v20 = vld [vmem:[#allocation91_spill] sm:$0xff]  ;;  %v18649_v21 = vld [vmem:[#allocation74_spill] sm:$0xff] }
 0xa72   : > { %13147 = vrsqrt.f32 %v6874_v3  ;;  %v6776_v24 = vsub.f32 %v18647_v17, %v17070_v15  ;;  %v6777_v41 = vsub.f32 %v18648_v20, %v17070_v15  ;;  %v6778_v33 = vsub.f32 %v18649_v21, %v6523_v2  ;;  %v18650_v3 = vld [vmem:[#allocation72_spill] sm:$0xff]  ;;  %v7068_v15 = vld [vmem:[%s17947_s6] ss:$2 sm:$0xf] }
 0xa73   : > { %7572 = vmatprep.mubr.bf16.mxu1 %v6999_v4  ;;  %7765 = vmatprep.mubr.bf16.mxu0 %v6999_v4  ;;  %v6875_v0 = vadd.f32 1e-05, %v6843_v35  ;;  %v6779_v56 = vsub.f32 %v18650_v3, %v6523_v2  ;;  %v18652_v2 = vld [vmem:[#allocation35_spill] sm:$0xff] }
 0xa74   : > { %7573 = vmatmul.mubr.bf16.gmra.mrb[244].mxu1 %v6998_v8  ;;  %7766 = vmatmul.mubr.bf16.gmra.mrb[116].mxu0 %v6998_v8  ;;  %v13144_v19 = vpop.eup %13143 }
 0xa75   : > { %13149 = vrsqrt.f32 %v6875_v0  ;;  %v6965_v4 = vmul.f32 %v13144_v19, %v6773_v31  ;;  %v6964_v51 = vmul.f32 %v13144_v19, %v6772_v32 }
 0xa77   : > { %v13146_v37 = vpop.eup %13145 }
 0xa78   : > { %v6967_v48 = vmul.f32 %v13146_v37, %v6775_v30  ;;  %v6966_v63 = vmul.f32 %v13146_v37, %v6774_v52 }
 0xa7a   : > { %v7001_v8 = vpack.c.bf16 %v6967_v48, %v6965_v4  ;;  %v7000_v36 = vpack.c.bf16 %v6966_v63, %v6964_v51  ;;  %v12529_v4 = vld [vmem:[#allocation11 + $0x104] ss:$8 sps:$4 sm:$0xff]   ;;  %v17103_v63 = vrot.slane %v7068_v15, %v18652_v2 }
 0xa7b   : > { %8577 = vmatprep.subr.bf16.mxu1 %v12529_v4  ;;  %v18651_v48 = vld [vmem:[#allocation19_spill] sm:$0xff] }
 0xa7c   : > { %7582 = vmatprep.mubr.bf16.mxu1 %v7001_v8  ;;  %7775 = vmatprep.mubr.bf16.mxu0 %v7001_v8  ;;  %v13148_v0 = vpop.eup %13147  ;;  %v17100_v51 = vrot.slane %v7068_v15, %v18651_v48  ;;  %v18653_v8 = vld [vmem:[#allocation20_spill] sm:$0xff] }
 0xa7d   : > { %7583 = vmatmul.mubr.bf16.gmra.mrb[248].mxu1 %v7000_v36  ;;  %7776 = vmatmul.mubr.bf16.gmra.mrb[120].mxu0 %v7000_v36  ;;  %v6969_v19 = vmul.f32 %v13148_v0, %v6777_v41  ;;  %v6968_v31 = vmul.f32 %v13148_v0, %v6776_v24  ;;  %v17106_v36 = vrot.slane %v7068_v15, %v18653_v8  ;;  %v18654_v0 = vld [vmem:[#allocation36_spill] sm:$0xff] }
 0xa7e   : > { %v17109_v24 = vrot.slane %v7068_v15, %v18654_v0 }
 0xa7f   : > { %v13150_v35 = vpop.eup %13149 }
 0xa80   : > { %v6971_v32 = vmul.f32 %v13150_v35, %v6779_v56  ;;  %v6970_v52 = vmul.f32 %v13150_v35, %v6778_v33 }
 0xa82   : > { %v7003_v30 = vpack.c.bf16 %v6971_v32, %v6969_v19  ;;  %v7002_v37 = vpack.c.bf16 %v6970_v52, %v6968_v31 }
 0xa84   : > { %7592 = vmatprep.mubr.bf16.mxu1 %v7003_v30  ;;  %7785 = vmatprep.mubr.bf16.mxu0 %v7003_v30 }
 0xa85   : > { %7593 = vmatmul.mubr.bf16.gmra.mrb[252].mxu1 %v7002_v37  ;;  %7786 = vmatmul.mubr.bf16.gmra.mrb[124].mxu0 %v7002_v37 }
 0xab6   : > { %v7444_v41 = vpop.f32.mrb[192].mxu1  ;;  %v7637_v56 = vpop.f32.mrb[64].mxu0 }
 0xab7   : > { %v7445_v33 = vadd.f32 %v7444_v41, %v17100_v51  ;;  %v7446_v35 = vpop.f32.mrb[193].mxu1  ;;  %v7638_v19 = vadd.f32 %v7637_v56, %v17103_v63  ;;  %v7639_v31 = vpop.f32.mrb[65].mxu0 }
 0xab8   : > { %v7447_v32 = vadd.f32 %v7446_v35, %v17106_v36  ;;  %v7448_v52 = vpop.f32.mrb[194].mxu1  ;;  %v7640_v30 = vadd.f32 %v7639_v31, %v17109_v24  ;;  %v7641_v4 = vpop.f32.mrb[66].mxu0 }
 0xab9   : > { %v7449_v37 = vadd.f32 %v7448_v52, %v17100_v51  ;;  %v7450_v3 = vpop.f32.mrb[195].mxu1  ;;  %v7642_v15 = vadd.f32 %v7641_v4, %v17103_v63  ;;  %v7643_v20 = vpop.f32.mrb[67].mxu0  ;;  %v7796_v41 = vmax.f32 %v7445_v33, 0.0  ;;  %v7798_v56 = vmax.f32 %v7638_v19, 0.0 }
 0xaba   : > { %v7451_v21 = vadd.f32 %v7450_v3, %v17106_v36  ;;  %v7644_v26 = vadd.f32 %v7643_v20, %v17109_v24  ;;  %v7797_v50 = vmax.f32 %v7447_v32, 0.0  ;;  %v7799_v49 = vmax.f32 %v7640_v30, 0.0 }
 0xabb   : > { %v7800_v17 = vmax.f32 %v7449_v37, 0.0  ;;  %v7802_v35 = vmax.f32 %v7642_v15, 0.0  ;;  %v12530_v15 = vld [vmem:[#allocation11 + $0x110] ss:$8 sps:$4 sm:$0xff]  }
 0xabc   : > { %v7801_v29 = vmax.f32 %v7451_v21, 0.0  ;;  %v7803_v31 = vmax.f32 %v7644_v26, 0.0 }
 0xabd   : > { %v7924_v7 = vpack.c.bf16 %v7800_v17, %v7796_v41  ;;  %v17119_v57 = vpack.c.bf16 %v7802_v35, %v7798_v56 }
 0xabe   : > { %v7925_v52 = vpack.c.bf16 %v7801_v29, %v7797_v50  ;;  %v7454_v9 = vpop.f32.mrb[196].mxu1  ;;  %v17121_v4 = vpack.c.bf16 %v7803_v31, %v7799_v49  ;;  %v7647_v33 = vpop.f32.mrb[68].mxu0  ;;  %v12535_v31 = vld [vmem:[#allocation11 + $0x124] ss:$8 sps:$4 sm:$0xff]  }
 0xabf   : > { %v7455_v3 = vadd.f32 %v7454_v9, %v17100_v51  ;;  %v7456_v37 = vpop.f32.mrb[197].mxu1  ;;  %v7648_v20 = vadd.f32 %v7647_v33, %v17103_v63  ;;  %v7649_v21 = vpop.f32.mrb[69].mxu0 }
 0xac0   : > { %v7457_v19 = vadd.f32 %v7456_v37, %v17106_v36  ;;  %v7458_v32 = vpop.f32.mrb[198].mxu1  ;;  %8416 = vmatprep.mubr.bf16.mxu1 %v7925_v52  ;;  %v7650_v26 = vadd.f32 %v7649_v21, %v17109_v24  ;;  %v7651_v50 = vpop.f32.mrb[70].mxu0 }
 0xac1   : > { %v7459_v29 = vadd.f32 %v7458_v32, %v17100_v51  ;;  %v7460_v17 = vpop.f32.mrb[199].mxu1  ;;  %8417 = vmatmul.mubr.bf16.vlgmr.msra.gmra.mrb[0].mxu1 %v7924_v7  ;;  %v7652_v49 = vadd.f32 %v7651_v50, %v17103_v63  ;;  %v7653_v30 = vpop.f32.mrb[71].mxu0  ;;  %v7804_v41 = vmax.f32 %v7455_v3, 0.0  ;;  %v7806_v52 = vmax.f32 %v7648_v20, 0.0  ;;  %v12538_v20 = vld [vmem:[#allocation11 + $0x134] ss:$8 sps:$4 sm:$0xff]  }
 0xac2   : > { %v7461_v9 = vadd.f32 %v7460_v17, %v17106_v36  ;;  %8578 = vmatpush1.bf16.msra.mxu1 %v12527_v25  ;;  %v7654_v35 = vadd.f32 %v7653_v30, %v17109_v24  ;;  %v7805_v33 = vmax.f32 %v7457_v19, 0.0  ;;  %v7807_v32 = vmax.f32 %v7650_v26, 0.0  ;;  %v12533_v25 = vld [vmem:[#allocation11 + $0x120] ss:$8 sps:$4 sm:$0xff]  }
 0xac3   : > { %v7808_v56 = vmax.f32 %v7459_v29, 0.0  ;;  %8579 = vmatprep.subr.bf16.mxu1 %v12532_v12  ;;  %v7810_v37 = vmax.f32 %v7652_v49, 0.0 }
 0xac4   : > { %v7809_v21 = vmax.f32 %v7461_v9, 0.0  ;;  %v7811_v7 = vmax.f32 %v7654_v35, 0.0 }
 0xac5   : > { %v7928_v46 = vpack.c.bf16 %v7808_v56, %v7804_v41  ;;  %v17131_v44 = vpack.c.bf16 %v7810_v37, %v7806_v52 }
 0xac6   : > { %v7929_v50 = vpack.c.bf16 %v7809_v21, %v7805_v33  ;;  %v7464_v17 = vpop.f32.mrb[200].mxu1  ;;  %8580 = vmatpush1.bf16.msra.mxu1 %v12530_v15  ;;  %v17133_v47 = vpack.c.bf16 %v7811_v7, %v7807_v32  ;;  %v7657_v29 = vpop.f32.mrb[72].mxu0  ;;  %v12536_v33 = vld [vmem:[#allocation11 + $0x130] ss:$8 sps:$4 sm:$0xff]   ;;  %v12541_v7 = vld [vmem:[#allocation11 + $0x144] ss:$8 sps:$4 sm:$0xff]  }
 0xac7   : > { %v7465_v3 = vadd.f32 %v7464_v17, %v17100_v51  ;;  %v7466_v12 = vpop.f32.mrb[201].mxu1  ;;  %8581 = vmatprep.subr.bf16.mxu1 %v12535_v31  ;;  %v7658_v19 = vadd.f32 %v7657_v29, %v17103_v63  ;;  %v7659_v49 = vpop.f32.mrb[73].mxu0 }
 0xac8   : > { %v7467_v26 = vadd.f32 %v7466_v12, %v17106_v36  ;;  %v7468_v9 = vpop.f32.mrb[202].mxu1  ;;  %8426 = vmatprep.mubr.bf16.mxu1 %v7929_v50  ;;  %v7660_v30 = vadd.f32 %v7659_v49, %v17109_v24  ;;  %v7661_v41 = vpop.f32.mrb[74].mxu0 }
 0xac9   : > { %v7469_v15 = vadd.f32 %v7468_v9, %v17100_v51  ;;  %v7470_v56 = vpop.f32.mrb[203].mxu1  ;;  %8427 = vmatmul.mubr.bf16.gmra.mrb[4].mxu1 %v7928_v46  ;;  %v7662_v35 = vadd.f32 %v7661_v41, %v17103_v63  ;;  %v7663_v31 = vpop.f32.mrb[75].mxu0  ;;  %v7812_v37 = vmax.f32 %v7465_v3, 0.0  ;;  %v7814_v50 = vmax.f32 %v7658_v19, 0.0  ;;  %v12544_v19 = vld [vmem:[#allocation11 + $0x154] ss:$8 sps:$4 sm:$0xff]  }
 0xaca   : > { %v7471_v52 = vadd.f32 %v7470_v56, %v17106_v36  ;;  %8582 = vmatpush1.bf16.msra.mxu1 %v12533_v25  ;;  %v7664_v32 = vadd.f32 %v7663_v31, %v17109_v24  ;;  %v7813_v17 = vmax.f32 %v7467_v26, 0.0  ;;  %v7815_v49 = vmax.f32 %v7660_v30, 0.0  ;;  %v12539_v25 = vld [vmem:[#allocation11 + $0x140] ss:$8 sps:$4 sm:$0xff]  }
 0xacb   : > { %v7816_v21 = vmax.f32 %v7469_v15, 0.0  ;;  %8583 = vmatprep.subr.bf16.mxu1 %v12538_v20  ;;  %v7818_v29 = vmax.f32 %v7662_v35, 0.0 }
 0xacc   : > { %v7817_v12 = vmax.f32 %v7471_v52, 0.0  ;;  %v7819_v46 = vmax.f32 %v7664_v32, 0.0 }
 0xacd   : > { %v7932_v9 = vpack.c.bf16 %v7816_v21, %v7812_v37  ;;  %v17143_v45 = vpack.c.bf16 %v7818_v29, %v7814_v50 }
 0xace   : > { %v7933_v41 = vpack.c.bf16 %v7817_v12, %v7813_v17  ;;  %v7474_v56 = vpop.f32.mrb[204].mxu1  ;;  %8584 = vmatpush1.bf16.msra.mxu1 %v12536_v33  ;;  %v17145_v18 = vpack.c.bf16 %v7819_v46, %v7815_v49  ;;  %v7667_v15 = vpop.f32.mrb[76].mxu0  ;;  %v12542_v17 = vld [vmem:[#allocation11 + $0x150] ss:$8 sps:$4 sm:$0xff]   ;;  %v12547_v46 = vld [vmem:[#allocation11 + $0x164] ss:$8 sps:$4 sm:$0xff]  }
 0xacf   : > { %v7475_v3 = vadd.f32 %v7474_v56, %v17100_v51  ;;  %v7476_v20 = vpop.f32.mrb[205].mxu1  ;;  %8585 = vmatprep.subr.bf16.mxu1 %v12541_v7  ;;  %v7668_v26 = vadd.f32 %v7667_v15, %v17103_v63  ;;  %v7669_v35 = vpop.f32.mrb[77].mxu0 }
 0xad0   : > { %v7477_v30 = vadd.f32 %v7476_v20, %v17106_v36  ;;  %v7478_v52 = vpop.f32.mrb[206].mxu1  ;;  %8436 = vmatprep.mubr.bf16.mxu1 %v7933_v41  ;;  %v7670_v31 = vadd.f32 %v7669_v35, %v17109_v24  ;;  %v7671_v37 = vpop.f32.mrb[78].mxu0 }
 0xad1   : > { %v7479_v33 = vadd.f32 %v7478_v52, %v17100_v51  ;;  %v7480_v21 = vpop.f32.mrb[207].mxu1  ;;  %8437 = vmatmul.mubr.bf16.gmra.mrb[8].mxu1 %v7932_v9  ;;  %v7672_v32 = vadd.f32 %v7671_v37, %v17103_v63  ;;  %v7673_v7 = vpop.f32.mrb[79].mxu0  ;;  %v7820_v29 = vmax.f32 %v7475_v3, 0.0  ;;  %v7822_v41 = vmax.f32 %v7668_v26, 0.0  ;;  %v12550_v26 = vld [vmem:[#allocation11 + $0x174] ss:$8 sps:$4 sm:$0xff]  }
 0xad2   : > { %v7481_v50 = vadd.f32 %v7480_v21, %v17106_v36  ;;  %8586 = vmatpush1.bf16.msra.mxu1 %v12539_v25  ;;  %v7674_v49 = vadd.f32 %v7673_v7, %v17109_v24  ;;  %v7821_v56 = vmax.f32 %v7477_v30, 0.0  ;;  %v7823_v35 = vmax.f32 %v7670_v31, 0.0  ;;  %v12545_v25 = vld [vmem:[#allocation11 + $0x160] ss:$8 sps:$4 sm:$0xff]  }
 0xad3   : > { %v7824_v12 = vmax.f32 %v7479_v33, 0.0  ;;  %8587 = vmatprep.subr.bf16.mxu1 %v12544_v19  ;;  %v7826_v15 = vmax.f32 %v7672_v32, 0.0 }
 0xad4   : > { %v7825_v20 = vmax.f32 %v7481_v50, 0.0  ;;  %v7827_v9 = vmax.f32 %v7674_v49, 0.0 }
 0xad5   : > { %v7936_v52 = vpack.c.bf16 %v7824_v12, %v7820_v29  ;;  %v17155_v61 = vpack.c.bf16 %v7826_v15, %v7822_v41 }
 0xad6   : > { %v7937_v37 = vpack.c.bf16 %v7825_v20, %v7821_v56  ;;  %v7484_v21 = vpop.f32.mrb[208].mxu1  ;;  %8588 = vmatpush1.bf16.msra.mxu1 %v12542_v17  ;;  %v17157_v40 = vpack.c.bf16 %v7827_v9, %v7823_v35  ;;  %v7677_v33 = vpop.f32.mrb[80].mxu0  ;;  %v12548_v56 = vld [vmem:[#allocation11 + $0x170] ss:$8 sps:$4 sm:$0xff]   ;;  %v12553_v9 = vld [vmem:[#allocation11 + $0x184] ss:$8 sps:$4 sm:$0xff]  }
 0xad7   : > { %v7485_v3 = vadd.f32 %v7484_v21, %v17100_v51  ;;  %v7486_v19 = vpop.f32.mrb[209].mxu1  ;;  %8589 = vmatprep.subr.bf16.mxu1 %v12547_v46  ;;  %v7678_v30 = vadd.f32 %v7677_v33, %v17103_v63  ;;  %v7679_v32 = vpop.f32.mrb[81].mxu0 }
 0xad8   : > { %v7487_v31 = vadd.f32 %v7486_v19, %v17106_v36  ;;  %v7488_v50 = vpop.f32.mrb[210].mxu1  ;;  %8446 = vmatprep.mubr.bf16.mxu1 %v7937_v37  ;;  %v7680_v7 = vadd.f32 %v7679_v32, %v17109_v24  ;;  %v7681_v29 = vpop.f32.mrb[82].mxu0 }
 0xad9   : > { %v7489_v17 = vadd.f32 %v7488_v50, %v17100_v51  ;;  %v7490_v12 = vpop.f32.mrb[211].mxu1  ;;  %8447 = vmatmul.mubr.bf16.gmra.mrb[12].mxu1 %v7936_v52  ;;  %v7682_v49 = vadd.f32 %v7681_v29, %v17103_v63  ;;  %v7683_v46 = vpop.f32.mrb[83].mxu0  ;;  %v7828_v15 = vmax.f32 %v7485_v3, 0.0  ;;  %v7830_v37 = vmax.f32 %v7678_v30, 0.0  ;;  %v12556_v30 = vld [vmem:[#allocation11 + $0x194] ss:$8 sps:$4 sm:$0xff]  }
 0xada   : > { %v7491_v41 = vadd.f32 %v7490_v12, %v17106_v36  ;;  %8590 = vmatpush1.bf16.msra.mxu1 %v12545_v25  ;;  %v7684_v35 = vadd.f32 %v7683_v46, %v17109_v24  ;;  %v7829_v21 = vmax.f32 %v7487_v31, 0.0  ;;  %v7831_v32 = vmax.f32 %v7680_v7, 0.0  ;;  %v12551_v25 = vld [vmem:[#allocation11 + $0x180] ss:$8 sps:$4 sm:$0xff]  }
 0xadb   : > { %v7832_v20 = vmax.f32 %v7489_v17, 0.0  ;;  %8591 = vmatprep.subr.bf16.mxu1 %v12550_v26  ;;  %v7834_v33 = vmax.f32 %v7682_v49, 0.0 }
 0xadc   : > { %v7833_v19 = vmax.f32 %v7491_v41, 0.0  ;;  %v7835_v52 = vmax.f32 %v7684_v35, 0.0 }
 0xadd   : > { %v7940_v50 = vpack.c.bf16 %v7832_v20, %v7828_v15  ;;  %v17167_v58 = vpack.c.bf16 %v7834_v33, %v7830_v37 }
 0xade   : > { %v7941_v29 = vpack.c.bf16 %v7833_v19, %v7829_v21  ;;  %v7494_v12 = vpop.f32.mrb[212].mxu1  ;;  %8592 = vmatpush1.bf16.msra.mxu1 %v12548_v56  ;;  %v17169_v16 = vpack.c.bf16 %v7835_v52, %v7831_v32  ;;  %v7687_v17 = vpop.f32.mrb[84].mxu0  ;;  %v12554_v21 = vld [vmem:[#allocation11 + $0x190] ss:$8 sps:$4 sm:$0xff]   ;;  %v12559_v52 = vld [vmem:[#allocation11 + $0x1a4] ss:$8 sps:$4 sm:$0xff]  }
 0xadf   : > { %v7495_v3 = vadd.f32 %v7494_v12, %v17100_v51  ;;  %v7496_v26 = vpop.f32.mrb[213].mxu1  ;;  %8593 = vmatprep.subr.bf16.mxu1 %v12553_v9  ;;  %v7688_v31 = vadd.f32 %v7687_v17, %v17103_v63  ;;  %v7689_v49 = vpop.f32.mrb[85].mxu0 }
 0xae0   : > { %v7497_v7 = vadd.f32 %v7496_v26, %v17106_v36  ;;  %v7498_v41 = vpop.f32.mrb[214].mxu1  ;;  %8456 = vmatprep.mubr.bf16.mxu1 %v7941_v29  ;;  %v7690_v46 = vadd.f32 %v7689_v49, %v17109_v24  ;;  %v7691_v15 = vpop.f32.mrb[86].mxu0 }
 0xae1   : > { %v7499_v56 = vadd.f32 %v7498_v41, %v17100_v51  ;;  %v7500_v20 = vpop.f32.mrb[215].mxu1  ;;  %8457 = vmatmul.mubr.bf16.gmra.mrb[16].mxu1 %v7940_v50  ;;  %v7692_v35 = vadd.f32 %v7691_v15, %v17103_v63  ;;  %v7693_v9 = vpop.f32.mrb[87].mxu0  ;;  %v7836_v33 = vmax.f32 %v7495_v3, 0.0  ;;  %v7838_v29 = vmax.f32 %v7688_v31, 0.0  ;;  %v12562_v31 = vld [vmem:[#allocation11 + $0x1b4] ss:$8 sps:$4 sm:$0xff]  }
 0xae2   : > { %v7501_v37 = vadd.f32 %v7500_v20, %v17106_v36  ;;  %8594 = vmatpush1.bf16.msra.mxu1 %v12551_v25  ;;  %v7694_v32 = vadd.f32 %v7693_v9, %v17109_v24  ;;  %v7837_v12 = vmax.f32 %v7497_v7, 0.0  ;;  %v7839_v49 = vmax.f32 %v7690_v46, 0.0  ;;  %v12557_v25 = vld [vmem:[#allocation11 + $0x1a0] ss:$8 sps:$4 sm:$0xff]  }
 0xae3   : > { %v7840_v19 = vmax.f32 %v7499_v56, 0.0  ;;  %8595 = vmatprep.subr.bf16.mxu1 %v12556_v30  ;;  %v7842_v17 = vmax.f32 %v7692_v35, 0.0 }
 0xae4   : > { %v7841_v26 = vmax.f32 %v7501_v37, 0.0  ;;  %v7843_v50 = vmax.f32 %v7694_v32, 0.0 }
 0xae5   : > { %v7944_v41 = vpack.c.bf16 %v7840_v19, %v7836_v33  ;;  %v17179_v55 = vpack.c.bf16 %v7842_v17, %v7838_v29 }
 0xae6   : > { %v7945_v15 = vpack.c.bf16 %v7841_v26, %v7837_v12  ;;  %v7504_v20 = vpop.f32.mrb[216].mxu1  ;;  %8596 = vmatpush1.bf16.msra.mxu1 %v12554_v21  ;;  %v17181_v28 = vpack.c.bf16 %v7843_v50, %v7839_v49  ;;  %v7697_v56 = vpop.f32.mrb[88].mxu0  ;;  %v12560_v12 = vld [vmem:[#allocation11 + $0x1b0] ss:$8 sps:$4 sm:$0xff]   ;;  %v12565_v50 = vld [vmem:[#allocation11 + $0x1c4] ss:$8 sps:$4 sm:$0xff]  }
 0xae7   : > { %v7505_v3 = vadd.f32 %v7504_v20, %v17100_v51  ;;  %v7506_v30 = vpop.f32.mrb[217].mxu1  ;;  %8597 = vmatprep.subr.bf16.mxu1 %v12559_v52  ;;  %v7698_v7 = vadd.f32 %v7697_v56, %v17103_v63  ;;  %v7699_v35 = vpop.f32.mrb[89].mxu0 }
 0xae8   : > { %v7507_v46 = vadd.f32 %v7506_v30, %v17106_v36  ;;  %v7508_v37 = vpop.f32.mrb[218].mxu1  ;;  %8466 = vmatprep.mubr.bf16.mxu1 %v7945_v15  ;;  %v7700_v9 = vadd.f32 %v7699_v35, %v17109_v24  ;;  %v7701_v33 = vpop.f32.mrb[90].mxu0 }
 0xae9   : > { %v7509_v21 = vadd.f32 %v7508_v37, %v17100_v51  ;;  %v7510_v19 = vpop.f32.mrb[219].mxu1  ;;  %8467 = vmatmul.mubr.bf16.gmra.mrb[20].mxu1 %v7944_v41  ;;  %v7702_v32 = vadd.f32 %v7701_v33, %v17103_v63  ;;  %v7703_v52 = vpop.f32.mrb[91].mxu0  ;;  %v7844_v17 = vmax.f32 %v7505_v3, 0.0  ;;  %v7846_v15 = vmax.f32 %v7698_v7, 0.0  ;;  %v12568_v7 = vld [vmem:[#allocation11 + $0x1d4] ss:$8 sps:$4 sm:$0xff]  }
 0xaea   : > { %v7511_v29 = vadd.f32 %v7510_v19, %v17106_v36  ;;  %8598 = vmatpush1.bf16.msra.mxu1 %v12557_v25  ;;  %v7704_v49 = vadd.f32 %v7703_v52, %v17109_v24  ;;  %v7845_v20 = vmax.f32 %v7507_v46, 0.0  ;;  %v7847_v35 = vmax.f32 %v7700_v9, 0.0  ;;  %v12563_v25 = vld [vmem:[#allocation11 + $0x1c0] ss:$8 sps:$4 sm:$0xff]  }
 0xaeb   : > { %v7848_v26 = vmax.f32 %v7509_v21, 0.0  ;;  %8599 = vmatprep.subr.bf16.mxu1 %v12562_v31  ;;  %v7850_v56 = vmax.f32 %v7702_v32, 0.0 }
 0xaec   : > { %v7849_v30 = vmax.f32 %v7511_v29, 0.0  ;;  %v7851_v41 = vmax.f32 %v7704_v49, 0.0 }
 0xaed   : > { %v7948_v37 = vpack.c.bf16 %v7848_v26, %v7844_v17  ;;  %v17191_v54 = vpack.c.bf16 %v7850_v56, %v7846_v15 }
 0xaee   : > { %v7949_v33 = vpack.c.bf16 %v7849_v30, %v7845_v20  ;;  %v7514_v19 = vpop.f32.mrb[220].mxu1  ;;  %8600 = vmatpush1.bf16.msra.mxu1 %v12560_v12  ;;  %v17193_v42 = vpack.c.bf16 %v7851_v41, %v7847_v35  ;;  %v7707_v21 = vpop.f32.mrb[92].mxu0  ;;  %v12566_v20 = vld [vmem:[#allocation11 + $0x1d0] ss:$8 sps:$4 sm:$0xff]   ;;  %v12571_v41 = vld [vmem:[#allocation11 + $0x1e4] ss:$8 sps:$4 sm:$0xff]  }
 0xaef   : > { %v7515_v3 = vadd.f32 %v7514_v19, %v17100_v51  ;;  %v7516_v31 = vpop.f32.mrb[221].mxu1  ;;  %8601 = vmatprep.subr.bf16.mxu1 %v12565_v50  ;;  %v7708_v46 = vadd.f32 %v7707_v21, %v17103_v63  ;;  %v7709_v32 = vpop.f32.mrb[93].mxu0 }
 0xaf0   : > { %v7517_v9 = vadd.f32 %v7516_v31, %v17106_v36  ;;  %v7518_v29 = vpop.f32.mrb[222].mxu1  ;;  %8476 = vmatprep.mubr.bf16.mxu1 %v7949_v33  ;;  %v7710_v52 = vadd.f32 %v7709_v32, %v17109_v24  ;;  %v7711_v17 = vpop.f32.mrb[94].mxu0 }
 0xaf1   : > { %v7519_v12 = vadd.f32 %v7518_v29, %v17100_v51  ;;  %v7520_v26 = vpop.f32.mrb[223].mxu1  ;;  %8477 = vmatmul.mubr.bf16.gmra.mrb[24].mxu1 %v7948_v37  ;;  %v7712_v49 = vadd.f32 %v7711_v17, %v17103_v63  ;;  %v7713_v50 = vpop.f32.mrb[95].mxu0  ;;  %v7852_v56 = vmax.f32 %v7515_v3, 0.0  ;;  %v7854_v33 = vmax.f32 %v7708_v46, 0.0  ;;  %v12574_v46 = vld [vmem:[#allocation11 + $0x1f4] ss:$8 sps:$4 sm:$0xff]  }
 0xaf2   : > { %v7521_v15 = vadd.f32 %v7520_v26, %v17106_v36  ;;  %8602 = vmatpush1.bf16.msra.mxu1 %v12563_v25  ;;  %v7714_v35 = vadd.f32 %v7713_v50, %v17109_v24  ;;  %v7853_v19 = vmax.f32 %v7517_v9, 0.0  ;;  %v7855_v32 = vmax.f32 %v7710_v52, 0.0  ;;  %v12569_v25 = vld [vmem:[#allocation11 + $0x1e0] ss:$8 sps:$4 sm:$0xff]  }
 0xaf3   : > { %v7856_v30 = vmax.f32 %v7519_v12, 0.0  ;;  %8603 = vmatprep.subr.bf16.mxu1 %v12568_v7  ;;  %v7858_v21 = vmax.f32 %v7712_v49, 0.0 }
 0xaf4   : > { %v7857_v31 = vmax.f32 %v7521_v15, 0.0  ;;  %v7859_v37 = vmax.f32 %v7714_v35, 0.0 }
 0xaf5   : > { %v7952_v29 = vpack.c.bf16 %v7856_v30, %v7852_v56  ;;  %v17203_v1 = vpack.c.bf16 %v7858_v21, %v7854_v33 }
 0xaf6   : > { %v7953_v17 = vpack.c.bf16 %v7857_v31, %v7853_v19  ;;  %v7524_v26 = vpop.f32.mrb[224].mxu1  ;;  %8604 = vmatpush1.bf16.msra.mxu1 %v12566_v20  ;;  %v17205_v6 = vpack.c.bf16 %v7859_v37, %v7855_v32  ;;  %v7717_v12 = vpop.f32.mrb[96].mxu0  ;;  %v12572_v19 = vld [vmem:[#allocation11 + $0x1f0] ss:$8 sps:$4 sm:$0xff]  }
 0xaf7   : > { %v7525_v3 = vadd.f32 %v7524_v26, %v17100_v51  ;;  %v7526_v7 = vpop.f32.mrb[225].mxu1  ;;  %8605 = vmatprep.subr.bf16.mxu1 %v12571_v41  ;;  %v7718_v9 = vadd.f32 %v7717_v12, %v17103_v63  ;;  %v7719_v49 = vpop.f32.mrb[97].mxu0 }
 0xaf8   : > { %v7527_v52 = vadd.f32 %v7526_v7, %v17106_v36  ;;  %v7528_v15 = vpop.f32.mrb[226].mxu1  ;;  %8486 = vmatprep.mubr.bf16.mxu1 %v7953_v17  ;;  %v7720_v50 = vadd.f32 %v7719_v49, %v17109_v24  ;;  %v7721_v56 = vpop.f32.mrb[98].mxu0 }
 0xaf9   : > { %v7529_v20 = vadd.f32 %v7528_v15, %v17100_v51  ;;  %v7530_v30 = vpop.f32.mrb[227].mxu1  ;;  %8487 = vmatmul.mubr.bf16.gmra.mrb[28].mxu1 %v7952_v29  ;;  %v7722_v35 = vadd.f32 %v7721_v56, %v17103_v63  ;;  %v7723_v41 = vpop.f32.mrb[99].mxu0  ;;  %v7860_v21 = vmax.f32 %v7525_v3, 0.0  ;;  %v7862_v37 = vmax.f32 %v7718_v9, 0.0 }
 0xafa   : > { %v7531_v33 = vadd.f32 %v7530_v30, %v17106_v36  ;;  %8606 = vmatpush1.bf16.msra.mxu1 %v12569_v25  ;;  %v7724_v32 = vadd.f32 %v7723_v41, %v17109_v24  ;;  %v7861_v17 = vmax.f32 %v7527_v52, 0.0  ;;  %v7863_v7 = vmax.f32 %v7720_v50, 0.0 }
 0xafb   : > { %v7864_v31 = vmax.f32 %v7529_v20, 0.0  ;;  %8607 = vmatprep.subr.bf16.mxu1 %v12574_v46  ;;  %v7866_v26 = vmax.f32 %v7722_v35, 0.0 }
 0xafc   : > { %v7865_v12 = vmax.f32 %v7531_v33, 0.0  ;;  %v7867_v15 = vmax.f32 %v7724_v32, 0.0 }
 0xafd   : > { %v7956_v49 = vpack.c.bf16 %v7864_v31, %v7860_v21  ;;  %v17215_v29 = vpack.c.bf16 %v7866_v26, %v7862_v37 }
 0xafe   : > { %v7957_v56 = vpack.c.bf16 %v7865_v12, %v7861_v17  ;;  %v7534_v38 = vpop.f32.mrb[228].mxu1  ;;  %8608 = vmatpush1.bf16.msra.mxu1 %v12572_v19  ;;  %v17217_v30 = vpack.c.bf16 %v7867_v15, %v7863_v7  ;;  %v7727_v3 = vpop.f32.mrb[100].mxu0 }
 0xaff   : > { %v7535_v25 = vadd.f32 %v7534_v38, %v17100_v51  ;;  %v7536_v20 = vpop.f32.mrb[229].mxu1  ;;  %v7728_v46 = vadd.f32 %v7727_v3, %v17103_v63  ;;  %v7729_v52 = vpop.f32.mrb[101].mxu0 }
 0xb00   : > { %v7537_v9 = vadd.f32 %v7536_v20, %v17106_v36  ;;  %v7538_v35 = vpop.f32.mrb[230].mxu1  ;;  %8496 = vmatprep.mubr.bf16.mxu1 %v7957_v56  ;;  %v7730_v50 = vadd.f32 %v7729_v52, %v17109_v24  ;;  %v7731_v41 = vpop.f32.mrb[102].mxu0 }
 0xb01   : > { %v7539_v33 = vadd.f32 %v7538_v35, %v17100_v51  ;;  %v7540_v21 = vpop.f32.mrb[231].mxu1  ;;  %8497 = vmatmul.mubr.bf16.gmra.mrb[32].mxu1 %v7956_v49  ;;  %v7732_v19 = vadd.f32 %v7731_v41, %v17103_v63  ;;  %v7733_v31 = vpop.f32.mrb[103].mxu0  ;;  %v7868_v32 = vmax.f32 %v7535_v25, 0.0  ;;  %v7870_v26 = vmax.f32 %v7728_v46, 0.0 }
 0xb02   : > { %v7541_v38 = vadd.f32 %v7540_v21, %v17106_v36  ;;  %v7734_v17 = vadd.f32 %v7733_v31, %v17109_v24  ;;  %v7869_v12 = vmax.f32 %v7537_v9, 0.0  ;;  %v7871_v56 = vmax.f32 %v7730_v50, 0.0 }
 0xb03   : > { %v7872_v37 = vmax.f32 %v7539_v33, 0.0  ;;  %v7874_v7 = vmax.f32 %v7732_v19, 0.0 }
 0xb04   : > { %v7873_v15 = vmax.f32 %v7541_v38, 0.0  ;;  %v7875_v20 = vmax.f32 %v7734_v17, 0.0 }
 0xb05   : > { %v7960_v3 = vpack.c.bf16 %v7872_v37, %v7868_v32  ;;  %v17227_v52 = vpack.c.bf16 %v7874_v7, %v7870_v26 }
 0xb06   : > { %v7961_v35 = vpack.c.bf16 %v7873_v15, %v7869_v12  ;;  %v7544_v49 = vpop.f32.mrb[232].mxu1  ;;  %v17229_v11 = vpack.c.bf16 %v7875_v20, %v7871_v56  ;;  %v7737_v21 = vpop.f32.mrb[104].mxu0 }
 0xb07   : > { %v7545_v41 = vadd.f32 %v7544_v49, %v17100_v51  ;;  %v7546_v25 = vpop.f32.mrb[233].mxu1  ;;  %v7738_v33 = vadd.f32 %v7737_v21, %v17103_v63  ;;  %v7739_v9 = vpop.f32.mrb[105].mxu0 }
 0xb08   : > { %v7547_v46 = vadd.f32 %v7546_v25, %v17106_v36  ;;  %v7548_v19 = vpop.f32.mrb[234].mxu1  ;;  %8506 = vmatprep.mubr.bf16.mxu1 %v7961_v35  ;;  %v7740_v50 = vadd.f32 %v7739_v9, %v17109_v24  ;;  %v7741_v31 = vpop.f32.mrb[106].mxu0 }
 0xb09   : > { %v7549_v38 = vadd.f32 %v7548_v19, %v17100_v51  ;;  %v7550_v32 = vpop.f32.mrb[235].mxu1  ;;  %8507 = vmatmul.mubr.bf16.gmra.mrb[36].mxu1 %v7960_v3  ;;  %v7742_v37 = vadd.f32 %v7741_v31, %v17103_v63  ;;  %v7743_v26 = vpop.f32.mrb[107].mxu0  ;;  %v7876_v12 = vmax.f32 %v7545_v41, 0.0  ;;  %v7878_v56 = vmax.f32 %v7738_v33, 0.0 }
 0xb0a   : > { %v7551_v17 = vadd.f32 %v7550_v32, %v17106_v36  ;;  %v7744_v15 = vadd.f32 %v7743_v26, %v17109_v24  ;;  %v7877_v20 = vmax.f32 %v7547_v46, 0.0  ;;  %v7879_v21 = vmax.f32 %v7740_v50, 0.0 }
 0xb0b   : > { %v7880_v7 = vmax.f32 %v7549_v38, 0.0  ;;  %v7882_v49 = vmax.f32 %v7742_v37, 0.0 }
 0xb0c   : > { %v7881_v35 = vmax.f32 %v7551_v17, 0.0  ;;  %v7883_v9 = vmax.f32 %v7744_v15, 0.0 }
 0xb0d   : > { %v7964_v25 = vpack.c.bf16 %v7880_v7, %v7876_v12  ;;  %v17239_v19 = vpack.c.bf16 %v7882_v49, %v7878_v56 }
 0xb0e   : > { %v7965_v60 = vpack.c.bf16 %v7881_v35, %v7877_v20  ;;  %v7554_v3 = vpop.f32.mrb[236].mxu1  ;;  %v17241_v5 = vpack.c.bf16 %v7883_v9, %v7879_v21  ;;  %v7747_v32 = vpop.f32.mrb[108].mxu0 }
 0xb0f   : > { %v7555_v31 = vadd.f32 %v7554_v3, %v17100_v51  ;;  %v7556_v41 = vpop.f32.mrb[237].mxu1  ;;  %v7748_v38 = vadd.f32 %v7747_v32, %v17103_v63  ;;  %v7749_v46 = vpop.f32.mrb[109].mxu0 }
 0xb10   : > { %v7557_v33 = vadd.f32 %v7556_v41, %v17106_v36  ;;  %v7558_v37 = vpop.f32.mrb[238].mxu1  ;;  %8516 = vmatprep.mubr.bf16.mxu1 %v7965_v60  ;;  %v7750_v50 = vadd.f32 %v7749_v46, %v17109_v24  ;;  %v7751_v26 = vpop.f32.mrb[110].mxu0 }
 0xb11   : > { %v7559_v17 = vadd.f32 %v7558_v37, %v17100_v51  ;;  %v7560_v12 = vpop.f32.mrb[239].mxu1  ;;  %8517 = vmatmul.mubr.bf16.gmra.mrb[40].mxu1 %v7964_v25  ;;  %v7752_v7 = vadd.f32 %v7751_v26, %v17103_v63  ;;  %v7753_v56 = vpop.f32.mrb[111].mxu0  ;;  %v7884_v20 = vmax.f32 %v7555_v31, 0.0  ;;  %v7886_v21 = vmax.f32 %v7748_v38, 0.0 }
 0xb12   : > { %v7561_v15 = vadd.f32 %v7560_v12, %v17106_v36  ;;  %v7754_v35 = vadd.f32 %v7753_v56, %v17109_v24  ;;  %v7885_v9 = vmax.f32 %v7557_v33, 0.0  ;;  %v7887_v32 = vmax.f32 %v7750_v50, 0.0 }
 0xb13   : > { %v7888_v49 = vmax.f32 %v7559_v17, 0.0  ;;  %v7890_v3 = vmax.f32 %v7752_v7, 0.0 }
 0xb14   : > { %v7889_v60 = vmax.f32 %v7561_v15, 0.0  ;;  %v7891_v46 = vmax.f32 %v7754_v35, 0.0 }
 0xb15   : > { %v7968_v41 = vpack.c.bf16 %v7888_v49, %v7884_v20  ;;  %v17251_v37 = vpack.c.bf16 %v7890_v3, %v7886_v21 }
 0xb16   : > { %v7969_v39 = vpack.c.bf16 %v7889_v60, %v7885_v9  ;;  %v17253_v25 = vpack.c.bf16 %v7891_v46, %v7887_v32 }
 0xb18   : > { %8526 = vmatprep.mubr.bf16.mxu1 %v7969_v39 }
 0xb19   : > { %8527 = vmatmul.mubr.bf16.gmra.mrb[44].mxu1 %v7968_v41 }
 0xb3f   : > { %v7564_v26 = vpop.f32.mrb[240].mxu1  ;;  %v7757_v12 = vpop.f32.mrb[112].mxu0 }
 0xb40   : > { %v7565_v31 = vadd.f32 %v7564_v26, %v17100_v51  ;;  %v7758_v17 = vadd.f32 %v7757_v12, %v17103_v63  ;;  %v7566_v38 = vpop.f32.mrb[241].mxu1  ;;  %v7759_v33 = vpop.f32.mrb[113].mxu0 }
 0xb41   : > { %v7567_v7 = vadd.f32 %v7566_v38, %v17106_v36  ;;  %v7760_v50 = vadd.f32 %v7759_v33, %v17109_v24  ;;  %v7568_v15 = vpop.f32.mrb[242].mxu1  ;;  %v7761_v56 = vpop.f32.mrb[114].mxu0 }
 0xb42   : > { %v7569_v20 = vadd.f32 %v7568_v15, %v17100_v51  ;;  %v7762_v49 = vadd.f32 %v7761_v56, %v17103_v63  ;;  %v7570_v39 = vpop.f32.mrb[243].mxu1  ;;  %v7763_v35 = vpop.f32.mrb[115].mxu0  ;;  %v7892_v3 = vmax.f32 %v7565_v31, 0.0  ;;  %v7894_v60 = vmax.f32 %v7758_v17, 0.0 }
 0xb43   : > { %v7571_v21 = vadd.f32 %v7570_v39, %v17106_v36  ;;  %v7764_v9 = vadd.f32 %v7763_v35, %v17109_v24  ;;  %v7893_v46 = vmax.f32 %v7567_v7, 0.0  ;;  %v7895_v26 = vmax.f32 %v7760_v50, 0.0 }
 0xb44   : > { %v7896_v32 = vmax.f32 %v7569_v20, 0.0  ;;  %v7898_v41 = vmax.f32 %v7762_v49, 0.0 }
 0xb45   : > { %v7897_v12 = vmax.f32 %v7571_v21, 0.0  ;;  %v7899_v38 = vmax.f32 %v7764_v9, 0.0 }
 0xb46   : > { %v7972_v33 = vpack.c.bf16 %v7896_v32, %v7892_v3  ;;  %v17263_v34 = vpack.c.bf16 %v7898_v41, %v7894_v60 }
 0xb47   : > { %v7973_v15 = vpack.c.bf16 %v7897_v12, %v7893_v46  ;;  %v17265_v27 = vpack.c.bf16 %v7899_v38, %v7895_v26  ;;  %v7574_v56 = vpop.f32.mrb[244].mxu1  ;;  %v7767_v23 = vpop.f32.mrb[116].mxu0 }
 0xb48   : > { %v7575_v39 = vadd.f32 %v7574_v56, %v17100_v51  ;;  %v7768_v35 = vadd.f32 %v7767_v23, %v17103_v63  ;;  %v7576_v31 = vpop.f32.mrb[245].mxu1  ;;  %v7769_v17 = vpop.f32.mrb[117].mxu0 }
 0xb49   : > { %v7577_v20 = vadd.f32 %v7576_v31, %v17106_v36  ;;  %v7770_v7 = vadd.f32 %v7769_v17, %v17109_v24  ;;  %v7578_v50 = vpop.f32.mrb[246].mxu1  ;;  %v7771_v49 = vpop.f32.mrb[118].mxu0  ;;  %8536 = vmatprep.mubr.bf16.mxu1 %v7973_v15 }
 0xb4a   : > { %v7579_v21 = vadd.f32 %v7578_v50, %v17100_v51  ;;  %v7772_v9 = vadd.f32 %v7771_v49, %v17103_v63  ;;  %v7580_v3 = vpop.f32.mrb[247].mxu1  ;;  %v7773_v60 = vpop.f32.mrb[119].mxu0  ;;  %8537 = vmatmul.mubr.bf16.gmra.mrb[48].mxu1 %v7972_v33  ;;  %v7900_v41 = vmax.f32 %v7575_v39, 0.0  ;;  %v7902_v46 = vmax.f32 %v7768_v35, 0.0 }
 0xb4b   : > { %v7581_v32 = vadd.f32 %v7580_v3, %v17106_v36  ;;  %v7774_v23 = vadd.f32 %v7773_v60, %v17109_v24  ;;  %v7901_v38 = vmax.f32 %v7577_v20, 0.0  ;;  %v7903_v56 = vmax.f32 %v7770_v7, 0.0 }
 0xb4c   : > { %v7904_v26 = vmax.f32 %v7579_v21, 0.0  ;;  %v7906_v12 = vmax.f32 %v7772_v9, 0.0 }
 0xb4d   : > { %v7905_v31 = vmax.f32 %v7581_v32, 0.0  ;;  %v7907_v17 = vmax.f32 %v7774_v23, 0.0 }
 0xb4e   : > { %v7976_v15 = vpack.c.bf16 %v7904_v26, %v7900_v41  ;;  %v17275_v59 = vpack.c.bf16 %v7906_v12, %v7902_v46 }
 0xb4f   : > { %v7977_v50 = vpack.c.bf16 %v7905_v31, %v7901_v38  ;;  %v17277_v49 = vpack.c.bf16 %v7907_v17, %v7903_v56 }
 0xb50   : > { %v7584_v53 = vpop.f32.mrb[248].mxu1  ;;  %v7777_v33 = vpop.f32.mrb[120].mxu0 }
 0xb51   : > { %8546 = vmatprep.mubr.bf16.mxu1 %v7977_v50  ;;  %v7585_v3 = vadd.f32 %v7584_v53, %v17100_v51  ;;  %v7778_v39 = vadd.f32 %v7777_v33, %v17103_v63  ;;  %v7586_v35 = vpop.f32.mrb[249].mxu1  ;;  %v7779_v21 = vpop.f32.mrb[121].mxu0 }
 0xb52   : > { %8547 = vmatmul.mubr.bf16.gmra.mrb[52].mxu1 %v7976_v15  ;;  %v7587_v20 = vadd.f32 %v7586_v35, %v17106_v36  ;;  %v7780_v7 = vadd.f32 %v7779_v21, %v17109_v24  ;;  %v7588_v9 = vpop.f32.mrb[250].mxu1  ;;  %v7781_v60 = vpop.f32.mrb[122].mxu0 }
 0xb53   : > { %v7589_v32 = vadd.f32 %v7588_v9, %v17100_v51  ;;  %v7782_v23 = vadd.f32 %v7781_v60, %v17103_v63  ;;  %v7590_v41 = vpop.f32.mrb[251].mxu1  ;;  %v7783_v46 = vpop.f32.mrb[123].mxu0  ;;  %v7908_v12 = vmax.f32 %v7585_v3, 0.0  ;;  %v7910_v38 = vmax.f32 %v7778_v39, 0.0 }
 0xb54   : > { %v7591_v26 = vadd.f32 %v7590_v41, %v17106_v36  ;;  %v7784_v53 = vadd.f32 %v7783_v46, %v17109_v24  ;;  %v7909_v17 = vmax.f32 %v7587_v20, 0.0  ;;  %v7911_v15 = vmax.f32 %v7780_v7, 0.0 }
 0xb55   : > { %v7912_v56 = vmax.f32 %v7589_v32, 0.0  ;;  %v7914_v31 = vmax.f32 %v7782_v23, 0.0 }
 0xb56   : > { %v7913_v50 = vmax.f32 %v7591_v26, 0.0  ;;  %v7915_v33 = vmax.f32 %v7784_v53, 0.0 }
 0xb57   : > { %v7980_v35 = vpack.c.bf16 %v7912_v56, %v7908_v12  ;;  %v17287_v21 = vpack.c.bf16 %v7914_v31, %v7910_v38 }
 0xb58   : > { %v7981_v9 = vpack.c.bf16 %v7913_v50, %v7909_v17  ;;  %v17289_v13 = vpack.c.bf16 %v7915_v33, %v7911_v15  ;;  %v7594_v60 = vpop.f32.mrb[252].mxu1  ;;  %v7787_v14 = vpop.f32.mrb[124].mxu0 }
 0xb59   : > { %v7595_v41 = vadd.f32 %v7594_v60, %v17100_v51  ;;  %v7788_v46 = vadd.f32 %v7787_v14, %v17103_v63  ;;  %v7596_v3 = vpop.f32.mrb[253].mxu1  ;;  %v7789_v39 = vpop.f32.mrb[125].mxu0 }
 0xb5a   : > { %v7597_v32 = vadd.f32 %v7596_v3, %v17106_v36  ;;  %v7790_v20 = vadd.f32 %v7789_v39, %v17109_v24  ;;  %v7598_v7 = vpop.f32.mrb[254].mxu1  ;;  %v7791_v23 = vpop.f32.mrb[126].mxu0  ;;  %8556 = vmatprep.mubr.bf16.mxu1 %v7981_v9 }
 0xb5b   : > { %v7599_v26 = vadd.f32 %v7598_v7, %v17100_v51  ;;  %v7792_v53 = vadd.f32 %v7791_v23, %v17103_v63  ;;  %v7600_v12 = vpop.f32.mrb[255].mxu1  ;;  %v7793_v38 = vpop.f32.mrb[127].mxu0  ;;  %8557 = vmatmul.mubr.bf16.gmra.mrb[56].mxu1 %v7980_v35  ;;  %v7916_v31 = vmax.f32 %v7595_v41, 0.0  ;;  %v7918_v17 = vmax.f32 %v7788_v46, 0.0  ;;  %v12575_v35 = vld [vmem:[#allocation10 + $0x200] ss:$16 sps:$4 sm:$0xff]  }
 0xb5c   : > { %v7601_v56 = vadd.f32 %v7600_v12, %v17106_v36  ;;  %v7794_v14 = vadd.f32 %v7793_v38, %v17109_v24  ;;  %v7917_v33 = vmax.f32 %v7597_v32, 0.0  ;;  %v7919_v60 = vmax.f32 %v7790_v20, 0.0  ;;  %v12577_v36 = vld [vmem:[#allocation10 + $0x204] ss:$16 sps:$4 sm:$0xff]   ;;  %v12578_v41 = vld [vmem:[#allocation10 + $0x220] ss:$16 sps:$4 sm:$0xff]  }
 0xb5d   : > { %v7920_v15 = vmax.f32 %v7599_v26, 0.0  ;;  %v7922_v50 = vmax.f32 %v7792_v53, 0.0  ;;  %v12580_v24 = vld [vmem:[#allocation10 + $0x224] ss:$16 sps:$4 sm:$0xff]   ;;  %9210 = vmatprep.subr.bf16.mxu0 %v12577_v36  ;;  %v12581_v32 = vld [vmem:[#allocation10 + $0x240] ss:$16 sps:$4 sm:$0xff]  }
 0xb5e   : > { %v7921_v3 = vmax.f32 %v7601_v56, 0.0  ;;  %v7923_v39 = vmax.f32 %v7794_v14, 0.0  ;;  %9211 = vmatpush1.bf16.msra.mxu0 %v12575_v35  ;;  %v12583_v46 = vld [vmem:[#allocation10 + $0x244] ss:$16 sps:$4 sm:$0xff]   ;;  %v12584_v7 = vld [vmem:[#allocation10 + $0x260] ss:$16 sps:$4 sm:$0xff]  }
 0xb5f   : > { %v7984_v9 = vpack.c.bf16 %v7920_v15, %v7916_v31  ;;  %v17299_v22 = vpack.c.bf16 %v7922_v50, %v7918_v17  ;;  %9212 = vmatprep.subr.bf16.mxu0 %v12580_v24  ;;  %v12586_v20 = vld [vmem:[#allocation10 + $0x264] ss:$16 sps:$4 sm:$0xff]   ;;  %v12590_v53 = vld [vmem:[#allocation10 + $0x2a0] ss:$16 sps:$4 sm:$0xff]  }
 0xb60   : > { %v7985_v51 = vpack.c.bf16 %v7921_v3, %v7917_v33  ;;  %v17301_v63 = vpack.c.bf16 %v7923_v39, %v7919_v60  ;;  %v12589_v23 = vld [vmem:[#allocation10 + $0x284] ss:$16 sps:$4 sm:$0xff]   ;;  %v12593_v12 = vld [vmem:[#allocation10 + $0x2c0] ss:$16 sps:$4 sm:$0xff]   ;;  %v12626_v60 = vld [vmem:[#allocation10 + $0x228] ss:$16 sps:$4 sm:$0xff]  }
 0xb61   : > { %v12592_v26 = vld [vmem:[#allocation10 + $0x2a4] ss:$16 sps:$4 sm:$0xff]   ;;  %v12596_v38 = vld [vmem:[#allocation10 + $0x2e0] ss:$16 sps:$4 sm:$0xff]  }
 0xb62   : > { %8566 = vmatprep.mubr.bf16.mxu1 %v7985_v51  ;;  %9213 = vmatpush1.bf16.msra.mxu0 %v12578_v41  ;;  %v12599_v56 = vld [vmem:[#allocation10 + $0x300] ss:$16 sps:$4 sm:$0xff]   ;;  %v12631_v51 = vld [vmem:[#allocation10 + $0x24c] ss:$16 sps:$4 sm:$0xff]   ;;  %v12629_v41 = vld [vmem:[#allocation10 + $0x248] ss:$16 sps:$4 sm:$0xff]  }
 0xb63   : > { %8567 = vmatmul.mubr.bf16.gmra.mrb[60].mxu1 %v7984_v9  ;;  %9214 = vmatprep.subr.bf16.mxu0 %v12583_v46  ;;  %v12602_v14 = vld [vmem:[#allocation10 + $0x320] ss:$16 sps:$4 sm:$0xff]   ;;  %v12634_v46 = vld [vmem:[#allocation10 + $0x26c] ss:$16 sps:$4 sm:$0xff]  }
 0xb64   : > { %8609 = vmatprep.mubr.bf16.mxu1 %v17121_v4  ;;  %v12587_v4 = vld [vmem:[#allocation10 + $0x280] ss:$16 sps:$4 sm:$0xff]  }
 0xb65   : > { %v12605_v31 = vld [vmem:[#allocation10 + $0x340] ss:$16 sps:$4 sm:$0xff]  }
 0xb66   : > { %9215 = vmatpush1.bf16.msra.mxu0 %v12581_v32  ;;  %v12608_v17 = vld [vmem:[#allocation10 + $0x360] ss:$16 sps:$4 sm:$0xff]  }
 0xb67   : > { %9216 = vmatprep.subr.bf16.mxu0 %v12586_v20  ;;  %v12611_v15 = vld [vmem:[#allocation10 + $0x380] ss:$16 sps:$4 sm:$0xff]  }
 0xb68   : > { %v12614_v50 = vld [vmem:[#allocation10 + $0x3a0] ss:$16 sps:$4 sm:$0xff]  }
 0xb6a   : > { %9217 = vmatpush1.bf16.msra.mxu0 %v12584_v7 }
 0xb6b   : > { %8610 = vmatmul.mubr.bf16.vlgmr.msra.gmra.mrb[0].mxu1 %v17119_v57  ;;  %9218 = vmatprep.subr.bf16.mxu0 %v12589_v23  ;;  %v12595_v57 = vld [vmem:[#allocation10 + $0x2c4] ss:$16 sps:$4 sm:$0xff]   ;;  %v12632_v23 = vld [vmem:[#allocation10 + $0x268] ss:$16 sps:$4 sm:$0xff]  }
 0xb6c   : > { %8619 = vmatprep.mubr.bf16.mxu1 %v17133_v47  ;;  %v12598_v47 = vld [vmem:[#allocation10 + $0x2e4] ss:$16 sps:$4 sm:$0xff]  }
 0xb6e   : > { %9219 = vmatpush1.bf16.msra.mxu0 %v12587_v4 }
 0xb6f   : > { %9220 = vmatprep.subr.bf16.mxu0 %v12592_v26 }
 0xb72   : > { %9221 = vmatpush1.bf16.msra.mxu0 %v12590_v53 }
 0xb73   : > { %8620 = vmatmul.mubr.bf16.gmra.mrb[4].mxu1 %v17131_v44  ;;  %9222 = vmatprep.subr.bf16.mxu0 %v12595_v57  ;;  %v12601_v44 = vld [vmem:[#allocation10 + $0x304] ss:$16 sps:$4 sm:$0xff]   ;;  %v12637_v57 = vld [vmem:[#allocation10 + $0x28c] ss:$16 sps:$4 sm:$0xff]  }
 0xb74   : > { %8629 = vmatprep.mubr.bf16.mxu1 %v17145_v18  ;;  %v12604_v18 = vld [vmem:[#allocation10 + $0x324] ss:$16 sps:$4 sm:$0xff]  }
 0xb76   : > { %9223 = vmatpush1.bf16.msra.mxu0 %v12593_v12 }
 0xb77   : > { %9224 = vmatprep.subr.bf16.mxu0 %v12598_v47 }
 0xb7a   : > { %9225 = vmatpush1.bf16.msra.mxu0 %v12596_v38 }
 0xb7b   : > { %8630 = vmatmul.mubr.bf16.gmra.mrb[8].mxu1 %v17143_v45  ;;  %9226 = vmatprep.subr.bf16.mxu0 %v12601_v44  ;;  %v12607_v45 = vld [vmem:[#allocation10 + $0x344] ss:$16 sps:$4 sm:$0xff]  }
 0xb7c   : > { %8639 = vmatprep.mubr.bf16.mxu1 %v17157_v40  ;;  %v12610_v40 = vld [vmem:[#allocation10 + $0x364] ss:$16 sps:$4 sm:$0xff]  }
 0xb7e   : > { %9227 = vmatpush1.bf16.msra.mxu0 %v12599_v56  ;;  %v12635_v56 = vld [vmem:[#allocation10 + $0x288] ss:$16 sps:$4 sm:$0xff]  }
 0xb7f   : > { %9228 = vmatprep.subr.bf16.mxu0 %v12604_v18  ;;  %v12640_v18 = vld [vmem:[#allocation10 + $0x2ac] ss:$16 sps:$4 sm:$0xff]  }
 0xb82   : > { %9229 = vmatpush1.bf16.msra.mxu0 %v12602_v14 }
 0xb83   : > { %8640 = vmatmul.mubr.bf16.gmra.mrb[12].mxu1 %v17155_v61  ;;  %9230 = vmatprep.subr.bf16.mxu0 %v12607_v45  ;;  %v12613_v61 = vld [vmem:[#allocation10 + $0x384] ss:$16 sps:$4 sm:$0xff]  }
 0xb84   : > { %8649 = vmatprep.mubr.bf16.mxu1 %v17169_v16  ;;  %v12616_v16 = vld [vmem:[#allocation10 + $0x3a4] ss:$16 sps:$4 sm:$0xff]  }
 0xb86   : > { %9231 = vmatpush1.bf16.msra.mxu0 %v12605_v31  ;;  %v12638_v31 = vld [vmem:[#allocation10 + $0x2a8] ss:$16 sps:$4 sm:$0xff]  }
 0xb87   : > { %9232 = vmatprep.subr.bf16.mxu0 %v12610_v40 }
 0xb8a   : > { %9233 = vmatpush1.bf16.msra.mxu0 %v12608_v17  ;;  %v12671_v17 = vld [vmem:[#allocation11 + $0x200] ss:$8 sps:$4 sm:$0xff]  }
 0xb8b   : > { %8650 = vmatmul.mubr.bf16.gmra.mrb[16].mxu1 %v17167_v58  ;;  %9234 = vmatprep.subr.bf16.mxu0 %v12613_v61  ;;  %v12673_v61 = vld [vmem:[#allocation11 + $0x204] ss:$8 sps:$4 sm:$0xff]  }
 0xb8c   : > { %8659 = vmatprep.mubr.bf16.mxu1 %v17181_v28  ;;  %10186 = vmatprep.subr.bf16.mxu1 %v12673_v61 }
 0xb8d   : > { %10187 = vmatpush1.bf16.msra.mxu1 %v12671_v17  ;;  %v12682_v17 = vld [vmem:[#allocation11 + $0x234] ss:$8 sps:$4 sm:$0xff]  }
 0xb8e   : > { %9235 = vmatpush1.bf16.msra.mxu0 %v12611_v15 }
 0xb8f   : > { %9236 = vmatprep.subr.bf16.mxu0 %v12616_v16 }
 0xb92   : > { %9237 = vmatpush1.bf16.msra.mxu0 %v12614_v50 }
 0xb93   : > { %8660 = vmatmul.mubr.bf16.gmra.mrb[20].mxu1 %v17179_v55 }
 0xb94   : > { %8669 = vmatprep.mubr.bf16.mxu1 %v17193_v42  ;;  %v12619_v42 = vld [vmem:[#allocation10 + $0x3c4] ss:$16 sps:$4 sm:$0xff]  }
 0xb95   : > { %9238 = vmatprep.subr.bf16.mxu0 %v12619_v42  ;;  %v12643_v42 = vld [vmem:[#allocation10 + $0x2cc] ss:$16 sps:$4 sm:$0xff]  }
 0xb9b   : > { %8670 = vmatmul.mubr.bf16.gmra.mrb[24].mxu1 %v17191_v54  ;;  %v12617_v54 = vld [vmem:[#allocation10 + $0x3c0] ss:$16 sps:$4 sm:$0xff]  }
 0xb9c   : > { %8679 = vmatprep.mubr.bf16.mxu1 %v17205_v6  ;;  %9239 = vmatpush1.bf16.msra.mxu0 %v12617_v54  ;;  %v12622_v6 = vld [vmem:[#allocation10 + $0x3e4] ss:$16 sps:$4 sm:$0xff]  }
 0xb9d   : > { %9240 = vmatprep.subr.bf16.mxu0 %v12622_v6 }
 0xba3   : > { %8680 = vmatmul.mubr.bf16.gmra.mrb[28].mxu1 %v17203_v1  ;;  %v12620_v1 = vld [vmem:[#allocation10 + $0x3e0] ss:$16 sps:$4 sm:$0xff]  }
 0xba4   : > { %8689 = vmatprep.mubr.bf16.mxu1 %v17217_v30  ;;  %9241 = vmatpush1.bf16.msra.mxu0 %v12620_v1 }
 0xbab   : > { %8690 = vmatmul.mubr.bf16.gmra.mrb[32].mxu1 %v17215_v29 }
 0xbac   : > { %8699 = vmatprep.mubr.bf16.mxu1 %v17229_v11 }
 0xbb3   : > { %8700 = vmatmul.mubr.bf16.gmra.mrb[36].mxu1 %v17227_v52 }
 0xbb4   : > { %8709 = vmatprep.mubr.bf16.mxu1 %v17241_v5  ;;  %v12625_v5 = vld [vmem:[#allocation10 + $0x20c] ss:$16 sps:$4 sm:$0xff]  }
 0xbb5   : > { %9403 = vmatprep.subr.bf16.mxu0 %v12625_v5 }
 0xbbb   : > { %8710 = vmatmul.mubr.bf16.gmra.mrb[40].mxu1 %v17239_v19 }
 0xbbc   : > { %8719 = vmatprep.mubr.bf16.mxu1 %v17253_v25  ;;  %v12628_v25 = vld [vmem:[#allocation10 + $0x22c] ss:$16 sps:$4 sm:$0xff]  }
 0xbc3   : > { %8720 = vmatmul.mubr.bf16.gmra.mrb[44].mxu1 %v17251_v37  ;;  %v12623_v37 = vld [vmem:[#allocation10 + $0x208] ss:$16 sps:$4 sm:$0xff]  }
 0xbc4   : > { %8729 = vmatprep.mubr.bf16.mxu1 %v17265_v27  ;;  %v8052_v27 = vld [vmem:[%s17949_s8] ss:$2 sm:$0x3] }
 0xbcb   : > { %8730 = vmatmul.mubr.bf16.gmra.mrb[48].mxu1 %v17263_v34  ;;  %v17339_v34 = vrot.slane %v8052_v27, %v18651_v48 }
 0xbcc   : > { %8739 = vmatprep.mubr.bf16.mxu1 %v17277_v49 }
 0xbd3   : > { %8740 = vmatmul.mubr.bf16.gmra.mrb[52].mxu1 %v17275_v59  ;;  %v17342_v59 = vrot.slane %v8052_v27, %v18653_v8  ;;  %v12641_v27 = vld [vmem:[#allocation10 + $0x2c8] ss:$16 sps:$4 sm:$0xff]  }
 0xbd4   : > { %8749 = vmatprep.mubr.bf16.mxu1 %v17289_v13 }
 0xbdb   : > { %8750 = vmatmul.mubr.bf16.gmra.mrb[56].mxu1 %v17287_v21 }
 0xbdc   : > { %8759 = vmatprep.mubr.bf16.mxu1 %v17301_v63 }
 0xbe3   : > { %8760 = vmatmul.mubr.bf16.gmra.mrb[60].mxu1 %v17299_v22 }
 0xc3e   : > { %v8611_v11 = vpop.f32.mrb[0].mxu1 }
 0xc3f   : > { %v8613_v13 = vpop.f32.mrb[1].mxu1  ;;  %v11828_v55 = vadd.f32 %v8611_v11, %v17339_v34  ;;  %v12646_v11 = vld [vmem:[#allocation10 + $0x2ec] ss:$16 sps:$4 sm:$0xff]  }
 0xc40   : > { %v8615_v28 = vpop.f32.mrb[2].mxu1  ;;  %v11829_v29 = vadd.f32 %v8613_v13, %v17342_v59 }
 0xc41   : > { %v11830_v58 = vadd.f32 %v8615_v28, %v17339_v34  ;;  %v8617_v22 = vpop.f32.mrb[3].mxu1 }
 0xc42   : > { %v11831_v30 = vadd.f32 %v8617_v22, %v17342_v59  ;;  %v12674_v22 = vld [vmem:[#allocation11 + $0x210] ss:$8 sps:$4 sm:$0xff]  }
 0xc43   : > { %v17348_v52 = vpack.c.bf16 %v11830_v58, %v11828_v55  ;;  %v12644_v55 = vld [vmem:[#allocation10 + $0x2e8] ss:$16 sps:$4 sm:$0xff]  }
 0xc44   : > { %v17350_v19 = vpack.c.bf16 %v11831_v30, %v11829_v29  ;;  %v12676_v29 = vld [vmem:[#allocation11 + $0x214] ss:$8 sps:$4 sm:$0xff]  }
 0xc45   : > { %10188 = vmatprep.subr.bf16.mxu1 %v12676_v29  ;;  %v12662_v29 = vld [vmem:[#allocation10 + $0x3a8] ss:$16 sps:$4 sm:$0xff]  }
 0xc46   : > { %v8621_v49 = vpop.f32.mrb[4].mxu1  ;;  %9242 = vmatprep.mubr.bf16.mxu0 %v17350_v19  ;;  %10189 = vmatpush1.bf16.msra.mxu1 %v12674_v22 }
 0xc47   : > { %v8623_v21 = vpop.f32.mrb[5].mxu1  ;;  %9243 = vmatmul.mubr.bf16.vlgmr.msra.gmra.mrb[128].mxu0 %v17348_v52  ;;  %v11832_v3 = vadd.f32 %v8621_v49, %v17339_v34  ;;  %v12649_v49 = vld [vmem:[#allocation10 + $0x30c] ss:$16 sps:$4 sm:$0xff]  }
 0xc48   : > { %v8625_v33 = vpop.f32.mrb[6].mxu1  ;;  %9404 = vmatpush1.bf16.msra.mxu0 %v12623_v37  ;;  %v11833_v63 = vadd.f32 %v8623_v21, %v17342_v59 }
 0xc49   : > { %v11834_v39 = vadd.f32 %v8625_v33, %v17339_v34  ;;  %v8627_v9 = vpop.f32.mrb[7].mxu1  ;;  %9405 = vmatprep.subr.bf16.mxu0 %v12628_v25 }
 0xc4a   : > { %v11835_v35 = vadd.f32 %v8627_v9, %v17342_v59  ;;  %v12652_v9 = vld [vmem:[#allocation10 + $0x32c] ss:$16 sps:$4 sm:$0xff]  }
 0xc4b   : > { %v17358_v36 = vpack.c.bf16 %v11834_v39, %v11832_v3  ;;  %v12647_v39 = vld [vmem:[#allocation10 + $0x308] ss:$16 sps:$4 sm:$0xff]  }
 0xc4c   : > { %v17360_v24 = vpack.c.bf16 %v11835_v35, %v11833_v63  ;;  %9406 = vmatpush1.bf16.msra.mxu0 %v12626_v60  ;;  %v12650_v35 = vld [vmem:[#allocation10 + $0x328] ss:$16 sps:$4 sm:$0xff]  }
 0xc4d   : > { %9407 = vmatprep.subr.bf16.mxu0 %v12631_v51 }
 0xc4e   : > { %v8631_v32 = vpop.f32.mrb[8].mxu1  ;;  %9252 = vmatprep.mubr.bf16.mxu0 %v17360_v24 }
 0xc4f   : > { %v8633_v20 = vpop.f32.mrb[9].mxu1  ;;  %9253 = vmatmul.mubr.bf16.gmra.mrb[132].mxu0 %v17358_v36  ;;  %v11836_v4 = vadd.f32 %v8631_v32, %v17339_v34  ;;  %v12679_v32 = vld [vmem:[#allocation11 + $0x224] ss:$8 sps:$4 sm:$0xff]  }
 0xc50   : > { %v8635_v7 = vpop.f32.mrb[10].mxu1  ;;  %9408 = vmatpush1.bf16.msra.mxu0 %v12629_v41  ;;  %v11837_v12 = vadd.f32 %v8633_v20, %v17342_v59  ;;  %10190 = vmatprep.subr.bf16.mxu1 %v12679_v32  ;;  %v12665_v32 = vld [vmem:[#allocation10 + $0x3c8] ss:$16 sps:$4 sm:$0xff]  }
 0xc51   : > { %v11838_v26 = vadd.f32 %v8635_v7, %v17339_v34  ;;  %v8637_v53 = vpop.f32.mrb[11].mxu1  ;;  %9409 = vmatprep.subr.bf16.mxu0 %v12634_v46  ;;  %v12677_v46 = vld [vmem:[#allocation11 + $0x220] ss:$8 sps:$4 sm:$0xff]  }
 0xc52   : > { %v11839_v47 = vadd.f32 %v8637_v53, %v17342_v59  ;;  %10191 = vmatpush1.bf16.msra.mxu1 %v12677_v46 }
 0xc53   : > { %v17368_v38 = vpack.c.bf16 %v11838_v26, %v11836_v4  ;;  %v12655_v4 = vld [vmem:[#allocation10 + $0x34c] ss:$16 sps:$4 sm:$0xff]   ;;  %10192 = vmatprep.subr.bf16.mxu1 %v12682_v17 }
 0xc54   : > { %v17370_v44 = vpack.c.bf16 %v11839_v47, %v11837_v12  ;;  %9410 = vmatpush1.bf16.msra.mxu0 %v12632_v23  ;;  %v12653_v47 = vld [vmem:[#allocation10 + $0x348] ss:$16 sps:$4 sm:$0xff]  }
 0xc55   : > { %9411 = vmatprep.subr.bf16.mxu0 %v12637_v57 }
 0xc56   : > { %v8641_v14 = vpop.f32.mrb[12].mxu1  ;;  %9262 = vmatprep.mubr.bf16.mxu0 %v17370_v44 }
 0xc57   : > { %v8643_v45 = vpop.f32.mrb[13].mxu1  ;;  %9263 = vmatmul.mubr.bf16.gmra.mrb[136].mxu0 %v17368_v38  ;;  %v11840_v15 = vadd.f32 %v8641_v14, %v17339_v34 }
 0xc58   : > { %v8645_v40 = vpop.f32.mrb[14].mxu1  ;;  %9412 = vmatpush1.bf16.msra.mxu0 %v12635_v56  ;;  %v11841_v54 = vadd.f32 %v8643_v45, %v17342_v59  ;;  %v12658_v56 = vld [vmem:[#allocation10 + $0x36c] ss:$16 sps:$4 sm:$0xff]   ;;  %v12656_v45 = vld [vmem:[#allocation10 + $0x368] ss:$16 sps:$4 sm:$0xff]  }
 0xc59   : > { %v11842_v16 = vadd.f32 %v8645_v40, %v17339_v34  ;;  %v8647_v50 = vpop.f32.mrb[15].mxu1  ;;  %9413 = vmatprep.subr.bf16.mxu0 %v12640_v18  ;;  %v12680_v40 = vld [vmem:[#allocation11 + $0x230] ss:$8 sps:$4 sm:$0xff]  }
 0xc5a   : > { %v11843_v6 = vadd.f32 %v8647_v50, %v17342_v59  ;;  %v12661_v50 = vld [vmem:[#allocation10 + $0x38c] ss:$16 sps:$4 sm:$0xff]   ;;  %10193 = vmatpush1.bf16.msra.mxu1 %v12680_v40 }
 0xc5b   : > { %v17378_v1 = vpack.c.bf16 %v11842_v16, %v11840_v15 }
 0xc5c   : > { %v17380_v5 = vpack.c.bf16 %v11843_v6, %v11841_v54  ;;  %9414 = vmatpush1.bf16.msra.mxu0 %v12638_v31 }
 0xc5d   : > { %9415 = vmatprep.subr.bf16.mxu0 %v12643_v42  ;;  %v12685_v42 = vld [vmem:[#allocation11 + $0x244] ss:$8 sps:$4 sm:$0xff]  }
 0xc5e   : > { %v8651_v13 = vpop.f32.mrb[16].mxu1  ;;  %9272 = vmatprep.mubr.bf16.mxu0 %v17380_v5  ;;  %10194 = vmatprep.subr.bf16.mxu1 %v12685_v42 }
 0xc5f   : > { %v8653_v28 = vpop.f32.mrb[17].mxu1  ;;  %9273 = vmatmul.mubr.bf16.gmra.mrb[140].mxu0 %v17378_v1  ;;  %v11844_v30 = vadd.f32 %v8651_v13, %v17339_v34 }
 0xc60   : > { %v8655_v58 = vpop.f32.mrb[18].mxu1  ;;  %9416 = vmatpush1.bf16.msra.mxu0 %v12641_v27  ;;  %v11845_v21 = vadd.f32 %v8653_v28, %v17342_v59  ;;  %v12659_v28 = vld [vmem:[#allocation10 + $0x388] ss:$16 sps:$4 sm:$0xff]  }
 0xc61   : > { %v11846_v37 = vadd.f32 %v8655_v58, %v17339_v34  ;;  %v8657_v25 = vpop.f32.mrb[19].mxu1  ;;  %9417 = vmatprep.subr.bf16.mxu0 %v12646_v11  ;;  %v12683_v11 = vld [vmem:[#allocation11 + $0x240] ss:$8 sps:$4 sm:$0xff]  }
 0xc62   : > { %v11847_v33 = vadd.f32 %v8657_v25, %v17342_v59  ;;  %10195 = vmatpush1.bf16.msra.mxu1 %v12683_v11  ;;  %v12688_v25 = vld [vmem:[#allocation11 + $0x254] ss:$8 sps:$4 sm:$0xff]  }
 0xc63   : > { %v17388_v60 = vpack.c.bf16 %v11846_v37, %v11844_v30  ;;  %v12686_v37 = vld [vmem:[#allocation11 + $0x250] ss:$8 sps:$4 sm:$0xff]   ;;  %10196 = vmatprep.subr.bf16.mxu1 %v12688_v25 }
 0xc64   : > { %v17390_v3 = vpack.c.bf16 %v11847_v33, %v11845_v21  ;;  %9418 = vmatpush1.bf16.msra.mxu0 %v12644_v55  ;;  %v12664_v55 = vld [vmem:[#allocation10 + $0x3ac] ss:$16 sps:$4 sm:$0xff]  }
 0xc65   : > { %9419 = vmatprep.subr.bf16.mxu0 %v12649_v49 }
 0xc66   : > { %v8661_v51 = vpop.f32.mrb[20].mxu1  ;;  %9282 = vmatprep.mubr.bf16.mxu0 %v17390_v3  ;;  %10197 = vmatpush1.bf16.msra.mxu1 %v12686_v37  ;;  %v12701_v37 = vld [vmem:[#allocation11 + $0x2a0] ss:$8 sps:$4 sm:$0xff]  }
 0xc67   : > { %v8663_v63 = vpop.f32.mrb[21].mxu1  ;;  %9283 = vmatmul.mubr.bf16.gmra.mrb[144].mxu0 %v17388_v60  ;;  %v11848_v20 = vadd.f32 %v8661_v51, %v17339_v34 }
 0xc68   : > { %v8665_v41 = vpop.f32.mrb[22].mxu1  ;;  %9420 = vmatpush1.bf16.msra.mxu0 %v12647_v39  ;;  %v11849_v26 = vadd.f32 %v8663_v63, %v17342_v59  ;;  %v12667_v39 = vld [vmem:[#allocation10 + $0x3cc] ss:$16 sps:$4 sm:$0xff]  }
 0xc69   : > { %v11850_v7 = vadd.f32 %v8665_v41, %v17339_v34  ;;  %v8667_v23 = vpop.f32.mrb[23].mxu1  ;;  %9421 = vmatprep.subr.bf16.mxu0 %v12652_v9  ;;  %v12691_v9 = vld [vmem:[#allocation11 + $0x264] ss:$8 sps:$4 sm:$0xff]   ;;  %v12689_v41 = vld [vmem:[#allocation11 + $0x260] ss:$8 sps:$4 sm:$0xff]  }
 0xc6a   : > { %v11851_v53 = vadd.f32 %v8667_v23, %v17342_v59  ;;  %10198 = vmatprep.subr.bf16.mxu1 %v12691_v9  ;;  %v12706_v9 = vld [vmem:[#allocation11 + $0x2b4] ss:$8 sps:$4 sm:$0xff]  }
 0xc6b   : > { %v17398_v57 = vpack.c.bf16 %v11850_v7, %v11848_v20  ;;  %v12670_v20 = vld [vmem:[#allocation10 + $0x3ec] ss:$16 sps:$4 sm:$0xff]   ;;  %10199 = vmatpush1.bf16.msra.mxu1 %v12689_v41 }
 0xc6c   : > { %v17400_v12 = vpack.c.bf16 %v11851_v53, %v11849_v26  ;;  %9422 = vmatpush1.bf16.msra.mxu0 %v12650_v35  ;;  %v12692_v53 = vld [vmem:[#allocation11 + $0x270] ss:$8 sps:$4 sm:$0xff]  }
 0xc6d   : > { %9423 = vmatprep.subr.bf16.mxu0 %v12655_v4  ;;  %v12668_v4 = vld [vmem:[#allocation10 + $0x3e8] ss:$16 sps:$4 sm:$0xff]  }
 0xc6e   : > { %v8671_v18 = vpop.f32.mrb[24].mxu1  ;;  %9292 = vmatprep.mubr.bf16.mxu0 %v17400_v12 }
 0xc6f   : > { %v8673_v14 = vpop.f32.mrb[25].mxu1  ;;  %9293 = vmatmul.mubr.bf16.gmra.mrb[148].mxu0 %v17398_v57  ;;  %v11852_v61 = vadd.f32 %v8671_v18, %v17339_v34 }
 0xc70   : > { %v8675_v31 = vpop.f32.mrb[26].mxu1  ;;  %9424 = vmatpush1.bf16.msra.mxu0 %v12653_v47  ;;  %v11853_v54 = vadd.f32 %v8673_v14, %v17342_v59  ;;  %v12694_v47 = vld [vmem:[#allocation11 + $0x274] ss:$8 sps:$4 sm:$0xff]  }
 0xc71   : > { %v11854_v15 = vadd.f32 %v8675_v31, %v17339_v34  ;;  %v8677_v16 = vpop.f32.mrb[27].mxu1  ;;  %9425 = vmatprep.subr.bf16.mxu0 %v12658_v56  ;;  %10200 = vmatprep.subr.bf16.mxu1 %v12694_v47 }
 0xc72   : > { %v11855_v6 = vadd.f32 %v8677_v16, %v17342_v59  ;;  %10201 = vmatpush1.bf16.msra.mxu1 %v12692_v53 }
 0xc73   : > { %v17408_v27 = vpack.c.bf16 %v11854_v15, %v11852_v61  ;;  %v12695_v61 = vld [vmem:[#allocation11 + $0x280] ss:$8 sps:$4 sm:$0xff]  }
 0xc74   : > { %v17410_v13 = vpack.c.bf16 %v11855_v6, %v11853_v54  ;;  %9426 = vmatpush1.bf16.msra.mxu0 %v12656_v45  ;;  %v12697_v45 = vld [vmem:[#allocation11 + $0x284] ss:$8 sps:$4 sm:$0xff]   ;;  %v12698_v54 = vld [vmem:[#allocation11 + $0x290] ss:$8 sps:$4 sm:$0xff]   ;;  %v12700_v6 = vld [vmem:[#allocation11 + $0x294] ss:$8 sps:$4 sm:$0xff]  }
 0xc75   : > { %9427 = vmatprep.subr.bf16.mxu0 %v12661_v50  ;;  %10202 = vmatprep.subr.bf16.mxu1 %v12697_v45 }
 0xc76   : > { %v8681_v58 = vpop.f32.mrb[28].mxu1  ;;  %9302 = vmatprep.mubr.bf16.mxu0 %v17410_v13  ;;  %10203 = vmatpush1.bf16.msra.mxu1 %v12695_v61 }
 0xc77   : > { %v8683_v22 = vpop.f32.mrb[29].mxu1  ;;  %9303 = vmatmul.mubr.bf16.gmra.mrb[152].mxu0 %v17408_v27  ;;  %v11856_v49 = vadd.f32 %v8681_v58, %v17339_v34  ;;  %v12703_v58 = vld [vmem:[#allocation11 + $0x2a4] ss:$8 sps:$4 sm:$0xff]   ;;  %10204 = vmatprep.subr.bf16.mxu1 %v12700_v6 }
 0xc78   : > { %v8685_v30 = vpop.f32.mrb[30].mxu1  ;;  %9428 = vmatpush1.bf16.msra.mxu0 %v12659_v28  ;;  %v11857_v51 = vadd.f32 %v8683_v22, %v17342_v59 }
 0xc79   : > { %v11858_v21 = vadd.f32 %v8685_v30, %v17339_v34  ;;  %v8687_v33 = vpop.f32.mrb[31].mxu1  ;;  %9429 = vmatprep.subr.bf16.mxu0 %v12664_v55 }
 0xc7a   : > { %v11859_v63 = vadd.f32 %v8687_v33, %v17342_v59  ;;  %10205 = vmatpush1.bf16.msra.mxu1 %v12698_v54  ;;  %v12715_v54 = vld [vmem:[#allocation11 + $0x2e4] ss:$8 sps:$4 sm:$0xff]  }
 0xc7b   : > { %v17418_v35 = vpack.c.bf16 %v11858_v21, %v11856_v49  ;;  %10206 = vmatprep.subr.bf16.mxu1 %v12703_v58 }
 0xc7c   : > { %v17420_v46 = vpack.c.bf16 %v11859_v63, %v11857_v51  ;;  %9430 = vmatpush1.bf16.msra.mxu0 %v12662_v29 }
 0xc7d   : > { %9431 = vmatprep.subr.bf16.mxu0 %v12667_v39  ;;  %v12704_v39 = vld [vmem:[#allocation11 + $0x2b0] ss:$8 sps:$4 sm:$0xff]  }
 0xc7e   : > { %v8691_v7 = vpop.f32.mrb[32].mxu1  ;;  %9312 = vmatprep.mubr.bf16.mxu0 %v17420_v46  ;;  %10207 = vmatpush1.bf16.msra.mxu1 %v12701_v37  ;;  %v12718_v37 = vld [vmem:[#allocation11 + $0x2f4] ss:$8 sps:$4 sm:$0xff]  }
 0xc7f   : > { %v8693_v23 = vpop.f32.mrb[33].mxu1  ;;  %9313 = vmatmul.mubr.bf16.gmra.mrb[156].mxu0 %v17418_v35  ;;  %v11860_v56 = vadd.f32 %v8691_v7, %v17339_v34  ;;  %10208 = vmatprep.subr.bf16.mxu1 %v12706_v9 }
 0xc80   : > { %v8695_v26 = vpop.f32.mrb[34].mxu1  ;;  %9432 = vmatpush1.bf16.msra.mxu0 %v12665_v32  ;;  %v11861_v31 = vadd.f32 %v8693_v23, %v17342_v59  ;;  %v12709_v32 = vld [vmem:[#allocation11 + $0x2c4] ss:$8 sps:$4 sm:$0xff]  }
 0xc81   : > { %v11862_v18 = vadd.f32 %v8695_v26, %v17339_v34  ;;  %v8697_v14 = vpop.f32.mrb[35].mxu1  ;;  %9433 = vmatprep.subr.bf16.mxu0 %v12670_v20 }
 0xc82   : > { %v11863_v40 = vadd.f32 %v8697_v14, %v17342_v59  ;;  %10209 = vmatpush1.bf16.msra.mxu1 %v12704_v39  ;;  %v12712_v14 = vld [vmem:[#allocation11 + $0x2d4] ss:$8 sps:$4 sm:$0xff]  }
 0xc83   : > { %v17428_v17 = vpack.c.bf16 %v11862_v18, %v11860_v56  ;;  %10210 = vmatprep.subr.bf16.mxu1 %v12709_v32  ;;  %v12710_v18 = vld [vmem:[#allocation11 + $0x2d0] ss:$8 sps:$4 sm:$0xff]  }
 0xc84   : > { %v17430_v15 = vpack.c.bf16 %v11863_v40, %v11861_v31  ;;  %9434 = vmatpush1.bf16.msra.mxu0 %v12668_v4  ;;  %v12707_v4 = vld [vmem:[#allocation11 + $0x2c0] ss:$8 sps:$4 sm:$0xff]  }
 0xc86   : > { %v8701_v16 = vpop.f32.mrb[36].mxu1  ;;  %9322 = vmatprep.mubr.bf16.mxu0 %v17430_v15  ;;  %10211 = vmatpush1.bf16.msra.mxu1 %v12707_v4 }
 0xc87   : > { %v8703_v50 = vpop.f32.mrb[37].mxu1  ;;  %9323 = vmatmul.mubr.bf16.gmra.mrb[160].mxu0 %v17428_v17  ;;  %v11864_v11 = vadd.f32 %v8701_v16, %v17339_v34  ;;  %10212 = vmatprep.subr.bf16.mxu1 %v12712_v14 }
 0xc88   : > { %v8705_v42 = vpop.f32.mrb[38].mxu1  ;;  %v11865_v22 = vadd.f32 %v8703_v50, %v17342_v59 }
 0xc89   : > { %v11866_v28 = vadd.f32 %v8705_v42, %v17339_v34  ;;  %v8707_v55 = vpop.f32.mrb[39].mxu1 }
 0xc8a   : > { %v11867_v29 = vadd.f32 %v8707_v55, %v17342_v59  ;;  %10213 = vmatpush1.bf16.msra.mxu1 %v12710_v18 }
 0xc8b   : > { %v17438_v30 = vpack.c.bf16 %v11866_v28, %v11864_v11  ;;  %v12713_v11 = vld [vmem:[#allocation11 + $0x2e0] ss:$8 sps:$4 sm:$0xff]   ;;  %10214 = vmatprep.subr.bf16.mxu1 %v12715_v54 }
 0xc8c   : > { %v17440_v25 = vpack.c.bf16 %v11867_v29, %v11865_v22 }
 0xc8e   : > { %v8711_v49 = vpop.f32.mrb[40].mxu1  ;;  %9332 = vmatprep.mubr.bf16.mxu0 %v17440_v25  ;;  %10215 = vmatpush1.bf16.msra.mxu1 %v12713_v11 }
 0xc8f   : > { %v8713_v21 = vpop.f32.mrb[41].mxu1  ;;  %9333 = vmatmul.mubr.bf16.gmra.mrb[164].mxu0 %v17438_v30  ;;  %v11868_v51 = vadd.f32 %v8711_v49, %v17339_v34  ;;  %10216 = vmatprep.subr.bf16.mxu1 %v12718_v37 }
 0xc90   : > { %v8715_v33 = vpop.f32.mrb[42].mxu1  ;;  %v11869_v20 = vadd.f32 %v8713_v21, %v17342_v59 }
 0xc91   : > { %v11870_v63 = vadd.f32 %v8715_v33, %v17339_v34  ;;  %v8717_v41 = vpop.f32.mrb[43].mxu1  ;;  %v12716_v33 = vld [vmem:[#allocation11 + $0x2f0] ss:$8 sps:$4 sm:$0xff]  }
 0xc92   : > { %v11871_v7 = vadd.f32 %v8717_v41, %v17342_v59  ;;  %10217 = vmatpush1.bf16.msra.mxu1 %v12716_v33 }
 0xc93   : > { %v17448_v23 = vpack.c.bf16 %v11870_v63, %v11868_v51 }
 0xc94   : > { %v17450_v26 = vpack.c.bf16 %v11871_v7, %v11869_v20 }
 0xc96   : > { %v8721_v53 = vpop.f32.mrb[44].mxu1  ;;  %9342 = vmatprep.mubr.bf16.mxu0 %v17450_v26 }
 0xc97   : > { %v8723_v47 = vpop.f32.mrb[45].mxu1  ;;  %9343 = vmatmul.mubr.bf16.gmra.mrb[168].mxu0 %v17448_v23  ;;  %v11872_v45 = vadd.f32 %v8721_v53, %v17339_v34 }
 0xc98   : > { %v8725_v56 = vpop.f32.mrb[46].mxu1  ;;  %v11873_v61 = vadd.f32 %v8723_v47, %v17342_v59 }
 0xc99   : > { %v11874_v31 = vadd.f32 %v8725_v56, %v17339_v34  ;;  %v8727_v40 = vpop.f32.mrb[47].mxu1 }
 0xc9a   : > { %v11875_v16 = vadd.f32 %v8727_v40, %v17342_v59 }
 0xc9b   : > { %v17458_v50 = vpack.c.bf16 %v11874_v31, %v11872_v45 }
 0xc9c   : > { %v17460_v42 = vpack.c.bf16 %v11875_v16, %v11873_v61 }
 0xc9e   : > { %v8731_v6 = vpop.f32.mrb[48].mxu1  ;;  %9352 = vmatprep.mubr.bf16.mxu0 %v17460_v42 }
 0xc9f   : > { %v8733_v28 = vpop.f32.mrb[49].mxu1  ;;  %9353 = vmatmul.mubr.bf16.gmra.mrb[172].mxu0 %v17458_v50  ;;  %v11876_v58 = vadd.f32 %v8731_v6, %v17339_v34 }
 0xca0   : > { %v8735_v55 = vpop.f32.mrb[50].mxu1  ;;  %v11877_v49 = vadd.f32 %v8733_v28, %v17342_v59 }
 0xca1   : > { %v11878_v22 = vadd.f32 %v8735_v55, %v17339_v34  ;;  %v8737_v29 = vpop.f32.mrb[51].mxu1 }
 0xca2   : > { %v11879_v21 = vadd.f32 %v8737_v29, %v17342_v59 }
 0xca3   : > { %v17468_v39 = vpack.c.bf16 %v11878_v22, %v11876_v58 }
 0xca4   : > { %v17470_v9 = vpack.c.bf16 %v11879_v21, %v11877_v49 }
 0xca6   : > { %v8741_v51 = vpop.f32.mrb[52].mxu1  ;;  %9362 = vmatprep.mubr.bf16.mxu0 %v17470_v9 }
 0xca7   : > { %v8743_v63 = vpop.f32.mrb[53].mxu1  ;;  %9363 = vmatmul.mubr.bf16.gmra.mrb[176].mxu0 %v17468_v39  ;;  %v11880_v32 = vadd.f32 %v8741_v51, %v17339_v34 }
 0xca8   : > { %v8745_v41 = vpop.f32.mrb[54].mxu1  ;;  %v11881_v4 = vadd.f32 %v8743_v63, %v17342_v59 }
 0xca9   : > { %v11882_v20 = vadd.f32 %v8745_v41, %v17339_v34  ;;  %v8747_v7 = vpop.f32.mrb[55].mxu1 }
 0xcaa   : > { %v11883_v53 = vadd.f32 %v8747_v7, %v17342_v59  ;;  %v12727_v7 = vld [vmem:[#allocation11 + $0x324] ss:$8 sps:$4 sm:$0xff]  }
 0xcab   : > { %v17478_v47 = vpack.c.bf16 %v11882_v20, %v11880_v32 }
 0xcac   : > { %v17480_v56 = vpack.c.bf16 %v11883_v53, %v11881_v4 }
 0xcae   : > { %v8751_v18 = vpop.f32.mrb[56].mxu1  ;;  %9372 = vmatprep.mubr.bf16.mxu0 %v17480_v56 }
 0xcaf   : > { %v8753_v14 = vpop.f32.mrb[57].mxu1  ;;  %9373 = vmatmul.mubr.bf16.gmra.mrb[180].mxu0 %v17478_v47  ;;  %v11884_v31 = vadd.f32 %v8751_v18, %v17339_v34 }
 0xcb0   : > { %v8755_v45 = vpop.f32.mrb[58].mxu1  ;;  %v11885_v16 = vadd.f32 %v8753_v14, %v17342_v59 }
 0xcb1   : > { %v11886_v40 = vadd.f32 %v8755_v45, %v17339_v34  ;;  %v8757_v61 = vpop.f32.mrb[59].mxu1 }
 0xcb2   : > { %v11887_v54 = vadd.f32 %v8757_v61, %v17342_v59 }
 0xcb3   : > { %v17488_v6 = vpack.c.bf16 %v11886_v40, %v11884_v31  ;;  %v12725_v31 = vld [vmem:[#allocation11 + $0x320] ss:$8 sps:$4 sm:$0xff]  }
 0xcb4   : > { %v17490_v11 = vpack.c.bf16 %v11887_v54, %v11885_v16  ;;  %v12730_v16 = vld [vmem:[#allocation11 + $0x334] ss:$8 sps:$4 sm:$0xff]  }
 0xcb6   : > { %v8761_v28 = vpop.f32.mrb[60].mxu1  ;;  %9382 = vmatprep.mubr.bf16.mxu0 %v17490_v11 }
 0xcb7   : > { %v8763_v55 = vpop.f32.mrb[61].mxu1  ;;  %9383 = vmatmul.mubr.bf16.gmra.mrb[184].mxu0 %v17488_v6  ;;  %v11888_v22 = vadd.f32 %v8761_v28, %v17339_v34 }
 0xcb8   : > { %v8765_v58 = vpop.f32.mrb[62].mxu1  ;;  %v11889_v49 = vadd.f32 %v8763_v55, %v17342_v59 }
 0xcb9   : > { %v11890_v29 = vadd.f32 %v8765_v58, %v17339_v34  ;;  %v8767_v37 = vpop.f32.mrb[63].mxu1  ;;  %v12721_v34 = vld [vmem:[#allocation11 + $0x304] ss:$8 sps:$4 sm:$0xff]   ;;  %v12728_v58 = vld [vmem:[#allocation11 + $0x330] ss:$8 sps:$4 sm:$0xff]  }
 0xcba   : > { %v11891_v21 = vadd.f32 %v8767_v37, %v17342_v59  ;;  %10379 = vmatprep.subr.bf16.mxu1 %v12721_v34  ;;  %v17528_v59 = vld [vmem:[%s17947_s6 + $0x1] ss:$2 sm:$0xf] }
 0xcbb   : > { %v17498_v33 = vpack.c.bf16 %v11890_v29, %v11888_v22  ;;  %v12733_v37 = vld [vmem:[#allocation11 + $0x344] ss:$8 sps:$4 sm:$0xff]  }
 0xcbc   : > { %v17500_v51 = vpack.c.bf16 %v11891_v21, %v11889_v49 }
 0xcbe   : > { %9392 = vmatprep.mubr.bf16.mxu0 %v17500_v51 }
 0xcbf   : > { %9393 = vmatmul.mubr.bf16.gmra.mrb[188].mxu0 %v17498_v33 }
 0xcc0   : > { %9435 = vmatprep.mubr.bf16.mxu0 %v17350_v19  ;;  %v17538_v19 = vrot.slane %v17528_v59, %v18653_v8 }
 0xcc7   : > { %9436 = vmatmul.mubr.bf16.vlgmr.msra.gmra.mrb[192].mxu0 %v17348_v52  ;;  %v17533_v52 = vrot.slane %v17528_v59, %v18651_v48 }
 0xcc8   : > { %9445 = vmatprep.mubr.bf16.mxu0 %v17360_v24 }
 0xccf   : > { %9446 = vmatmul.mubr.bf16.gmra.mrb[196].mxu0 %v17358_v36 }
 0xcd0   : > { %9455 = vmatprep.mubr.bf16.mxu0 %v17370_v44 }
 0xcd7   : > { %9456 = vmatmul.mubr.bf16.gmra.mrb[200].mxu0 %v17368_v38 }
 0xcd8   : > { %9465 = vmatprep.mubr.bf16.mxu0 %v17380_v5 }
 0xcdf   : > { %9466 = vmatmul.mubr.bf16.gmra.mrb[204].mxu0 %v17378_v1 }
 0xce0   : > { %9475 = vmatprep.mubr.bf16.mxu0 %v17390_v3 }
 0xce7   : > { %9476 = vmatmul.mubr.bf16.gmra.mrb[208].mxu0 %v17388_v60 }
 0xce8   : > { %9485 = vmatprep.mubr.bf16.mxu0 %v17400_v12 }
 0xcef   : > { %9486 = vmatmul.mubr.bf16.gmra.mrb[212].mxu0 %v17398_v57 }
 0xcf0   : > { %9495 = vmatprep.mubr.bf16.mxu0 %v17410_v13 }
 0xcf7   : > { %9496 = vmatmul.mubr.bf16.gmra.mrb[216].mxu0 %v17408_v27 }
 0xcf8   : > { %9505 = vmatprep.mubr.bf16.mxu0 %v17420_v46 }
 0xcff   : > { %9506 = vmatmul.mubr.bf16.gmra.mrb[220].mxu0 %v17418_v35 }
 0xd00   : > { %9515 = vmatprep.mubr.bf16.mxu0 %v17430_v15  ;;  %v12719_v15 = vld [vmem:[#allocation11 + $0x300] ss:$8 sps:$4 sm:$0xff]  }
 0xd07   : > { %9516 = vmatmul.mubr.bf16.gmra.mrb[224].mxu0 %v17428_v17 }
 0xd08   : > { %9525 = vmatprep.mubr.bf16.mxu0 %v17440_v25 }
 0xd0f   : > { %9526 = vmatmul.mubr.bf16.gmra.mrb[228].mxu0 %v17438_v30 }
 0xd10   : > { %9535 = vmatprep.mubr.bf16.mxu0 %v17450_v26 }
 0xd17   : > { %9536 = vmatmul.mubr.bf16.gmra.mrb[232].mxu0 %v17448_v23  ;;  %v12724_v23 = vld [vmem:[#allocation11 + $0x314] ss:$8 sps:$4 sm:$0xff]  }
 0xd18   : > { %9545 = vmatprep.mubr.bf16.mxu0 %v17460_v42 }
 0xd1a   : > { %v9244_v36 = vpop.f32.mrb[128].mxu0 }
 0xd1b   : > { %v9245_v24 = vadd.f32 %v9244_v36, %v17533_v52  ;;  %v9246_v38 = vpop.f32.mrb[129].mxu0 }
 0xd1c   : > { %v9247_v44 = vadd.f32 %v9246_v38, %v17538_v19  ;;  %v9248_v1 = vpop.f32.mrb[130].mxu0  ;;  %v12731_v38 = vld [vmem:[#allocation11 + $0x340] ss:$8 sps:$4 sm:$0xff]  }
 0xd1d   : > { %v9249_v5 = vadd.f32 %v9248_v1, %v17533_v52  ;;  %v9250_v60 = vpop.f32.mrb[131].mxu0  ;;  %v9596_v57 = vmax.f32 %v9245_v24, 0.0 }
 0xd1e   : > { %v9251_v3 = vadd.f32 %v9250_v60, %v17538_v19  ;;  %v9597_v27 = vmax.f32 %v9247_v44, 0.0 }
 0xd1f   : > { %v9600_v12 = vmax.f32 %v9249_v5, 0.0  ;;  %9546 = vmatmul.mubr.bf16.gmra.mrb[236].mxu0 %v17458_v50  ;;  %v12736_v5 = vld [vmem:[#allocation11 + $0x354] ss:$8 sps:$4 sm:$0xff]  }
 0xd20   : > { %v9601_v13 = vmax.f32 %v9251_v3, 0.0  ;;  %9555 = vmatprep.mubr.bf16.mxu0 %v17470_v9  ;;  %v12722_v9 = vld [vmem:[#allocation11 + $0x310] ss:$8 sps:$4 sm:$0xff]  }
 0xd21   : > { %v9724_v35 = vpack.c.bf16 %v9600_v12, %v9596_v57  ;;  %v12734_v12 = vld [vmem:[#allocation11 + $0x350] ss:$8 sps:$4 sm:$0xff]  }
 0xd22   : > { %v9725_v46 = vpack.c.bf16 %v9601_v13, %v9597_v27  ;;  %v9254_v17 = vpop.f32.mrb[132].mxu0 }
 0xd23   : > { %v9255_v30 = vadd.f32 %v9254_v17, %v17533_v52  ;;  %v9256_v25 = vpop.f32.mrb[133].mxu0 }
 0xd24   : > { %v9257_v26 = vadd.f32 %v9256_v25, %v17538_v19  ;;  %v9258_v42 = vpop.f32.mrb[134].mxu0  ;;  %10218 = vmatprep.mubr.bf16.mxu1 %v9725_v46 }
 0xd25   : > { %v9259_v63 = vadd.f32 %v9258_v42, %v17533_v52  ;;  %v9260_v41 = vpop.f32.mrb[135].mxu0  ;;  %10219 = vmatmul.mubr.bf16.vlgmr.msra.gmra.mrb[64].mxu1 %v9724_v35  ;;  %v9604_v32 = vmax.f32 %v9255_v30, 0.0  ;;  %v12739_v35 = vld [vmem:[#allocation11 + $0x364] ss:$8 sps:$4 sm:$0xff]  }
 0xd26   : > { %v9261_v50 = vadd.f32 %v9260_v41, %v17538_v19  ;;  %10380 = vmatpush1.bf16.msra.mxu1 %v12719_v15  ;;  %v9605_v4 = vmax.f32 %v9257_v26, 0.0 }
 0xd27   : > { %v9608_v20 = vmax.f32 %v9259_v63, 0.0  ;;  %9556 = vmatmul.mubr.bf16.gmra.mrb[240].mxu0 %v17468_v39  ;;  %10381 = vmatprep.subr.bf16.mxu1 %v12724_v23  ;;  %v12737_v23 = vld [vmem:[#allocation11 + $0x360] ss:$8 sps:$4 sm:$0xff]   ;;  %v12742_v63 = vld [vmem:[#allocation11 + $0x374] ss:$8 sps:$4 sm:$0xff]  }
 0xd28   : > { %v9609_v53 = vmax.f32 %v9261_v50, 0.0  ;;  %9565 = vmatprep.mubr.bf16.mxu0 %v17480_v56 }
 0xd29   : > { %v9728_v18 = vpack.c.bf16 %v9608_v20, %v9604_v32  ;;  %v12740_v32 = vld [vmem:[#allocation11 + $0x370] ss:$8 sps:$4 sm:$0xff]  }
 0xd2a   : > { %v9729_v14 = vpack.c.bf16 %v9609_v53, %v9605_v4  ;;  %v9264_v45 = vpop.f32.mrb[136].mxu0  ;;  %10382 = vmatpush1.bf16.msra.mxu1 %v12722_v9  ;;  %v12745_v4 = vld [vmem:[#allocation11 + $0x384] ss:$8 sps:$4 sm:$0xff]  }
 0xd2b   : > { %v9265_v40 = vadd.f32 %v9264_v45, %v17533_v52  ;;  %v9266_v61 = vpop.f32.mrb[137].mxu0  ;;  %10383 = vmatprep.subr.bf16.mxu1 %v12727_v7 }
 0xd2c   : > { %v9267_v54 = vadd.f32 %v9266_v61, %v17538_v19  ;;  %v9268_v28 = vpop.f32.mrb[138].mxu0  ;;  %10228 = vmatprep.mubr.bf16.mxu1 %v9729_v14 }
 0xd2d   : > { %v9269_v39 = vadd.f32 %v9268_v28, %v17533_v52  ;;  %v9270_v55 = vpop.f32.mrb[139].mxu0  ;;  %10229 = vmatmul.mubr.bf16.gmra.mrb[68].mxu1 %v9728_v18  ;;  %v9612_v22 = vmax.f32 %v9265_v40, 0.0  ;;  %v12743_v40 = vld [vmem:[#allocation11 + $0x380] ss:$8 sps:$4 sm:$0xff]  }
 0xd2e   : > { %v9271_v56 = vadd.f32 %v9270_v55, %v17538_v19  ;;  %10384 = vmatpush1.bf16.msra.mxu1 %v12725_v31  ;;  %v9613_v49 = vmax.f32 %v9267_v54, 0.0  ;;  %v12748_v54 = vld [vmem:[#allocation11 + $0x394] ss:$8 sps:$4 sm:$0xff]  }
 0xd2f   : > { %v9616_v29 = vmax.f32 %v9269_v39, 0.0  ;;  %9566 = vmatmul.mubr.bf16.gmra.mrb[244].mxu0 %v17478_v47  ;;  %10385 = vmatprep.subr.bf16.mxu1 %v12730_v16 }
 0xd30   : > { %v9617_v21 = vmax.f32 %v9271_v56, 0.0  ;;  %9575 = vmatprep.mubr.bf16.mxu0 %v17490_v11 }
 0xd31   : > { %v9732_v34 = vpack.c.bf16 %v9616_v29, %v9612_v22 }
 0xd32   : > { %v9733_v36 = vpack.c.bf16 %v9617_v21, %v9613_v49  ;;  %v9274_v24 = vpop.f32.mrb[140].mxu0  ;;  %10386 = vmatpush1.bf16.msra.mxu1 %v12728_v58  ;;  %v12746_v58 = vld [vmem:[#allocation11 + $0x390] ss:$8 sps:$4 sm:$0xff]  }
 0xd33   : > { %v9275_v44 = vadd.f32 %v9274_v24, %v17533_v52  ;;  %v9276_v1 = vpop.f32.mrb[141].mxu0  ;;  %10387 = vmatprep.subr.bf16.mxu1 %v12733_v37  ;;  %v12751_v37 = vld [vmem:[#allocation11 + $0x3a4] ss:$8 sps:$4 sm:$0xff]  }
 0xd34   : > { %v9277_v60 = vadd.f32 %v9276_v1, %v17538_v19  ;;  %v9278_v3 = vpop.f32.mrb[142].mxu0  ;;  %10238 = vmatprep.mubr.bf16.mxu1 %v9733_v36 }
 0xd35   : > { %v9279_v47 = vadd.f32 %v9278_v3, %v17533_v52  ;;  %v9280_v57 = vpop.f32.mrb[143].mxu0  ;;  %10239 = vmatmul.mubr.bf16.gmra.mrb[72].mxu1 %v9732_v34  ;;  %v9620_v27 = vmax.f32 %v9275_v44, 0.0 }
 0xd36   : > { %v9281_v11 = vadd.f32 %v9280_v57, %v17538_v19  ;;  %10388 = vmatpush1.bf16.msra.mxu1 %v12731_v38  ;;  %v9621_v46 = vmax.f32 %v9277_v60, 0.0  ;;  %v12749_v38 = vld [vmem:[#allocation11 + $0x3a0] ss:$8 sps:$4 sm:$0xff]  }
 0xd37   : > { %v9624_v13 = vmax.f32 %v9279_v47, 0.0  ;;  %9576 = vmatmul.mubr.bf16.gmra.mrb[248].mxu0 %v17488_v6  ;;  %10389 = vmatprep.subr.bf16.mxu1 %v12736_v5  ;;  %v12754_v5 = vld [vmem:[#allocation11 + $0x3b4] ss:$8 sps:$4 sm:$0xff]  }
 0xd38   : > { %v9625_v17 = vmax.f32 %v9281_v11, 0.0  ;;  %9585 = vmatprep.mubr.bf16.mxu0 %v17500_v51 }
 0xd39   : > { %v9736_v15 = vpack.c.bf16 %v9624_v13, %v9620_v27 }
 0xd3a   : > { %v9737_v30 = vpack.c.bf16 %v9625_v17, %v9621_v46  ;;  %v9284_v25 = vpop.f32.mrb[144].mxu0  ;;  %10390 = vmatpush1.bf16.msra.mxu1 %v12734_v12  ;;  %v12752_v12 = vld [vmem:[#allocation11 + $0x3b0] ss:$8 sps:$4 sm:$0xff]  }
 0xd3b   : > { %v9285_v26 = vadd.f32 %v9284_v25, %v17533_v52  ;;  %v9286_v42 = vpop.f32.mrb[145].mxu0  ;;  %10391 = vmatprep.subr.bf16.mxu1 %v12739_v35  ;;  %v12757_v35 = vld [vmem:[#allocation11 + $0x3c4] ss:$8 sps:$4 sm:$0xff]  }
 0xd3c   : > { %v9287_v41 = vadd.f32 %v9286_v42, %v17538_v19  ;;  %v9288_v50 = vpop.f32.mrb[146].mxu0  ;;  %10248 = vmatprep.mubr.bf16.mxu1 %v9737_v30 }
 0xd3d   : > { %v9289_v6 = vadd.f32 %v9288_v50, %v17533_v52  ;;  %v9290_v9 = vpop.f32.mrb[147].mxu0  ;;  %10249 = vmatmul.mubr.bf16.gmra.mrb[76].mxu1 %v9736_v15  ;;  %v9628_v20 = vmax.f32 %v9285_v26, 0.0 }
 0xd3e   : > { %v9291_v51 = vadd.f32 %v9290_v9, %v17538_v19  ;;  %10392 = vmatpush1.bf16.msra.mxu1 %v12737_v23  ;;  %v9629_v53 = vmax.f32 %v9287_v41, 0.0  ;;  %v12755_v23 = vld [vmem:[#allocation11 + $0x3c0] ss:$8 sps:$4 sm:$0xff]  }
 0xd3f   : > { %v9632_v7 = vmax.f32 %v9289_v6, 0.0  ;;  %9586 = vmatmul.mubr.bf16.gmra.mrb[252].mxu0 %v17498_v33  ;;  %10393 = vmatprep.subr.bf16.mxu1 %v12742_v63  ;;  %v12760_v63 = vld [vmem:[#allocation11 + $0x3d4] ss:$8 sps:$4 sm:$0xff]  }
 0xd40   : > { %v9633_v18 = vmax.f32 %v9291_v51, 0.0 }
 0xd41   : > { %v9740_v14 = vpack.c.bf16 %v9632_v7, %v9628_v20 }
 0xd42   : > { %v9741_v45 = vpack.c.bf16 %v9633_v18, %v9629_v53  ;;  %v9294_v31 = vpop.f32.mrb[148].mxu0  ;;  %10394 = vmatpush1.bf16.msra.mxu1 %v12740_v32  ;;  %v12758_v32 = vld [vmem:[#allocation11 + $0x3d0] ss:$8 sps:$4 sm:$0xff]  }
 0xd43   : > { %v9295_v61 = vadd.f32 %v9294_v31, %v17533_v52  ;;  %v9296_v16 = vpop.f32.mrb[149].mxu0  ;;  %10395 = vmatprep.subr.bf16.mxu1 %v12745_v4  ;;  %v12763_v4 = vld [vmem:[#allocation11 + $0x3e4] ss:$8 sps:$4 sm:$0xff]  }
 0xd44   : > { %v9297_v28 = vadd.f32 %v9296_v16, %v17538_v19  ;;  %v9298_v39 = vpop.f32.mrb[150].mxu0  ;;  %10258 = vmatprep.mubr.bf16.mxu1 %v9741_v45 }
 0xd45   : > { %v9299_v33 = vadd.f32 %v9298_v39, %v17533_v52  ;;  %v9300_v55 = vpop.f32.mrb[151].mxu0  ;;  %10259 = vmatmul.mubr.bf16.gmra.mrb[80].mxu1 %v9740_v14  ;;  %v9636_v22 = vmax.f32 %v9295_v61, 0.0 }
 0xd46   : > { %v9301_v56 = vadd.f32 %v9300_v55, %v17538_v19  ;;  %10396 = vmatpush1.bf16.msra.mxu1 %v12743_v40  ;;  %v9637_v49 = vmax.f32 %v9297_v28, 0.0  ;;  %v12761_v40 = vld [vmem:[#allocation11 + $0x3e0] ss:$8 sps:$4 sm:$0xff]  }
 0xd47   : > { %v9640_v29 = vmax.f32 %v9299_v33, 0.0  ;;  %10397 = vmatprep.subr.bf16.mxu1 %v12748_v54  ;;  %v12766_v54 = vld [vmem:[#allocation11 + $0x3f4] ss:$8 sps:$4 sm:$0xff]  }
 0xd48   : > { %v9641_v21 = vmax.f32 %v9301_v56, 0.0 }
 0xd49   : > { %v9744_v34 = vpack.c.bf16 %v9640_v29, %v9636_v22 }
 0xd4a   : > { %v9745_v36 = vpack.c.bf16 %v9641_v21, %v9637_v49  ;;  %v9304_v24 = vpop.f32.mrb[152].mxu0  ;;  %10398 = vmatpush1.bf16.msra.mxu1 %v12746_v58  ;;  %v12764_v58 = vld [vmem:[#allocation11 + $0x3f0] ss:$8 sps:$4 sm:$0xff]  }
 0xd4b   : > { %v9305_v44 = vadd.f32 %v9304_v24, %v17533_v52  ;;  %v9306_v1 = vpop.f32.mrb[153].mxu0  ;;  %10399 = vmatprep.subr.bf16.mxu1 %v12751_v37 }
 0xd4c   : > { %v9307_v60 = vadd.f32 %v9306_v1, %v17538_v19  ;;  %v9308_v3 = vpop.f32.mrb[154].mxu0  ;;  %10268 = vmatprep.mubr.bf16.mxu1 %v9745_v36 }
 0xd4d   : > { %v9309_v47 = vadd.f32 %v9308_v3, %v17533_v52  ;;  %v9310_v57 = vpop.f32.mrb[155].mxu0  ;;  %10269 = vmatmul.mubr.bf16.gmra.mrb[84].mxu1 %v9744_v34  ;;  %v9644_v27 = vmax.f32 %v9305_v44, 0.0 }
 0xd4e   : > { %v9311_v11 = vadd.f32 %v9310_v57, %v17538_v19  ;;  %10400 = vmatpush1.bf16.msra.mxu1 %v12749_v38  ;;  %v9645_v46 = vmax.f32 %v9307_v60, 0.0 }
 0xd4f   : > { %v9648_v13 = vmax.f32 %v9309_v47, 0.0  ;;  %10401 = vmatprep.subr.bf16.mxu1 %v12754_v5 }
 0xd50   : > { %v9649_v17 = vmax.f32 %v9311_v11, 0.0 }
 0xd51   : > { %v9748_v15 = vpack.c.bf16 %v9648_v13, %v9644_v27 }
 0xd52   : > { %v9749_v30 = vpack.c.bf16 %v9649_v17, %v9645_v46  ;;  %v9314_v25 = vpop.f32.mrb[156].mxu0  ;;  %10402 = vmatpush1.bf16.msra.mxu1 %v12752_v12 }
 0xd53   : > { %v9315_v26 = vadd.f32 %v9314_v25, %v17533_v52  ;;  %v9316_v42 = vpop.f32.mrb[157].mxu0  ;;  %10403 = vmatprep.subr.bf16.mxu1 %v12757_v35 }
 0xd54   : > { %v9317_v41 = vadd.f32 %v9316_v42, %v17538_v19  ;;  %v9318_v50 = vpop.f32.mrb[158].mxu0  ;;  %10278 = vmatprep.mubr.bf16.mxu1 %v9749_v30 }
 0xd55   : > { %v9319_v6 = vadd.f32 %v9318_v50, %v17533_v52  ;;  %v9320_v9 = vpop.f32.mrb[159].mxu0  ;;  %10279 = vmatmul.mubr.bf16.gmra.mrb[88].mxu1 %v9748_v15  ;;  %v9652_v20 = vmax.f32 %v9315_v26, 0.0 }
 0xd56   : > { %v9321_v51 = vadd.f32 %v9320_v9, %v17538_v19  ;;  %10404 = vmatpush1.bf16.msra.mxu1 %v12755_v23  ;;  %v9653_v53 = vmax.f32 %v9317_v41, 0.0 }
 0xd57   : > { %v9656_v7 = vmax.f32 %v9319_v6, 0.0  ;;  %10405 = vmatprep.subr.bf16.mxu1 %v12760_v63 }
 0xd58   : > { %v9657_v18 = vmax.f32 %v9321_v51, 0.0 }
 0xd59   : > { %v9752_v14 = vpack.c.bf16 %v9656_v7, %v9652_v20 }
 0xd5a   : > { %v9753_v45 = vpack.c.bf16 %v9657_v18, %v9653_v53  ;;  %v9324_v31 = vpop.f32.mrb[160].mxu0  ;;  %10406 = vmatpush1.bf16.msra.mxu1 %v12758_v32 }
 0xd5b   : > { %v9325_v61 = vadd.f32 %v9324_v31, %v17533_v52  ;;  %v9326_v16 = vpop.f32.mrb[161].mxu0  ;;  %10407 = vmatprep.subr.bf16.mxu1 %v12763_v4 }
 0xd5c   : > { %v9327_v28 = vadd.f32 %v9326_v16, %v17538_v19  ;;  %v9328_v39 = vpop.f32.mrb[162].mxu0  ;;  %10288 = vmatprep.mubr.bf16.mxu1 %v9753_v45 }
 0xd5d   : > { %v9329_v33 = vadd.f32 %v9328_v39, %v17533_v52  ;;  %v9330_v55 = vpop.f32.mrb[163].mxu0  ;;  %10289 = vmatmul.mubr.bf16.gmra.mrb[92].mxu1 %v9752_v14  ;;  %v9660_v22 = vmax.f32 %v9325_v61, 0.0 }
 0xd5e   : > { %v9331_v56 = vadd.f32 %v9330_v55, %v17538_v19  ;;  %10408 = vmatpush1.bf16.msra.mxu1 %v12761_v40  ;;  %v9661_v37 = vmax.f32 %v9327_v28, 0.0 }
 0xd5f   : > { %v9664_v29 = vmax.f32 %v9329_v33, 0.0  ;;  %10409 = vmatprep.subr.bf16.mxu1 %v12766_v54 }
 0xd60   : > { %v9665_v49 = vmax.f32 %v9331_v56, 0.0 }
 0xd61   : > { %v9756_v21 = vpack.c.bf16 %v9664_v29, %v9660_v22 }
 0xd62   : > { %v9757_v34 = vpack.c.bf16 %v9665_v49, %v9661_v37  ;;  %v9334_v36 = vpop.f32.mrb[164].mxu0  ;;  %10410 = vmatpush1.bf16.msra.mxu1 %v12764_v58 }
 0xd63   : > { %v9335_v24 = vadd.f32 %v9334_v36, %v17533_v52  ;;  %v9336_v38 = vpop.f32.mrb[165].mxu0 }
 0xd64   : > { %v9337_v44 = vadd.f32 %v9336_v38, %v17538_v19  ;;  %v9338_v1 = vpop.f32.mrb[166].mxu0  ;;  %10298 = vmatprep.mubr.bf16.mxu1 %v9757_v34 }
 0xd65   : > { %v9339_v5 = vadd.f32 %v9338_v1, %v17533_v52  ;;  %v9340_v60 = vpop.f32.mrb[167].mxu0  ;;  %10299 = vmatmul.mubr.bf16.gmra.mrb[96].mxu1 %v9756_v21  ;;  %v9668_v47 = vmax.f32 %v9335_v24, 0.0 }
 0xd66   : > { %v9341_v3 = vadd.f32 %v9340_v60, %v17538_v19  ;;  %v9669_v11 = vmax.f32 %v9337_v44, 0.0 }
 0xd67   : > { %v9672_v57 = vmax.f32 %v9339_v5, 0.0 }
 0xd68   : > { %v9673_v12 = vmax.f32 %v9341_v3, 0.0 }
 0xd69   : > { %v9760_v27 = vpack.c.bf16 %v9672_v57, %v9668_v47 }
 0xd6a   : > { %v9761_v13 = vpack.c.bf16 %v9673_v12, %v9669_v11  ;;  %v9344_v35 = vpop.f32.mrb[168].mxu0 }
 0xd6b   : > { %v9345_v46 = vadd.f32 %v9344_v35, %v17533_v52  ;;  %v9346_v17 = vpop.f32.mrb[169].mxu0 }
 0xd6c   : > { %v9347_v15 = vadd.f32 %v9346_v17, %v17538_v19  ;;  %v9348_v30 = vpop.f32.mrb[170].mxu0  ;;  %10308 = vmatprep.mubr.bf16.mxu1 %v9761_v13 }
 0xd6d   : > { %v9349_v25 = vadd.f32 %v9348_v30, %v17533_v52  ;;  %v9350_v23 = vpop.f32.mrb[171].mxu0  ;;  %10309 = vmatmul.mubr.bf16.gmra.mrb[100].mxu1 %v9760_v27  ;;  %v9676_v42 = vmax.f32 %v9345_v46, 0.0 }
 0xd6e   : > { %v9351_v26 = vadd.f32 %v9350_v23, %v17538_v19  ;;  %v9677_v41 = vmax.f32 %v9347_v15, 0.0 }
 0xd6f   : > { %v9680_v63 = vmax.f32 %v9349_v25, 0.0 }
 0xd70   : > { %v9681_v50 = vmax.f32 %v9351_v26, 0.0 }
 0xd71   : > { %v9764_v6 = vpack.c.bf16 %v9680_v63, %v9676_v42 }
 0xd72   : > { %v9765_v9 = vpack.c.bf16 %v9681_v50, %v9677_v41  ;;  %v9354_v51 = vpop.f32.mrb[172].mxu0 }
 0xd73   : > { %v9355_v32 = vadd.f32 %v9354_v51, %v17533_v52  ;;  %v9356_v20 = vpop.f32.mrb[173].mxu0 }
 0xd74   : > { %v9357_v7 = vadd.f32 %v9356_v20, %v17538_v19  ;;  %v9358_v4 = vpop.f32.mrb[174].mxu0  ;;  %10318 = vmatprep.mubr.bf16.mxu1 %v9765_v9 }
 0xd75   : > { %v9359_v53 = vadd.f32 %v9358_v4, %v17533_v52  ;;  %v9360_v18 = vpop.f32.mrb[175].mxu0  ;;  %10319 = vmatmul.mubr.bf16.gmra.mrb[104].mxu1 %v9764_v6  ;;  %v9684_v45 = vmax.f32 %v9355_v32, 0.0 }
 0xd76   : > { %v9361_v14 = vadd.f32 %v9360_v18, %v17538_v19  ;;  %v9685_v40 = vmax.f32 %v9357_v7, 0.0 }
 0xd77   : > { %v9688_v31 = vmax.f32 %v9359_v53, 0.0 }
 0xd78   : > { %v9689_v61 = vmax.f32 %v9361_v14, 0.0 }
 0xd79   : > { %v9768_v16 = vpack.c.bf16 %v9688_v31, %v9684_v45 }
 0xd7a   : > { %v9769_v54 = vpack.c.bf16 %v9689_v61, %v9685_v40  ;;  %v9364_v28 = vpop.f32.mrb[176].mxu0 }
 0xd7b   : > { %v9365_v39 = vadd.f32 %v9364_v28, %v17533_v52  ;;  %v9366_v33 = vpop.f32.mrb[177].mxu0 }
 0xd7c   : > { %v9367_v55 = vadd.f32 %v9366_v33, %v17538_v19  ;;  %v9368_v56 = vpop.f32.mrb[178].mxu0  ;;  %10328 = vmatprep.mubr.bf16.mxu1 %v9769_v54 }
 0xd7d   : > { %v9369_v58 = vadd.f32 %v9368_v56, %v17533_v52  ;;  %v9370_v22 = vpop.f32.mrb[179].mxu0  ;;  %10329 = vmatmul.mubr.bf16.gmra.mrb[108].mxu1 %v9768_v16  ;;  %v9692_v37 = vmax.f32 %v9365_v39, 0.0  ;;  %v17615_v16 = vrot.slane %v17528_v59, %v18652_v2  ;;  %v17619_v39 = vrot.slane %v17528_v59, %v18654_v0 }
 0xd7e   : > { %v9371_v29 = vadd.f32 %v9370_v22, %v17538_v19  ;;  %v9693_v21 = vmax.f32 %v9367_v55, 0.0 }
 0xd7f   : > { %v9696_v49 = vmax.f32 %v9369_v58, 0.0 }
 0xd80   : > { %v9697_v34 = vmax.f32 %v9371_v29, 0.0 }
 0xd81   : > { %v9772_v36 = vpack.c.bf16 %v9696_v49, %v9692_v37 }
 0xd82   : > { %v9773_v24 = vpack.c.bf16 %v9697_v34, %v9693_v21  ;;  %v9374_v38 = vpop.f32.mrb[180].mxu0 }
 0xd83   : > { %v9375_v44 = vadd.f32 %v9374_v38, %v17533_v52  ;;  %v9376_v1 = vpop.f32.mrb[181].mxu0 }
 0xd84   : > { %v9377_v5 = vadd.f32 %v9376_v1, %v17538_v19  ;;  %v9378_v60 = vpop.f32.mrb[182].mxu0  ;;  %10338 = vmatprep.mubr.bf16.mxu1 %v9773_v24 }
 0xd85   : > { %v9379_v3 = vadd.f32 %v9378_v60, %v17533_v52  ;;  %v9380_v47 = vpop.f32.mrb[183].mxu0  ;;  %10339 = vmatmul.mubr.bf16.gmra.mrb[112].mxu1 %v9772_v36  ;;  %v9700_v11 = vmax.f32 %v9375_v44, 0.0 }
 0xd86   : > { %v9381_v57 = vadd.f32 %v9380_v47, %v17538_v19  ;;  %v9701_v27 = vmax.f32 %v9377_v5, 0.0 }
 0xd87   : > { %v9704_v12 = vmax.f32 %v9379_v3, 0.0 }
 0xd88   : > { %v9705_v13 = vmax.f32 %v9381_v57, 0.0 }
 0xd89   : > { %v9776_v35 = vpack.c.bf16 %v9704_v12, %v9700_v11 }
 0xd8a   : > { %v9777_v46 = vpack.c.bf16 %v9705_v13, %v9701_v27  ;;  %v9384_v17 = vpop.f32.mrb[184].mxu0 }
 0xd8b   : > { %v9385_v15 = vadd.f32 %v9384_v17, %v17533_v52  ;;  %v9386_v30 = vpop.f32.mrb[185].mxu0 }
 0xd8c   : > { %v9387_v25 = vadd.f32 %v9386_v30, %v17538_v19  ;;  %v9388_v23 = vpop.f32.mrb[186].mxu0  ;;  %10348 = vmatprep.mubr.bf16.mxu1 %v9777_v46 }
 0xd8d   : > { %v9389_v26 = vadd.f32 %v9388_v23, %v17533_v52  ;;  %v9390_v42 = vpop.f32.mrb[187].mxu0  ;;  %10349 = vmatmul.mubr.bf16.gmra.mrb[116].mxu1 %v9776_v35  ;;  %v9708_v41 = vmax.f32 %v9385_v15, 0.0 }
 0xd8e   : > { %v9391_v63 = vadd.f32 %v9390_v42, %v17538_v19  ;;  %v9709_v6 = vmax.f32 %v9387_v25, 0.0 }
 0xd8f   : > { %v9712_v50 = vmax.f32 %v9389_v26, 0.0 }
 0xd90   : > { %v9713_v9 = vmax.f32 %v9391_v63, 0.0 }
 0xd91   : > { %v9780_v51 = vpack.c.bf16 %v9712_v50, %v9708_v41 }
 0xd92   : > { %v9781_v32 = vpack.c.bf16 %v9713_v9, %v9709_v6  ;;  %v9394_v20 = vpop.f32.mrb[188].mxu0 }
 0xd93   : > { %v9395_v7 = vadd.f32 %v9394_v20, %v17533_v52  ;;  %v9396_v4 = vpop.f32.mrb[189].mxu0 }
 0xd94   : > { %v9397_v53 = vadd.f32 %v9396_v4, %v17538_v19  ;;  %v9398_v18 = vpop.f32.mrb[190].mxu0  ;;  %10358 = vmatprep.mubr.bf16.mxu1 %v9781_v32 }
 0xd95   : > { %v9399_v14 = vadd.f32 %v9398_v18, %v17533_v52  ;;  %v9400_v45 = vpop.f32.mrb[191].mxu0  ;;  %10359 = vmatmul.mubr.bf16.gmra.mrb[120].mxu1 %v9780_v51  ;;  %v9716_v40 = vmax.f32 %v9395_v7, 0.0 }
 0xd96   : > { %v9401_v31 = vadd.f32 %v9400_v45, %v17538_v19  ;;  %v9717_v54 = vmax.f32 %v9397_v53, 0.0 }
 0xd97   : > { %v9720_v61 = vmax.f32 %v9399_v14, 0.0 }
 0xd98   : > { %v9721_v28 = vmax.f32 %v9401_v31, 0.0 }
 0xd99   : > { %v9784_v33 = vpack.c.bf16 %v9720_v61, %v9716_v40 }
 0xd9a   : > { %v9785_v55 = vpack.c.bf16 %v9721_v28, %v9717_v54  ;;  %v9437_v56 = vpop.f32.mrb[192].mxu0 }
 0xd9b   : > { %v9438_v52 = vadd.f32 %v9437_v56, %v17615_v16  ;;  %v9439_v58 = vpop.f32.mrb[193].mxu0 }
 0xd9c   : > { %v9440_v19 = vadd.f32 %v9439_v58, %v17619_v39  ;;  %v9441_v22 = vpop.f32.mrb[194].mxu0  ;;  %10368 = vmatprep.mubr.bf16.mxu1 %v9785_v55 }
 0xd9d   : > { %v9442_v29 = vadd.f32 %v9441_v22, %v17615_v16  ;;  %v9443_v2 = vpop.f32.mrb[195].mxu0  ;;  %10369 = vmatmul.mubr.bf16.gmra.mrb[124].mxu1 %v9784_v33  ;;  %v9598_v49 = vmax.f32 %v9438_v52, 0.0 }
 0xd9e   : > { %v9444_v37 = vadd.f32 %v9443_v2, %v17619_v39  ;;  %v9599_v0 = vmax.f32 %v9440_v19, 0.0 }
 0xd9f   : > { %v9602_v21 = vmax.f32 %v9442_v29, 0.0 }
 0xda0   : > { %v9603_v59 = vmax.f32 %v9444_v37, 0.0 }
 0xda1   : > { %v9726_v34 = vpack.c.bf16 %v9602_v21, %v9598_v49 }
 0xda2   : > { %v9727_v36 = vpack.c.bf16 %v9603_v59, %v9599_v0  ;;  %v9447_v24 = vpop.f32.mrb[196].mxu0 }
 0xda3   : > { %v9448_v38 = vadd.f32 %v9447_v24, %v17615_v16  ;;  %v9449_v44 = vpop.f32.mrb[197].mxu0 }
 0xda4   : > { %v9450_v1 = vadd.f32 %v9449_v44, %v17619_v39  ;;  %v9451_v5 = vpop.f32.mrb[198].mxu0  ;;  %10411 = vmatprep.mubr.bf16.mxu1 %v9727_v36 }
 0xda5   : > { %v9452_v60 = vadd.f32 %v9451_v5, %v17615_v16  ;;  %v9453_v3 = vpop.f32.mrb[199].mxu0  ;;  %10412 = vmatmul.mubr.bf16.vlgmr.msra.gmra.mrb[64].mxu1 %v9726_v34  ;;  %v9606_v57 = vmax.f32 %v9448_v38, 0.0 }
 0xda6   : > { %v9454_v47 = vadd.f32 %v9453_v3, %v17619_v39  ;;  %v9607_v12 = vmax.f32 %v9450_v1, 0.0 }
 0xda7   : > { %v9610_v11 = vmax.f32 %v9452_v60, 0.0 }
 0xda8   : > { %v9611_v27 = vmax.f32 %v9454_v47, 0.0 }
 0xda9   : > { %v9730_v13 = vpack.c.bf16 %v9610_v11, %v9606_v57 }
 0xdaa   : > { %v9731_v35 = vpack.c.bf16 %v9611_v27, %v9607_v12  ;;  %v9457_v46 = vpop.f32.mrb[200].mxu0 }
 0xdab   : > { %v9458_v17 = vadd.f32 %v9457_v46, %v17615_v16  ;;  %v9459_v15 = vpop.f32.mrb[201].mxu0 }
 0xdac   : > { %v9460_v30 = vadd.f32 %v9459_v15, %v17619_v39  ;;  %v9461_v25 = vpop.f32.mrb[202].mxu0  ;;  %10421 = vmatprep.mubr.bf16.mxu1 %v9731_v35 }
 0xdad   : > { %v9462_v23 = vadd.f32 %v9461_v25, %v17615_v16  ;;  %v9463_v26 = vpop.f32.mrb[203].mxu0  ;;  %10422 = vmatmul.mubr.bf16.gmra.mrb[68].mxu1 %v9730_v13  ;;  %v9614_v63 = vmax.f32 %v9458_v17, 0.0 }
 0xdae   : > { %v9464_v42 = vadd.f32 %v9463_v26, %v17619_v39  ;;  %v9615_v50 = vmax.f32 %v9460_v30, 0.0 }
 0xdaf   : > { %v9618_v41 = vmax.f32 %v9462_v23, 0.0 }
 0xdb0   : > { %v9619_v6 = vmax.f32 %v9464_v42, 0.0 }
 0xdb1   : > { %v9734_v9 = vpack.c.bf16 %v9618_v41, %v9614_v63 }
 0xdb2   : > { %v9735_v51 = vpack.c.bf16 %v9619_v6, %v9615_v50  ;;  %v9467_v32 = vpop.f32.mrb[204].mxu0 }
 0xdb3   : > { %v9468_v20 = vadd.f32 %v9467_v32, %v17615_v16  ;;  %v9469_v7 = vpop.f32.mrb[205].mxu0 }
 0xdb4   : > { %v9470_v4 = vadd.f32 %v9469_v7, %v17619_v39  ;;  %v9471_v53 = vpop.f32.mrb[206].mxu0  ;;  %10431 = vmatprep.mubr.bf16.mxu1 %v9735_v51 }
 0xdb5   : > { %v9472_v18 = vadd.f32 %v9471_v53, %v17615_v16  ;;  %v9473_v14 = vpop.f32.mrb[207].mxu0  ;;  %10432 = vmatmul.mubr.bf16.gmra.mrb[72].mxu1 %v9734_v9  ;;  %v9622_v31 = vmax.f32 %v9468_v20, 0.0 }
 0xdb6   : > { %v9474_v45 = vadd.f32 %v9473_v14, %v17619_v39  ;;  %v9623_v61 = vmax.f32 %v9470_v4, 0.0 }
 0xdb7   : > { %v9626_v40 = vmax.f32 %v9472_v18, 0.0 }
 0xdb8   : > { %v9627_v54 = vmax.f32 %v9474_v45, 0.0 }
 0xdb9   : > { %v9738_v28 = vpack.c.bf16 %v9626_v40, %v9622_v31 }
 0xdba   : > { %v9739_v33 = vpack.c.bf16 %v9627_v54, %v9623_v61  ;;  %v9477_v55 = vpop.f32.mrb[208].mxu0 }
 0xdbb   : > { %v9478_v56 = vadd.f32 %v9477_v55, %v17615_v16  ;;  %v9479_v52 = vpop.f32.mrb[209].mxu0 }
 0xdbc   : > { %v9480_v58 = vadd.f32 %v9479_v52, %v17619_v39  ;;  %v9481_v19 = vpop.f32.mrb[210].mxu0  ;;  %10441 = vmatprep.mubr.bf16.mxu1 %v9739_v33 }
 0xdbd   : > { %v9482_v22 = vadd.f32 %v9481_v19, %v17615_v16  ;;  %v9483_v29 = vpop.f32.mrb[211].mxu0  ;;  %10442 = vmatmul.mubr.bf16.gmra.mrb[76].mxu1 %v9738_v28  ;;  %v9630_v37 = vmax.f32 %v9478_v56, 0.0 }
 0xdbe   : > { %v9484_v2 = vadd.f32 %v9483_v29, %v17619_v39  ;;  %v9631_v21 = vmax.f32 %v9480_v58, 0.0 }
 0xdbf   : > { %v9634_v49 = vmax.f32 %v9482_v22, 0.0 }
 0xdc0   : > { %v9635_v0 = vmax.f32 %v9484_v2, 0.0 }
 0xdc1   : > { %v9742_v59 = vpack.c.bf16 %v9634_v49, %v9630_v37 }
 0xdc2   : > { %v9743_v34 = vpack.c.bf16 %v9635_v0, %v9631_v21  ;;  %v9487_v36 = vpop.f32.mrb[212].mxu0 }
 0xdc3   : > { %v9488_v24 = vadd.f32 %v9487_v36, %v17615_v16  ;;  %v9489_v38 = vpop.f32.mrb[213].mxu0 }
 0xdc4   : > { %v9490_v44 = vadd.f32 %v9489_v38, %v17619_v39  ;;  %v9491_v1 = vpop.f32.mrb[214].mxu0  ;;  %10451 = vmatprep.mubr.bf16.mxu1 %v9743_v34 }
 0xdc5   : > { %v9492_v5 = vadd.f32 %v9491_v1, %v17615_v16  ;;  %v9493_v60 = vpop.f32.mrb[215].mxu0  ;;  %10452 = vmatmul.mubr.bf16.gmra.mrb[80].mxu1 %v9742_v59  ;;  %v9638_v47 = vmax.f32 %v9488_v24, 0.0 }
 0xdc6   : > { %v9494_v3 = vadd.f32 %v9493_v60, %v17619_v39  ;;  %v9639_v11 = vmax.f32 %v9490_v44, 0.0 }
 0xdc7   : > { %v9642_v57 = vmax.f32 %v9492_v5, 0.0 }
 0xdc8   : > { %v9643_v12 = vmax.f32 %v9494_v3, 0.0 }
 0xdc9   : > { %v9746_v27 = vpack.c.bf16 %v9642_v57, %v9638_v47 }
 0xdca   : > { %v9747_v13 = vpack.c.bf16 %v9643_v12, %v9639_v11  ;;  %v9497_v35 = vpop.f32.mrb[216].mxu0 }
 0xdcb   : > { %v9498_v46 = vadd.f32 %v9497_v35, %v17615_v16  ;;  %v9499_v17 = vpop.f32.mrb[217].mxu0 }
 0xdcc   : > { %v9500_v15 = vadd.f32 %v9499_v17, %v17619_v39  ;;  %v9501_v30 = vpop.f32.mrb[218].mxu0  ;;  %10461 = vmatprep.mubr.bf16.mxu1 %v9747_v13 }
 0xdcd   : > { %v9502_v25 = vadd.f32 %v9501_v30, %v17615_v16  ;;  %v9503_v23 = vpop.f32.mrb[219].mxu0  ;;  %10462 = vmatmul.mubr.bf16.gmra.mrb[84].mxu1 %v9746_v27  ;;  %v9646_v42 = vmax.f32 %v9498_v46, 0.0 }
 0xdce   : > { %v9504_v26 = vadd.f32 %v9503_v23, %v17619_v39  ;;  %v9647_v41 = vmax.f32 %v9500_v15, 0.0 }
 0xdcf   : > { %v9650_v63 = vmax.f32 %v9502_v25, 0.0 }
 0xdd0   : > { %v9651_v50 = vmax.f32 %v9504_v26, 0.0 }
 0xdd1   : > { %v9750_v6 = vpack.c.bf16 %v9650_v63, %v9646_v42 }
 0xdd2   : > { %v9751_v9 = vpack.c.bf16 %v9651_v50, %v9647_v41  ;;  %v9507_v51 = vpop.f32.mrb[220].mxu0 }
 0xdd3   : > { %v9508_v32 = vadd.f32 %v9507_v51, %v17615_v16  ;;  %v9509_v20 = vpop.f32.mrb[221].mxu0 }
 0xdd4   : > { %v9510_v7 = vadd.f32 %v9509_v20, %v17619_v39  ;;  %v9511_v4 = vpop.f32.mrb[222].mxu0  ;;  %10471 = vmatprep.mubr.bf16.mxu1 %v9751_v9 }
 0xdd5   : > { %v9512_v53 = vadd.f32 %v9511_v4, %v17615_v16  ;;  %v9513_v18 = vpop.f32.mrb[223].mxu0  ;;  %10472 = vmatmul.mubr.bf16.gmra.mrb[88].mxu1 %v9750_v6  ;;  %v9654_v45 = vmax.f32 %v9508_v32, 0.0 }
 0xdd6   : > { %v9514_v14 = vadd.f32 %v9513_v18, %v17619_v39  ;;  %v9655_v40 = vmax.f32 %v9510_v7, 0.0 }
 0xdd7   : > { %v9658_v31 = vmax.f32 %v9512_v53, 0.0 }
 0xdd8   : > { %v9659_v61 = vmax.f32 %v9514_v14, 0.0 }
 0xdd9   : > { %v9754_v54 = vpack.c.bf16 %v9658_v31, %v9654_v45 }
 0xdda   : > { %v9755_v28 = vpack.c.bf16 %v9659_v61, %v9655_v40  ;;  %v9517_v33 = vpop.f32.mrb[224].mxu0 }
 0xddb   : > { %v9518_v55 = vadd.f32 %v9517_v33, %v17615_v16  ;;  %v9519_v56 = vpop.f32.mrb[225].mxu0 }
 0xddc   : > { %v9520_v52 = vadd.f32 %v9519_v56, %v17619_v39  ;;  %v9521_v58 = vpop.f32.mrb[226].mxu0  ;;  %10481 = vmatprep.mubr.bf16.mxu1 %v9755_v28 }
 0xddd   : > { %v9522_v19 = vadd.f32 %v9521_v58, %v17615_v16  ;;  %v9523_v22 = vpop.f32.mrb[227].mxu0  ;;  %10482 = vmatmul.mubr.bf16.gmra.mrb[92].mxu1 %v9754_v54  ;;  %v9662_v2 = vmax.f32 %v9518_v55, 0.0 }
 0xdde   : > { %v9524_v29 = vadd.f32 %v9523_v22, %v17619_v39  ;;  %v9663_v49 = vmax.f32 %v9520_v52, 0.0 }
 0xddf   : > { %v9666_v37 = vmax.f32 %v9522_v19, 0.0 }
 0xde0   : > { %v9667_v21 = vmax.f32 %v9524_v29, 0.0 }
 0xde1   : > { %v9758_v0 = vpack.c.bf16 %v9666_v37, %v9662_v2 }
 0xde2   : > { %v9759_v59 = vpack.c.bf16 %v9667_v21, %v9663_v49  ;;  %v9527_v34 = vpop.f32.mrb[228].mxu0 }
 0xde3   : > { %v9528_v36 = vadd.f32 %v9527_v34, %v17615_v16  ;;  %v9529_v24 = vpop.f32.mrb[229].mxu0 }
 0xde4   : > { %v9530_v38 = vadd.f32 %v9529_v24, %v17619_v39  ;;  %v9531_v44 = vpop.f32.mrb[230].mxu0  ;;  %10491 = vmatprep.mubr.bf16.mxu1 %v9759_v59 }
 0xde5   : > { %v9532_v1 = vadd.f32 %v9531_v44, %v17615_v16  ;;  %v9533_v5 = vpop.f32.mrb[231].mxu0  ;;  %10492 = vmatmul.mubr.bf16.gmra.mrb[96].mxu1 %v9758_v0  ;;  %v9670_v3 = vmax.f32 %v9528_v36, 0.0 }
 0xde6   : > { %v9534_v60 = vadd.f32 %v9533_v5, %v17619_v39  ;;  %v9671_v57 = vmax.f32 %v9530_v38, 0.0 }
 0xde7   : > { %v9674_v47 = vmax.f32 %v9532_v1, 0.0 }
 0xde8   : > { %v9675_v11 = vmax.f32 %v9534_v60, 0.0 }
 0xde9   : > { %v9762_v12 = vpack.c.bf16 %v9674_v47, %v9670_v3 }
 0xdea   : > { %v9763_v27 = vpack.c.bf16 %v9675_v11, %v9671_v57  ;;  %v9537_v13 = vpop.f32.mrb[232].mxu0 }
 0xdeb   : > { %v9538_v35 = vadd.f32 %v9537_v13, %v17615_v16  ;;  %v9539_v46 = vpop.f32.mrb[233].mxu0 }
 0xdec   : > { %v9540_v17 = vadd.f32 %v9539_v46, %v17619_v39  ;;  %v9541_v15 = vpop.f32.mrb[234].mxu0  ;;  %10501 = vmatprep.mubr.bf16.mxu1 %v9763_v27 }
 0xded   : > { %v9542_v30 = vadd.f32 %v9541_v15, %v17615_v16  ;;  %v9543_v25 = vpop.f32.mrb[235].mxu0  ;;  %10502 = vmatmul.mubr.bf16.gmra.mrb[100].mxu1 %v9762_v12  ;;  %v9678_v26 = vmax.f32 %v9538_v35, 0.0 }
 0xdee   : > { %v9544_v23 = vadd.f32 %v9543_v25, %v17619_v39  ;;  %v9679_v63 = vmax.f32 %v9540_v17, 0.0 }
 0xdef   : > { %v9682_v42 = vmax.f32 %v9542_v30, 0.0 }
 0xdf0   : > { %v9683_v41 = vmax.f32 %v9544_v23, 0.0 }
 0xdf1   : > { %v9766_v50 = vpack.c.bf16 %v9682_v42, %v9678_v26 }
 0xdf2   : > { %v9767_v6 = vpack.c.bf16 %v9683_v41, %v9679_v63  ;;  %v9547_v9 = vpop.f32.mrb[236].mxu0 }
 0xdf3   : > { %v9548_v51 = vadd.f32 %v9547_v9, %v17615_v16  ;;  %v9549_v32 = vpop.f32.mrb[237].mxu0 }
 0xdf4   : > { %v9550_v20 = vadd.f32 %v9549_v32, %v17619_v39  ;;  %v9551_v7 = vpop.f32.mrb[238].mxu0  ;;  %10511 = vmatprep.mubr.bf16.mxu1 %v9767_v6 }
 0xdf5   : > { %v9552_v4 = vadd.f32 %v9551_v7, %v17615_v16  ;;  %v9553_v53 = vpop.f32.mrb[239].mxu0  ;;  %10512 = vmatmul.mubr.bf16.gmra.mrb[104].mxu1 %v9766_v50  ;;  %v9686_v14 = vmax.f32 %v9548_v51, 0.0 }
 0xdf6   : > { %v9554_v18 = vadd.f32 %v9553_v53, %v17619_v39  ;;  %v9687_v31 = vmax.f32 %v9550_v20, 0.0 }
 0xdf7   : > { %v9690_v45 = vmax.f32 %v9552_v4, 0.0 }
 0xdf8   : > { %v9691_v40 = vmax.f32 %v9554_v18, 0.0 }
 0xdf9   : > { %v9770_v61 = vpack.c.bf16 %v9690_v45, %v9686_v14 }
 0xdfa   : > { %v9771_v54 = vpack.c.bf16 %v9691_v40, %v9687_v31  ;;  %v9557_v28 = vpop.f32.mrb[240].mxu0 }
 0xdfb   : > { %v9558_v33 = vadd.f32 %v9557_v28, %v17615_v16  ;;  %v9559_v55 = vpop.f32.mrb[241].mxu0 }
 0xdfc   : > { %v9560_v56 = vadd.f32 %v9559_v55, %v17619_v39  ;;  %v9561_v52 = vpop.f32.mrb[242].mxu0  ;;  %10521 = vmatprep.mubr.bf16.mxu1 %v9771_v54  ;;  %v11209_v54 = vld [vmem:[%s17949_s8 + $0x1] ss:$2 sm:$0x3] }
 0xdfd   : > { %v9562_v58 = vadd.f32 %v9561_v52, %v17615_v16  ;;  %v9563_v19 = vpop.f32.mrb[243].mxu0  ;;  %10522 = vmatmul.mubr.bf16.gmra.mrb[108].mxu1 %v9770_v61  ;;  %v9694_v29 = vmax.f32 %v9558_v33, 0.0  ;;  %v17689_v28 = vrot.slane %v11209_v54, %v18651_v48 }
 0xdfe   : > { %v9564_v22 = vadd.f32 %v9563_v19, %v17619_v39  ;;  %v9695_v37 = vmax.f32 %v9560_v56, 0.0 }
 0xdff   : > { %v9698_v2 = vmax.f32 %v9562_v58, 0.0  ;;  %v18655_v58 = vld [vmem:[#allocation77_spill] sm:$0xff] }
 0xe00   : > { %v9699_v49 = vmax.f32 %v9564_v22, 0.0 }
 0xe01   : > { %v9774_v21 = vpack.c.bf16 %v9698_v2, %v9694_v29  ;;  %v18656_v2 = vld [vmem:[#allocation80_spill] sm:$0xff] }
 0xe02   : > { %v9775_v0 = vpack.c.bf16 %v9699_v49, %v9695_v37  ;;  %v9567_v59 = vpop.f32.mrb[244].mxu0 }
 0xe03   : > { %v9568_v34 = vadd.f32 %v9567_v59, %v17615_v16  ;;  %v9569_v36 = vpop.f32.mrb[245].mxu0 }
 0xe04   : > { %v9570_v24 = vadd.f32 %v9569_v36, %v17619_v39  ;;  %v9571_v38 = vpop.f32.mrb[246].mxu0  ;;  %10531 = vmatprep.mubr.bf16.mxu1 %v9775_v0 }
 0xe05   : > { %v9572_v44 = vadd.f32 %v9571_v38, %v17615_v16  ;;  %v9573_v1 = vpop.f32.mrb[247].mxu0  ;;  %10532 = vmatmul.mubr.bf16.gmra.mrb[112].mxu1 %v9774_v21  ;;  %v9702_v60 = vmax.f32 %v9568_v34, 0.0  ;;  %v18658_v21 = vld [vmem:[#allocation24_spill] sm:$0xff] }
 0xe06   : > { %v9574_v5 = vadd.f32 %v9573_v1, %v17619_v39  ;;  %v9703_v47 = vmax.f32 %v9570_v24, 0.0 }
 0xe07   : > { %v9706_v3 = vmax.f32 %v9572_v44, 0.0 }
 0xe08   : > { %v9707_v57 = vmax.f32 %v9574_v5, 0.0 }
 0xe09   : > { %v9778_v11 = vpack.c.bf16 %v9706_v3, %v9702_v60 }
 0xe0a   : > { %v9779_v12 = vpack.c.bf16 %v9707_v57, %v9703_v47  ;;  %v9577_v27 = vpop.f32.mrb[248].mxu0  ;;  %v18659_v57 = vld [vmem:[#allocation23_spill] sm:$0xff] }
 0xe0b   : > { %v9578_v13 = vadd.f32 %v9577_v27, %v17615_v16  ;;  %v9579_v35 = vpop.f32.mrb[249].mxu0 }
 0xe0c   : > { %v9580_v46 = vadd.f32 %v9579_v35, %v17619_v39  ;;  %v9581_v17 = vpop.f32.mrb[250].mxu0  ;;  %10541 = vmatprep.mubr.bf16.mxu1 %v9779_v12  ;;  %v18660_v35 = vld [vmem:[#allocation26_spill] sm:$0xff] }
 0xe0d   : > { %v9582_v15 = vadd.f32 %v9581_v17, %v17615_v16  ;;  %v9583_v30 = vpop.f32.mrb[251].mxu0  ;;  %10542 = vmatmul.mubr.bf16.gmra.mrb[116].mxu1 %v9778_v11  ;;  %v9710_v23 = vmax.f32 %v9578_v13, 0.0 }
 0xe0e   : > { %v9584_v25 = vadd.f32 %v9583_v30, %v17619_v39  ;;  %v9711_v42 = vmax.f32 %v9580_v46, 0.0 }
 0xe0f   : > { %v9714_v26 = vmax.f32 %v9582_v15, 0.0  ;;  %v18661_v15 = vld [vmem:[#allocation25_spill] sm:$0xff] }
 0xe10   : > { %v9715_v63 = vmax.f32 %v9584_v25, 0.0 }
 0xe11   : > { %v9782_v41 = vpack.c.bf16 %v9714_v26, %v9710_v23  ;;  %v18662_v23 = vld [vmem:[#allocation82_spill] sm:$0xff] }
 0xe12   : > { %v9783_v50 = vpack.c.bf16 %v9715_v63, %v9711_v42  ;;  %v9587_v6 = vpop.f32.mrb[252].mxu0  ;;  %v18663_v42 = vld [vmem:[#allocation81_spill] sm:$0xff] }
 0xe13   : > { %v9588_v9 = vadd.f32 %v9587_v6, %v17615_v16  ;;  %v9589_v51 = vpop.f32.mrb[253].mxu0 }
 0xe14   : > { %v9590_v32 = vadd.f32 %v9589_v51, %v17619_v39  ;;  %v9591_v20 = vpop.f32.mrb[254].mxu0  ;;  %10551 = vmatprep.mubr.bf16.mxu1 %v9783_v50 }
 0xe15   : > { %v9592_v7 = vadd.f32 %v9591_v20, %v17615_v16  ;;  %v9593_v4 = vpop.f32.mrb[255].mxu0  ;;  %10552 = vmatmul.mubr.bf16.gmra.mrb[120].mxu1 %v9782_v41  ;;  %v9718_v18 = vmax.f32 %v9588_v9, 0.0  ;;  %v17692_v16 = vrot.slane %v11209_v54, %v18653_v8  ;;  %v18657_v8 = vld [vmem:[#allocation79_spill] sm:$0xff] }
 0xe16   : > { %v9594_v53 = vadd.f32 %v9593_v4, %v17619_v39  ;;  %v9719_v45 = vmax.f32 %v9590_v32, 0.0  ;;  %v18664_v32 = vld [vmem:[#allocation84_spill] sm:$0xff] }
 0xe17   : > { %v9722_v14 = vmax.f32 %v9592_v7, 0.0 }
 0xe18   : > { %v9723_v31 = vmax.f32 %v9594_v53, 0.0  ;;  %v18665_v53 = vld [vmem:[#allocation83_spill] sm:$0xff] }
 0xe19   : > { %v9786_v40 = vpack.c.bf16 %v9722_v14, %v9718_v18 }
 0xe1a   : > { %v9787_v61 = vpack.c.bf16 %v9723_v31, %v9719_v45  ;;  %v18666_v45 = vld [vmem:[#allocation28_spill] sm:$0xff] }
 0xe1c   : > { %10561 = vmatprep.mubr.bf16.mxu1 %v9787_v61 }
 0xe1d   : > { %10562 = vmatmul.mubr.bf16.gmra.mrb[124].mxu1 %v9786_v40  ;;  %v18667_v40 = vld [vmem:[#allocation27_spill] sm:$0xff] }
 0xe78   : > { %v10413_v39 = vpop.f32.mrb[64].mxu1 }
 0xe79   : > { %v11892_v33 = vadd.f32 %v10413_v39, %v17689_v28  ;;  %v10415_v55 = vpop.f32.mrb[65].mxu1 }
 0xe7a   : > { %v11893_v56 = vadd.f32 %v10415_v55, %v17692_v16  ;;  %v10417_v52 = vpop.f32.mrb[66].mxu1 }
 0xe7b   : > { %v10572_v19 = vadd.f32 %v11892_v33, %v18655_v58  ;;  %v11894_v22 = vadd.f32 %v10417_v52, %v17689_v28  ;;  %v10419_v29 = vpop.f32.mrb[67].mxu1  ;;  %v18668_v52 = vld [vmem:[#allocation30_spill] sm:$0xff] }
 0xe7c   : > { %v10573_v37 = vadd.f32 %v11893_v56, %v18656_v2  ;;  %v11895_v48 = vadd.f32 %v10419_v29, %v17692_v16  ;;  %v18669_v29 = vld [vmem:[#allocation29_spill] sm:$0xff] }
 0xe7d   : > { %10636 = vst [vmem:[%s17702_s19] sm:$0xff] %v10572_v19  ;;  %v10574_v49 = vadd.f32 %v11894_v22, %v18657_v8 }
 0xe7e   : > { %10637 = vst [vmem:[%s17702_s19 + $0x8] sm:$0xff] %v10573_v37  ;;  %v10575_v0 = vadd.f32 %v11895_v48, %v18658_v21  ;;  %v18670_v48 = vld [vmem:[#allocation86_spill] sm:$0xff] }
 0xe7f   : > { %10638 = vst [vmem:[%s17702_s19 + $0x10] sm:$0xff] %v10574_v49  ;;  %v18671_v49 = vld [vmem:[#allocation85_spill] sm:$0xff] }
 0xe80   : > { %10639 = vst [vmem:[%s17702_s19 + $0x18] sm:$0xff] %v10575_v0  ;;  %v10423_v59 = vpop.f32.mrb[68].mxu1 }
 0xe81   : > { %v11896_v34 = vadd.f32 %v10423_v59, %v17689_v28  ;;  %v10425_v36 = vpop.f32.mrb[69].mxu1 }
 0xe82   : > { %v11897_v24 = vadd.f32 %v10425_v36, %v17692_v16  ;;  %v10427_v38 = vpop.f32.mrb[70].mxu1 }
 0xe83   : > { %v10576_v44 = vadd.f32 %v11896_v34, %v16441_v62  ;;  %v11898_v1 = vadd.f32 %v10427_v38, %v17689_v28  ;;  %v10429_v5 = vpop.f32.mrb[71].mxu1  ;;  %v18672_v38 = vld [vmem:[#allocation88_spill] sm:$0xff] }
 0xe84   : > { %v10577_v60 = vadd.f32 %v11897_v24, %v16445_v10  ;;  %v11899_v3 = vadd.f32 %v10429_v5, %v17692_v16 }
 0xe85   : > { %10640 = vst [vmem:[%s17702_s19 + $0x20] sm:$0xff] %v10576_v44  ;;  %v10578_v47 = vadd.f32 %v11898_v1, %v16449_v43 }
 0xe86   : > { %10641 = vst [vmem:[%s17702_s19 + $0x28] sm:$0xff] %v10577_v60  ;;  %v10579_v11 = vadd.f32 %v11899_v3, %v18659_v57  ;;  %v18673_v60 = vld [vmem:[#allocation87_spill] sm:$0xff]  ;;  %v18674_v57 = vld [vmem:[#allocation32_spill] sm:$0xff] }
 0xe87   : > { %10642 = vst [vmem:[%s17702_s19 + $0x30] sm:$0xff] %v10578_v47 }
 0xe88   : > { %10643 = vst [vmem:[%s17702_s19 + $0x38] sm:$0xff] %v10579_v11  ;;  %v10433_v62 = vpop.f32.mrb[72].mxu1 }
 0xe89   : > { %v11900_v12 = vadd.f32 %v10433_v62, %v17689_v28  ;;  %v10435_v27 = vpop.f32.mrb[73].mxu1  ;;  %v18675_v62 = vld [vmem:[#allocation31_spill] sm:$0xff] }
 0xe8a   : > { %v11901_v10 = vadd.f32 %v10435_v27, %v17692_v16  ;;  %v10437_v13 = vpop.f32.mrb[74].mxu1 }
 0xe8b   : > { %v10580_v46 = vadd.f32 %v11900_v12, %v18660_v35  ;;  %v11902_v17 = vadd.f32 %v10437_v13, %v17689_v28  ;;  %v10439_v43 = vpop.f32.mrb[75].mxu1 }
 0xe8c   : > { %v10581_v30 = vadd.f32 %v11901_v10, %v18661_v15  ;;  %v11903_v25 = vadd.f32 %v10439_v43, %v17692_v16 }
 0xe8d   : > { %10644 = vst [vmem:[%s17702_s19 + $0x40] sm:$0xff] %v10580_v46  ;;  %v10582_v26 = vadd.f32 %v11902_v17, %v18662_v23  ;;  %v18676_v17 = vld [vmem:[#allocation34_spill] sm:$0xff] }
 0xe8e   : > { %10645 = vst [vmem:[%s17702_s19 + $0x48] sm:$0xff] %v10581_v30  ;;  %v10583_v63 = vadd.f32 %v11903_v25, %v18663_v42  ;;  %v18677_v25 = vld [vmem:[#allocation33_spill] sm:$0xff]  ;;  %v18678_v42 = vld [vmem:[#allocation90_spill] sm:$0xff] }
 0xe8f   : > { %10646 = vst [vmem:[%s17702_s19 + $0x50] sm:$0xff] %v10582_v26 }
 0xe90   : > { %10647 = vst [vmem:[%s17702_s19 + $0x58] sm:$0xff] %v10583_v63  ;;  %v10443_v41 = vpop.f32.mrb[76].mxu1 }
 0xe91   : > { %v11904_v50 = vadd.f32 %v10443_v41, %v17689_v28  ;;  %v10445_v6 = vpop.f32.mrb[77].mxu1  ;;  %v18679_v41 = vld [vmem:[#allocation89_spill] sm:$0xff] }
 0xe92   : > { %v11905_v9 = vadd.f32 %v10445_v6, %v17692_v16  ;;  %v10447_v51 = vpop.f32.mrb[78].mxu1 }
 0xe93   : > { %v10584_v20 = vadd.f32 %v11904_v50, %v18664_v32  ;;  %v11906_v7 = vadd.f32 %v10447_v51, %v17689_v28  ;;  %v10449_v4 = vpop.f32.mrb[79].mxu1 }
 0xe94   : > { %v10585_v18 = vadd.f32 %v11905_v9, %v18665_v53  ;;  %v11907_v14 = vadd.f32 %v10449_v4, %v17692_v16 }
 0xe95   : > { %10648 = vst [vmem:[%s17702_s19 + $0x60] sm:$0xff] %v10584_v20  ;;  %v10586_v31 = vadd.f32 %v11906_v7, %v18666_v45  ;;  %v18680_v7 = vld [vmem:[#allocation40_spill] sm:$0xff] }
 0xe96   : > { %10649 = vst [vmem:[%s17702_s19 + $0x68] sm:$0xff] %v10585_v18  ;;  %v10587_v61 = vadd.f32 %v11907_v14, %v18667_v40  ;;  %v18681_v14 = vld [vmem:[#allocation39_spill] sm:$0xff]  ;;  %v18682_v40 = vld [vmem:[#allocation38_spill] sm:$0xff] }
 0xe97   : > { %10650 = vst [vmem:[%s17702_s19 + $0x70] sm:$0xff] %v10586_v31 }
 0xe98   : > { %10651 = vst [vmem:[%s17702_s19 + $0x78] sm:$0xff] %v10587_v61  ;;  %v10453_v54 = vpop.f32.mrb[80].mxu1 }
 0xe99   : > { %v11908_v39 = vadd.f32 %v10453_v54, %v17689_v28  ;;  %v10455_v33 = vpop.f32.mrb[81].mxu1  ;;  %v18683_v54 = vld [vmem:[#allocation37_spill] sm:$0xff] }
 0xe9a   : > { %v11909_v55 = vadd.f32 %v10455_v33, %v17692_v16  ;;  %v10457_v56 = vpop.f32.mrb[82].mxu1 }
 0xe9b   : > { %v10588_v58 = vadd.f32 %v11908_v39, %v18668_v52  ;;  %v11910_v19 = vadd.f32 %v10457_v56, %v17689_v28  ;;  %v10459_v22 = vpop.f32.mrb[83].mxu1 }
 0xe9c   : > { %v10589_v2 = vadd.f32 %v11909_v55, %v18669_v29  ;;  %v11911_v37 = vadd.f32 %v10459_v22, %v17692_v16 }
 0xe9d   : > { %10652 = vst [vmem:[%s17702_s19 + $0x80] sm:$0xff] %v10588_v58  ;;  %v10590_v8 = vadd.f32 %v11910_v19, %v18670_v48  ;;  %v18684_v19 = vld [vmem:[#allocation42_spill] sm:$0xff] }
 0xe9e   : > { %10653 = vst [vmem:[%s17702_s19 + $0x88] sm:$0xff] %v10589_v2  ;;  %v10591_v21 = vadd.f32 %v11911_v37, %v18671_v49  ;;  %v18685_v37 = vld [vmem:[#allocation41_spill] sm:$0xff]  ;;  %v18686_v49 = vld [vmem:[#allocation44_spill] sm:$0xff] }
 0xe9f   : > { %10654 = vst [vmem:[%s17702_s19 + $0x90] sm:$0xff] %v10590_v8 }
 0xea0   : > { %10655 = vst [vmem:[%s17702_s19 + $0x98] sm:$0xff] %v10591_v21  ;;  %v10463_v0 = vpop.f32.mrb[84].mxu1 }
 0xea1   : > { %v11912_v59 = vadd.f32 %v10463_v0, %v17689_v28  ;;  %v10465_v34 = vpop.f32.mrb[85].mxu1  ;;  %v18687_v0 = vld [vmem:[#allocation43_spill] sm:$0xff] }
 0xea2   : > { %v11913_v36 = vadd.f32 %v10465_v34, %v17692_v16  ;;  %v10467_v24 = vpop.f32.mrb[86].mxu1 }
 0xea3   : > { %v10592_v44 = vadd.f32 %v11912_v59, %v18672_v38  ;;  %v11914_v1 = vadd.f32 %v10467_v24, %v17689_v28  ;;  %v10469_v5 = vpop.f32.mrb[87].mxu1 }
 0xea4   : > { %v10593_v3 = vadd.f32 %v11913_v36, %v18673_v60  ;;  %v11915_v47 = vadd.f32 %v10469_v5, %v17692_v16 }
 0xea5   : > { %10656 = vst [vmem:[%s17702_s19 + $0xa0] sm:$0xff] %v10592_v44  ;;  %v10594_v11 = vadd.f32 %v11914_v1, %v18674_v57  ;;  %v18688_v1 = vld [vmem:[#allocation48_spill] sm:$0xff] }
 0xea6   : > { %10657 = vst [vmem:[%s17702_s19 + $0xa8] sm:$0xff] %v10593_v3  ;;  %v10595_v12 = vadd.f32 %v11915_v47, %v18675_v62  ;;  %v18689_v47 = vld [vmem:[#allocation47_spill] sm:$0xff]  ;;  %v18690_v62 = vld [vmem:[#allocation46_spill] sm:$0xff] }
 0xea7   : > { %10658 = vst [vmem:[%s17702_s19 + $0xb0] sm:$0xff] %v10594_v11 }
 0xea8   : > { %10659 = vst [vmem:[%s17702_s19 + $0xb8] sm:$0xff] %v10595_v12  ;;  %v10473_v27 = vpop.f32.mrb[88].mxu1 }
 0xea9   : > { %v11916_v10 = vadd.f32 %v10473_v27, %v17689_v28  ;;  %v10475_v13 = vpop.f32.mrb[89].mxu1  ;;  %v18691_v27 = vld [vmem:[#allocation45_spill] sm:$0xff] }
 0xeaa   : > { %v11917_v35 = vadd.f32 %v10475_v13, %v17692_v16  ;;  %v10477_v46 = vpop.f32.mrb[90].mxu1 }
 0xeab   : > { %v10596_v43 = vadd.f32 %v11916_v10, %v18676_v17  ;;  %v11918_v15 = vadd.f32 %v10477_v46, %v17689_v28  ;;  %v10479_v30 = vpop.f32.mrb[91].mxu1 }
 0xeac   : > { %v10597_v23 = vadd.f32 %v11917_v35, %v18677_v25  ;;  %v11919_v26 = vadd.f32 %v10479_v30, %v17692_v16 }
 0xead   : > { %10660 = vst [vmem:[%s17702_s19 + $0xc0] sm:$0xff] %v10596_v43  ;;  %v10598_v63 = vadd.f32 %v11918_v15, %v18678_v42  ;;  %v18692_v15 = vld [vmem:[#allocation50_spill] sm:$0xff] }
 0xeae   : > { %10661 = vst [vmem:[%s17702_s19 + $0xc8] sm:$0xff] %v10597_v23  ;;  %v10599_v50 = vadd.f32 %v11919_v26, %v18679_v41  ;;  %v18693_v26 = vld [vmem:[#allocation49_spill] sm:$0xff]  ;;  %v18694_v41 = vld [vmem:[#allocation52_spill] sm:$0xff] }
 0xeaf   : > { %10662 = vst [vmem:[%s17702_s19 + $0xd0] sm:$0xff] %v10598_v63 }
 0xeb0   : > { %10663 = vst [vmem:[%s17702_s19 + $0xd8] sm:$0xff] %v10599_v50  ;;  %v10483_v6 = vpop.f32.mrb[92].mxu1 }
 0xeb1   : > { %v11920_v9 = vadd.f32 %v10483_v6, %v17689_v28  ;;  %v10485_v51 = vpop.f32.mrb[93].mxu1  ;;  %v18695_v6 = vld [vmem:[#allocation51_spill] sm:$0xff] }
 0xeb2   : > { %v11921_v32 = vadd.f32 %v10485_v51, %v17692_v16  ;;  %v10487_v20 = vpop.f32.mrb[94].mxu1 }
 0xeb3   : > { %v10600_v4 = vadd.f32 %v11920_v9, %v18680_v7  ;;  %v11922_v53 = vadd.f32 %v10487_v20, %v17689_v28  ;;  %v10489_v18 = vpop.f32.mrb[95].mxu1 }
 0xeb4   : > { %v10601_v45 = vadd.f32 %v11921_v32, %v18681_v14  ;;  %v11923_v31 = vadd.f32 %v10489_v18, %v17692_v16 }
 0xeb5   : > { %10664 = vst [vmem:[%s17702_s19 + $0xe0] sm:$0xff] %v10600_v4  ;;  %v10602_v61 = vadd.f32 %v11922_v53, %v18682_v40  ;;  %v18696_v53 = vld [vmem:[#allocation56_spill] sm:$0xff] }
 0xeb6   : > { %10665 = vst [vmem:[%s17702_s19 + $0xe8] sm:$0xff] %v10601_v45  ;;  %v10603_v39 = vadd.f32 %v11923_v31, %v18683_v54  ;;  %v18697_v31 = vld [vmem:[#allocation55_spill] sm:$0xff]  ;;  %v18698_v54 = vld [vmem:[#allocation54_spill] sm:$0xff] }
 0xeb7   : > { %10666 = vst [vmem:[%s17702_s19 + $0xf0] sm:$0xff] %v10602_v61 }
 0xeb8   : > { %10667 = vst [vmem:[%s17702_s19 + $0xf8] sm:$0xff] %v10603_v39  ;;  %v10493_v33 = vpop.f32.mrb[96].mxu1 }
 0xeb9   : > { %v11924_v55 = vadd.f32 %v10493_v33, %v17689_v28  ;;  %v10495_v56 = vpop.f32.mrb[97].mxu1  ;;  %v18699_v33 = vld [vmem:[#allocation53_spill] sm:$0xff] }
 0xeba   : > { %v11925_v52 = vadd.f32 %v10495_v56, %v17692_v16  ;;  %v10497_v58 = vpop.f32.mrb[98].mxu1 }
 0xebb   : > { %v10604_v22 = vadd.f32 %v11924_v55, %v18684_v19  ;;  %v11926_v29 = vadd.f32 %v10497_v58, %v17689_v28  ;;  %v10499_v2 = vpop.f32.mrb[99].mxu1 }
 0xebc   : > { %v10605_v48 = vadd.f32 %v11925_v52, %v18685_v37  ;;  %v11927_v8 = vadd.f32 %v10499_v2, %v17692_v16 }
 0xebd   : > { %10668 = vst [vmem:[%s17702_s19 + $0x100] sm:$0xff] %v10604_v22  ;;  %v10606_v21 = vadd.f32 %v11926_v29, %v18686_v49  ;;  %v18700_v29 = vld [vmem:[#allocation58_spill] sm:$0xff] }
 0xebe   : > { %10669 = vst [vmem:[%s17702_s19 + $0x108] sm:$0xff] %v10605_v48  ;;  %v10607_v59 = vadd.f32 %v11927_v8, %v18687_v0  ;;  %v18701_v8 = vld [vmem:[#allocation57_spill] sm:$0xff]  ;;  %v18702_v0 = vld [vmem:[#allocation60_spill] sm:$0xff] }
 0xebf   : > { %10670 = vst [vmem:[%s17702_s19 + $0x110] sm:$0xff] %v10606_v21 }
 0xec0   : > { %10671 = vst [vmem:[%s17702_s19 + $0x118] sm:$0xff] %v10607_v59  ;;  %v10503_v34 = vpop.f32.mrb[100].mxu1 }
 0xec1   : > { %v11928_v36 = vadd.f32 %v10503_v34, %v17689_v28  ;;  %v10505_v24 = vpop.f32.mrb[101].mxu1  ;;  %v18703_v34 = vld [vmem:[#allocation59_spill] sm:$0xff] }
 0xec2   : > { %v11929_v38 = vadd.f32 %v10505_v24, %v17692_v16  ;;  %v10507_v44 = vpop.f32.mrb[102].mxu1 }
 0xec3   : > { %v10608_v5 = vadd.f32 %v11928_v36, %v18688_v1  ;;  %v11930_v60 = vadd.f32 %v10507_v44, %v17689_v28  ;;  %v10509_v3 = vpop.f32.mrb[103].mxu1 }
 0xec4   : > { %v10609_v57 = vadd.f32 %v11929_v38, %v18689_v47  ;;  %v11931_v11 = vadd.f32 %v10509_v3, %v17692_v16 }
 0xec5   : > { %10672 = vst [vmem:[%s17702_s19 + $0x120] sm:$0xff] %v10608_v5  ;;  %v10610_v12 = vadd.f32 %v11930_v60, %v18690_v62  ;;  %v18704_v60 = vld [vmem:[#allocation66_spill] sm:$0xff] }
 0xec6   : > { %10673 = vst [vmem:[%s17702_s19 + $0x128] sm:$0xff] %v10609_v57  ;;  %v10611_v10 = vadd.f32 %v11931_v11, %v18691_v27  ;;  %v18705_v11 = vld [vmem:[#allocation65_spill] sm:$0xff]  ;;  %v18706_v27 = vld [vmem:[#allocation62_spill] sm:$0xff] }
 0xec7   : > { %10674 = vst [vmem:[%s17702_s19 + $0x130] sm:$0xff] %v10610_v12 }
 0xec8   : > { %10675 = vst [vmem:[%s17702_s19 + $0x138] sm:$0xff] %v10611_v10  ;;  %v10513_v13 = vpop.f32.mrb[104].mxu1 }
 0xec9   : > { %v11932_v35 = vadd.f32 %v10513_v13, %v17689_v28  ;;  %v10515_v46 = vpop.f32.mrb[105].mxu1  ;;  %v18707_v13 = vld [vmem:[#allocation61_spill] sm:$0xff] }
 0xeca   : > { %v11933_v17 = vadd.f32 %v10515_v46, %v17692_v16  ;;  %v10517_v43 = vpop.f32.mrb[106].mxu1 }
 0xecb   : > { %v10612_v30 = vadd.f32 %v11932_v35, %v18692_v15  ;;  %v11934_v25 = vadd.f32 %v10517_v43, %v17689_v28  ;;  %v10519_v23 = vpop.f32.mrb[107].mxu1 }
 0xecc   : > { %v10613_v42 = vadd.f32 %v11933_v17, %v18693_v26  ;;  %v11935_v63 = vadd.f32 %v10519_v23, %v17692_v16 }
 0xecd   : > { %10676 = vst [vmem:[%s17702_s19 + $0x140] sm:$0xff] %v10612_v30  ;;  %v10614_v50 = vadd.f32 %v11934_v25, %v18694_v41  ;;  %v18708_v25 = vld [vmem:[#allocation70_spill] sm:$0xff] }
 0xece   : > { %10677 = vst [vmem:[%s17702_s19 + $0x148] sm:$0xff] %v10613_v42  ;;  %v10615_v9 = vadd.f32 %v11935_v63, %v18695_v6  ;;  %v18709_v63 = vld [vmem:[#allocation69_spill] sm:$0xff] }
 0xecf   : > { %10678 = vst [vmem:[%s17702_s19 + $0x150] sm:$0xff] %v10614_v50  ;;  %v18710_v6 = vld [vmem:[#allocation73_spill] sm:$0xff] }
 0xed0   : > { %10679 = vst [vmem:[%s17702_s19 + $0x158] sm:$0xff] %v10615_v9  ;;  %v10523_v51 = vpop.f32.mrb[108].mxu1 }
 0xed1   : > { %v11936_v32 = vadd.f32 %v10523_v51, %v17689_v28  ;;  %v10525_v20 = vpop.f32.mrb[109].mxu1  ;;  %v18711_v51 = vld [vmem:[#allocation71_spill] sm:$0xff] }
 0xed2   : > { %v11937_v7 = vadd.f32 %v10525_v20, %v17692_v16  ;;  %v10527_v4 = vpop.f32.mrb[110].mxu1 }
 0xed3   : > { %v10616_v18 = vadd.f32 %v11936_v32, %v18696_v53  ;;  %v11938_v14 = vadd.f32 %v10527_v4, %v17689_v28  ;;  %v10529_v45 = vpop.f32.mrb[111].mxu1 }
 0xed4   : > { %v10617_v40 = vadd.f32 %v11937_v7, %v18697_v31  ;;  %v11939_v61 = vadd.f32 %v10529_v45, %v17692_v16 }
 0xed5   : > { %10680 = vst [vmem:[%s17702_s19 + $0x160] sm:$0xff] %v10616_v18  ;;  %v10618_v39 = vadd.f32 %v11938_v14, %v18698_v54  ;;  %v18712_v14 = vld [vmem:[#allocation92_spill] sm:$0xff] }
 0xed6   : > { %10681 = vst [vmem:[%s17702_s19 + $0x168] sm:$0xff] %v10617_v40  ;;  %v10619_v55 = vadd.f32 %v11939_v61, %v18699_v33  ;;  %v18713_v61 = vld [vmem:[#allocation91_spill] sm:$0xff]  ;;  %v18714_v33 = vld [vmem:[#allocation74_spill] sm:$0xff] }
 0xed7   : > { %10682 = vst [vmem:[%s17702_s19 + $0x170] sm:$0xff] %v10618_v39 }
 0xed8   : > { %10683 = vst [vmem:[%s17702_s19 + $0x178] sm:$0xff] %v10619_v55  ;;  %v10533_v56 = vpop.f32.mrb[112].mxu1 }
 0xed9   : > { %v11940_v52 = vadd.f32 %v10533_v56, %v17689_v28  ;;  %v10535_v58 = vpop.f32.mrb[113].mxu1 }
 0xeda   : > { %v11941_v19 = vadd.f32 %v10535_v58, %v17692_v16  ;;  %v10537_v22 = vpop.f32.mrb[114].mxu1 }
 0xedb   : > { %v10620_v2 = vadd.f32 %v11940_v52, %v18700_v29  ;;  %v11942_v37 = vadd.f32 %v10537_v22, %v17689_v28  ;;  %v10539_v48 = vpop.f32.mrb[115].mxu1 }
 0xedc   : > { %v10621_v49 = vadd.f32 %v11941_v19, %v18701_v8  ;;  %v11943_v21 = vadd.f32 %v10539_v48, %v17692_v16 }
 0xedd   : > { %10684 = vst [vmem:[%s17702_s19 + $0x180] sm:$0xff] %v10620_v2  ;;  %v10622_v59 = vadd.f32 %v11942_v37, %v18702_v0 }
 0xede   : > { %10685 = vst [vmem:[%s17702_s19 + $0x188] sm:$0xff] %v10621_v49  ;;  %v10623_v36 = vadd.f32 %v11943_v21, %v18703_v34 }
 0xedf   : > { %10686 = vst [vmem:[%s17702_s19 + $0x190] sm:$0xff] %v10622_v59 }
 0xee0   : > { %10687 = vst [vmem:[%s17702_s19 + $0x198] sm:$0xff] %v10623_v36  ;;  %v10543_v24 = vpop.f32.mrb[116].mxu1 }
 0xee1   : > { %v11944_v38 = vadd.f32 %v10543_v24, %v17689_v28  ;;  %v10545_v44 = vpop.f32.mrb[117].mxu1 }
 0xee2   : > { %v11945_v1 = vadd.f32 %v10545_v44, %v17692_v16  ;;  %v10547_v5 = vpop.f32.mrb[118].mxu1 }
 0xee3   : > { %v10624_v3 = vadd.f32 %v11944_v38, %v18704_v60  ;;  %v11946_v47 = vadd.f32 %v10547_v5, %v17689_v28  ;;  %v10549_v57 = vpop.f32.mrb[119].mxu1 }
 0xee4   : > { %v10625_v62 = vadd.f32 %v11945_v1, %v18705_v11  ;;  %v11947_v12 = vadd.f32 %v10549_v57, %v17692_v16 }
 0xee5   : > { %10688 = vst [vmem:[%s17702_s19 + $0x1a0] sm:$0xff] %v10624_v3  ;;  %v10626_v10 = vadd.f32 %v11946_v47, %v18706_v27 }
 0xee6   : > { %10689 = vst [vmem:[%s17702_s19 + $0x1a8] sm:$0xff] %v10625_v62  ;;  %v10627_v35 = vadd.f32 %v11947_v12, %v18707_v13 }
 0xee7   : > { %10690 = vst [vmem:[%s17702_s19 + $0x1b0] sm:$0xff] %v10626_v10 }
 0xee8   : > { %10691 = vst [vmem:[%s17702_s19 + $0x1b8] sm:$0xff] %v10627_v35  ;;  %v10553_v46 = vpop.f32.mrb[120].mxu1 }
 0xee9   : > { %v11948_v17 = vadd.f32 %v10553_v46, %v17689_v28  ;;  %v10555_v43 = vpop.f32.mrb[121].mxu1 }
 0xeea   : > { %v11949_v15 = vadd.f32 %v10555_v43, %v17692_v16  ;;  %v10557_v30 = vpop.f32.mrb[122].mxu1 }
 0xeeb   : > { %v10628_v23 = vadd.f32 %v11948_v17, %v18708_v25  ;;  %v11950_v26 = vadd.f32 %v10557_v30, %v17689_v28  ;;  %v10559_v42 = vpop.f32.mrb[123].mxu1 }
 0xeec   : > { %v10629_v41 = vadd.f32 %v11949_v15, %v18709_v63  ;;  %v11951_v50 = vadd.f32 %v10559_v42, %v17692_v16 }
 0xeed   : > { %10692 = vst [vmem:[%s17702_s19 + $0x1c0] sm:$0xff] %v10628_v23  ;;  %v10630_v9 = vadd.f32 %v11950_v26, %v18710_v6 }
 0xeee   : > { %10693 = vst [vmem:[%s17702_s19 + $0x1c8] sm:$0xff] %v10629_v41  ;;  %v10631_v32 = vadd.f32 %v11951_v50, %v18711_v51 }
 0xeef   : > { %10694 = vst [vmem:[%s17702_s19 + $0x1d0] sm:$0xff] %v10630_v9 }
 0xef0   : > { %10695 = vst [vmem:[%s17702_s19 + $0x1d8] sm:$0xff] %v10631_v32  ;;  %v10563_v20 = vpop.f32.mrb[124].mxu1 }
 0xef1   : > { %v11952_v7 = vadd.f32 %v10563_v20, %v17689_v28  ;;  %v10565_v4 = vpop.f32.mrb[125].mxu1 }
 0xef2   : > { %v11953_v53 = vadd.f32 %v10565_v4, %v17692_v16  ;;  %v10567_v18 = vpop.f32.mrb[126].mxu1 }
 0xef3   : > { %v10632_v45 = vadd.f32 %v11952_v7, %v18712_v14  ;;  %v11954_v31 = vadd.f32 %v10567_v18, %v17689_v28  ;;  %v10569_v40 = vpop.f32.mrb[127].mxu1  ;;  %v18716_v28 = vld [vmem:[#allocation72_spill] sm:$0xff] }
 0xef4   : > { %v10633_v54 = vadd.f32 %v11953_v53, %v18713_v61  ;;  %v11955_v39 = vadd.f32 %v10569_v40, %v17692_v16 }
 0xef5   : > { %10696 = vst [vmem:[%s17702_s19 + $0x1e0] sm:$0xff] %v10632_v45  ;;  %v10634_v55 = vadd.f32 %v11954_v31, %v18714_v33 }
 0xef6   : > { %10697 = vst [vmem:[%s17702_s19 + $0x1e8] sm:$0xff] %v10633_v54  ;;  %v10635_v56 = vadd.f32 %v11955_v39, %v18716_v28 }
 0xef7   : > { %10698 = vst [vmem:[%s17702_s19 + $0x1f0] sm:$0xff] %v10634_v55 }
 0xef8   : > { %10699 = vst [vmem:[%s17702_s19 + $0x1f8] sm:$0xff] %v10635_v56 }
 0xef9   : > { %13493 = shalt.err (!%p13490_p8)
}
 0xefa   : > { %s13494_s20 = scalar_lea.hbm %s17891_s25, 8192  ;;  %s13498_s14 = scalar_lea.hbm %s18715_s13, 16384 }
 0xefb   : > { %p13495_p6 = scmp.ne.s32.totalorder %s17891_s25, %s13494_s20  ;;  %p13499_p3 = scmp.lt.u32.totalorder %s17891_s25, %s18715_s13 }
 0xefc   : > { %p13500_p5 = scmp.lt.u32.totalorder %s13498_s14, %s13494_s20  ;;  %p13502_p7 = scmp.lt.u32.totalorder %s13494_s20, %s17891_s25 }
 0xefd   : > { %p13496_p10 = pnand %p13495_p6, %p18717_p4 }
 0xefe   : > { %p13501_p9 = por %p13500_p5, %p13499_p3 }
 0xeff   : > { %p13497_p11 = pneg %p13496_p10 }
 0xf00   : > { %p13503_p12 = por %p13502_p7, %p13501_p9 }
 0xf02   : > { %p13504_p1 = pnand %p13503_p12, %p13497_p11 }
 0xf04   : > { %13507 = shalt.err (!%p13504_p1)
}
 0xf05   : > { %s13575_s17 = smov 256   ;;  %s13576_s9 = smov 16  }
 0xf06   : > { %12106 = dma.vmem_to_hbm [thread:$0]  (%p18717_p4), %s17893_s16, 8192, %s17891_s25, %s10701_s15, %s13575_s17, %s13575_s17, %s13576_s9  }
 0xf07 PF: > { %s10730_s22 = sand.u32 1, %s13546_s30   ;;  %p18718_p13 = scmp.ne.s32.totalorder %s18192_s21, 0 }
 0xf08   : > { %p18719_p0 = scmp.ge.s32.totalorder %s13558_s12, 2  ;;  %s10731_s20 = scalar_lea.sflag [#allocation4], %s10730_s22 }
 0xf0a   : > { %p12129_p2 = pnand %p18719_p0, %p18718_p13 }
 0xf0c   : > { %13541 = dma.done.wait (!%p12129_p2), %s10731_s20, 8192  }
 0xf0d   : > { %13543 = vsyncadd (!%p12129_p2), %s10731_s20, 4294959104  ;;  %p25_p8 = scmp.ge.s32.totalorder %s13794_s27, 4   ;;  %s18720_s30 = smov %s13550_s10 }
 0xf0e   : > { %s18721_s10 = smov %s13554_s11  ;;  %s18722_s11 = smov %s13806_s26 }
 0xf0f   : > { %s18723_s12 = smov %s13794_s27  ;;  %27 = sbr.rel (!%p25_p8) target bundleno = 10 (0xa), region = 125 }
 0xf16   :  { %10736 = vsyncpa [#allocation3], 1 }
 0xf17   :  { %10738 = vsyncpa [#allocation3 + $0x1], 1 }
 0xf18   :  { %10739 = vsyncpa [#allocation6], 1 }
 0xf19   :  { %10740 = vsyncpa [#allocation9], 1 }
 0xf1a   :  { %10741 = vsyncpa [#allocation12], 1 }
 0xf1b   :  { %10742 = vsyncpa [#allocation4], 1 }
 0xf1c   :  { %10744 = vsyncpa [#allocation4 + $0x1], 1 }

</bundles_post_ra>
